<compile_context>
chip_gen: v7x
topology: tpu7x:2x2x1
jax: 0.10.0
libtpu: 0.0.40
codegen_flags: <defaults>
</compile_context>

<pallas_src>
import functools

import numpy as np
import jax
import jax.numpy as jnp
from jax import lax
from jax.experimental import pallas as pl
from jax.experimental.pallas import tpu as pltpu

# ----------------------------------------------------------------------------- config
CFG = dict(
    image_size=16,
    patch_size=4,
    num_classes=10,
    dim=32,
    depth=2,
    cls_depth=1,
    heads=2,
    dim_head=16,
    mlp_dim=64,
    local_patch_kernel_size=3,
)

DIM = CFG["dim"]
HEADS = CFG["heads"]
DH = CFG["dim_head"]
INNER = HEADS * DH
MLP = CFG["mlp_dim"]
PS = CFG["patch_size"]
HH = CFG["image_size"] // PS
WW = CFG["image_size"] // PS
N_TOK = HH * WW
NUM_CLASSES = CFG["num_classes"]
PATCH_DIM = 3 * PS * PS
DEPTH = CFG["depth"]
CLS_DEPTH = CFG["cls_depth"]
LN_EPS = 1e-5
BN_EPS = 1e-5
ATTN_SCALE = DH ** -0.5

_SQRT_2_OVER_PI = 0.7978845608028654


# ----------------------------------------------------------------------------- in-kernel helpers
def _gelu(x):
    # TODO(synk): torch nn.GELU() defaults to the exact erf form; erf has no
    # reliable Pallas/Mosaic lowering, so the tanh approximation is used here.
    return 0.5 * x * (1.0 + jnp.tanh(_SQRT_2_OVER_PI * (x + 0.044715 * x * x * x)))


def _ln(x, g, b):
    mu = jnp.mean(x, axis=-1, keepdims=True)
    var = jnp.mean((x - mu) ** 2, axis=-1, keepdims=True)
    return (x - mu) * lax.rsqrt(var + LN_EPS) * g + b


def _softmax(s):
    # Row softmax; the divide runs on the EUP via approx reciprocal.
    e = jnp.exp(s - jnp.max(s, axis=-1, keepdims=True))
    return e * pl.reciprocal(jnp.sum(e, axis=-1, keepdims=True), approx=True)


def _ff(x, ld, pre):
    # LN -> Linear -> GELU -> Linear; LayerScale folded into w2 / b2.
    y = _ln(x, ld(pre + "ln_g"), ld(pre + "ln_b"))
    h = jnp.dot(y, ld(pre + "w1"), preferred_element_type=jnp.float32) + ld(pre + "b1")
    h = _gelu(h)
    return jnp.dot(h, ld(pre + "w2"), preferred_element_type=jnp.float32) + ld(pre + "b2")


def _xca(x, os_ref, ld, pre, batch):
    """Cross-covariance attention + residual (returns the new x value)."""
    y = _ln(x, ld(pre + "ln_g"), ld(pre + "ln_b"))
    # Fused projections: q/k for ALL batches & heads in the 'h d, n' orientation
    # with one rhs-transposed matmul; v for all batches/heads with one matmul.
    qkT = lax.dot_general(ld(pre + "wqkT"), y, (((1,), (1,)), ((), ())),
                          preferred_element_type=jnp.float32)          # (2*INNER, B*N)
    v = jnp.dot(y, ld(pre + "wv"), preferred_element_type=jnp.float32)  # (B*N, INNER)
    temp_col = ld(pre + "temp")                                         # (2*INNER, 1)
    for b in range(batch):
        c0 = b * N_TOK
        qk_b = qkT[:, c0:c0 + N_TOK]                                    # (2*INNER, N)
        # F.normalize over the token axis; exp(temperature) folded into q rows.
        ssq = jnp.sum(qk_b * qk_b, axis=-1, keepdims=True)
        qk_b = qk_b * (lax.rsqrt(jnp.maximum(ssq, 1e-24)) * temp_col)
        v_b = v[c0:c0 + N_TOK, :]                                       # (N, INNER)
        for h in range(HEADS):
            r0 = h * DH
            qn = qk_b[r0:r0 + DH, :]                                    # (DH, N)
            kn = qk_b[INNER + r0:INNER + r0 + DH, :]                    # (DH, N)
            sim = lax.dot_general(qn, kn, (((1,), (1,)), ((), ())),
                                  preferred_element_type=jnp.float32)  # (DH, DH)
            attn = _softmax(sim)
            out = lax.dot_general(v_b[:, r0:r0 + DH], attn, (((1,), (1,)), ((), ())),
                                  preferred_element_type=jnp.float32)  # (N, DH)
            os_ref[c0:c0 + N_TOK, r0:r0 + DH] = out
    # Single batched output projection (LayerScale folded into wout / bout).
    o = jnp.dot(os_ref[...], ld(pre + "wout"), preferred_element_type=jnp.float32)
    return x + o + ld(pre + "bout")


def _dwconv(src, ld_rows, w, bias, bn):
    # Depthwise 3x3 'same' conv computed directly in the flat (B*N, C) layout:
    # the per-tap row shift + zero padding + cross-batch masking are folded
    # into a precomputed 0/1 shift matrix, so each 3-tap group is one MXU
    # matmul (no VMEM row-copy shifts, no mask multiplies).
    acc = jnp.zeros((bn, DIM), jnp.float32)
    for g in range(3):
        smg = ld_rows("sm", 3 * g * bn, 3 * (g + 1) * bn)               # (3*bn, bn)
        taps = jnp.dot(smg, src, preferred_element_type=jnp.float32)    # (3*bn, DIM)
        for i in range(3):
            t = 3 * g + i
            acc = acc + taps[i * bn:(i + 1) * bn, :] * w[t:t + 1, :]
    return acc + bias


def _lpi(x, ld, ld_rows, pre, bn):
    # LocalPatchInteraction: LN -> dwconv3x3 -> BatchNorm -> GELU -> dwconv3x3,
    # LayerScale folded into the second conv; residual applied to the input.
    y = _ln(x, ld(pre + "ln_g"), ld(pre + "ln_b"))
    h = _dwconv(y, ld_rows, ld(pre + "cw1"), ld(pre + "cb1"), bn)
    # BatchNorm2d, training-mode (biased) batch statistics over (b, h, w).
    mu = jnp.mean(h, axis=0, keepdims=True)
    var = jnp.mean((h - mu) ** 2, axis=0, keepdims=True)
    h = (h - mu) * lax.rsqrt(var + BN_EPS) * ld(pre + "bn_g") + ld(pre + "bn_b")
    h = _gelu(h)
    return x + _dwconv(h, ld_rows, ld(pre + "cw2"), ld(pre + "cb2"), bn)


def _cls_attn(cls_x, ctx, os_ref, ld, pre, batch):
    # Class attention; keys/values = [LN(cls), patch tokens], combined with a
    # two-part online softmax (no concat).  q / kv / out-proj are batched over
    # the (B, dim) cls block; only the per-(b, h) context dot-products loop.
    xn = _ln(cls_x, ld(pre + "ln_g"), ld(pre + "ln_b"))
    q = jnp.dot(xn, ld(pre + "wq"), preferred_element_type=jnp.float32) * ATTN_SCALE
    kv_c = jnp.dot(xn, ld(pre + "wkv"), preferred_element_type=jnp.float32)    # (B, 2*INNER)
    kv_p = jnp.dot(ctx, ld(pre + "wkv"), preferred_element_type=jnp.float32)   # (B*N, 2*INNER)
    for b in range(batch):
        r0 = b * N_TOK
        for h in range(HEADS):
            c = h * DH
            q_bh = q[b:b + 1, c:c + DH]                                        # (1, DH)
            k_c = kv_c[b:b + 1, c:c + DH]
            v_c = kv_c[b:b + 1, INNER + c:INNER + c + DH]
            k_p = kv_p[r0:r0 + N_TOK, c:c + DH]                                # (N, DH)
            v_p = kv_p[r0:r0 + N_TOK, INNER + c:INNER + c + DH]
            s_c = jnp.sum(q_bh * k_c, axis=-1, keepdims=True)                  # (1, 1)
            s_p = lax.dot_general(q_bh, k_p, (((1,), (1,)), ((), ())),
                                  preferred_element_type=jnp.float32)          # (1, N)
            m = jnp.maximum(jnp.max(s_p, axis=-1, keepdims=True), s_c)
            e_c = jnp.exp(s_c - m)
            e_p = jnp.exp(s_p - m)
            inv = pl.reciprocal(jnp.sum(e_p, axis=-1, keepdims=True) + e_c, approx=True)
            os_ref[b:b + 1, c:c + DH] = (
                jnp.dot(e_p, v_p, preferred_element_type=jnp.float32) + e_c * v_c) * inv
    o = jnp.dot(os_ref[0:batch, 0:INNER], ld(pre + "wout"),
                preferred_element_type=jnp.float32)
    return o + ld(pre + "bout")


# ----------------------------------------------------------------------------- fused kernel
def _xcit_kernel(x_ref, pp_ref, out_ref, os_ref, *, layout, batch):
    bn = batch * N_TOK

    def ld(name):
        off, r, c = layout[name]
        return pp_ref[off:off + r, 0:c]

    def ld_rows(name, r0, r1):
        off, _, c = layout[name]
        return pp_ref[off + r0:off + r1, 0:c]

    # ---- patch embedding: LN -> Linear -> LN -> + pos (emb dropout p = 0) ----
    x = _ln(x_ref[...], ld("p_ln1_g"), ld("p_ln1_b"))
    x = jnp.dot(x, ld("p_w"), preferred_element_type=jnp.float32) + ld("p_b")
    x = _ln(x, ld("p_ln2_g"), ld("p_ln2_b"))
    x = x + ld("pos")

    # ---- XCATransformer (layer_dropout = 0): XCA -> LPI -> FF, residual each ----
    for li in range(DEPTH):
        x = _xca(x, os_ref, ld, f"x{li}a_", batch)
        x = _lpi(x, ld, ld_rows, f"x{li}l_", bn)
        x = x + _ff(x, ld, f"x{li}f_")

    # ---- final norm; patch tokens become the class-attention context ----
    ctx = _ln(x, ld("fin_g"), ld("fin_b"))

    # ---- class transformer on the stacked (B, dim) cls block ----
    cls_x = ld("cls_tok")
    for li in range(CLS_DEPTH):
        cls_x = cls_x + _cls_attn(cls_x, ctx, os_ref, ld, f"c{li}a_", batch)
        cls_x = cls_x + _ff(cls_x, ld, f"c{li}f_")

    # ---- mlp head; single (B, num_classes) store ----
    hv = _ln(cls_x, ld("head_ln_g"), ld("head_ln_b"))
    out_ref[...] = (jnp.dot(hv, ld("head_w"), preferred_element_type=jnp.float32)
                    + ld("head_b"))


# ----------------------------------------------------------------------------- wrapper
def _patchify(img):
    # 'b c (h p1) (w p2) -> (b h w) (p1 p2 c)'
    B, C, H, W = img.shape
    x = img.reshape(B, C, H // PS, PS, W // PS, PS)
    x = jnp.transpose(x, (0, 2, 4, 3, 5, 1))
    return x.reshape(B * (H // PS) * (W // PS), PS * PS * C)


def xcit_forward(img, packed, *, layout):
    B = img.shape[0]
    patches = _patchify(img)
    bn = B * N_TOK
    kernel = functools.partial(_xcit_kernel, layout=layout, batch=B)
    return pl.pallas_call(
        kernel,
        out_shape=jax.ShapeDtypeStruct((B, NUM_CLASSES), jnp.float32),
        grid=(1,),
        in_specs=[pl.BlockSpec(patches.shape, lambda i: (0, 0)),
                  pl.BlockSpec(packed.shape, lambda i: (0, 0))],
        out_specs=pl.BlockSpec((B, NUM_CLASSES), lambda i: (0, 0)),
        scratch_shapes=[pltpu.VMEM((bn, INNER), jnp.float32)],
        # Single grid point: whole model (<1 MiB) is VMEM resident.  For large
        # batches add a leading "parallel" batch grid axis (v7x second core);
        # at B=2 that split is pure overhead.
        compiler_params=pltpu.CompilerParams(dimension_semantics=("arbitrary",)),
    )(patches, packed)


# ----------------------------------------------------------------------------- param prep (one-time)
def _shift_matrix(batch):
    """(9*B*N, B*N) 0/1 matrix: rows [t*BN:(t+1)*BN] select, for each output
    token, its (di, dj) neighbour within the SAME image (zero row when the
    neighbour is out of bounds), so the depthwise conv's shift, zero-pad and
    cross-batch masking all become plain matmuls."""
    bn = batch * N_TOK
    sm = np.zeros((9 * bn, bn), np.float32)
    for r in range(bn):
        base = (r // N_TOK) * N_TOK
        sp = r % N_TOK
        i, j = sp // WW, sp % WW
        for t in range(9):
            di, dj = t // 3 - 1, t % 3 - 1
            ii, jj = i + di, j + dj
            if 0 <= ii < HH and 0 <= jj < WW:
                sm[t * bn + r, base + ii * WW + jj] = 1.0
    return jnp.asarray(sm)


def prepare_params(params, batch):
    """One-time host prep: fold LayerScale / exp(temperature) into weights,
    transpose the XCA q/k projection for the in-kernel 'h d, n' orientation,
    build the depthwise-conv shift matrix, and pack EVERY leaf into one
    lane-dense (rows, 128) f32 slab (single prologue DMA; 8-row-aligned
    offsets so every in-kernel slice is tile aligned).
    Returns (packed_array, layout{name: (row_off, rows, cols)})."""
    row = lambda v: jnp.asarray(v, jnp.float32).reshape(1, -1)
    entries = []
    add = lambda n, a: entries.append((n, jnp.asarray(a, jnp.float32)))

    add("p_ln1_g", row(params["patch_ln1"]["g"]))
    add("p_ln1_b", row(params["patch_ln1"]["b"]))
    add("p_w", params["patch_w"])
    add("p_b", row(params["patch_b"]))
    add("p_ln2_g", row(params["patch_ln2"]["g"]))
    add("p_ln2_b", row(params["patch_ln2"]["b"]))
    add("pos", jnp.tile(params["pos_embedding"][0, :N_TOK], (batch, 1)))
    add("sm", _shift_matrix(batch))
    add("fin_g", row(params["final_ln"]["g"]))
    add("fin_b", row(params["final_ln"]["b"]))
    add("cls_tok", jnp.tile(params["cls_token"].reshape(1, DIM), (batch, 1)))
    add("head_ln_g", row(params["head_ln"]["g"]))
    add("head_ln_b", row(params["head_ln"]["b"]))
    add("head_w", params["head_w"])
    add("head_b", row(params["head_b"]))

    def add_ff(pre, p):
        s = p["scale"]
        add(pre + "ln_g", row(p["ln_g"])); add(pre + "ln_b", row(p["ln_b"]))
        add(pre + "w1", p["w1"]); add(pre + "b1", row(p["b1"]))
        add(pre + "w2", p["w2"] * s[None, :]); add(pre + "b2", row(p["b2"] * s))

    for li, layer in enumerate(params["xcit_layers"]):
        a, l = layer["xca"], layer["lpi"]
        sa, sl = a["scale"], l["scale"]
        pre = f"x{li}a_"
        add(pre + "ln_g", row(a["ln_g"])); add(pre + "ln_b", row(a["ln_b"]))
        add(pre + "wqkT", jnp.transpose(a["w_qkv"][:, :2 * INNER]))     # (2*inner, dim)
        add(pre + "wv", a["w_qkv"][:, 2 * INNER:])                      # (dim, inner)
        temp = jnp.repeat(jnp.exp(a["temperature"].reshape(-1)), DH)    # (inner,)
        add(pre + "temp",
            jnp.concatenate([temp, jnp.ones((INNER,), jnp.float32)]).reshape(-1, 1))
        add(pre + "wout", a["w_out"] * sa[None, :])
        add(pre + "bout", row(a["b_out"] * sa))
        pre = f"x{li}l_"
        add(pre + "ln_g", row(l["ln_g"])); add(pre + "ln_b", row(l["ln_b"]))
        add(pre + "cw1", l["w1"]); add(pre + "cb1", row(l["b1"]))
        add(pre + "bn_g", row(l["bn_w"])); add(pre + "bn_b", row(l["bn_b"]))
        add(pre + "cw2", l["w2"] * sl[None, :]); add(pre + "cb2", row(l["b2"] * sl))
        add_ff(f"x{li}f_", layer["ff"])

    for li, layer in enumerate(params["cls_layers"]):
        a = layer["attn"]
        sa = a["scale"]
        pre = f"c{li}a_"
        add(pre + "ln_g", row(a["ln_g"])); add(pre + "ln_b", row(a["ln_b"]))
        add(pre + "wq", a["w_q"]); add(pre + "wkv", a["w_kv"])
        add(pre + "wout", a["w_out"] * sa[None, :])
        add(pre + "bout", row(a["b_out"] * sa))
        add_ff(f"c{li}f_", layer["ff"])

    layout, blocks, off = {}, [], 0
    for name, a in entries:
        r, c = a.shape
        rp = -(-r // 8) * 8
        blk = jnp.zeros((rp, 128), jnp.float32).at[:r, :c].set(a)
        blocks.append(blk)
        layout[name] = (off, r, c)
        off += rp
    return jnp.concatenate(blocks, axis=0), layout


# ----------------------------------------------------------------------------- params
def init_params(key):
    ks = iter(jax.random.split(key, 256))

    def w(shape, scale=0.02):
        return scale * jax.random.normal(next(ks), shape, dtype=jnp.float32)

    dim, heads, dh, mlp = DIM, HEADS, DH, MLP
    inner = heads * dh

    ones = lambda d: jnp.ones((d,), jnp.float32)
    zeros = lambda d: jnp.zeros((d,), jnp.float32)
    ln = lambda d: dict(g=ones(d), b=zeros(d))
    layerscale = jnp.full((dim,), 0.1, jnp.float32)   # depth <= 18 -> init_eps = 0.1

    def ff_params():
        return dict(scale=layerscale, ln_g=ones(dim), ln_b=zeros(dim),
                    w1=w((dim, mlp)), b1=zeros(mlp),
                    w2=w((mlp, dim)), b2=zeros(dim))

    params = dict(
        patch_ln1=ln(PATCH_DIM),
        patch_w=w((PATCH_DIM, dim)),
        patch_b=zeros(dim),
        patch_ln2=ln(dim),
        pos_embedding=jax.random.normal(next(ks), (1, N_TOK, dim), jnp.float32),
        cls_token=jax.random.normal(next(ks), (dim,), jnp.float32),
        final_ln=ln(dim),
        head_ln=ln(dim),
        head_w=w((dim, NUM_CLASSES)),
        head_b=zeros(NUM_CLASSES),
    )

    xcit_layers = []
    for _ in range(DEPTH):
        xca = dict(scale=layerscale, ln_g=ones(dim), ln_b=zeros(dim),
                   w_qkv=w((dim, inner * 3)),
                   temperature=jnp.ones((heads, 1, 1), jnp.float32),
                   w_out=w((inner, dim)), b_out=zeros(dim))
        lpi = dict(scale=layerscale, ln_g=ones(dim), ln_b=zeros(dim),
                   w1=w((9, dim), 0.1), b1=zeros(dim),     # depthwise conv1 taps (3*3, C)
                   bn_w=ones(dim), bn_b=zeros(dim),
                   w2=w((9, dim), 0.1), b2=zeros(dim))     # depthwise conv2 taps
        xcit_layers.append(dict(xca=xca, lpi=lpi, ff=ff_params()))
    params["xcit_layers"] = xcit_layers

    cls_layers = []
    for _ in range(CLS_DEPTH):
        attn = dict(scale=layerscale, ln_g=ones(dim), ln_b=zeros(dim),
                    w_q=w((dim, inner)), w_kv=w((dim, inner * 2)),
                    w_out=w((inner, dim)), b_out=zeros(dim))
        cls_layers.append(dict(attn=attn, ff=ff_params()))
    params["cls_layers"] = cls_layers
    return params


# ----------------------------------------------------------------------------- main
if __name__ == "__main__":
    key = jax.random.PRNGKey(0)
    pkey, ikey = jax.random.split(key)
    params = init_params(pkey)

    B = 2
    packed, layout = prepare_params(params, batch=B)     # one-time, outside jit
    img = jax.random.normal(ikey, (B, 3, CFG["image_size"], CFG["image_size"]),
                            dtype=jnp.float32)

    fwd = jax.jit(functools.partial(xcit_forward, layout=layout))
    logits = jax.block_until_ready(fwd(img, packed))
    assert logits.shape == (B, NUM_CLASSES), logits.shape
    assert bool(jnp.all(jnp.isfinite(logits)))
    print("KERNEL_OK")
</pallas_src>

<mosaic_0001>
module attributes {stable_mosaic.version = 11 : i64} {
  func.func @_xcit_kernel(%arg0: i32, %arg1: memref<32x48xf32, #tpu.memory_space<vmem>>, %arg2: memref<1584x128xf32, #tpu.memory_space<vmem>>, %arg3: memref<2x10xf32, #tpu.memory_space<vmem>>, %arg4: memref<32x32xf32, #tpu.memory_space<vmem>>) attributes {dimension_semantics = [#tpu.dimension_semantics<arbitrary>], iteration_bounds = array<i64: 1>, scalar_prefetch = 0 : i64, scratch_operands = 1 : i64, tpu.core_type = #tpu.core_type<tc>, window_params = [{pipeline_mode = #tpu.pipeline_mode<synchronous>, transform_indices = @transform_0, window_bounds = array<i64: 32, 48>}, {pipeline_mode = #tpu.pipeline_mode<synchronous>, transform_indices = @transform_1, window_bounds = array<i64: 1584, 128>}, {pipeline_mode = #tpu.pipeline_mode<synchronous>, transform_indices = @transform_2, window_bounds = array<i64: 2, 10>}]} {
    %c0 = arith.constant 0 : index
    %c0_0 = arith.constant 0 : index
    %0 = vector.load %arg1[%c0, %c0_0] : memref<32x48xf32, #tpu.memory_space<vmem>>, vector<32x48xf32>
    %c0_1 = arith.constant 0 : index
    %c0_2 = arith.constant 0 : index
    %1 = vector.load %arg2[%c0_1, %c0_2] : memref<1584x128xf32, #tpu.memory_space<vmem>>, vector<1x48xf32>
    %c8 = arith.constant 8 : index
    %c0_3 = arith.constant 0 : index
    %2 = vector.load %arg2[%c8, %c0_3] : memref<1584x128xf32, #tpu.memory_space<vmem>>, vector<1x48xf32>
    %cst = arith.constant dense<0.000000e+00> : vector<32xf32>
    %3 = vector.multi_reduction <add>, %0, %cst [1] : vector<32x48xf32> to vector<32xf32>
    %4 = vector.shape_cast %3 : vector<32xf32> to vector<32x1xf32>
    %cst_4 = arith.constant 4.800000e+01 : f32
    %5 = vector.broadcast %cst_4 : f32 to vector<32x1xf32>
    %6 = arith.divf %4, %5 : vector<32x1xf32>
    %7 = vector.broadcast %6 : vector<32x1xf32> to vector<32x48xf32>
    %8 = arith.subf %0, %7 : vector<32x48xf32>
    %9 = arith.mulf %8, %8 : vector<32x48xf32>
    %cst_5 = arith.constant dense<0.000000e+00> : vector<32xf32>
    %10 = vector.multi_reduction <add>, %9, %cst_5 [1] : vector<32x48xf32> to vector<32xf32>
    %11 = vector.shape_cast %10 : vector<32xf32> to vector<32x1xf32>
    %cst_6 = arith.constant 4.800000e+01 : f32
    %12 = vector.broadcast %cst_6 : f32 to vector<32x1xf32>
    %13 = arith.divf %11, %12 : vector<32x1xf32>
    %14 = vector.broadcast %6 : vector<32x1xf32> to vector<32x48xf32>
    %15 = arith.subf %0, %14 : vector<32x48xf32>
    %cst_7 = arith.constant 9.99999974E-6 : f32
    %16 = vector.broadcast %cst_7 : f32 to vector<32x1xf32>
    %17 = arith.addf %13, %16 : vector<32x1xf32>
    %18 = math.rsqrt %17 : vector<32x1xf32>
    %19 = vector.broadcast %18 : vector<32x1xf32> to vector<32x48xf32>
    %20 = arith.mulf %15, %19 : vector<32x48xf32>
    %21 = vector.broadcast %1 : vector<1x48xf32> to vector<32x48xf32>
    %22 = arith.mulf %20, %21 : vector<32x48xf32>
    %23 = vector.broadcast %2 : vector<1x48xf32> to vector<32x48xf32>
    %24 = arith.addf %22, %23 : vector<32x48xf32>
    %c16 = arith.constant 16 : index
    %c0_8 = arith.constant 0 : index
    %25 = vector.load %arg2[%c16, %c0_8] : memref<1584x128xf32, #tpu.memory_space<vmem>>, vector<48x32xf32>
    %cst_9 = arith.constant dense<0.000000e+00> : vector<32x32xf32>
    %26 = tpu.matmul %24, %25, %cst_9 {dimension_numbers = #tpu.dot_dimension_numbers<[1], [0], [0], [1], [0, 0, 1, 1], [], []>} : vector<32x48xf32>, vector<48x32xf32>, vector<32x32xf32> -> vector<32x32xf32>
    %c64 = arith.constant 64 : index
    %c0_10 = arith.constant 0 : index
    %27 = vector.load %arg2[%c64, %c0_10] : memref<1584x128xf32, #tpu.memory_space<vmem>>, vector<1x32xf32>
    %28 = vector.broadcast %27 : vector<1x32xf32> to vector<32x32xf32>
    %29 = arith.addf %26, %28 : vector<32x32xf32>
    %c72 = arith.constant 72 : index
    %c0_11 = arith.constant 0 : index
    %30 = vector.load %arg2[%c72, %c0_11] : memref<1584x128xf32, #tpu.memory_space<vmem>>, vector<1x32xf32>
    %c80 = arith.constant 80 : index
    %c0_12 = arith.constant 0 : index
    %31 = vector.load %arg2[%c80, %c0_12] : memref<1584x128xf32, #tpu.memory_space<vmem>>, vector<1x32xf32>
    %cst_13 = arith.constant dense<0.000000e+00> : vector<32xf32>
    %32 = vector.multi_reduction <add>, %29, %cst_13 [1] : vector<32x32xf32> to vector<32xf32>
    %33 = vector.shape_cast %32 : vector<32xf32> to vector<32x1xf32>
    %cst_14 = arith.constant 3.200000e+01 : f32
    %34 = vector.broadcast %cst_14 : f32 to vector<32x1xf32>
    %35 = arith.divf %33, %34 : vector<32x1xf32>
    %36 = vector.broadcast %35 : vector<32x1xf32> to vector<32x32xf32>
    %37 = arith.subf %29, %36 : vector<32x32xf32>
    %38 = arith.mulf %37, %37 : vector<32x32xf32>
    %cst_15 = arith.constant dense<0.000000e+00> : vector<32xf32>
    %39 = vector.multi_reduction <add>, %38, %cst_15 [1] : vector<32x32xf32> to vector<32xf32>
    %40 = vector.shape_cast %39 : vector<32xf32> to vector<32x1xf32>
    %cst_16 = arith.constant 3.200000e+01 : f32
    %41 = vector.broadcast %cst_16 : f32 to vector<32x1xf32>
    %42 = arith.divf %40, %41 : vector<32x1xf32>
    %43 = vector.broadcast %35 : vector<32x1xf32> to vector<32x32xf32>
    %44 = arith.subf %29, %43 : vector<32x32xf32>
    %cst_17 = arith.constant 9.99999974E-6 : f32
    %45 = vector.broadcast %cst_17 : f32 to vector<32x1xf32>
    %46 = arith.addf %42, %45 : vector<32x1xf32>
    %47 = math.rsqrt %46 : vector<32x1xf32>
    %48 = vector.broadcast %47 : vector<32x1xf32> to vector<32x32xf32>
    %49 = arith.mulf %44, %48 : vector<32x32xf32>
    %50 = vector.broadcast %30 : vector<1x32xf32> to vector<32x32xf32>
    %51 = arith.mulf %49, %50 : vector<32x32xf32>
    %52 = vector.broadcast %31 : vector<1x32xf32> to vector<32x32xf32>
    %53 = arith.addf %51, %52 : vector<32x32xf32>
    %c88 = arith.constant 88 : index
    %c0_18 = arith.constant 0 : index
    %54 = vector.load %arg2[%c88, %c0_18] : memref<1584x128xf32, #tpu.memory_space<vmem>>, vector<32x32xf32>
    %55 = arith.addf %53, %54 : vector<32x32xf32>
    %c488 = arith.constant 488 : index
    %c0_19 = arith.constant 0 : index
    %56 = vector.load %arg2[%c488, %c0_19] : memref<1584x128xf32, #tpu.memory_space<vmem>>, vector<1x32xf32>
    %c496 = arith.constant 496 : index
    %c0_20 = arith.constant 0 : index
    %57 = vector.load %arg2[%c496, %c0_20] : memref<1584x128xf32, #tpu.memory_space<vmem>>, vector<1x32xf32>
    %cst_21 = arith.constant dense<0.000000e+00> : vector<32xf32>
    %58 = vector.multi_reduction <add>, %55, %cst_21 [1] : vector<32x32xf32> to vector<32xf32>
    %59 = vector.shape_cast %58 : vector<32xf32> to vector<32x1xf32>
    %cst_22 = arith.constant 3.200000e+01 : f32
    %60 = vector.broadcast %cst_22 : f32 to vector<32x1xf32>
    %61 = arith.divf %59, %60 : vector<32x1xf32>
    %62 = vector.broadcast %61 : vector<32x1xf32> to vector<32x32xf32>
    %63 = arith.subf %55, %62 : vector<32x32xf32>
    %64 = arith.mulf %63, %63 : vector<32x32xf32>
    %cst_23 = arith.constant dense<0.000000e+00> : vector<32xf32>
    %65 = vector.multi_reduction <add>, %64, %cst_23 [1] : vector<32x32xf32> to vector<32xf32>
    %66 = vector.shape_cast %65 : vector<32xf32> to vector<32x1xf32>
    %cst_24 = arith.constant 3.200000e+01 : f32
    %67 = vector.broadcast %cst_24 : f32 to vector<32x1xf32>
    %68 = arith.divf %66, %67 : vector<32x1xf32>
    %69 = vector.broadcast %61 : vector<32x1xf32> to vector<32x32xf32>
    %70 = arith.subf %55, %69 : vector<32x32xf32>
    %cst_25 = arith.constant 9.99999974E-6 : f32
    %71 = vector.broadcast %cst_25 : f32 to vector<32x1xf32>
    %72 = arith.addf %68, %71 : vector<32x1xf32>
    %73 = math.rsqrt %72 : vector<32x1xf32>
    %74 = vector.broadcast %73 : vector<32x1xf32> to vector<32x32xf32>
    %75 = arith.mulf %70, %74 : vector<32x32xf32>
    %76 = vector.broadcast %56 : vector<1x32xf32> to vector<32x32xf32>
    %77 = arith.mulf %75, %76 : vector<32x32xf32>
    %78 = vector.broadcast %57 : vector<1x32xf32> to vector<32x32xf32>
    %79 = arith.addf %77, %78 : vector<32x32xf32>
    %c504 = arith.constant 504 : index
    %c0_26 = arith.constant 0 : index
    %80 = vector.load %arg2[%c504, %c0_26] : memref<1584x128xf32, #tpu.memory_space<vmem>>, vector<64x32xf32>
    %cst_27 = arith.constant dense<0.000000e+00> : vector<64x32xf32>
    %81 = tpu.matmul %80, %79, %cst_27 {dimension_numbers = #tpu.dot_dimension_numbers<[1], [1], [0], [0], [0, 0, 1, 0], [], []>} : vector<64x32xf32>, vector<32x32xf32>, vector<64x32xf32> -> vector<64x32xf32>
    %c568 = arith.constant 568 : index
    %c0_28 = arith.constant 0 : index
    %82 = vector.load %arg2[%c568, %c0_28] : memref<1584x128xf32, #tpu.memory_space<vmem>>, vector<32x32xf32>
    %cst_29 = arith.constant dense<0.000000e+00> : vector<32x32xf32>
    %83 = tpu.matmul %79, %82, %cst_29 {dimension_numbers = #tpu.dot_dimension_numbers<[1], [0], [0], [1], [0, 0, 1, 1], [], []>} : vector<32x32xf32>, vector<32x32xf32>, vector<32x32xf32> -> vector<32x32xf32>
    %c600 = arith.constant 600 : index
    %c0_30 = arith.constant 0 : index
    %84 = vector.load %arg2[%c600, %c0_30] : memref<1584x128xf32, #tpu.memory_space<vmem>>, vector<64x1xf32>
    %85 = vector.extract_strided_slice %81 {offsets = [0, 0], sizes = [64, 16], strides = [1, 1]} : vector<64x32xf32> to vector<64x16xf32>
    %86 = arith.mulf %85, %85 : vector<64x16xf32>
    %cst_31 = arith.constant dense<0.000000e+00> : vector<64xf32>
    %87 = vector.multi_reduction <add>, %86, %cst_31 [1] : vector<64x16xf32> to vector<64xf32>
    %88 = vector.shape_cast %87 : vector<64xf32> to vector<64x1xf32>
    %cst_32 = arith.constant 1.000000e-24 : f32
    %89 = vector.broadcast %cst_32 : f32 to vector<64x1xf32>
    %90 = arith.maximumf %88, %89 : vector<64x1xf32>
    %91 = math.rsqrt %90 : vector<64x1xf32>
    %92 = arith.mulf %91, %84 : vector<64x1xf32>
    %93 = vector.broadcast %92 : vector<64x1xf32> to vector<64x16xf32>
    %94 = arith.mulf %85, %93 : vector<64x16xf32>
    %95 = vector.extract_strided_slice %83 {offsets = [0, 0], sizes = [16, 32], strides = [1, 1]} : vector<32x32xf32> to vector<16x32xf32>
    %96 = vector.extract_strided_slice %94 {offsets = [0, 0], sizes = [16, 16], strides = [1, 1]} : vector<64x16xf32> to vector<16x16xf32>
    %97 = vector.extract_strided_slice %94 {offsets = [32, 0], sizes = [16, 16], strides = [1, 1]} : vector<64x16xf32> to vector<16x16xf32>
    %cst_33 = arith.constant dense<0.000000e+00> : vector<16x16xf32>
    %98 = tpu.matmul %96, %97, %cst_33 {dimension_numbers = #tpu.dot_dimension_numbers<[1], [1], [0], [0], [0, 0, 1, 0], [], []>} : vector<16x16xf32>, vector<16x16xf32>, vector<16x16xf32> -> vector<16x16xf32>
    %cst_34 = arith.constant dense<0xFF800000> : vector<16xf32>
    %99 = vector.multi_reduction <maximumf>, %98, %cst_34 [1] : vector<16x16xf32> to vector<16xf32>
    %100 = vector.shape_cast %99 : vector<16xf32> to vector<16x1xf32>
    %101 = vector.broadcast %100 : vector<16x1xf32> to vector<16x16xf32>
    %102 = arith.subf %98, %101 : vector<16x16xf32>
    %103 = math.exp %102 : vector<16x16xf32>
    %cst_35 = arith.constant dense<0.000000e+00> : vector<16xf32>
    %104 = vector.multi_reduction <add>, %103, %cst_35 [1] : vector<16x16xf32> to vector<16xf32>
    %105 = vector.shape_cast %104 : vector<16xf32> to vector<16x1xf32>
    %106 = tpu.reciprocal %105 {approx = true} : vector<16x1xf32> -> vector<16x1xf32>
    %107 = vector.broadcast %106 : vector<16x1xf32> to vector<16x16xf32>
    %108 = arith.mulf %103, %107 : vector<16x16xf32>
    %109 = vector.extract_strided_slice %95 {offsets = [0, 0], sizes = [16, 16], strides = [1, 1]} : vector<16x32xf32> to vector<16x16xf32>
    %cst_36 = arith.constant dense<0.000000e+00> : vector<16x16xf32>
    %110 = tpu.matmul %109, %108, %cst_36 {dimension_numbers = #tpu.dot_dimension_numbers<[1], [1], [0], [0], [0, 0, 1, 0], [], []>} : vector<16x16xf32>, vector<16x16xf32>, vector<16x16xf32> -> vector<16x16xf32>
    %c0_37 = arith.constant 0 : index
    %c0_38 = arith.constant 0 : index
    %111 = vector.load %arg4[%c0_37, %c0_38] : memref<32x32xf32, #tpu.memory_space<vmem>>, vector<16x16xf32>
    tpu.vector_store %arg4[%c0_37, %c0_38], %110 {strides = array<i32>} : memref<32x32xf32, #tpu.memory_space<vmem>>, vector<16x16xf32>,
    %112 = vector.extract_strided_slice %94 {offsets = [16, 0], sizes = [16, 16], strides = [1, 1]} : vector<64x16xf32> to vector<16x16xf32>
    %113 = vector.extract_strided_slice %94 {offsets = [48, 0], sizes = [16, 16], strides = [1, 1]} : vector<64x16xf32> to vector<16x16xf32>
    %cst_39 = arith.constant dense<0.000000e+00> : vector<16x16xf32>
    %114 = tpu.matmul %112, %113, %cst_39 {dimension_numbers = #tpu.dot_dimension_numbers<[1], [1], [0], [0], [0, 0, 1, 0], [], []>} : vector<16x16xf32>, vector<16x16xf32>, vector<16x16xf32> -> vector<16x16xf32>
    %cst_40 = arith.constant dense<0xFF800000> : vector<16xf32>
    %115 = vector.multi_reduction <maximumf>, %114, %cst_40 [1] : vector<16x16xf32> to vector<16xf32>
    %116 = vector.shape_cast %115 : vector<16xf32> to vector<16x1xf32>
    %117 = vector.broadcast %116 : vector<16x1xf32> to vector<16x16xf32>
    %118 = arith.subf %114, %117 : vector<16x16xf32>
    %119 = math.exp %118 : vector<16x16xf32>
    %cst_41 = arith.constant dense<0.000000e+00> : vector<16xf32>
    %120 = vector.multi_reduction <add>, %119, %cst_41 [1] : vector<16x16xf32> to vector<16xf32>
    %121 = vector.shape_cast %120 : vector<16xf32> to vector<16x1xf32>
    %122 = tpu.reciprocal %121 {approx = true} : vector<16x1xf32> -> vector<16x1xf32>
    %123 = vector.broadcast %122 : vector<16x1xf32> to vector<16x16xf32>
    %124 = arith.mulf %119, %123 : vector<16x16xf32>
    %125 = vector.extract_strided_slice %95 {offsets = [0, 16], sizes = [16, 16], strides = [1, 1]} : vector<16x32xf32> to vector<16x16xf32>
    %cst_42 = arith.constant dense<0.000000e+00> : vector<16x16xf32>
    %126 = tpu.matmul %125, %124, %cst_42 {dimension_numbers = #tpu.dot_dimension_numbers<[1], [1], [0], [0], [0, 0, 1, 0], [], []>} : vector<16x16xf32>, vector<16x16xf32>, vector<16x16xf32> -> vector<16x16xf32>
    %c0_43 = arith.constant 0 : index
    %c16_44 = arith.constant 16 : index
    %127 = vector.load %arg4[%c0_43, %c16_44] : memref<32x32xf32, #tpu.memory_space<vmem>>, vector<16x16xf32>
    tpu.vector_store %arg4[%c0_43, %c16_44], %126 {strides = array<i32>} : memref<32x32xf32, #tpu.memory_space<vmem>>, vector<16x16xf32>,
    %128 = vector.extract_strided_slice %81 {offsets = [0, 16], sizes = [64, 16], strides = [1, 1]} : vector<64x32xf32> to vector<64x16xf32>
    %129 = arith.mulf %128, %128 : vector<64x16xf32>
    %cst_45 = arith.constant dense<0.000000e+00> : vector<64xf32>
    %130 = vector.multi_reduction <add>, %129, %cst_45 [1] : vector<64x16xf32> to vector<64xf32>
    %131 = vector.shape_cast %130 : vector<64xf32> to vector<64x1xf32>
    %cst_46 = arith.constant 1.000000e-24 : f32
    %132 = vector.broadcast %cst_46 : f32 to vector<64x1xf32>
    %133 = arith.maximumf %131, %132 : vector<64x1xf32>
    %134 = math.rsqrt %133 : vector<64x1xf32>
    %135 = arith.mulf %134, %84 : vector<64x1xf32>
    %136 = vector.broadcast %135 : vector<64x1xf32> to vector<64x16xf32>
    %137 = arith.mulf %128, %136 : vector<64x16xf32>
    %138 = vector.extract_strided_slice %83 {offsets = [16, 0], sizes = [16, 32], strides = [1, 1]} : vector<32x32xf32> to vector<16x32xf32>
    %139 = vector.extract_strided_slice %137 {offsets = [0, 0], sizes = [16, 16], strides = [1, 1]} : vector<64x16xf32> to vector<16x16xf32>
    %140 = vector.extract_strided_slice %137 {offsets = [32, 0], sizes = [16, 16], strides = [1, 1]} : vector<64x16xf32> to vector<16x16xf32>
    %cst_47 = arith.constant dense<0.000000e+00> : vector<16x16xf32>
    %141 = tpu.matmul %139, %140, %cst_47 {dimension_numbers = #tpu.dot_dimension_numbers<[1], [1], [0], [0], [0, 0, 1, 0], [], []>} : vector<16x16xf32>, vector<16x16xf32>, vector<16x16xf32> -> vector<16x16xf32>
    %cst_48 = arith.constant dense<0xFF800000> : vector<16xf32>
    %142 = vector.multi_reduction <maximumf>, %141, %cst_48 [1] : vector<16x16xf32> to vector<16xf32>
    %143 = vector.shape_cast %142 : vector<16xf32> to vector<16x1xf32>
    %144 = vector.broadcast %143 : vector<16x1xf32> to vector<16x16xf32>
    %145 = arith.subf %141, %144 : vector<16x16xf32>
    %146 = math.exp %145 : vector<16x16xf32>
    %cst_49 = arith.constant dense<0.000000e+00> : vector<16xf32>
    %147 = vector.multi_reduction <add>, %146, %cst_49 [1] : vector<16x16xf32> to vector<16xf32>
    %148 = vector.shape_cast %147 : vector<16xf32> to vector<16x1xf32>
    %149 = tpu.reciprocal %148 {approx = true} : vector<16x1xf32> -> vector<16x1xf32>
    %150 = vector.broadcast %149 : vector<16x1xf32> to vector<16x16xf32>
    %151 = arith.mulf %146, %150 : vector<16x16xf32>
    %152 = vector.extract_strided_slice %138 {offsets = [0, 0], sizes = [16, 16], strides = [1, 1]} : vector<16x32xf32> to vector<16x16xf32>
    %cst_50 = arith.constant dense<0.000000e+00> : vector<16x16xf32>
    %153 = tpu.matmul %152, %151, %cst_50 {dimension_numbers = #tpu.dot_dimension_numbers<[1], [1], [0], [0], [0, 0, 1, 0], [], []>} : vector<16x16xf32>, vector<16x16xf32>, vector<16x16xf32> -> vector<16x16xf32>
    %c16_51 = arith.constant 16 : index
    %c0_52 = arith.constant 0 : index
    %154 = vector.load %arg4[%c16_51, %c0_52] : memref<32x32xf32, #tpu.memory_space<vmem>>, vector<16x16xf32>
    tpu.vector_store %arg4[%c16_51, %c0_52], %153 {strides = array<i32>} : memref<32x32xf32, #tpu.memory_space<vmem>>, vector<16x16xf32>,
    %155 = vector.extract_strided_slice %137 {offsets = [16, 0], sizes = [16, 16], strides = [1, 1]} : vector<64x16xf32> to vector<16x16xf32>
    %156 = vector.extract_strided_slice %137 {offsets = [48, 0], sizes = [16, 16], strides = [1, 1]} : vector<64x16xf32> to vector<16x16xf32>
    %cst_53 = arith.constant dense<0.000000e+00> : vector<16x16xf32>
    %157 = tpu.matmul %155, %156, %cst_53 {dimension_numbers = #tpu.dot_dimension_numbers<[1], [1], [0], [0], [0, 0, 1, 0], [], []>} : vector<16x16xf32>, vector<16x16xf32>, vector<16x16xf32> -> vector<16x16xf32>
    %cst_54 = arith.constant dense<0xFF800000> : vector<16xf32>
    %158 = vector.multi_reduction <maximumf>, %157, %cst_54 [1] : vector<16x16xf32> to vector<16xf32>
    %159 = vector.shape_cast %158 : vector<16xf32> to vector<16x1xf32>
    %160 = vector.broadcast %159 : vector<16x1xf32> to vector<16x16xf32>
    %161 = arith.subf %157, %160 : vector<16x16xf32>
    %162 = math.exp %161 : vector<16x16xf32>
    %cst_55 = arith.constant dense<0.000000e+00> : vector<16xf32>
    %163 = vector.multi_reduction <add>, %162, %cst_55 [1] : vector<16x16xf32> to vector<16xf32>
    %164 = vector.shape_cast %163 : vector<16xf32> to vector<16x1xf32>
    %165 = tpu.reciprocal %164 {approx = true} : vector<16x1xf32> -> vector<16x1xf32>
    %166 = vector.broadcast %165 : vector<16x1xf32> to vector<16x16xf32>
    %167 = arith.mulf %162, %166 : vector<16x16xf32>
    %168 = vector.extract_strided_slice %138 {offsets = [0, 16], sizes = [16, 16], strides = [1, 1]} : vector<16x32xf32> to vector<16x16xf32>
    %cst_56 = arith.constant dense<0.000000e+00> : vector<16x16xf32>
    %169 = tpu.matmul %168, %167, %cst_56 {dimension_numbers = #tpu.dot_dimension_numbers<[1], [1], [0], [0], [0, 0, 1, 0], [], []>} : vector<16x16xf32>, vector<16x16xf32>, vector<16x16xf32> -> vector<16x16xf32>
    %c16_57 = arith.constant 16 : index
    %c16_58 = arith.constant 16 : index
    %170 = vector.load %arg4[%c16_57, %c16_58] : memref<32x32xf32, #tpu.memory_space<vmem>>, vector<16x16xf32>
    tpu.vector_store %arg4[%c16_57, %c16_58], %169 {strides = array<i32>} : memref<32x32xf32, #tpu.memory_space<vmem>>, vector<16x16xf32>,
    %c0_59 = arith.constant 0 : index
    %c0_60 = arith.constant 0 : index
    %171 = vector.load %arg4[%c0_59, %c0_60] : memref<32x32xf32, #tpu.memory_space<vmem>>, vector<32x32xf32>
    %c664 = arith.constant 664 : index
    %c0_61 = arith.constant 0 : index
    %172 = vector.load %arg2[%c664, %c0_61] : memref<1584x128xf32, #tpu.memory_space<vmem>>, vector<32x32xf32>
    %cst_62 = arith.constant dense<0.000000e+00> : vector<32x32xf32>
    %173 = tpu.matmul %171, %172, %cst_62 {dimension_numbers = #tpu.dot_dimension_numbers<[1], [0], [0], [1], [0, 0, 1, 1], [], []>} : vector<32x32xf32>, vector<32x32xf32>, vector<32x32xf32> -> vector<32x32xf32>
    %174 = arith.addf %55, %173 : vector<32x32xf32>
    %c696 = arith.constant 696 : index
    %c0_63 = arith.constant 0 : index
    %175 = vector.load %arg2[%c696, %c0_63] : memref<1584x128xf32, #tpu.memory_space<vmem>>, vector<1x32xf32>
    %176 = vector.broadcast %175 : vector<1x32xf32> to vector<32x32xf32>
    %177 = arith.addf %174, %176 : vector<32x32xf32>
    %c704 = arith.constant 704 : index
    %c0_64 = arith.constant 0 : index
    %178 = vector.load %arg2[%c704, %c0_64] : memref<1584x128xf32, #tpu.memory_space<vmem>>, vector<1x32xf32>
    %c712 = arith.constant 712 : index
    %c0_65 = arith.constant 0 : index
    %179 = vector.load %arg2[%c712, %c0_65] : memref<1584x128xf32, #tpu.memory_space<vmem>>, vector<1x32xf32>
    %cst_66 = arith.constant dense<0.000000e+00> : vector<32xf32>
    %180 = vector.multi_reduction <add>, %177, %cst_66 [1] : vector<32x32xf32> to vector<32xf32>
    %181 = vector.shape_cast %180 : vector<32xf32> to vector<32x1xf32>
    %cst_67 = arith.constant 3.200000e+01 : f32
    %182 = vector.broadcast %cst_67 : f32 to vector<32x1xf32>
    %183 = arith.divf %181, %182 : vector<32x1xf32>
    %184 = vector.broadcast %183 : vector<32x1xf32> to vector<32x32xf32>
    %185 = arith.subf %177, %184 : vector<32x32xf32>
    %186 = arith.mulf %185, %185 : vector<32x32xf32>
    %cst_68 = arith.constant dense<0.000000e+00> : vector<32xf32>
    %187 = vector.multi_reduction <add>, %186, %cst_68 [1] : vector<32x32xf32> to vector<32xf32>
    %188 = vector.shape_cast %187 : vector<32xf32> to vector<32x1xf32>
    %cst_69 = arith.constant 3.200000e+01 : f32
    %189 = vector.broadcast %cst_69 : f32 to vector<32x1xf32>
    %190 = arith.divf %188, %189 : vector<32x1xf32>
    %191 = vector.broadcast %183 : vector<32x1xf32> to vector<32x32xf32>
    %192 = arith.subf %177, %191 : vector<32x32xf32>
    %cst_70 = arith.constant 9.99999974E-6 : f32
    %193 = vector.broadcast %cst_70 : f32 to vector<32x1xf32>
    %194 = arith.addf %190, %193 : vector<32x1xf32>
    %195 = math.rsqrt %194 : vector<32x1xf32>
    %196 = vector.broadcast %195 : vector<32x1xf32> to vector<32x32xf32>
    %197 = arith.mulf %192, %196 : vector<32x32xf32>
    %198 = vector.broadcast %178 : vector<1x32xf32> to vector<32x32xf32>
    %199 = arith.mulf %197, %198 : vector<32x32xf32>
    %200 = vector.broadcast %179 : vector<1x32xf32> to vector<32x32xf32>
    %201 = arith.addf %199, %200 : vector<32x32xf32>
    %c720 = arith.constant 720 : index
    %c0_71 = arith.constant 0 : index
    %202 = vector.load %arg2[%c720, %c0_71] : memref<1584x128xf32, #tpu.memory_space<vmem>>, vector<9x32xf32>
    %c736 = arith.constant 736 : index
    %c0_72 = arith.constant 0 : index
    %203 = vector.load %arg2[%c736, %c0_72] : memref<1584x128xf32, #tpu.memory_space<vmem>>, vector<1x32xf32>
    %cst_73 = arith.constant 0.000000e+00 : f32
    %204 = vector.broadcast %cst_73 : f32 to vector<32x32xf32>
    %c120 = arith.constant 120 : index
    %c0_74 = arith.constant 0 : index
    %205 = vector.load %arg2[%c120, %c0_74] : memref<1584x128xf32, #tpu.memory_space<vmem>>, vector<96x32xf32>
    %cst_75 = arith.constant dense<0.000000e+00> : vector<96x32xf32>
    %206 = tpu.matmul %205, %201, %cst_75 {dimension_numbers = #tpu.dot_dimension_numbers<[1], [0], [0], [1], [0, 0, 1, 1], [], []>} : vector<96x32xf32>, vector<32x32xf32>, vector<96x32xf32> -> vector<96x32xf32>
    %207 = vector.extract_strided_slice %206 {offsets = [0, 0], sizes = [32, 32], strides = [1, 1]} : vector<96x32xf32> to vector<32x32xf32>
    %208 = vector.extract_strided_slice %202 {offsets = [0, 0], sizes = [1, 32], strides = [1, 1]} : vector<9x32xf32> to vector<1x32xf32>
    %209 = vector.broadcast %208 : vector<1x32xf32> to vector<32x32xf32>
    %210 = arith.mulf %207, %209 : vector<32x32xf32>
    %211 = arith.addf %204, %210 : vector<32x32xf32>
    %212 = vector.extract_strided_slice %206 {offsets = [32, 0], sizes = [32, 32], strides = [1, 1]} : vector<96x32xf32> to vector<32x32xf32>
    %213 = vector.extract_strided_slice %202 {offsets = [1, 0], sizes = [1, 32], strides = [1, 1]} : vector<9x32xf32> to vector<1x32xf32>
    %214 = vector.broadcast %213 : vector<1x32xf32> to vector<32x32xf32>
    %215 = arith.mulf %212, %214 : vector<32x32xf32>
    %216 = arith.addf %211, %215 : vector<32x32xf32>
    %217 = vector.extract_strided_slice %206 {offsets = [64, 0], sizes = [32, 32], strides = [1, 1]} : vector<96x32xf32> to vector<32x32xf32>
    %218 = vector.extract_strided_slice %202 {offsets = [2, 0], sizes = [1, 32], strides = [1, 1]} : vector<9x32xf32> to vector<1x32xf32>
    %219 = vector.broadcast %218 : vector<1x32xf32> to vector<32x32xf32>
    %220 = arith.mulf %217, %219 : vector<32x32xf32>
    %221 = arith.addf %216, %220 : vector<32x32xf32>
    %c216 = arith.constant 216 : index
    %c0_76 = arith.constant 0 : index
    %222 = vector.load %arg2[%c216, %c0_76] : memref<1584x128xf32, #tpu.memory_space<vmem>>, vector<96x32xf32>
    %cst_77 = arith.constant dense<0.000000e+00> : vector<96x32xf32>
    %223 = tpu.matmul %222, %201, %cst_77 {dimension_numbers = #tpu.dot_dimension_numbers<[1], [0], [0], [1], [0, 0, 1, 1], [], []>} : vector<96x32xf32>, vector<32x32xf32>, vector<96x32xf32> -> vector<96x32xf32>
    %224 = vector.extract_strided_slice %223 {offsets = [0, 0], sizes = [32, 32], strides = [1, 1]} : vector<96x32xf32> to vector<32x32xf32>
    %225 = vector.extract_strided_slice %202 {offsets = [3, 0], sizes = [1, 32], strides = [1, 1]} : vector<9x32xf32> to vector<1x32xf32>
    %226 = vector.broadcast %225 : vector<1x32xf32> to vector<32x32xf32>
    %227 = arith.mulf %224, %226 : vector<32x32xf32>
    %228 = arith.addf %221, %227 : vector<32x32xf32>
    %229 = vector.extract_strided_slice %223 {offsets = [32, 0], sizes = [32, 32], strides = [1, 1]} : vector<96x32xf32> to vector<32x32xf32>
    %230 = vector.extract_strided_slice %202 {offsets = [4, 0], sizes = [1, 32], strides = [1, 1]} : vector<9x32xf32> to vector<1x32xf32>
    %231 = vector.broadcast %230 : vector<1x32xf32> to vector<32x32xf32>
    %232 = arith.mulf %229, %231 : vector<32x32xf32>
    %233 = arith.addf %228, %232 : vector<32x32xf32>
    %234 = vector.extract_strided_slice %223 {offsets = [64, 0], sizes = [32, 32], strides = [1, 1]} : vector<96x32xf32> to vector<32x32xf32>
    %235 = vector.extract_strided_slice %202 {offsets = [5, 0], sizes = [1, 32], strides = [1, 1]} : vector<9x32xf32> to vector<1x32xf32>
    %236 = vector.broadcast %235 : vector<1x32xf32> to vector<32x32xf32>
    %237 = arith.mulf %234, %236 : vector<32x32xf32>
    %238 = arith.addf %233, %237 : vector<32x32xf32>
    %c312 = arith.constant 312 : index
    %c0_78 = arith.constant 0 : index
    %239 = vector.load %arg2[%c312, %c0_78] : memref<1584x128xf32, #tpu.memory_space<vmem>>, vector<96x32xf32>
    %cst_79 = arith.constant dense<0.000000e+00> : vector<96x32xf32>
    %240 = tpu.matmul %239, %201, %cst_79 {dimension_numbers = #tpu.dot_dimension_numbers<[1], [0], [0], [1], [0, 0, 1, 1], [], []>} : vector<96x32xf32>, vector<32x32xf32>, vector<96x32xf32> -> vector<96x32xf32>
    %241 = vector.extract_strided_slice %240 {offsets = [0, 0], sizes = [32, 32], strides = [1, 1]} : vector<96x32xf32> to vector<32x32xf32>
    %242 = vector.extract_strided_slice %202 {offsets = [6, 0], sizes = [1, 32], strides = [1, 1]} : vector<9x32xf32> to vector<1x32xf32>
    %243 = vector.broadcast %242 : vector<1x32xf32> to vector<32x32xf32>
    %244 = arith.mulf %241, %243 : vector<32x32xf32>
    %245 = arith.addf %238, %244 : vector<32x32xf32>
    %246 = vector.extract_strided_slice %240 {offsets = [32, 0], sizes = [32, 32], strides = [1, 1]} : vector<96x32xf32> to vector<32x32xf32>
    %247 = vector.extract_strided_slice %202 {offsets = [7, 0], sizes = [1, 32], strides = [1, 1]} : vector<9x32xf32> to vector<1x32xf32>
    %248 = vector.broadcast %247 : vector<1x32xf32> to vector<32x32xf32>
    %249 = arith.mulf %246, %248 : vector<32x32xf32>
    %250 = arith.addf %245, %249 : vector<32x32xf32>
    %251 = vector.extract_strided_slice %240 {offsets = [64, 0], sizes = [32, 32], strides = [1, 1]} : vector<96x32xf32> to vector<32x32xf32>
    %252 = vector.extract_strided_slice %202 {offsets = [8, 0], sizes = [1, 32], strides = [1, 1]} : vector<9x32xf32> to vector<1x32xf32>
    %253 = vector.broadcast %252 : vector<1x32xf32> to vector<32x32xf32>
    %254 = arith.mulf %251, %253 : vector<32x32xf32>
    %255 = arith.addf %250, %254 : vector<32x32xf32>
    %256 = vector.broadcast %203 : vector<1x32xf32> to vector<32x32xf32>
    %257 = arith.addf %255, %256 : vector<32x32xf32>
    %cst_80 = arith.constant dense<0.000000e+00> : vector<32xf32>
    %258 = vector.multi_reduction <add>, %257, %cst_80 [0] : vector<32x32xf32> to vector<32xf32>
    %259 = vector.shape_cast %258 : vector<32xf32> to vector<1x32xf32>
    %cst_81 = arith.constant 3.200000e+01 : f32
    %260 = vector.broadcast %cst_81 : f32 to vector<1x32xf32>
    %261 = arith.divf %259, %260 : vector<1x32xf32>
    %262 = vector.broadcast %261 : vector<1x32xf32> to vector<32x32xf32>
    %263 = arith.subf %257, %262 : vector<32x32xf32>
    %264 = arith.mulf %263, %263 : vector<32x32xf32>
    %cst_82 = arith.constant dense<0.000000e+00> : vector<32xf32>
    %265 = vector.multi_reduction <add>, %264, %cst_82 [0] : vector<32x32xf32> to vector<32xf32>
    %266 = vector.shape_cast %265 : vector<32xf32> to vector<1x32xf32>
    %cst_83 = arith.constant 3.200000e+01 : f32
    %267 = vector.broadcast %cst_83 : f32 to vector<1x32xf32>
    %268 = arith.divf %266, %267 : vector<1x32xf32>
    %269 = vector.broadcast %261 : vector<1x32xf32> to vector<32x32xf32>
    %270 = arith.subf %257, %269 : vector<32x32xf32>
    %cst_84 = arith.constant 9.99999974E-6 : f32
    %271 = vector.broadcast %cst_84 : f32 to vector<1x32xf32>
    %272 = arith.addf %268, %271 : vector<1x32xf32>
    %273 = math.rsqrt %272 : vector<1x32xf32>
    %274 = vector.broadcast %273 : vector<1x32xf32> to vector<32x32xf32>
    %275 = arith.mulf %270, %274 : vector<32x32xf32>
    %c744 = arith.constant 744 : index
    %c0_85 = arith.constant 0 : index
    %276 = vector.load %arg2[%c744, %c0_85] : memref<1584x128xf32, #tpu.memory_space<vmem>>, vector<1x32xf32>
    %277 = vector.broadcast %276 : vector<1x32xf32> to vector<32x32xf32>
    %278 = arith.mulf %275, %277 : vector<32x32xf32>
    %c752 = arith.constant 752 : index
    %c0_86 = arith.constant 0 : index
    %279 = vector.load %arg2[%c752, %c0_86] : memref<1584x128xf32, #tpu.memory_space<vmem>>, vector<1x32xf32>
    %280 = vector.broadcast %279 : vector<1x32xf32> to vector<32x32xf32>
    %281 = arith.addf %278, %280 : vector<32x32xf32>
    %cst_87 = arith.constant 5.000000e-01 : f32
    %282 = vector.broadcast %cst_87 : f32 to vector<32x32xf32>
    %283 = arith.mulf %282, %281 : vector<32x32xf32>
    %cst_88 = arith.constant 4.471500e-02 : f32
    %284 = vector.broadcast %cst_88 : f32 to vector<32x32xf32>
    %285 = arith.mulf %284, %281 : vector<32x32xf32>
    %286 = arith.mulf %285, %281 : vector<32x32xf32>
    %287 = arith.mulf %286, %281 : vector<32x32xf32>
    %288 = arith.addf %281, %287 : vector<32x32xf32>
    %cst_89 = arith.constant 0.797884583 : f32
    %289 = vector.broadcast %cst_89 : f32 to vector<32x32xf32>
    %290 = arith.mulf %289, %288 : vector<32x32xf32>
    %291 = math.tanh %290 : vector<32x32xf32>
    %cst_90 = arith.constant 1.000000e+00 : f32
    %292 = vector.broadcast %cst_90 : f32 to vector<32x32xf32>
    %293 = arith.addf %292, %291 : vector<32x32xf32>
    %294 = arith.mulf %283, %293 : vector<32x32xf32>
    %c760 = arith.constant 760 : index
    %c0_91 = arith.constant 0 : index
    %295 = vector.load %arg2[%c760, %c0_91] : memref<1584x128xf32, #tpu.memory_space<vmem>>, vector<9x32xf32>
    %c776 = arith.constant 776 : index
    %c0_92 = arith.constant 0 : index
    %296 = vector.load %arg2[%c776, %c0_92] : memref<1584x128xf32, #tpu.memory_space<vmem>>, vector<1x32xf32>
    %cst_93 = arith.constant 0.000000e+00 : f32
    %297 = vector.broadcast %cst_93 : f32 to vector<32x32xf32>
    %c120_94 = arith.constant 120 : index
    %c0_95 = arith.constant 0 : index
    %298 = vector.load %arg2[%c120_94, %c0_95] : memref<1584x128xf32, #tpu.memory_space<vmem>>, vector<96x32xf32>
    %cst_96 = arith.constant dense<0.000000e+00> : vector<96x32xf32>
    %299 = tpu.matmul %298, %294, %cst_96 {dimension_numbers = #tpu.dot_dimension_numbers<[1], [0], [0], [1], [0, 0, 1, 1], [], []>} : vector<96x32xf32>, vector<32x32xf32>, vector<96x32xf32> -> vector<96x32xf32>
    %300 = vector.extract_strided_slice %299 {offsets = [0, 0], sizes = [32, 32], strides = [1, 1]} : vector<96x32xf32> to vector<32x32xf32>
    %301 = vector.extract_strided_slice %295 {offsets = [0, 0], sizes = [1, 32], strides = [1, 1]} : vector<9x32xf32> to vector<1x32xf32>
    %302 = vector.broadcast %301 : vector<1x32xf32> to vector<32x32xf32>
    %303 = arith.mulf %300, %302 : vector<32x32xf32>
    %304 = arith.addf %297, %303 : vector<32x32xf32>
    %305 = vector.extract_strided_slice %299 {offsets = [32, 0], sizes = [32, 32], strides = [1, 1]} : vector<96x32xf32> to vector<32x32xf32>
    %306 = vector.extract_strided_slice %295 {offsets = [1, 0], sizes = [1, 32], strides = [1, 1]} : vector<9x32xf32> to vector<1x32xf32>
    %307 = vector.broadcast %306 : vector<1x32xf32> to vector<32x32xf32>
    %308 = arith.mulf %305, %307 : vector<32x32xf32>
    %309 = arith.addf %304, %308 : vector<32x32xf32>
    %310 = vector.extract_strided_slice %299 {offsets = [64, 0], sizes = [32, 32], strides = [1, 1]} : vector<96x32xf32> to vector<32x32xf32>
    %311 = vector.extract_strided_slice %295 {offsets = [2, 0], sizes = [1, 32], strides = [1, 1]} : vector<9x32xf32> to vector<1x32xf32>
    %312 = vector.broadcast %311 : vector<1x32xf32> to vector<32x32xf32>
    %313 = arith.mulf %310, %312 : vector<32x32xf32>
    %314 = arith.addf %309, %313 : vector<32x32xf32>
    %c216_97 = arith.constant 216 : index
    %c0_98 = arith.constant 0 : index
    %315 = vector.load %arg2[%c216_97, %c0_98] : memref<1584x128xf32, #tpu.memory_space<vmem>>, vector<96x32xf32>
    %cst_99 = arith.constant dense<0.000000e+00> : vector<96x32xf32>
    %316 = tpu.matmul %315, %294, %cst_99 {dimension_numbers = #tpu.dot_dimension_numbers<[1], [0], [0], [1], [0, 0, 1, 1], [], []>} : vector<96x32xf32>, vector<32x32xf32>, vector<96x32xf32> -> vector<96x32xf32>
    %317 = vector.extract_strided_slice %316 {offsets = [0, 0], sizes = [32, 32], strides = [1, 1]} : vector<96x32xf32> to vector<32x32xf32>
    %318 = vector.extract_strided_slice %295 {offsets = [3, 0], sizes = [1, 32], strides = [1, 1]} : vector<9x32xf32> to vector<1x32xf32>
    %319 = vector.broadcast %318 : vector<1x32xf32> to vector<32x32xf32>
    %320 = arith.mulf %317, %319 : vector<32x32xf32>
    %321 = arith.addf %314, %320 : vector<32x32xf32>
    %322 = vector.extract_strided_slice %316 {offsets = [32, 0], sizes = [32, 32], strides = [1, 1]} : vector<96x32xf32> to vector<32x32xf32>
    %323 = vector.extract_strided_slice %295 {offsets = [4, 0], sizes = [1, 32], strides = [1, 1]} : vector<9x32xf32> to vector<1x32xf32>
    %324 = vector.broadcast %323 : vector<1x32xf32> to vector<32x32xf32>
    %325 = arith.mulf %322, %324 : vector<32x32xf32>
    %326 = arith.addf %321, %325 : vector<32x32xf32>
    %327 = vector.extract_strided_slice %316 {offsets = [64, 0], sizes = [32, 32], strides = [1, 1]} : vector<96x32xf32> to vector<32x32xf32>
    %328 = vector.extract_strided_slice %295 {offsets = [5, 0], sizes = [1, 32], strides = [1, 1]} : vector<9x32xf32> to vector<1x32xf32>
    %329 = vector.broadcast %328 : vector<1x32xf32> to vector<32x32xf32>
    %330 = arith.mulf %327, %329 : vector<32x32xf32>
    %331 = arith.addf %326, %330 : vector<32x32xf32>
    %c312_100 = arith.constant 312 : index
    %c0_101 = arith.constant 0 : index
    %332 = vector.load %arg2[%c312_100, %c0_101] : memref<1584x128xf32, #tpu.memory_space<vmem>>, vector<96x32xf32>
    %cst_102 = arith.constant dense<0.000000e+00> : vector<96x32xf32>
    %333 = tpu.matmul %332, %294, %cst_102 {dimension_numbers = #tpu.dot_dimension_numbers<[1], [0], [0], [1], [0, 0, 1, 1], [], []>} : vector<96x32xf32>, vector<32x32xf32>, vector<96x32xf32> -> vector<96x32xf32>
    %334 = vector.extract_strided_slice %333 {offsets = [0, 0], sizes = [32, 32], strides = [1, 1]} : vector<96x32xf32> to vector<32x32xf32>
    %335 = vector.extract_strided_slice %295 {offsets = [6, 0], sizes = [1, 32], strides = [1, 1]} : vector<9x32xf32> to vector<1x32xf32>
    %336 = vector.broadcast %335 : vector<1x32xf32> to vector<32x32xf32>
    %337 = arith.mulf %334, %336 : vector<32x32xf32>
    %338 = arith.addf %331, %337 : vector<32x32xf32>
    %339 = vector.extract_strided_slice %333 {offsets = [32, 0], sizes = [32, 32], strides = [1, 1]} : vector<96x32xf32> to vector<32x32xf32>
    %340 = vector.extract_strided_slice %295 {offsets = [7, 0], sizes = [1, 32], strides = [1, 1]} : vector<9x32xf32> to vector<1x32xf32>
    %341 = vector.broadcast %340 : vector<1x32xf32> to vector<32x32xf32>
    %342 = arith.mulf %339, %341 : vector<32x32xf32>
    %343 = arith.addf %338, %342 : vector<32x32xf32>
    %344 = vector.extract_strided_slice %333 {offsets = [64, 0], sizes = [32, 32], strides = [1, 1]} : vector<96x32xf32> to vector<32x32xf32>
    %345 = vector.extract_strided_slice %295 {offsets = [8, 0], sizes = [1, 32], strides = [1, 1]} : vector<9x32xf32> to vector<1x32xf32>
    %346 = vector.broadcast %345 : vector<1x32xf32> to vector<32x32xf32>
    %347 = arith.mulf %344, %346 : vector<32x32xf32>
    %348 = arith.addf %343, %347 : vector<32x32xf32>
    %349 = vector.broadcast %296 : vector<1x32xf32> to vector<32x32xf32>
    %350 = arith.addf %348, %349 : vector<32x32xf32>
    %351 = arith.addf %177, %350 : vector<32x32xf32>
    %c784 = arith.constant 784 : index
    %c0_103 = arith.constant 0 : index
    %352 = vector.load %arg2[%c784, %c0_103] : memref<1584x128xf32, #tpu.memory_space<vmem>>, vector<1x32xf32>
    %c792 = arith.constant 792 : index
    %c0_104 = arith.constant 0 : index
    %353 = vector.load %arg2[%c792, %c0_104] : memref<1584x128xf32, #tpu.memory_space<vmem>>, vector<1x32xf32>
    %cst_105 = arith.constant dense<0.000000e+00> : vector<32xf32>
    %354 = vector.multi_reduction <add>, %351, %cst_105 [1] : vector<32x32xf32> to vector<32xf32>
    %355 = vector.shape_cast %354 : vector<32xf32> to vector<32x1xf32>
    %cst_106 = arith.constant 3.200000e+01 : f32
    %356 = vector.broadcast %cst_106 : f32 to vector<32x1xf32>
    %357 = arith.divf %355, %356 : vector<32x1xf32>
    %358 = vector.broadcast %357 : vector<32x1xf32> to vector<32x32xf32>
    %359 = arith.subf %351, %358 : vector<32x32xf32>
    %360 = arith.mulf %359, %359 : vector<32x32xf32>
    %cst_107 = arith.constant dense<0.000000e+00> : vector<32xf32>
    %361 = vector.multi_reduction <add>, %360, %cst_107 [1] : vector<32x32xf32> to vector<32xf32>
    %362 = vector.shape_cast %361 : vector<32xf32> to vector<32x1xf32>
    %cst_108 = arith.constant 3.200000e+01 : f32
    %363 = vector.broadcast %cst_108 : f32 to vector<32x1xf32>
    %364 = arith.divf %362, %363 : vector<32x1xf32>
    %365 = vector.broadcast %357 : vector<32x1xf32> to vector<32x32xf32>
    %366 = arith.subf %351, %365 : vector<32x32xf32>
    %cst_109 = arith.constant 9.99999974E-6 : f32
    %367 = vector.broadcast %cst_109 : f32 to vector<32x1xf32>
    %368 = arith.addf %364, %367 : vector<32x1xf32>
    %369 = math.rsqrt %368 : vector<32x1xf32>
    %370 = vector.broadcast %369 : vector<32x1xf32> to vector<32x32xf32>
    %371 = arith.mulf %366, %370 : vector<32x32xf32>
    %372 = vector.broadcast %352 : vector<1x32xf32> to vector<32x32xf32>
    %373 = arith.mulf %371, %372 : vector<32x32xf32>
    %374 = vector.broadcast %353 : vector<1x32xf32> to vector<32x32xf32>
    %375 = arith.addf %373, %374 : vector<32x32xf32>
    %c800 = arith.constant 800 : index
    %c0_110 = arith.constant 0 : index
    %376 = vector.load %arg2[%c800, %c0_110] : memref<1584x128xf32, #tpu.memory_space<vmem>>, vector<32x64xf32>
    %cst_111 = arith.constant dense<0.000000e+00> : vector<32x64xf32>
    %377 = tpu.matmul %375, %376, %cst_111 {dimension_numbers = #tpu.dot_dimension_numbers<[1], [0], [0], [1], [0, 0, 1, 1], [], []>} : vector<32x32xf32>, vector<32x64xf32>, vector<32x64xf32> -> vector<32x64xf32>
    %c832 = arith.constant 832 : index
    %c0_112 = arith.constant 0 : index
    %378 = vector.load %arg2[%c832, %c0_112] : memref<1584x128xf32, #tpu.memory_space<vmem>>, vector<1x64xf32>
    %379 = vector.broadcast %378 : vector<1x64xf32> to vector<32x64xf32>
    %380 = arith.addf %377, %379 : vector<32x64xf32>
    %cst_113 = arith.constant 5.000000e-01 : f32
    %381 = vector.broadcast %cst_113 : f32 to vector<32x64xf32>
    %382 = arith.mulf %381, %380 : vector<32x64xf32>
    %cst_114 = arith.constant 4.471500e-02 : f32
    %383 = vector.broadcast %cst_114 : f32 to vector<32x64xf32>
    %384 = arith.mulf %383, %380 : vector<32x64xf32>
    %385 = arith.mulf %384, %380 : vector<32x64xf32>
    %386 = arith.mulf %385, %380 : vector<32x64xf32>
    %387 = arith.addf %380, %386 : vector<32x64xf32>
    %cst_115 = arith.constant 0.797884583 : f32
    %388 = vector.broadcast %cst_115 : f32 to vector<32x64xf32>
    %389 = arith.mulf %388, %387 : vector<32x64xf32>
    %390 = math.tanh %389 : vector<32x64xf32>
    %cst_116 = arith.constant 1.000000e+00 : f32
    %391 = vector.broadcast %cst_116 : f32 to vector<32x64xf32>
    %392 = arith.addf %391, %390 : vector<32x64xf32>
    %393 = arith.mulf %382, %392 : vector<32x64xf32>
    %c840 = arith.constant 840 : index
    %c0_117 = arith.constant 0 : index
    %394 = vector.load %arg2[%c840, %c0_117] : memref<1584x128xf32, #tpu.memory_space<vmem>>, vector<64x32xf32>
    %cst_118 = arith.constant dense<0.000000e+00> : vector<32x32xf32>
    %395 = tpu.matmul %393, %394, %cst_118 {dimension_numbers = #tpu.dot_dimension_numbers<[1], [0], [0], [1], [0, 0, 1, 1], [], []>} : vector<32x64xf32>, vector<64x32xf32>, vector<32x32xf32> -> vector<32x32xf32>
    %c904 = arith.constant 904 : index
    %c0_119 = arith.constant 0 : index
    %396 = vector.load %arg2[%c904, %c0_119] : memref<1584x128xf32, #tpu.memory_space<vmem>>, vector<1x32xf32>
    %397 = vector.broadcast %396 : vector<1x32xf32> to vector<32x32xf32>
    %398 = arith.addf %395, %397 : vector<32x32xf32>
    %399 = arith.addf %351, %398 : vector<32x32xf32>
    %c912 = arith.constant 912 : index
    %c0_120 = arith.constant 0 : index
    %400 = vector.load %arg2[%c912, %c0_120] : memref<1584x128xf32, #tpu.memory_space<vmem>>, vector<1x32xf32>
    %c920 = arith.constant 920 : index
    %c0_121 = arith.constant 0 : index
    %401 = vector.load %arg2[%c920, %c0_121] : memref<1584x128xf32, #tpu.memory_space<vmem>>, vector<1x32xf32>
    %cst_122 = arith.constant dense<0.000000e+00> : vector<32xf32>
    %402 = vector.multi_reduction <add>, %399, %cst_122 [1] : vector<32x32xf32> to vector<32xf32>
    %403 = vector.shape_cast %402 : vector<32xf32> to vector<32x1xf32>
    %cst_123 = arith.constant 3.200000e+01 : f32
    %404 = vector.broadcast %cst_123 : f32 to vector<32x1xf32>
    %405 = arith.divf %403, %404 : vector<32x1xf32>
    %406 = vector.broadcast %405 : vector<32x1xf32> to vector<32x32xf32>
    %407 = arith.subf %399, %406 : vector<32x32xf32>
    %408 = arith.mulf %407, %407 : vector<32x32xf32>
    %cst_124 = arith.constant dense<0.000000e+00> : vector<32xf32>
    %409 = vector.multi_reduction <add>, %408, %cst_124 [1] : vector<32x32xf32> to vector<32xf32>
    %410 = vector.shape_cast %409 : vector<32xf32> to vector<32x1xf32>
    %cst_125 = arith.constant 3.200000e+01 : f32
    %411 = vector.broadcast %cst_125 : f32 to vector<32x1xf32>
    %412 = arith.divf %410, %411 : vector<32x1xf32>
    %413 = vector.broadcast %405 : vector<32x1xf32> to vector<32x32xf32>
    %414 = arith.subf %399, %413 : vector<32x32xf32>
    %cst_126 = arith.constant 9.99999974E-6 : f32
    %415 = vector.broadcast %cst_126 : f32 to vector<32x1xf32>
    %416 = arith.addf %412, %415 : vector<32x1xf32>
    %417 = math.rsqrt %416 : vector<32x1xf32>
    %418 = vector.broadcast %417 : vector<32x1xf32> to vector<32x32xf32>
    %419 = arith.mulf %414, %418 : vector<32x32xf32>
    %420 = vector.broadcast %400 : vector<1x32xf32> to vector<32x32xf32>
    %421 = arith.mulf %419, %420 : vector<32x32xf32>
    %422 = vector.broadcast %401 : vector<1x32xf32> to vector<32x32xf32>
    %423 = arith.addf %421, %422 : vector<32x32xf32>
    %c928 = arith.constant 928 : index
    %c0_127 = arith.constant 0 : index
    %424 = vector.load %arg2[%c928, %c0_127] : memref<1584x128xf32, #tpu.memory_space<vmem>>, vector<64x32xf32>
    %cst_128 = arith.constant dense<0.000000e+00> : vector<64x32xf32>
    %425 = tpu.matmul %424, %423, %cst_128 {dimension_numbers = #tpu.dot_dimension_numbers<[1], [1], [0], [0], [0, 0, 1, 0], [], []>} : vector<64x32xf32>, vector<32x32xf32>, vector<64x32xf32> -> vector<64x32xf32>
    %c992 = arith.constant 992 : index
    %c0_129 = arith.constant 0 : index
    %426 = vector.load %arg2[%c992, %c0_129] : memref<1584x128xf32, #tpu.memory_space<vmem>>, vector<32x32xf32>
    %cst_130 = arith.constant dense<0.000000e+00> : vector<32x32xf32>
    %427 = tpu.matmul %423, %426, %cst_130 {dimension_numbers = #tpu.dot_dimension_numbers<[1], [0], [0], [1], [0, 0, 1, 1], [], []>} : vector<32x32xf32>, vector<32x32xf32>, vector<32x32xf32> -> vector<32x32xf32>
    %c1024 = arith.constant 1024 : index
    %c0_131 = arith.constant 0 : index
    %428 = vector.load %arg2[%c1024, %c0_131] : memref<1584x128xf32, #tpu.memory_space<vmem>>, vector<64x1xf32>
    %429 = vector.extract_strided_slice %425 {offsets = [0, 0], sizes = [64, 16], strides = [1, 1]} : vector<64x32xf32> to vector<64x16xf32>
    %430 = arith.mulf %429, %429 : vector<64x16xf32>
    %cst_132 = arith.constant dense<0.000000e+00> : vector<64xf32>
    %431 = vector.multi_reduction <add>, %430, %cst_132 [1] : vector<64x16xf32> to vector<64xf32>
    %432 = vector.shape_cast %431 : vector<64xf32> to vector<64x1xf32>
    %cst_133 = arith.constant 1.000000e-24 : f32
    %433 = vector.broadcast %cst_133 : f32 to vector<64x1xf32>
    %434 = arith.maximumf %432, %433 : vector<64x1xf32>
    %435 = math.rsqrt %434 : vector<64x1xf32>
    %436 = arith.mulf %435, %428 : vector<64x1xf32>
    %437 = vector.broadcast %436 : vector<64x1xf32> to vector<64x16xf32>
    %438 = arith.mulf %429, %437 : vector<64x16xf32>
    %439 = vector.extract_strided_slice %427 {offsets = [0, 0], sizes = [16, 32], strides = [1, 1]} : vector<32x32xf32> to vector<16x32xf32>
    %440 = vector.extract_strided_slice %438 {offsets = [0, 0], sizes = [16, 16], strides = [1, 1]} : vector<64x16xf32> to vector<16x16xf32>
    %441 = vector.extract_strided_slice %438 {offsets = [32, 0], sizes = [16, 16], strides = [1, 1]} : vector<64x16xf32> to vector<16x16xf32>
    %cst_134 = arith.constant dense<0.000000e+00> : vector<16x16xf32>
    %442 = tpu.matmul %440, %441, %cst_134 {dimension_numbers = #tpu.dot_dimension_numbers<[1], [1], [0], [0], [0, 0, 1, 0], [], []>} : vector<16x16xf32>, vector<16x16xf32>, vector<16x16xf32> -> vector<16x16xf32>
    %cst_135 = arith.constant dense<0xFF800000> : vector<16xf32>
    %443 = vector.multi_reduction <maximumf>, %442, %cst_135 [1] : vector<16x16xf32> to vector<16xf32>
    %444 = vector.shape_cast %443 : vector<16xf32> to vector<16x1xf32>
    %445 = vector.broadcast %444 : vector<16x1xf32> to vector<16x16xf32>
    %446 = arith.subf %442, %445 : vector<16x16xf32>
    %447 = math.exp %446 : vector<16x16xf32>
    %cst_136 = arith.constant dense<0.000000e+00> : vector<16xf32>
    %448 = vector.multi_reduction <add>, %447, %cst_136 [1] : vector<16x16xf32> to vector<16xf32>
    %449 = vector.shape_cast %448 : vector<16xf32> to vector<16x1xf32>
    %450 = tpu.reciprocal %449 {approx = true} : vector<16x1xf32> -> vector<16x1xf32>
    %451 = vector.broadcast %450 : vector<16x1xf32> to vector<16x16xf32>
    %452 = arith.mulf %447, %451 : vector<16x16xf32>
    %453 = vector.extract_strided_slice %439 {offsets = [0, 0], sizes = [16, 16], strides = [1, 1]} : vector<16x32xf32> to vector<16x16xf32>
    %cst_137 = arith.constant dense<0.000000e+00> : vector<16x16xf32>
    %454 = tpu.matmul %453, %452, %cst_137 {dimension_numbers = #tpu.dot_dimension_numbers<[1], [1], [0], [0], [0, 0, 1, 0], [], []>} : vector<16x16xf32>, vector<16x16xf32>, vector<16x16xf32> -> vector<16x16xf32>
    %c0_138 = arith.constant 0 : index
    %c0_139 = arith.constant 0 : index
    %455 = vector.load %arg4[%c0_138, %c0_139] : memref<32x32xf32, #tpu.memory_space<vmem>>, vector<16x16xf32>
    tpu.vector_store %arg4[%c0_138, %c0_139], %454 {strides = array<i32>} : memref<32x32xf32, #tpu.memory_space<vmem>>, vector<16x16xf32>,
    %456 = vector.extract_strided_slice %438 {offsets = [16, 0], sizes = [16, 16], strides = [1, 1]} : vector<64x16xf32> to vector<16x16xf32>
    %457 = vector.extract_strided_slice %438 {offsets = [48, 0], sizes = [16, 16], strides = [1, 1]} : vector<64x16xf32> to vector<16x16xf32>
    %cst_140 = arith.constant dense<0.000000e+00> : vector<16x16xf32>
    %458 = tpu.matmul %456, %457, %cst_140 {dimension_numbers = #tpu.dot_dimension_numbers<[1], [1], [0], [0], [0, 0, 1, 0], [], []>} : vector<16x16xf32>, vector<16x16xf32>, vector<16x16xf32> -> vector<16x16xf32>
    %cst_141 = arith.constant dense<0xFF800000> : vector<16xf32>
    %459 = vector.multi_reduction <maximumf>, %458, %cst_141 [1] : vector<16x16xf32> to vector<16xf32>
    %460 = vector.shape_cast %459 : vector<16xf32> to vector<16x1xf32>
    %461 = vector.broadcast %460 : vector<16x1xf32> to vector<16x16xf32>
    %462 = arith.subf %458, %461 : vector<16x16xf32>
    %463 = math.exp %462 : vector<16x16xf32>
    %cst_142 = arith.constant dense<0.000000e+00> : vector<16xf32>
    %464 = vector.multi_reduction <add>, %463, %cst_142 [1] : vector<16x16xf32> to vector<16xf32>
    %465 = vector.shape_cast %464 : vector<16xf32> to vector<16x1xf32>
    %466 = tpu.reciprocal %465 {approx = true} : vector<16x1xf32> -> vector<16x1xf32>
    %467 = vector.broadcast %466 : vector<16x1xf32> to vector<16x16xf32>
    %468 = arith.mulf %463, %467 : vector<16x16xf32>
    %469 = vector.extract_strided_slice %439 {offsets = [0, 16], sizes = [16, 16], strides = [1, 1]} : vector<16x32xf32> to vector<16x16xf32>
    %cst_143 = arith.constant dense<0.000000e+00> : vector<16x16xf32>
    %470 = tpu.matmul %469, %468, %cst_143 {dimension_numbers = #tpu.dot_dimension_numbers<[1], [1], [0], [0], [0, 0, 1, 0], [], []>} : vector<16x16xf32>, vector<16x16xf32>, vector<16x16xf32> -> vector<16x16xf32>
    %c0_144 = arith.constant 0 : index
    %c16_145 = arith.constant 16 : index
    %471 = vector.load %arg4[%c0_144, %c16_145] : memref<32x32xf32, #tpu.memory_space<vmem>>, vector<16x16xf32>
    tpu.vector_store %arg4[%c0_144, %c16_145], %470 {strides = array<i32>} : memref<32x32xf32, #tpu.memory_space<vmem>>, vector<16x16xf32>,
    %472 = vector.extract_strided_slice %425 {offsets = [0, 16], sizes = [64, 16], strides = [1, 1]} : vector<64x32xf32> to vector<64x16xf32>
    %473 = arith.mulf %472, %472 : vector<64x16xf32>
    %cst_146 = arith.constant dense<0.000000e+00> : vector<64xf32>
    %474 = vector.multi_reduction <add>, %473, %cst_146 [1] : vector<64x16xf32> to vector<64xf32>
    %475 = vector.shape_cast %474 : vector<64xf32> to vector<64x1xf32>
    %cst_147 = arith.constant 1.000000e-24 : f32
    %476 = vector.broadcast %cst_147 : f32 to vector<64x1xf32>
    %477 = arith.maximumf %475, %476 : vector<64x1xf32>
    %478 = math.rsqrt %477 : vector<64x1xf32>
    %479 = arith.mulf %478, %428 : vector<64x1xf32>
    %480 = vector.broadcast %479 : vector<64x1xf32> to vector<64x16xf32>
    %481 = arith.mulf %472, %480 : vector<64x16xf32>
    %482 = vector.extract_strided_slice %427 {offsets = [16, 0], sizes = [16, 32], strides = [1, 1]} : vector<32x32xf32> to vector<16x32xf32>
    %483 = vector.extract_strided_slice %481 {offsets = [0, 0], sizes = [16, 16], strides = [1, 1]} : vector<64x16xf32> to vector<16x16xf32>
    %484 = vector.extract_strided_slice %481 {offsets = [32, 0], sizes = [16, 16], strides = [1, 1]} : vector<64x16xf32> to vector<16x16xf32>
    %cst_148 = arith.constant dense<0.000000e+00> : vector<16x16xf32>
    %485 = tpu.matmul %483, %484, %cst_148 {dimension_numbers = #tpu.dot_dimension_numbers<[1], [1], [0], [0], [0, 0, 1, 0], [], []>} : vector<16x16xf32>, vector<16x16xf32>, vector<16x16xf32> -> vector<16x16xf32>
    %cst_149 = arith.constant dense<0xFF800000> : vector<16xf32>
    %486 = vector.multi_reduction <maximumf>, %485, %cst_149 [1] : vector<16x16xf32> to vector<16xf32>
    %487 = vector.shape_cast %486 : vector<16xf32> to vector<16x1xf32>
    %488 = vector.broadcast %487 : vector<16x1xf32> to vector<16x16xf32>
    %489 = arith.subf %485, %488 : vector<16x16xf32>
    %490 = math.exp %489 : vector<16x16xf32>
    %cst_150 = arith.constant dense<0.000000e+00> : vector<16xf32>
    %491 = vector.multi_reduction <add>, %490, %cst_150 [1] : vector<16x16xf32> to vector<16xf32>
    %492 = vector.shape_cast %491 : vector<16xf32> to vector<16x1xf32>
    %493 = tpu.reciprocal %492 {approx = true} : vector<16x1xf32> -> vector<16x1xf32>
    %494 = vector.broadcast %493 : vector<16x1xf32> to vector<16x16xf32>
    %495 = arith.mulf %490, %494 : vector<16x16xf32>
    %496 = vector.extract_strided_slice %482 {offsets = [0, 0], sizes = [16, 16], strides = [1, 1]} : vector<16x32xf32> to vector<16x16xf32>
    %cst_151 = arith.constant dense<0.000000e+00> : vector<16x16xf32>
    %497 = tpu.matmul %496, %495, %cst_151 {dimension_numbers = #tpu.dot_dimension_numbers<[1], [1], [0], [0], [0, 0, 1, 0], [], []>} : vector<16x16xf32>, vector<16x16xf32>, vector<16x16xf32> -> vector<16x16xf32>
    %c16_152 = arith.constant 16 : index
    %c0_153 = arith.constant 0 : index
    %498 = vector.load %arg4[%c16_152, %c0_153] : memref<32x32xf32, #tpu.memory_space<vmem>>, vector<16x16xf32>
    tpu.vector_store %arg4[%c16_152, %c0_153], %497 {strides = array<i32>} : memref<32x32xf32, #tpu.memory_space<vmem>>, vector<16x16xf32>,
    %499 = vector.extract_strided_slice %481 {offsets = [16, 0], sizes = [16, 16], strides = [1, 1]} : vector<64x16xf32> to vector<16x16xf32>
    %500 = vector.extract_strided_slice %481 {offsets = [48, 0], sizes = [16, 16], strides = [1, 1]} : vector<64x16xf32> to vector<16x16xf32>
    %cst_154 = arith.constant dense<0.000000e+00> : vector<16x16xf32>
    %501 = tpu.matmul %499, %500, %cst_154 {dimension_numbers = #tpu.dot_dimension_numbers<[1], [1], [0], [0], [0, 0, 1, 0], [], []>} : vector<16x16xf32>, vector<16x16xf32>, vector<16x16xf32> -> vector<16x16xf32>
    %cst_155 = arith.constant dense<0xFF800000> : vector<16xf32>
    %502 = vector.multi_reduction <maximumf>, %501, %cst_155 [1] : vector<16x16xf32> to vector<16xf32>
    %503 = vector.shape_cast %502 : vector<16xf32> to vector<16x1xf32>
    %504 = vector.broadcast %503 : vector<16x1xf32> to vector<16x16xf32>
    %505 = arith.subf %501, %504 : vector<16x16xf32>
    %506 = math.exp %505 : vector<16x16xf32>
    %cst_156 = arith.constant dense<0.000000e+00> : vector<16xf32>
    %507 = vector.multi_reduction <add>, %506, %cst_156 [1] : vector<16x16xf32> to vector<16xf32>
    %508 = vector.shape_cast %507 : vector<16xf32> to vector<16x1xf32>
    %509 = tpu.reciprocal %508 {approx = true} : vector<16x1xf32> -> vector<16x1xf32>
    %510 = vector.broadcast %509 : vector<16x1xf32> to vector<16x16xf32>
    %511 = arith.mulf %506, %510 : vector<16x16xf32>
    %512 = vector.extract_strided_slice %482 {offsets = [0, 16], sizes = [16, 16], strides = [1, 1]} : vector<16x32xf32> to vector<16x16xf32>
    %cst_157 = arith.constant dense<0.000000e+00> : vector<16x16xf32>
    %513 = tpu.matmul %512, %511, %cst_157 {dimension_numbers = #tpu.dot_dimension_numbers<[1], [1], [0], [0], [0, 0, 1, 0], [], []>} : vector<16x16xf32>, vector<16x16xf32>, vector<16x16xf32> -> vector<16x16xf32>
    %c16_158 = arith.constant 16 : index
    %c16_159 = arith.constant 16 : index
    %514 = vector.load %arg4[%c16_158, %c16_159] : memref<32x32xf32, #tpu.memory_space<vmem>>, vector<16x16xf32>
    tpu.vector_store %arg4[%c16_158, %c16_159], %513 {strides = array<i32>} : memref<32x32xf32, #tpu.memory_space<vmem>>, vector<16x16xf32>,
    %c0_160 = arith.constant 0 : index
    %c0_161 = arith.constant 0 : index
    %515 = vector.load %arg4[%c0_160, %c0_161] : memref<32x32xf32, #tpu.memory_space<vmem>>, vector<32x32xf32>
    %c1088 = arith.constant 1088 : index
    %c0_162 = arith.constant 0 : index
    %516 = vector.load %arg2[%c1088, %c0_162] : memref<1584x128xf32, #tpu.memory_space<vmem>>, vector<32x32xf32>
    %cst_163 = arith.constant dense<0.000000e+00> : vector<32x32xf32>
    %517 = tpu.matmul %515, %516, %cst_163 {dimension_numbers = #tpu.dot_dimension_numbers<[1], [0], [0], [1], [0, 0, 1, 1], [], []>} : vector<32x32xf32>, vector<32x32xf32>, vector<32x32xf32> -> vector<32x32xf32>
    %518 = arith.addf %399, %517 : vector<32x32xf32>
    %c1120 = arith.constant 1120 : index
    %c0_164 = arith.constant 0 : index
    %519 = vector.load %arg2[%c1120, %c0_164] : memref<1584x128xf32, #tpu.memory_space<vmem>>, vector<1x32xf32>
    %520 = vector.broadcast %519 : vector<1x32xf32> to vector<32x32xf32>
    %521 = arith.addf %518, %520 : vector<32x32xf32>
    %c1128 = arith.constant 1128 : index
    %c0_165 = arith.constant 0 : index
    %522 = vector.load %arg2[%c1128, %c0_165] : memref<1584x128xf32, #tpu.memory_space<vmem>>, vector<1x32xf32>
    %c1136 = arith.constant 1136 : index
    %c0_166 = arith.constant 0 : index
    %523 = vector.load %arg2[%c1136, %c0_166] : memref<1584x128xf32, #tpu.memory_space<vmem>>, vector<1x32xf32>
    %cst_167 = arith.constant dense<0.000000e+00> : vector<32xf32>
    %524 = vector.multi_reduction <add>, %521, %cst_167 [1] : vector<32x32xf32> to vector<32xf32>
    %525 = vector.shape_cast %524 : vector<32xf32> to vector<32x1xf32>
    %cst_168 = arith.constant 3.200000e+01 : f32
    %526 = vector.broadcast %cst_168 : f32 to vector<32x1xf32>
    %527 = arith.divf %525, %526 : vector<32x1xf32>
    %528 = vector.broadcast %527 : vector<32x1xf32> to vector<32x32xf32>
    %529 = arith.subf %521, %528 : vector<32x32xf32>
    %530 = arith.mulf %529, %529 : vector<32x32xf32>
    %cst_169 = arith.constant dense<0.000000e+00> : vector<32xf32>
    %531 = vector.multi_reduction <add>, %530, %cst_169 [1] : vector<32x32xf32> to vector<32xf32>
    %532 = vector.shape_cast %531 : vector<32xf32> to vector<32x1xf32>
    %cst_170 = arith.constant 3.200000e+01 : f32
    %533 = vector.broadcast %cst_170 : f32 to vector<32x1xf32>
    %534 = arith.divf %532, %533 : vector<32x1xf32>
    %535 = vector.broadcast %527 : vector<32x1xf32> to vector<32x32xf32>
    %536 = arith.subf %521, %535 : vector<32x32xf32>
    %cst_171 = arith.constant 9.99999974E-6 : f32
    %537 = vector.broadcast %cst_171 : f32 to vector<32x1xf32>
    %538 = arith.addf %534, %537 : vector<32x1xf32>
    %539 = math.rsqrt %538 : vector<32x1xf32>
    %540 = vector.broadcast %539 : vector<32x1xf32> to vector<32x32xf32>
    %541 = arith.mulf %536, %540 : vector<32x32xf32>
    %542 = vector.broadcast %522 : vector<1x32xf32> to vector<32x32xf32>
    %543 = arith.mulf %541, %542 : vector<32x32xf32>
    %544 = vector.broadcast %523 : vector<1x32xf32> to vector<32x32xf32>
    %545 = arith.addf %543, %544 : vector<32x32xf32>
    %c1144 = arith.constant 1144 : index
    %c0_172 = arith.constant 0 : index
    %546 = vector.load %arg2[%c1144, %c0_172] : memref<1584x128xf32, #tpu.memory_space<vmem>>, vector<9x32xf32>
    %c1160 = arith.constant 1160 : index
    %c0_173 = arith.constant 0 : index
    %547 = vector.load %arg2[%c1160, %c0_173] : memref<1584x128xf32, #tpu.memory_space<vmem>>, vector<1x32xf32>
    %cst_174 = arith.constant 0.000000e+00 : f32
    %548 = vector.broadcast %cst_174 : f32 to vector<32x32xf32>
    %c120_175 = arith.constant 120 : index
    %c0_176 = arith.constant 0 : index
    %549 = vector.load %arg2[%c120_175, %c0_176] : memref<1584x128xf32, #tpu.memory_space<vmem>>, vector<96x32xf32>
    %cst_177 = arith.constant dense<0.000000e+00> : vector<96x32xf32>
    %550 = tpu.matmul %549, %545, %cst_177 {dimension_numbers = #tpu.dot_dimension_numbers<[1], [0], [0], [1], [0, 0, 1, 1], [], []>} : vector<96x32xf32>, vector<32x32xf32>, vector<96x32xf32> -> vector<96x32xf32>
    %551 = vector.extract_strided_slice %550 {offsets = [0, 0], sizes = [32, 32], strides = [1, 1]} : vector<96x32xf32> to vector<32x32xf32>
    %552 = vector.extract_strided_slice %546 {offsets = [0, 0], sizes = [1, 32], strides = [1, 1]} : vector<9x32xf32> to vector<1x32xf32>
    %553 = vector.broadcast %552 : vector<1x32xf32> to vector<32x32xf32>
    %554 = arith.mulf %551, %553 : vector<32x32xf32>
    %555 = arith.addf %548, %554 : vector<32x32xf32>
    %556 = vector.extract_strided_slice %550 {offsets = [32, 0], sizes = [32, 32], strides = [1, 1]} : vector<96x32xf32> to vector<32x32xf32>
    %557 = vector.extract_strided_slice %546 {offsets = [1, 0], sizes = [1, 32], strides = [1, 1]} : vector<9x32xf32> to vector<1x32xf32>
    %558 = vector.broadcast %557 : vector<1x32xf32> to vector<32x32xf32>
    %559 = arith.mulf %556, %558 : vector<32x32xf32>
    %560 = arith.addf %555, %559 : vector<32x32xf32>
    %561 = vector.extract_strided_slice %550 {offsets = [64, 0], sizes = [32, 32], strides = [1, 1]} : vector<96x32xf32> to vector<32x32xf32>
    %562 = vector.extract_strided_slice %546 {offsets = [2, 0], sizes = [1, 32], strides = [1, 1]} : vector<9x32xf32> to vector<1x32xf32>
    %563 = vector.broadcast %562 : vector<1x32xf32> to vector<32x32xf32>
    %564 = arith.mulf %561, %563 : vector<32x32xf32>
    %565 = arith.addf %560, %564 : vector<32x32xf32>
    %c216_178 = arith.constant 216 : index
    %c0_179 = arith.constant 0 : index
    %566 = vector.load %arg2[%c216_178, %c0_179] : memref<1584x128xf32, #tpu.memory_space<vmem>>, vector<96x32xf32>
    %cst_180 = arith.constant dense<0.000000e+00> : vector<96x32xf32>
    %567 = tpu.matmul %566, %545, %cst_180 {dimension_numbers = #tpu.dot_dimension_numbers<[1], [0], [0], [1], [0, 0, 1, 1], [], []>} : vector<96x32xf32>, vector<32x32xf32>, vector<96x32xf32> -> vector<96x32xf32>
    %568 = vector.extract_strided_slice %567 {offsets = [0, 0], sizes = [32, 32], strides = [1, 1]} : vector<96x32xf32> to vector<32x32xf32>
    %569 = vector.extract_strided_slice %546 {offsets = [3, 0], sizes = [1, 32], strides = [1, 1]} : vector<9x32xf32> to vector<1x32xf32>
    %570 = vector.broadcast %569 : vector<1x32xf32> to vector<32x32xf32>
    %571 = arith.mulf %568, %570 : vector<32x32xf32>
    %572 = arith.addf %565, %571 : vector<32x32xf32>
    %573 = vector.extract_strided_slice %567 {offsets = [32, 0], sizes = [32, 32], strides = [1, 1]} : vector<96x32xf32> to vector<32x32xf32>
    %574 = vector.extract_strided_slice %546 {offsets = [4, 0], sizes = [1, 32], strides = [1, 1]} : vector<9x32xf32> to vector<1x32xf32>
    %575 = vector.broadcast %574 : vector<1x32xf32> to vector<32x32xf32>
    %576 = arith.mulf %573, %575 : vector<32x32xf32>
    %577 = arith.addf %572, %576 : vector<32x32xf32>
    %578 = vector.extract_strided_slice %567 {offsets = [64, 0], sizes = [32, 32], strides = [1, 1]} : vector<96x32xf32> to vector<32x32xf32>
    %579 = vector.extract_strided_slice %546 {offsets = [5, 0], sizes = [1, 32], strides = [1, 1]} : vector<9x32xf32> to vector<1x32xf32>
    %580 = vector.broadcast %579 : vector<1x32xf32> to vector<32x32xf32>
    %581 = arith.mulf %578, %580 : vector<32x32xf32>
    %582 = arith.addf %577, %581 : vector<32x32xf32>
    %c312_181 = arith.constant 312 : index
    %c0_182 = arith.constant 0 : index
    %583 = vector.load %arg2[%c312_181, %c0_182] : memref<1584x128xf32, #tpu.memory_space<vmem>>, vector<96x32xf32>
    %cst_183 = arith.constant dense<0.000000e+00> : vector<96x32xf32>
    %584 = tpu.matmul %583, %545, %cst_183 {dimension_numbers = #tpu.dot_dimension_numbers<[1], [0], [0], [1], [0, 0, 1, 1], [], []>} : vector<96x32xf32>, vector<32x32xf32>, vector<96x32xf32> -> vector<96x32xf32>
    %585 = vector.extract_strided_slice %584 {offsets = [0, 0], sizes = [32, 32], strides = [1, 1]} : vector<96x32xf32> to vector<32x32xf32>
    %586 = vector.extract_strided_slice %546 {offsets = [6, 0], sizes = [1, 32], strides = [1, 1]} : vector<9x32xf32> to vector<1x32xf32>
    %587 = vector.broadcast %586 : vector<1x32xf32> to vector<32x32xf32>
    %588 = arith.mulf %585, %587 : vector<32x32xf32>
    %589 = arith.addf %582, %588 : vector<32x32xf32>
    %590 = vector.extract_strided_slice %584 {offsets = [32, 0], sizes = [32, 32], strides = [1, 1]} : vector<96x32xf32> to vector<32x32xf32>
    %591 = vector.extract_strided_slice %546 {offsets = [7, 0], sizes = [1, 32], strides = [1, 1]} : vector<9x32xf32> to vector<1x32xf32>
    %592 = vector.broadcast %591 : vector<1x32xf32> to vector<32x32xf32>
    %593 = arith.mulf %590, %592 : vector<32x32xf32>
    %594 = arith.addf %589, %593 : vector<32x32xf32>
    %595 = vector.extract_strided_slice %584 {offsets = [64, 0], sizes = [32, 32], strides = [1, 1]} : vector<96x32xf32> to vector<32x32xf32>
    %596 = vector.extract_strided_slice %546 {offsets = [8, 0], sizes = [1, 32], strides = [1, 1]} : vector<9x32xf32> to vector<1x32xf32>
    %597 = vector.broadcast %596 : vector<1x32xf32> to vector<32x32xf32>
    %598 = arith.mulf %595, %597 : vector<32x32xf32>
    %599 = arith.addf %594, %598 : vector<32x32xf32>
    %600 = vector.broadcast %547 : vector<1x32xf32> to vector<32x32xf32>
    %601 = arith.addf %599, %600 : vector<32x32xf32>
    %cst_184 = arith.constant dense<0.000000e+00> : vector<32xf32>
    %602 = vector.multi_reduction <add>, %601, %cst_184 [0] : vector<32x32xf32> to vector<32xf32>
    %603 = vector.shape_cast %602 : vector<32xf32> to vector<1x32xf32>
    %cst_185 = arith.constant 3.200000e+01 : f32
    %604 = vector.broadcast %cst_185 : f32 to vector<1x32xf32>
    %605 = arith.divf %603, %604 : vector<1x32xf32>
    %606 = vector.broadcast %605 : vector<1x32xf32> to vector<32x32xf32>
    %607 = arith.subf %601, %606 : vector<32x32xf32>
    %608 = arith.mulf %607, %607 : vector<32x32xf32>
    %cst_186 = arith.constant dense<0.000000e+00> : vector<32xf32>
    %609 = vector.multi_reduction <add>, %608, %cst_186 [0] : vector<32x32xf32> to vector<32xf32>
    %610 = vector.shape_cast %609 : vector<32xf32> to vector<1x32xf32>
    %cst_187 = arith.constant 3.200000e+01 : f32
    %611 = vector.broadcast %cst_187 : f32 to vector<1x32xf32>
    %612 = arith.divf %610, %611 : vector<1x32xf32>
    %613 = vector.broadcast %605 : vector<1x32xf32> to vector<32x32xf32>
    %614 = arith.subf %601, %613 : vector<32x32xf32>
    %cst_188 = arith.constant 9.99999974E-6 : f32
    %615 = vector.broadcast %cst_188 : f32 to vector<1x32xf32>
    %616 = arith.addf %612, %615 : vector<1x32xf32>
    %617 = math.rsqrt %616 : vector<1x32xf32>
    %618 = vector.broadcast %617 : vector<1x32xf32> to vector<32x32xf32>
    %619 = arith.mulf %614, %618 : vector<32x32xf32>
    %c1168 = arith.constant 1168 : index
    %c0_189 = arith.constant 0 : index
    %620 = vector.load %arg2[%c1168, %c0_189] : memref<1584x128xf32, #tpu.memory_space<vmem>>, vector<1x32xf32>
    %621 = vector.broadcast %620 : vector<1x32xf32> to vector<32x32xf32>
    %622 = arith.mulf %619, %621 : vector<32x32xf32>
    %c1176 = arith.constant 1176 : index
    %c0_190 = arith.constant 0 : index
    %623 = vector.load %arg2[%c1176, %c0_190] : memref<1584x128xf32, #tpu.memory_space<vmem>>, vector<1x32xf32>
    %624 = vector.broadcast %623 : vector<1x32xf32> to vector<32x32xf32>
    %625 = arith.addf %622, %624 : vector<32x32xf32>
    %cst_191 = arith.constant 5.000000e-01 : f32
    %626 = vector.broadcast %cst_191 : f32 to vector<32x32xf32>
    %627 = arith.mulf %626, %625 : vector<32x32xf32>
    %cst_192 = arith.constant 4.471500e-02 : f32
    %628 = vector.broadcast %cst_192 : f32 to vector<32x32xf32>
    %629 = arith.mulf %628, %625 : vector<32x32xf32>
    %630 = arith.mulf %629, %625 : vector<32x32xf32>
    %631 = arith.mulf %630, %625 : vector<32x32xf32>
    %632 = arith.addf %625, %631 : vector<32x32xf32>
    %cst_193 = arith.constant 0.797884583 : f32
    %633 = vector.broadcast %cst_193 : f32 to vector<32x32xf32>
    %634 = arith.mulf %633, %632 : vector<32x32xf32>
    %635 = math.tanh %634 : vector<32x32xf32>
    %cst_194 = arith.constant 1.000000e+00 : f32
    %636 = vector.broadcast %cst_194 : f32 to vector<32x32xf32>
    %637 = arith.addf %636, %635 : vector<32x32xf32>
    %638 = arith.mulf %627, %637 : vector<32x32xf32>
    %c1184 = arith.constant 1184 : index
    %c0_195 = arith.constant 0 : index
    %639 = vector.load %arg2[%c1184, %c0_195] : memref<1584x128xf32, #tpu.memory_space<vmem>>, vector<9x32xf32>
    %c1200 = arith.constant 1200 : index
    %c0_196 = arith.constant 0 : index
    %640 = vector.load %arg2[%c1200, %c0_196] : memref<1584x128xf32, #tpu.memory_space<vmem>>, vector<1x32xf32>
    %cst_197 = arith.constant 0.000000e+00 : f32
    %641 = vector.broadcast %cst_197 : f32 to vector<32x32xf32>
    %c120_198 = arith.constant 120 : index
    %c0_199 = arith.constant 0 : index
    %642 = vector.load %arg2[%c120_198, %c0_199] : memref<1584x128xf32, #tpu.memory_space<vmem>>, vector<96x32xf32>
    %cst_200 = arith.constant dense<0.000000e+00> : vector<96x32xf32>
    %643 = tpu.matmul %642, %638, %cst_200 {dimension_numbers = #tpu.dot_dimension_numbers<[1], [0], [0], [1], [0, 0, 1, 1], [], []>} : vector<96x32xf32>, vector<32x32xf32>, vector<96x32xf32> -> vector<96x32xf32>
    %644 = vector.extract_strided_slice %643 {offsets = [0, 0], sizes = [32, 32], strides = [1, 1]} : vector<96x32xf32> to vector<32x32xf32>
    %645 = vector.extract_strided_slice %639 {offsets = [0, 0], sizes = [1, 32], strides = [1, 1]} : vector<9x32xf32> to vector<1x32xf32>
    %646 = vector.broadcast %645 : vector<1x32xf32> to vector<32x32xf32>
    %647 = arith.mulf %644, %646 : vector<32x32xf32>
    %648 = arith.addf %641, %647 : vector<32x32xf32>
    %649 = vector.extract_strided_slice %643 {offsets = [32, 0], sizes = [32, 32], strides = [1, 1]} : vector<96x32xf32> to vector<32x32xf32>
    %650 = vector.extract_strided_slice %639 {offsets = [1, 0], sizes = [1, 32], strides = [1, 1]} : vector<9x32xf32> to vector<1x32xf32>
    %651 = vector.broadcast %650 : vector<1x32xf32> to vector<32x32xf32>
    %652 = arith.mulf %649, %651 : vector<32x32xf32>
    %653 = arith.addf %648, %652 : vector<32x32xf32>
    %654 = vector.extract_strided_slice %643 {offsets = [64, 0], sizes = [32, 32], strides = [1, 1]} : vector<96x32xf32> to vector<32x32xf32>
    %655 = vector.extract_strided_slice %639 {offsets = [2, 0], sizes = [1, 32], strides = [1, 1]} : vector<9x32xf32> to vector<1x32xf32>
    %656 = vector.broadcast %655 : vector<1x32xf32> to vector<32x32xf32>
    %657 = arith.mulf %654, %656 : vector<32x32xf32>
    %658 = arith.addf %653, %657 : vector<32x32xf32>
    %c216_201 = arith.constant 216 : index
    %c0_202 = arith.constant 0 : index
    %659 = vector.load %arg2[%c216_201, %c0_202] : memref<1584x128xf32, #tpu.memory_space<vmem>>, vector<96x32xf32>
    %cst_203 = arith.constant dense<0.000000e+00> : vector<96x32xf32>
    %660 = tpu.matmul %659, %638, %cst_203 {dimension_numbers = #tpu.dot_dimension_numbers<[1], [0], [0], [1], [0, 0, 1, 1], [], []>} : vector<96x32xf32>, vector<32x32xf32>, vector<96x32xf32> -> vector<96x32xf32>
    %661 = vector.extract_strided_slice %660 {offsets = [0, 0], sizes = [32, 32], strides = [1, 1]} : vector<96x32xf32> to vector<32x32xf32>
    %662 = vector.extract_strided_slice %639 {offsets = [3, 0], sizes = [1, 32], strides = [1, 1]} : vector<9x32xf32> to vector<1x32xf32>
    %663 = vector.broadcast %662 : vector<1x32xf32> to vector<32x32xf32>
    %664 = arith.mulf %661, %663 : vector<32x32xf32>
    %665 = arith.addf %658, %664 : vector<32x32xf32>
    %666 = vector.extract_strided_slice %660 {offsets = [32, 0], sizes = [32, 32], strides = [1, 1]} : vector<96x32xf32> to vector<32x32xf32>
    %667 = vector.extract_strided_slice %639 {offsets = [4, 0], sizes = [1, 32], strides = [1, 1]} : vector<9x32xf32> to vector<1x32xf32>
    %668 = vector.broadcast %667 : vector<1x32xf32> to vector<32x32xf32>
    %669 = arith.mulf %666, %668 : vector<32x32xf32>
    %670 = arith.addf %665, %669 : vector<32x32xf32>
    %671 = vector.extract_strided_slice %660 {offsets = [64, 0], sizes = [32, 32], strides = [1, 1]} : vector<96x32xf32> to vector<32x32xf32>
    %672 = vector.extract_strided_slice %639 {offsets = [5, 0], sizes = [1, 32], strides = [1, 1]} : vector<9x32xf32> to vector<1x32xf32>
    %673 = vector.broadcast %672 : vector<1x32xf32> to vector<32x32xf32>
    %674 = arith.mulf %671, %673 : vector<32x32xf32>
    %675 = arith.addf %670, %674 : vector<32x32xf32>
    %c312_204 = arith.constant 312 : index
    %c0_205 = arith.constant 0 : index
    %676 = vector.load %arg2[%c312_204, %c0_205] : memref<1584x128xf32, #tpu.memory_space<vmem>>, vector<96x32xf32>
    %cst_206 = arith.constant dense<0.000000e+00> : vector<96x32xf32>
    %677 = tpu.matmul %676, %638, %cst_206 {dimension_numbers = #tpu.dot_dimension_numbers<[1], [0], [0], [1], [0, 0, 1, 1], [], []>} : vector<96x32xf32>, vector<32x32xf32>, vector<96x32xf32> -> vector<96x32xf32>
    %678 = vector.extract_strided_slice %677 {offsets = [0, 0], sizes = [32, 32], strides = [1, 1]} : vector<96x32xf32> to vector<32x32xf32>
    %679 = vector.extract_strided_slice %639 {offsets = [6, 0], sizes = [1, 32], strides = [1, 1]} : vector<9x32xf32> to vector<1x32xf32>
    %680 = vector.broadcast %679 : vector<1x32xf32> to vector<32x32xf32>
    %681 = arith.mulf %678, %680 : vector<32x32xf32>
    %682 = arith.addf %675, %681 : vector<32x32xf32>
    %683 = vector.extract_strided_slice %677 {offsets = [32, 0], sizes = [32, 32], strides = [1, 1]} : vector<96x32xf32> to vector<32x32xf32>
    %684 = vector.extract_strided_slice %639 {offsets = [7, 0], sizes = [1, 32], strides = [1, 1]} : vector<9x32xf32> to vector<1x32xf32>
    %685 = vector.broadcast %684 : vector<1x32xf32> to vector<32x32xf32>
    %686 = arith.mulf %683, %685 : vector<32x32xf32>
    %687 = arith.addf %682, %686 : vector<32x32xf32>
    %688 = vector.extract_strided_slice %677 {offsets = [64, 0], sizes = [32, 32], strides = [1, 1]} : vector<96x32xf32> to vector<32x32xf32>
    %689 = vector.extract_strided_slice %639 {offsets = [8, 0], sizes = [1, 32], strides = [1, 1]} : vector<9x32xf32> to vector<1x32xf32>
    %690 = vector.broadcast %689 : vector<1x32xf32> to vector<32x32xf32>
    %691 = arith.mulf %688, %690 : vector<32x32xf32>
    %692 = arith.addf %687, %691 : vector<32x32xf32>
    %693 = vector.broadcast %640 : vector<1x32xf32> to vector<32x32xf32>
    %694 = arith.addf %692, %693 : vector<32x32xf32>
    %695 = arith.addf %521, %694 : vector<32x32xf32>
    %c1208 = arith.constant 1208 : index
    %c0_207 = arith.constant 0 : index
    %696 = vector.load %arg2[%c1208, %c0_207] : memref<1584x128xf32, #tpu.memory_space<vmem>>, vector<1x32xf32>
    %c1216 = arith.constant 1216 : index
    %c0_208 = arith.constant 0 : index
    %697 = vector.load %arg2[%c1216, %c0_208] : memref<1584x128xf32, #tpu.memory_space<vmem>>, vector<1x32xf32>
    %cst_209 = arith.constant dense<0.000000e+00> : vector<32xf32>
    %698 = vector.multi_reduction <add>, %695, %cst_209 [1] : vector<32x32xf32> to vector<32xf32>
    %699 = vector.shape_cast %698 : vector<32xf32> to vector<32x1xf32>
    %cst_210 = arith.constant 3.200000e+01 : f32
    %700 = vector.broadcast %cst_210 : f32 to vector<32x1xf32>
    %701 = arith.divf %699, %700 : vector<32x1xf32>
    %702 = vector.broadcast %701 : vector<32x1xf32> to vector<32x32xf32>
    %703 = arith.subf %695, %702 : vector<32x32xf32>
    %704 = arith.mulf %703, %703 : vector<32x32xf32>
    %cst_211 = arith.constant dense<0.000000e+00> : vector<32xf32>
    %705 = vector.multi_reduction <add>, %704, %cst_211 [1] : vector<32x32xf32> to vector<32xf32>
    %706 = vector.shape_cast %705 : vector<32xf32> to vector<32x1xf32>
    %cst_212 = arith.constant 3.200000e+01 : f32
    %707 = vector.broadcast %cst_212 : f32 to vector<32x1xf32>
    %708 = arith.divf %706, %707 : vector<32x1xf32>
    %709 = vector.broadcast %701 : vector<32x1xf32> to vector<32x32xf32>
    %710 = arith.subf %695, %709 : vector<32x32xf32>
    %cst_213 = arith.constant 9.99999974E-6 : f32
    %711 = vector.broadcast %cst_213 : f32 to vector<32x1xf32>
    %712 = arith.addf %708, %711 : vector<32x1xf32>
    %713 = math.rsqrt %712 : vector<32x1xf32>
    %714 = vector.broadcast %713 : vector<32x1xf32> to vector<32x32xf32>
    %715 = arith.mulf %710, %714 : vector<32x32xf32>
    %716 = vector.broadcast %696 : vector<1x32xf32> to vector<32x32xf32>
    %717 = arith.mulf %715, %716 : vector<32x32xf32>
    %718 = vector.broadcast %697 : vector<1x32xf32> to vector<32x32xf32>
    %719 = arith.addf %717, %718 : vector<32x32xf32>
    %c1224 = arith.constant 1224 : index
    %c0_214 = arith.constant 0 : index
    %720 = vector.load %arg2[%c1224, %c0_214] : memref<1584x128xf32, #tpu.memory_space<vmem>>, vector<32x64xf32>
    %cst_215 = arith.constant dense<0.000000e+00> : vector<32x64xf32>
    %721 = tpu.matmul %719, %720, %cst_215 {dimension_numbers = #tpu.dot_dimension_numbers<[1], [0], [0], [1], [0, 0, 1, 1], [], []>} : vector<32x32xf32>, vector<32x64xf32>, vector<32x64xf32> -> vector<32x64xf32>
    %c1256 = arith.constant 1256 : index
    %c0_216 = arith.constant 0 : index
    %722 = vector.load %arg2[%c1256, %c0_216] : memref<1584x128xf32, #tpu.memory_space<vmem>>, vector<1x64xf32>
    %723 = vector.broadcast %722 : vector<1x64xf32> to vector<32x64xf32>
    %724 = arith.addf %721, %723 : vector<32x64xf32>
    %cst_217 = arith.constant 5.000000e-01 : f32
    %725 = vector.broadcast %cst_217 : f32 to vector<32x64xf32>
    %726 = arith.mulf %725, %724 : vector<32x64xf32>
    %cst_218 = arith.constant 4.471500e-02 : f32
    %727 = vector.broadcast %cst_218 : f32 to vector<32x64xf32>
    %728 = arith.mulf %727, %724 : vector<32x64xf32>
    %729 = arith.mulf %728, %724 : vector<32x64xf32>
    %730 = arith.mulf %729, %724 : vector<32x64xf32>
    %731 = arith.addf %724, %730 : vector<32x64xf32>
    %cst_219 = arith.constant 0.797884583 : f32
    %732 = vector.broadcast %cst_219 : f32 to vector<32x64xf32>
    %733 = arith.mulf %732, %731 : vector<32x64xf32>
    %734 = math.tanh %733 : vector<32x64xf32>
    %cst_220 = arith.constant 1.000000e+00 : f32
    %735 = vector.broadcast %cst_220 : f32 to vector<32x64xf32>
    %736 = arith.addf %735, %734 : vector<32x64xf32>
    %737 = arith.mulf %726, %736 : vector<32x64xf32>
    %c1264 = arith.constant 1264 : index
    %c0_221 = arith.constant 0 : index
    %738 = vector.load %arg2[%c1264, %c0_221] : memref<1584x128xf32, #tpu.memory_space<vmem>>, vector<64x32xf32>
    %cst_222 = arith.constant dense<0.000000e+00> : vector<32x32xf32>
    %739 = tpu.matmul %737, %738, %cst_222 {dimension_numbers = #tpu.dot_dimension_numbers<[1], [0], [0], [1], [0, 0, 1, 1], [], []>} : vector<32x64xf32>, vector<64x32xf32>, vector<32x32xf32> -> vector<32x32xf32>
    %c1328 = arith.constant 1328 : index
    %c0_223 = arith.constant 0 : index
    %740 = vector.load %arg2[%c1328, %c0_223] : memref<1584x128xf32, #tpu.memory_space<vmem>>, vector<1x32xf32>
    %741 = vector.broadcast %740 : vector<1x32xf32> to vector<32x32xf32>
    %742 = arith.addf %739, %741 : vector<32x32xf32>
    %743 = arith.addf %695, %742 : vector<32x32xf32>
    %c408 = arith.constant 408 : index
    %c0_224 = arith.constant 0 : index
    %744 = vector.load %arg2[%c408, %c0_224] : memref<1584x128xf32, #tpu.memory_space<vmem>>, vector<1x32xf32>
    %c416 = arith.constant 416 : index
    %c0_225 = arith.constant 0 : index
    %745 = vector.load %arg2[%c416, %c0_225] : memref<1584x128xf32, #tpu.memory_space<vmem>>, vector<1x32xf32>
    %cst_226 = arith.constant dense<0.000000e+00> : vector<32xf32>
    %746 = vector.multi_reduction <add>, %743, %cst_226 [1] : vector<32x32xf32> to vector<32xf32>
    %747 = vector.shape_cast %746 : vector<32xf32> to vector<32x1xf32>
    %cst_227 = arith.constant 3.200000e+01 : f32
    %748 = vector.broadcast %cst_227 : f32 to vector<32x1xf32>
    %749 = arith.divf %747, %748 : vector<32x1xf32>
    %750 = vector.broadcast %749 : vector<32x1xf32> to vector<32x32xf32>
    %751 = arith.subf %743, %750 : vector<32x32xf32>
    %752 = arith.mulf %751, %751 : vector<32x32xf32>
    %cst_228 = arith.constant dense<0.000000e+00> : vector<32xf32>
    %753 = vector.multi_reduction <add>, %752, %cst_228 [1] : vector<32x32xf32> to vector<32xf32>
    %754 = vector.shape_cast %753 : vector<32xf32> to vector<32x1xf32>
    %cst_229 = arith.constant 3.200000e+01 : f32
    %755 = vector.broadcast %cst_229 : f32 to vector<32x1xf32>
    %756 = arith.divf %754, %755 : vector<32x1xf32>
    %757 = vector.broadcast %749 : vector<32x1xf32> to vector<32x32xf32>
    %758 = arith.subf %743, %757 : vector<32x32xf32>
    %cst_230 = arith.constant 9.99999974E-6 : f32
    %759 = vector.broadcast %cst_230 : f32 to vector<32x1xf32>
    %760 = arith.addf %756, %759 : vector<32x1xf32>
    %761 = math.rsqrt %760 : vector<32x1xf32>
    %762 = vector.broadcast %761 : vector<32x1xf32> to vector<32x32xf32>
    %763 = arith.mulf %758, %762 : vector<32x32xf32>
    %764 = vector.broadcast %744 : vector<1x32xf32> to vector<32x32xf32>
    %765 = arith.mulf %763, %764 : vector<32x32xf32>
    %766 = vector.broadcast %745 : vector<1x32xf32> to vector<32x32xf32>
    %767 = arith.addf %765, %766 : vector<32x32xf32>
    %c424 = arith.constant 424 : index
    %c0_231 = arith.constant 0 : index
    %768 = vector.load %arg2[%c424, %c0_231] : memref<1584x128xf32, #tpu.memory_space<vmem>>, vector<2x32xf32>
    %c1336 = arith.constant 1336 : index
    %c0_232 = arith.constant 0 : index
    %769 = vector.load %arg2[%c1336, %c0_232] : memref<1584x128xf32, #tpu.memory_space<vmem>>, vector<1x32xf32>
    %c1344 = arith.constant 1344 : index
    %c0_233 = arith.constant 0 : index
    %770 = vector.load %arg2[%c1344, %c0_233] : memref<1584x128xf32, #tpu.memory_space<vmem>>, vector<1x32xf32>
    %cst_234 = arith.constant dense<0.000000e+00> : vector<2xf32>
    %771 = vector.multi_reduction <add>, %768, %cst_234 [1] : vector<2x32xf32> to vector<2xf32>
    %772 = vector.shape_cast %771 : vector<2xf32> to vector<2x1xf32>
    %cst_235 = arith.constant 3.200000e+01 : f32
    %773 = vector.broadcast %cst_235 : f32 to vector<2x1xf32>
    %774 = arith.divf %772, %773 : vector<2x1xf32>
    %775 = vector.broadcast %774 : vector<2x1xf32> to vector<2x32xf32>
    %776 = arith.subf %768, %775 : vector<2x32xf32>
    %777 = arith.mulf %776, %776 : vector<2x32xf32>
    %cst_236 = arith.constant dense<0.000000e+00> : vector<2xf32>
    %778 = vector.multi_reduction <add>, %777, %cst_236 [1] : vector<2x32xf32> to vector<2xf32>
    %779 = vector.shape_cast %778 : vector<2xf32> to vector<2x1xf32>
    %cst_237 = arith.constant 3.200000e+01 : f32
    %780 = vector.broadcast %cst_237 : f32 to vector<2x1xf32>
    %781 = arith.divf %779, %780 : vector<2x1xf32>
    %782 = vector.broadcast %774 : vector<2x1xf32> to vector<2x32xf32>
    %783 = arith.subf %768, %782 : vector<2x32xf32>
    %cst_238 = arith.constant 9.99999974E-6 : f32
    %784 = vector.broadcast %cst_238 : f32 to vector<2x1xf32>
    %785 = arith.addf %781, %784 : vector<2x1xf32>
    %786 = math.rsqrt %785 : vector<2x1xf32>
    %787 = vector.broadcast %786 : vector<2x1xf32> to vector<2x32xf32>
    %788 = arith.mulf %783, %787 : vector<2x32xf32>
    %789 = vector.broadcast %769 : vector<1x32xf32> to vector<2x32xf32>
    %790 = arith.mulf %788, %789 : vector<2x32xf32>
    %791 = vector.broadcast %770 : vector<1x32xf32> to vector<2x32xf32>
    %792 = arith.addf %790, %791 : vector<2x32xf32>
    %c1352 = arith.constant 1352 : index
    %c0_239 = arith.constant 0 : index
    %793 = vector.load %arg2[%c1352, %c0_239] : memref<1584x128xf32, #tpu.memory_space<vmem>>, vector<32x32xf32>
    %cst_240 = arith.constant dense<0.000000e+00> : vector<2x32xf32>
    %794 = tpu.matmul %792, %793, %cst_240 {dimension_numbers = #tpu.dot_dimension_numbers<[1], [0], [0], [1], [0, 0, 1, 1], [], []>} : vector<2x32xf32>, vector<32x32xf32>, vector<2x32xf32> -> vector<2x32xf32>
    %cst_241 = arith.constant 2.500000e-01 : f32
    %795 = vector.broadcast %cst_241 : f32 to vector<2x32xf32>
    %796 = arith.mulf %794, %795 : vector<2x32xf32>
    %c1384 = arith.constant 1384 : index
    %c0_242 = arith.constant 0 : index
    %797 = vector.load %arg2[%c1384, %c0_242] : memref<1584x128xf32, #tpu.memory_space<vmem>>, vector<32x64xf32>
    %cst_243 = arith.constant dense<0.000000e+00> : vector<2x64xf32>
    %798 = tpu.matmul %792, %797, %cst_243 {dimension_numbers = #tpu.dot_dimension_numbers<[1], [0], [0], [1], [0, 0, 1, 1], [], []>} : vector<2x32xf32>, vector<32x64xf32>, vector<2x64xf32> -> vector<2x64xf32>
    %c1384_244 = arith.constant 1384 : index
    %c0_245 = arith.constant 0 : index
    %799 = vector.load %arg2[%c1384_244, %c0_245] : memref<1584x128xf32, #tpu.memory_space<vmem>>, vector<32x64xf32>
    %cst_246 = arith.constant dense<0.000000e+00> : vector<32x64xf32>
    %800 = tpu.matmul %767, %799, %cst_246 {dimension_numbers = #tpu.dot_dimension_numbers<[1], [0], [0], [1], [0, 0, 1, 1], [], []>} : vector<32x32xf32>, vector<32x64xf32>, vector<32x64xf32> -> vector<32x64xf32>
    %801 = vector.extract_strided_slice %796 {offsets = [0, 0], sizes = [1, 16], strides = [1, 1]} : vector<2x32xf32> to vector<1x16xf32>
    %802 = vector.extract_strided_slice %798 {offsets = [0, 0], sizes = [1, 16], strides = [1, 1]} : vector<2x64xf32> to vector<1x16xf32>
    %803 = vector.extract_strided_slice %798 {offsets = [0, 32], sizes = [1, 16], strides = [1, 1]} : vector<2x64xf32> to vector<1x16xf32>
    %804 = vector.extract_strided_slice %800 {offsets = [0, 0], sizes = [16, 16], strides = [1, 1]} : vector<32x64xf32> to vector<16x16xf32>
    %805 = vector.extract_strided_slice %800 {offsets = [0, 32], sizes = [16, 16], strides = [1, 1]} : vector<32x64xf32> to vector<16x16xf32>
    %806 = arith.mulf %801, %802 : vector<1x16xf32>
    %cst_247 = arith.constant dense<0.000000e+00> : vector<1xf32>
    %807 = vector.multi_reduction <add>, %806, %cst_247 [1] : vector<1x16xf32> to vector<1xf32>
    %808 = vector.shape_cast %807 : vector<1xf32> to vector<1x1xf32>
    %cst_248 = arith.constant dense<0.000000e+00> : vector<1x16xf32>
    %809 = tpu.matmul %801, %804, %cst_248 {dimension_numbers = #tpu.dot_dimension_numbers<[1], [1], [0], [0], [0, 0, 1, 0], [], []>} : vector<1x16xf32>, vector<16x16xf32>, vector<1x16xf32> -> vector<1x16xf32>
    %cst_249 = arith.constant dense<0xFF800000> : vector<1xf32>
    %810 = vector.multi_reduction <maximumf>, %809, %cst_249 [1] : vector<1x16xf32> to vector<1xf32>
    %811 = vector.shape_cast %810 : vector<1xf32> to vector<1x1xf32>
    %812 = arith.maximumf %811, %808 : vector<1x1xf32>
    %813 = arith.subf %808, %812 : vector<1x1xf32>
    %814 = math.exp %813 : vector<1x1xf32>
    %815 = vector.broadcast %812 : vector<1x1xf32> to vector<1x16xf32>
    %816 = arith.subf %809, %815 : vector<1x16xf32>
    %817 = math.exp %816 : vector<1x16xf32>
    %cst_250 = arith.constant dense<0.000000e+00> : vector<1xf32>
    %818 = vector.multi_reduction <add>, %817, %cst_250 [1] : vector<1x16xf32> to vector<1xf32>
    %819 = vector.shape_cast %818 : vector<1xf32> to vector<1x1xf32>
    %820 = arith.addf %819, %814 : vector<1x1xf32>
    %821 = tpu.reciprocal %820 {approx = true} : vector<1x1xf32> -> vector<1x1xf32>
    %cst_251 = arith.constant dense<0.000000e+00> : vector<1x16xf32>
    %822 = tpu.matmul %817, %805, %cst_251 {dimension_numbers = #tpu.dot_dimension_numbers<[1], [0], [0], [1], [0, 0, 1, 1], [], []>} : vector<1x16xf32>, vector<16x16xf32>, vector<1x16xf32> -> vector<1x16xf32>
    %823 = vector.broadcast %814 : vector<1x1xf32> to vector<1x16xf32>
    %824 = arith.mulf %823, %803 : vector<1x16xf32>
    %825 = arith.addf %822, %824 : vector<1x16xf32>
    %826 = vector.broadcast %821 : vector<1x1xf32> to vector<1x16xf32>
    %827 = arith.mulf %825, %826 : vector<1x16xf32>
    %c0_252 = arith.constant 0 : index
    %c0_253 = arith.constant 0 : index
    %828 = vector.load %arg4[%c0_252, %c0_253] : memref<32x32xf32, #tpu.memory_space<vmem>>, vector<1x16xf32>
    tpu.vector_store %arg4[%c0_252, %c0_253], %827 {strides = array<i32>} : memref<32x32xf32, #tpu.memory_space<vmem>>, vector<1x16xf32>,
    %829 = vector.extract_strided_slice %796 {offsets = [0, 16], sizes = [1, 16], strides = [1, 1]} : vector<2x32xf32> to vector<1x16xf32>
    %830 = vector.extract_strided_slice %798 {offsets = [0, 16], sizes = [1, 16], strides = [1, 1]} : vector<2x64xf32> to vector<1x16xf32>
    %831 = vector.extract_strided_slice %798 {offsets = [0, 48], sizes = [1, 16], strides = [1, 1]} : vector<2x64xf32> to vector<1x16xf32>
    %832 = vector.extract_strided_slice %800 {offsets = [0, 16], sizes = [16, 16], strides = [1, 1]} : vector<32x64xf32> to vector<16x16xf32>
    %833 = vector.extract_strided_slice %800 {offsets = [0, 48], sizes = [16, 16], strides = [1, 1]} : vector<32x64xf32> to vector<16x16xf32>
    %834 = arith.mulf %829, %830 : vector<1x16xf32>
    %cst_254 = arith.constant dense<0.000000e+00> : vector<1xf32>
    %835 = vector.multi_reduction <add>, %834, %cst_254 [1] : vector<1x16xf32> to vector<1xf32>
    %836 = vector.shape_cast %835 : vector<1xf32> to vector<1x1xf32>
    %cst_255 = arith.constant dense<0.000000e+00> : vector<1x16xf32>
    %837 = tpu.matmul %829, %832, %cst_255 {dimension_numbers = #tpu.dot_dimension_numbers<[1], [1], [0], [0], [0, 0, 1, 0], [], []>} : vector<1x16xf32>, vector<16x16xf32>, vector<1x16xf32> -> vector<1x16xf32>
    %cst_256 = arith.constant dense<0xFF800000> : vector<1xf32>
    %838 = vector.multi_reduction <maximumf>, %837, %cst_256 [1] : vector<1x16xf32> to vector<1xf32>
    %839 = vector.shape_cast %838 : vector<1xf32> to vector<1x1xf32>
    %840 = arith.maximumf %839, %836 : vector<1x1xf32>
    %841 = arith.subf %836, %840 : vector<1x1xf32>
    %842 = math.exp %841 : vector<1x1xf32>
    %843 = vector.broadcast %840 : vector<1x1xf32> to vector<1x16xf32>
    %844 = arith.subf %837, %843 : vector<1x16xf32>
    %845 = math.exp %844 : vector<1x16xf32>
    %cst_257 = arith.constant dense<0.000000e+00> : vector<1xf32>
    %846 = vector.multi_reduction <add>, %845, %cst_257 [1] : vector<1x16xf32> to vector<1xf32>
    %847 = vector.shape_cast %846 : vector<1xf32> to vector<1x1xf32>
    %848 = arith.addf %847, %842 : vector<1x1xf32>
    %849 = tpu.reciprocal %848 {approx = true} : vector<1x1xf32> -> vector<1x1xf32>
    %cst_258 = arith.constant dense<0.000000e+00> : vector<1x16xf32>
    %850 = tpu.matmul %845, %833, %cst_258 {dimension_numbers = #tpu.dot_dimension_numbers<[1], [0], [0], [1], [0, 0, 1, 1], [], []>} : vector<1x16xf32>, vector<16x16xf32>, vector<1x16xf32> -> vector<1x16xf32>
    %851 = vector.broadcast %842 : vector<1x1xf32> to vector<1x16xf32>
    %852 = arith.mulf %851, %831 : vector<1x16xf32>
    %853 = arith.addf %850, %852 : vector<1x16xf32>
    %854 = vector.broadcast %849 : vector<1x1xf32> to vector<1x16xf32>
    %855 = arith.mulf %853, %854 : vector<1x16xf32>
    %c0_259 = arith.constant 0 : index
    %c16_260 = arith.constant 16 : index
    %856 = vector.load %arg4[%c0_259, %c16_260] : memref<32x32xf32, #tpu.memory_space<vmem>>, vector<1x16xf32>
    tpu.vector_store %arg4[%c0_259, %c16_260], %855 {strides = array<i32>} : memref<32x32xf32, #tpu.memory_space<vmem>>, vector<1x16xf32>,
    %857 = vector.extract_strided_slice %796 {offsets = [1, 0], sizes = [1, 16], strides = [1, 1]} : vector<2x32xf32> to vector<1x16xf32>
    %858 = vector.extract_strided_slice %798 {offsets = [1, 0], sizes = [1, 16], strides = [1, 1]} : vector<2x64xf32> to vector<1x16xf32>
    %859 = vector.extract_strided_slice %798 {offsets = [1, 32], sizes = [1, 16], strides = [1, 1]} : vector<2x64xf32> to vector<1x16xf32>
    %860 = vector.extract_strided_slice %800 {offsets = [16, 0], sizes = [16, 16], strides = [1, 1]} : vector<32x64xf32> to vector<16x16xf32>
    %861 = vector.extract_strided_slice %800 {offsets = [16, 32], sizes = [16, 16], strides = [1, 1]} : vector<32x64xf32> to vector<16x16xf32>
    %862 = arith.mulf %857, %858 : vector<1x16xf32>
    %cst_261 = arith.constant dense<0.000000e+00> : vector<1xf32>
    %863 = vector.multi_reduction <add>, %862, %cst_261 [1] : vector<1x16xf32> to vector<1xf32>
    %864 = vector.shape_cast %863 : vector<1xf32> to vector<1x1xf32>
    %cst_262 = arith.constant dense<0.000000e+00> : vector<1x16xf32>
    %865 = tpu.matmul %857, %860, %cst_262 {dimension_numbers = #tpu.dot_dimension_numbers<[1], [1], [0], [0], [0, 0, 1, 0], [], []>} : vector<1x16xf32>, vector<16x16xf32>, vector<1x16xf32> -> vector<1x16xf32>
    %cst_263 = arith.constant dense<0xFF800000> : vector<1xf32>
    %866 = vector.multi_reduction <maximumf>, %865, %cst_263 [1] : vector<1x16xf32> to vector<1xf32>
    %867 = vector.shape_cast %866 : vector<1xf32> to vector<1x1xf32>
    %868 = arith.maximumf %867, %864 : vector<1x1xf32>
    %869 = arith.subf %864, %868 : vector<1x1xf32>
    %870 = math.exp %869 : vector<1x1xf32>
    %871 = vector.broadcast %868 : vector<1x1xf32> to vector<1x16xf32>
    %872 = arith.subf %865, %871 : vector<1x16xf32>
    %873 = math.exp %872 : vector<1x16xf32>
    %cst_264 = arith.constant dense<0.000000e+00> : vector<1xf32>
    %874 = vector.multi_reduction <add>, %873, %cst_264 [1] : vector<1x16xf32> to vector<1xf32>
    %875 = vector.shape_cast %874 : vector<1xf32> to vector<1x1xf32>
    %876 = arith.addf %875, %870 : vector<1x1xf32>
    %877 = tpu.reciprocal %876 {approx = true} : vector<1x1xf32> -> vector<1x1xf32>
    %cst_265 = arith.constant dense<0.000000e+00> : vector<1x16xf32>
    %878 = tpu.matmul %873, %861, %cst_265 {dimension_numbers = #tpu.dot_dimension_numbers<[1], [0], [0], [1], [0, 0, 1, 1], [], []>} : vector<1x16xf32>, vector<16x16xf32>, vector<1x16xf32> -> vector<1x16xf32>
    %879 = vector.broadcast %870 : vector<1x1xf32> to vector<1x16xf32>
    %880 = arith.mulf %879, %859 : vector<1x16xf32>
    %881 = arith.addf %878, %880 : vector<1x16xf32>
    %882 = vector.broadcast %877 : vector<1x1xf32> to vector<1x16xf32>
    %883 = arith.mulf %881, %882 : vector<1x16xf32>
    %c1 = arith.constant 1 : index
    %c0_266 = arith.constant 0 : index
    %884 = vector.load %arg4[%c1, %c0_266] : memref<32x32xf32, #tpu.memory_space<vmem>>, vector<1x16xf32>
    tpu.vector_store %arg4[%c1, %c0_266], %883 {strides = array<i32>} : memref<32x32xf32, #tpu.memory_space<vmem>>, vector<1x16xf32>,
    %885 = vector.extract_strided_slice %796 {offsets = [1, 16], sizes = [1, 16], strides = [1, 1]} : vector<2x32xf32> to vector<1x16xf32>
    %886 = vector.extract_strided_slice %798 {offsets = [1, 16], sizes = [1, 16], strides = [1, 1]} : vector<2x64xf32> to vector<1x16xf32>
    %887 = vector.extract_strided_slice %798 {offsets = [1, 48], sizes = [1, 16], strides = [1, 1]} : vector<2x64xf32> to vector<1x16xf32>
    %888 = vector.extract_strided_slice %800 {offsets = [16, 16], sizes = [16, 16], strides = [1, 1]} : vector<32x64xf32> to vector<16x16xf32>
    %889 = vector.extract_strided_slice %800 {offsets = [16, 48], sizes = [16, 16], strides = [1, 1]} : vector<32x64xf32> to vector<16x16xf32>
    %890 = arith.mulf %885, %886 : vector<1x16xf32>
    %cst_267 = arith.constant dense<0.000000e+00> : vector<1xf32>
    %891 = vector.multi_reduction <add>, %890, %cst_267 [1] : vector<1x16xf32> to vector<1xf32>
    %892 = vector.shape_cast %891 : vector<1xf32> to vector<1x1xf32>
    %cst_268 = arith.constant dense<0.000000e+00> : vector<1x16xf32>
    %893 = tpu.matmul %885, %888, %cst_268 {dimension_numbers = #tpu.dot_dimension_numbers<[1], [1], [0], [0], [0, 0, 1, 0], [], []>} : vector<1x16xf32>, vector<16x16xf32>, vector<1x16xf32> -> vector<1x16xf32>
    %cst_269 = arith.constant dense<0xFF800000> : vector<1xf32>
    %894 = vector.multi_reduction <maximumf>, %893, %cst_269 [1] : vector<1x16xf32> to vector<1xf32>
    %895 = vector.shape_cast %894 : vector<1xf32> to vector<1x1xf32>
    %896 = arith.maximumf %895, %892 : vector<1x1xf32>
    %897 = arith.subf %892, %896 : vector<1x1xf32>
    %898 = math.exp %897 : vector<1x1xf32>
    %899 = vector.broadcast %896 : vector<1x1xf32> to vector<1x16xf32>
    %900 = arith.subf %893, %899 : vector<1x16xf32>
    %901 = math.exp %900 : vector<1x16xf32>
    %cst_270 = arith.constant dense<0.000000e+00> : vector<1xf32>
    %902 = vector.multi_reduction <add>, %901, %cst_270 [1] : vector<1x16xf32> to vector<1xf32>
    %903 = vector.shape_cast %902 : vector<1xf32> to vector<1x1xf32>
    %904 = arith.addf %903, %898 : vector<1x1xf32>
    %905 = tpu.reciprocal %904 {approx = true} : vector<1x1xf32> -> vector<1x1xf32>
    %cst_271 = arith.constant dense<0.000000e+00> : vector<1x16xf32>
    %906 = tpu.matmul %901, %889, %cst_271 {dimension_numbers = #tpu.dot_dimension_numbers<[1], [0], [0], [1], [0, 0, 1, 1], [], []>} : vector<1x16xf32>, vector<16x16xf32>, vector<1x16xf32> -> vector<1x16xf32>
    %907 = vector.broadcast %898 : vector<1x1xf32> to vector<1x16xf32>
    %908 = arith.mulf %907, %887 : vector<1x16xf32>
    %909 = arith.addf %906, %908 : vector<1x16xf32>
    %910 = vector.broadcast %905 : vector<1x1xf32> to vector<1x16xf32>
    %911 = arith.mulf %909, %910 : vector<1x16xf32>
    %c1_272 = arith.constant 1 : index
    %c16_273 = arith.constant 16 : index
    %912 = vector.load %arg4[%c1_272, %c16_273] : memref<32x32xf32, #tpu.memory_space<vmem>>, vector<1x16xf32>
    tpu.vector_store %arg4[%c1_272, %c16_273], %911 {strides = array<i32>} : memref<32x32xf32, #tpu.memory_space<vmem>>, vector<1x16xf32>,
    %c0_274 = arith.constant 0 : index
    %c0_275 = arith.constant 0 : index
    %913 = vector.load %arg4[%c0_274, %c0_275] : memref<32x32xf32, #tpu.memory_space<vmem>>, vector<2x32xf32>
    %c1416 = arith.constant 1416 : index
    %c0_276 = arith.constant 0 : index
    %914 = vector.load %arg2[%c1416, %c0_276] : memref<1584x128xf32, #tpu.memory_space<vmem>>, vector<32x32xf32>
    %cst_277 = arith.constant dense<0.000000e+00> : vector<2x32xf32>
    %915 = tpu.matmul %913, %914, %cst_277 {dimension_numbers = #tpu.dot_dimension_numbers<[1], [0], [0], [1], [0, 0, 1, 1], [], []>} : vector<2x32xf32>, vector<32x32xf32>, vector<2x32xf32> -> vector<2x32xf32>
    %c1448 = arith.constant 1448 : index
    %c0_278 = arith.constant 0 : index
    %916 = vector.load %arg2[%c1448, %c0_278] : memref<1584x128xf32, #tpu.memory_space<vmem>>, vector<1x32xf32>
    %917 = vector.broadcast %916 : vector<1x32xf32> to vector<2x32xf32>
    %918 = arith.addf %915, %917 : vector<2x32xf32>
    %919 = arith.addf %768, %918 : vector<2x32xf32>
    %c1456 = arith.constant 1456 : index
    %c0_279 = arith.constant 0 : index
    %920 = vector.load %arg2[%c1456, %c0_279] : memref<1584x128xf32, #tpu.memory_space<vmem>>, vector<1x32xf32>
    %c1464 = arith.constant 1464 : index
    %c0_280 = arith.constant 0 : index
    %921 = vector.load %arg2[%c1464, %c0_280] : memref<1584x128xf32, #tpu.memory_space<vmem>>, vector<1x32xf32>
    %cst_281 = arith.constant dense<0.000000e+00> : vector<2xf32>
    %922 = vector.multi_reduction <add>, %919, %cst_281 [1] : vector<2x32xf32> to vector<2xf32>
    %923 = vector.shape_cast %922 : vector<2xf32> to vector<2x1xf32>
    %cst_282 = arith.constant 3.200000e+01 : f32
    %924 = vector.broadcast %cst_282 : f32 to vector<2x1xf32>
    %925 = arith.divf %923, %924 : vector<2x1xf32>
    %926 = vector.broadcast %925 : vector<2x1xf32> to vector<2x32xf32>
    %927 = arith.subf %919, %926 : vector<2x32xf32>
    %928 = arith.mulf %927, %927 : vector<2x32xf32>
    %cst_283 = arith.constant dense<0.000000e+00> : vector<2xf32>
    %929 = vector.multi_reduction <add>, %928, %cst_283 [1] : vector<2x32xf32> to vector<2xf32>
    %930 = vector.shape_cast %929 : vector<2xf32> to vector<2x1xf32>
    %cst_284 = arith.constant 3.200000e+01 : f32
    %931 = vector.broadcast %cst_284 : f32 to vector<2x1xf32>
    %932 = arith.divf %930, %931 : vector<2x1xf32>
    %933 = vector.broadcast %925 : vector<2x1xf32> to vector<2x32xf32>
    %934 = arith.subf %919, %933 : vector<2x32xf32>
    %cst_285 = arith.constant 9.99999974E-6 : f32
    %935 = vector.broadcast %cst_285 : f32 to vector<2x1xf32>
    %936 = arith.addf %932, %935 : vector<2x1xf32>
    %937 = math.rsqrt %936 : vector<2x1xf32>
    %938 = vector.broadcast %937 : vector<2x1xf32> to vector<2x32xf32>
    %939 = arith.mulf %934, %938 : vector<2x32xf32>
    %940 = vector.broadcast %920 : vector<1x32xf32> to vector<2x32xf32>
    %941 = arith.mulf %939, %940 : vector<2x32xf32>
    %942 = vector.broadcast %921 : vector<1x32xf32> to vector<2x32xf32>
    %943 = arith.addf %941, %942 : vector<2x32xf32>
    %c1472 = arith.constant 1472 : index
    %c0_286 = arith.constant 0 : index
    %944 = vector.load %arg2[%c1472, %c0_286] : memref<1584x128xf32, #tpu.memory_space<vmem>>, vector<32x64xf32>
    %cst_287 = arith.constant dense<0.000000e+00> : vector<2x64xf32>
    %945 = tpu.matmul %943, %944, %cst_287 {dimension_numbers = #tpu.dot_dimension_numbers<[1], [0], [0], [1], [0, 0, 1, 1], [], []>} : vector<2x32xf32>, vector<32x64xf32>, vector<2x64xf32> -> vector<2x64xf32>
    %c1504 = arith.constant 1504 : index
    %c0_288 = arith.constant 0 : index
    %946 = vector.load %arg2[%c1504, %c0_288] : memref<1584x128xf32, #tpu.memory_space<vmem>>, vector<1x64xf32>
    %947 = vector.broadcast %946 : vector<1x64xf32> to vector<2x64xf32>
    %948 = arith.addf %945, %947 : vector<2x64xf32>
    %cst_289 = arith.constant 5.000000e-01 : f32
    %949 = vector.broadcast %cst_289 : f32 to vector<2x64xf32>
    %950 = arith.mulf %949, %948 : vector<2x64xf32>
    %cst_290 = arith.constant 4.471500e-02 : f32
    %951 = vector.broadcast %cst_290 : f32 to vector<2x64xf32>
    %952 = arith.mulf %951, %948 : vector<2x64xf32>
    %953 = arith.mulf %952, %948 : vector<2x64xf32>
    %954 = arith.mulf %953, %948 : vector<2x64xf32>
    %955 = arith.addf %948, %954 : vector<2x64xf32>
    %cst_291 = arith.constant 0.797884583 : f32
    %956 = vector.broadcast %cst_291 : f32 to vector<2x64xf32>
    %957 = arith.mulf %956, %955 : vector<2x64xf32>
    %958 = math.tanh %957 : vector<2x64xf32>
    %cst_292 = arith.constant 1.000000e+00 : f32
    %959 = vector.broadcast %cst_292 : f32 to vector<2x64xf32>
    %960 = arith.addf %959, %958 : vector<2x64xf32>
    %961 = arith.mulf %950, %960 : vector<2x64xf32>
    %c1512 = arith.constant 1512 : index
    %c0_293 = arith.constant 0 : index
    %962 = vector.load %arg2[%c1512, %c0_293] : memref<1584x128xf32, #tpu.memory_space<vmem>>, vector<64x32xf32>
    %cst_294 = arith.constant dense<0.000000e+00> : vector<2x32xf32>
    %963 = tpu.matmul %961, %962, %cst_294 {dimension_numbers = #tpu.dot_dimension_numbers<[1], [0], [0], [1], [0, 0, 1, 1], [], []>} : vector<2x64xf32>, vector<64x32xf32>, vector<2x32xf32> -> vector<2x32xf32>
    %c1576 = arith.constant 1576 : index
    %c0_295 = arith.constant 0 : index
    %964 = vector.load %arg2[%c1576, %c0_295] : memref<1584x128xf32, #tpu.memory_space<vmem>>, vector<1x32xf32>
    %965 = vector.broadcast %964 : vector<1x32xf32> to vector<2x32xf32>
    %966 = arith.addf %963, %965 : vector<2x32xf32>
    %967 = arith.addf %919, %966 : vector<2x32xf32>
    %c432 = arith.constant 432 : index
    %c0_296 = arith.constant 0 : index
    %968 = vector.load %arg2[%c432, %c0_296] : memref<1584x128xf32, #tpu.memory_space<vmem>>, vector<1x32xf32>
    %c440 = arith.constant 440 : index
    %c0_297 = arith.constant 0 : index
    %969 = vector.load %arg2[%c440, %c0_297] : memref<1584x128xf32, #tpu.memory_space<vmem>>, vector<1x32xf32>
    %cst_298 = arith.constant dense<0.000000e+00> : vector<2xf32>
    %970 = vector.multi_reduction <add>, %967, %cst_298 [1] : vector<2x32xf32> to vector<2xf32>
    %971 = vector.shape_cast %970 : vector<2xf32> to vector<2x1xf32>
    %cst_299 = arith.constant 3.200000e+01 : f32
    %972 = vector.broadcast %cst_299 : f32 to vector<2x1xf32>
    %973 = arith.divf %971, %972 : vector<2x1xf32>
    %974 = vector.broadcast %973 : vector<2x1xf32> to vector<2x32xf32>
    %975 = arith.subf %967, %974 : vector<2x32xf32>
    %976 = arith.mulf %975, %975 : vector<2x32xf32>
    %cst_300 = arith.constant dense<0.000000e+00> : vector<2xf32>
    %977 = vector.multi_reduction <add>, %976, %cst_300 [1] : vector<2x32xf32> to vector<2xf32>
    %978 = vector.shape_cast %977 : vector<2xf32> to vector<2x1xf32>
    %cst_301 = arith.constant 3.200000e+01 : f32
    %979 = vector.broadcast %cst_301 : f32 to vector<2x1xf32>
    %980 = arith.divf %978, %979 : vector<2x1xf32>
    %981 = vector.broadcast %973 : vector<2x1xf32> to vector<2x32xf32>
    %982 = arith.subf %967, %981 : vector<2x32xf32>
    %cst_302 = arith.constant 9.99999974E-6 : f32
    %983 = vector.broadcast %cst_302 : f32 to vector<2x1xf32>
    %984 = arith.addf %980, %983 : vector<2x1xf32>
    %985 = math.rsqrt %984 : vector<2x1xf32>
    %986 = vector.broadcast %985 : vector<2x1xf32> to vector<2x32xf32>
    %987 = arith.mulf %982, %986 : vector<2x32xf32>
    %988 = vector.broadcast %968 : vector<1x32xf32> to vector<2x32xf32>
    %989 = arith.mulf %987, %988 : vector<2x32xf32>
    %990 = vector.broadcast %969 : vector<1x32xf32> to vector<2x32xf32>
    %991 = arith.addf %989, %990 : vector<2x32xf32>
    %c448 = arith.constant 448 : index
    %c0_303 = arith.constant 0 : index
    %992 = vector.load %arg2[%c448, %c0_303] : memref<1584x128xf32, #tpu.memory_space<vmem>>, vector<32x10xf32>
    %cst_304 = arith.constant dense<0.000000e+00> : vector<2x10xf32>
    %993 = tpu.matmul %991, %992, %cst_304 {dimension_numbers = #tpu.dot_dimension_numbers<[1], [0], [0], [1], [0, 0, 1, 1], [], []>} : vector<2x32xf32>, vector<32x10xf32>, vector<2x10xf32> -> vector<2x10xf32>
    %c480 = arith.constant 480 : index
    %c0_305 = arith.constant 0 : index
    %994 = vector.load %arg2[%c480, %c0_305] : memref<1584x128xf32, #tpu.memory_space<vmem>>, vector<1x10xf32>
    %995 = vector.broadcast %994 : vector<1x10xf32> to vector<2x10xf32>
    %996 = arith.addf %993, %995 : vector<2x10xf32>
    %c0_306 = arith.constant 0 : index
    %c0_307 = arith.constant 0 : index
    %997 = vector.load %arg3[%c0_306, %c0_307] : memref<2x10xf32, #tpu.memory_space<vmem>>, vector<2x10xf32>
    tpu.vector_store %arg3[%c0_306, %c0_307], %996 {strides = array<i32>} : memref<2x10xf32, #tpu.memory_space<vmem>>, vector<2x10xf32>,
    return
  }
  func.func @transform_0(%arg0: i32) -> (i32, i32) {
    %c0_i32 = arith.constant 0 : i32
    %c0_i32_0 = arith.constant 0 : i32
    %c0_i32_1 = arith.constant 0 : i32
    return %c0_i32, %c0_i32_0 : i32, i32
  }
  func.func @transform_1(%arg0: i32) -> (i32, i32) {
    %c0_i32 = arith.constant 0 : i32
    %c0_i32_0 = arith.constant 0 : i32
    %c0_i32_1 = arith.constant 0 : i32
    return %c0_i32, %c0_i32_0 : i32, i32
  }
  func.func @transform_2(%arg0: i32) -> (i32, i32) {
    %c0_i32 = arith.constant 0 : i32
    %c0_i32_0 = arith.constant 0 : i32
    %c0_i32_1 = arith.constant 0 : i32
    return %c0_i32, %c0_i32_0 : i32, i32
  }
}

</mosaic_0001>

<bundles_post_ra>
// kernel: xcit_forward.1
= control target key start
LH: loop header
LB: loop body
LE: loop exit
PB: predicated region body
PF: predicated region fallthrough
CT: control target
= control target key end

     0   :  { %vm18_vm0 = vcmask 392192   ;;  %s12511_s0 = inlined_call_operand.vmem [shape: f32[32,48], index: 0, kind: input, shape index: {}]   ;;  %s12512_s1 = inlined_call_operand.vmem [shape: f32[1584,128], index: 1, kind: input, shape index: {}]   ;;  %s12513_s2 = inlined_call_operand.hbm [shape: f32[2,10], index: 2, kind: output, shape index: {}]  }
   0x1   :  { %v12_v0 = vld [vmem:[%s12511_s0] sm:$0xff]  ;;  %v14_v1 = vld [vmem:[%s12511_s0 + $0x10] sm:$0xff]  ;;  %v13_v2 = vld [vmem:[%s12511_s0 + $0x8] sm:$0xff] }
   0x2   :  { %v19_v3 = vsel %vm18_vm0, %v12_v0, 0.0  ;;  %v25_v4 = vsel %vm18_vm0, %v14_v1, 0.0  ;;  %v15_v5 = vld [vmem:[%s12511_s0 + $0x18] sm:$0xff] }
   0x3   :  { %7 = vsyncpa [#allocation4], 0  ;;  %20 = vadd.xlane.f32.xlu0 %v19_v3  ;;  %26 = vadd.xlane.f32.xlu1 %v25_v4  ;;  %v22_v6 = vsel %vm18_vm0, %v13_v2, 0.0  ;;  %v28_v7 = vsel %vm18_vm0, %v15_v5, 0.0  ;;  %v88_v28 = vld [vmem:[%s12512_s1 + $0x10] sm:$0xff]  ;;  %v89_v29 = vld [vmem:[%s12512_s1 + $0x18] sm:$0xff] }
   0x4   :  { %v9602_v30 = vpack.c.bf16 %v89_v29, %v88_v28  ;;  %v90_v31 = vld [vmem:[%s12512_s1 + $0x20] sm:$0xff]  ;;  %v91_v32 = vld [vmem:[%s12512_s1 + $0x28] sm:$0xff]  ;;  %v92_v34 = vld [vmem:[%s12512_s1 + $0x30] sm:$0xff]  ;;  %vm198_vm1 = vcmask 261120   ;;  %vm600_vm3 = vcmask 130048   ;;  %s10341_s0 = smov 112  }
   0x5   :  { %v9606_v33 = vpack.c.bf16 %v91_v32, %v90_v31  ;;  %v93_v35 = vld [vmem:[%s12512_s1 + $0x38] sm:$0xff]  ;;  %v8079_v50 = vld [vmem:[%s12512_s1] ss:$0 sm:$0xff]  ;;  %v8080_v52 = vld [vmem:[%s12512_s1 + $0x8] ss:$0 sm:$0xff]  ;;  %s10343_s13 = smov 16  }
   0x6   :  { %9603 = vmatprep.subr.bf16.mxu0 %v9602_v30  ;;  %v9610_v36 = vpack.c.bf16 %v93_v35, %v92_v34  ;;  %v8081_v3 = vld [vmem:[%s12512_s1 + $0x40] ss:$0 sm:$0xff]  ;;  %vm10490_vm2 = vmpackc.low %vm198_vm1, %vm198_vm1  ;;  %vm1101_vm5 = vcmask 261248   ;;  %vm3299_vm6 = vcmask 523264   ;;  %vm6596_vm7 = vcmask 254976   ;;  %s10347_s20 = smov 96  }
   0x7   :  { %23 = vadd.xlane.f32.xlu0 %v22_v6  ;;  %29 = vadd.xlane.f32.xlu1 %v28_v7  ;;  %vm10650_vm4 = vmpackc.low %vm600_vm3, %vm600_vm3  ;;  %vm10345_vm8 = vmmov 0   ;;  %vm6870_vm9 = vcmask 122880   ;;  %vm7249_vm10 = vcmask 123905   ;;  %s10348_s21 = smov 80   ;;  %vm7247_vm11 = vcmask 254080  }
   0x8   :  { %9605 = vmatpush3.bf16.msra.mxu0 %v9602_v30  ;;  %vm8063_vm12 = vcmask 74752  }
   0x9   :  { %9607 = vmatprep.subr.bf16.mxu0 %v9606_v33 }
   0xc   :  { %9609 = vmatpush3.bf16.msra.mxu0 %v9606_v33 }
   0xd   :  { %9611 = vmatprep.subr.bf16.mxu0 %v9610_v36 }
  0x10   :  { %9613 = vmatpush3.bf16.msra.mxu0 %v9610_v36 }
  0x90   :  { %v21_v8 = vpop.xlane.xlu0 %20  ;;  %v27_v9 = vpop.xlane.xlu1 %26 }
  0x91   :  { %v32_v10 = vmul.f32 0.020833334, %v21_v8  ;;  %v34_v11 = vmul.f32 0.020833334, %v27_v9 }
  0x93   :  { %v36_v12 = vsub.f32 %v12_v0, %v32_v10  ;;  %v38_v13 = vsub.f32 %v14_v1, %v34_v11 }
  0x94   :  { %v24_v14 = vpop.xlane.xlu0 %23  ;;  %v30_v15 = vpop.xlane.xlu1 %29 }
  0x95   :  { %v33_v16 = vmul.f32 0.020833334, %v24_v14  ;;  %v35_v17 = vmul.f32 0.020833334, %v30_v15  ;;  %v40_v18 = vmul.f32 %v36_v12, %v36_v12  ;;  %v42_v19 = vmul.f32 %v38_v13, %v38_v13 }
  0x97   :  { %v37_v20 = vsub.f32 %v13_v2, %v33_v16  ;;  %v39_v21 = vsub.f32 %v15_v5, %v35_v17  ;;  %v44_v22 = vsel %vm18_vm0, %v40_v18, 0.0  ;;  %v50_v23 = vsel %vm18_vm0, %v42_v19, 0.0 }
  0x98   :  { %45 = vadd.xlane.f32.xlu0 %v44_v22 }
  0x99   :  { %v41_v24 = vmul.f32 %v37_v20, %v37_v20  ;;  %v43_v25 = vmul.f32 %v39_v21, %v39_v21 }
  0x9b   :  { %v47_v26 = vsel %vm18_vm0, %v41_v24, 0.0  ;;  %v53_v27 = vsel %vm18_vm0, %v43_v25, 0.0 }
  0x9c   :  { %51 = vadd.xlane.f32.xlu0 %v50_v23  ;;  %48 = vadd.xlane.f32.xlu1 %v47_v26 }
  0xa0   :  { %54 = vadd.xlane.f32.xlu1 %v53_v27 }
 0x125   :  { %v46_v37 = vpop.xlane.xlu0 %45 }
 0x126   :  { %v56_v38 = vmul.f32 0.020833334, %v46_v37 }
 0x128   :  { %v60_v39 = vadd.f32 1e-05, %v56_v38 }
 0x129   :  { %v49_v40 = vpop.xlane.xlu1 %48  ;;  %v52_v41 = vpop.xlane.xlu0 %51 }
 0x12a   :  { %10049 = vrsqrt.f32 %v60_v39  ;;  %v57_v42 = vmul.f32 0.020833334, %v49_v40  ;;  %v58_v43 = vmul.f32 0.020833334, %v52_v41 }
 0x12c   :  { %v61_v44 = vadd.f32 1e-05, %v57_v42  ;;  %v62_v45 = vadd.f32 1e-05, %v58_v43 }
 0x12d   :  { %v55_v46 = vpop.xlane.xlu1 %54 }
 0x12e   :  { %10051 = vrsqrt.f32 %v61_v44  ;;  %v59_v47 = vmul.f32 0.020833334, %v55_v46 }
 0x12f   :  { %10053 = vrsqrt.f32 %v62_v45 }
 0x130   :  { %v63_v48 = vadd.f32 1e-05, %v59_v47 }
 0x132   :  { %10055 = vrsqrt.f32 %v63_v48 }
 0x134   :  { %v10050_v49 = vpop.eup %10049 }
 0x135   :  { %v68_v51 = vmul.f32 %v10050_v49, %v36_v12  ;;  %v8086_v49 = vld [vmem:[%s12512_s1 + $0x48] ss:$0 sm:$0xff] }
 0x137   :  { %v76_v53 = vmul.f32 %v8079_v50, %v68_v51 }
 0x138   :  { %v10052_v54 = vpop.eup %10051 }
 0x139   :  { %v10054_v55 = vpop.eup %10053  ;;  %v84_v56 = vadd.f32 %v8080_v52, %v76_v53  ;;  %v69_v57 = vmul.f32 %v10052_v54, %v37_v20 }
 0x13a   :  { %v70_v58 = vmul.f32 %v10054_v55, %v38_v13 }
 0x13b   :  { %8860 = vmatprep.mubr.msk.f32.mxu0 %vm18_vm0, %v84_v56  ;;  %v77_v59 = vmul.f32 %v8079_v50, %v69_v57  ;;  %v269_v56 = vld [vmem:[%s12512_s1 + $0x60] sm:$0xff] }
 0x13c   :  { %v10056_v60 = vpop.eup %10055  ;;  %v78_v61 = vmul.f32 %v8079_v50, %v70_v58 }
 0x13d   :  { %v85_v62 = vadd.f32 %v8080_v52, %v77_v59  ;;  %v71_v63 = vmul.f32 %v10056_v60, %v39_v21  ;;  %v268_v60 = vld [vmem:[%s12512_s1 + $0x58] sm:$0xff] }
 0x13e   :  { %v86_v0 = vadd.f32 %v8080_v52, %v78_v61 }
 0x13f   :  { %8861 = vmatmul.mubr.msk.f32.vlgmr.msra.gmra.mrb[0].mxu0 %vm18_vm0, %v85_v62  ;;  %v79_v1 = vmul.f32 %v8079_v50, %v71_v63 }
 0x140   :  { %8863 = vmatprep.mubr.msk.f32.mxu0 %vm18_vm0, %v86_v0 }
 0x141   :  { %v87_v2 = vadd.f32 %v8080_v52, %v79_v1  ;;  %v8087_v52 = vld [vmem:[%s12512_s1 + $0x50] ss:$0 sm:$0xff] }
 0x143   :  { %8864 = vmatmul.mubr.msk.f32.gmra.mrb[2].mxu0 %vm18_vm0, %v87_v2 }
 0x212   :  { %v8862_v4 = vpop.f32.mrb[0].mxu0 }
 0x213   :  { %v183_v5 = vadd.f32 %v8862_v4, %v8081_v3  ;;  %v177_v6 = vpop.f32.mrb[1].mxu0 }
 0x214   :  { %v178_v7 = vadd.f32 %v8081_v3, %v177_v6 }
 0x215   :  { %v202_v8 = vsel %vm198_vm1, %v183_v5, 0.0 }
 0x216   :  { %203 = vadd.xlane.f32.xlu1 %v202_v8  ;;  %v8865_v9 = vpop.f32.mrb[2].mxu0  ;;  %v199_v10 = vsel %vm198_vm1, %v178_v7, 0.0 }
 0x217   :  { %v193_v11 = vadd.f32 %v8865_v9, %v8081_v3  ;;  %200 = vadd.xlane.f32.xlu0 %v199_v10  ;;  %v187_v12 = vpop.f32.mrb[3].mxu0 }
 0x218   :  { %v188_v13 = vadd.f32 %v8081_v3, %v187_v12  ;;  %v271_v3 = vld [vmem:[%s12512_s1 + $0x70] sm:$0xff] }
 0x219   :  { %v208_v14 = vsel %vm198_vm1, %v193_v11, 0.0 }
 0x21a   :  { %209 = vadd.xlane.f32.xlu1 %v208_v14  ;;  %v205_v15 = vsel %vm198_vm1, %v188_v13, 0.0 }
 0x21b   :  { %206 = vadd.xlane.f32.xlu0 %v205_v15 }
 0x2a3   :  { %v204_v16 = vpop.xlane.xlu1 %203 }
 0x2a4   :  { %v213_v17 = vmul.f32 0.03125, %v204_v16  ;;  %v201_v18 = vpop.xlane.xlu0 %200 }
 0x2a5   :  { %v212_v19 = vmul.f32 0.03125, %v201_v18 }
 0x2a6   :  { %v217_v20 = vsub.f32 %v183_v5, %v213_v17 }
 0x2a7   :  { %v216_v21 = vsub.f32 %v178_v7, %v212_v19  ;;  %v210_v22 = vpop.xlane.xlu1 %209  ;;  %v270_v7 = vld [vmem:[%s12512_s1 + $0x68] sm:$0xff] }
 0x2a8   :  { %v215_v23 = vmul.f32 0.03125, %v210_v22  ;;  %v207_v24 = vpop.xlane.xlu0 %206  ;;  %v221_v25 = vmul.f32 %v217_v20, %v217_v20 }
 0x2a9   :  { %v214_v26 = vmul.f32 0.03125, %v207_v24  ;;  %v220_v27 = vmul.f32 %v216_v21, %v216_v21 }
 0x2aa   :  { %v219_v28 = vsub.f32 %v193_v11, %v215_v23  ;;  %v227_v29 = vsel %vm198_vm1, %v221_v25, 0.0 }
 0x2ab   :  { %v218_v30 = vsub.f32 %v188_v13, %v214_v26  ;;  %228 = vadd.xlane.f32.xlu1 %v227_v29  ;;  %v224_v31 = vsel %vm198_vm1, %v220_v27, 0.0 }
 0x2ac   :  { %225 = vadd.xlane.f32.xlu0 %v224_v31  ;;  %v223_v32 = vmul.f32 %v219_v28, %v219_v28 }
 0x2ad   :  { %v222_v33 = vmul.f32 %v218_v30, %v218_v30 }
 0x2ae   :  { %v233_v34 = vsel %vm198_vm1, %v223_v32, 0.0 }
 0x2af   :  { %234 = vadd.xlane.f32.xlu1 %v233_v34  ;;  %v230_v35 = vsel %vm198_vm1, %v222_v33, 0.0  ;;  %v495_v34 = vld [vmem:[%s12512_s1 + $0x238] sm:$0xff] }
 0x2b0   :  { %231 = vadd.xlane.f32.xlu0 %v230_v35  ;;  %v496_v35 = vld [vmem:[%s12512_s1 + $0x240] sm:$0xff] }
 0x338   :  { %v229_v36 = vpop.xlane.xlu1 %228 }
 0x339   :  { %v237_v37 = vmul.f32 0.03125, %v229_v36  ;;  %v226_v38 = vpop.xlane.xlu0 %225  ;;  %v9626_v36 = vpack.c.bf16 %v496_v35, %v495_v34 }
 0x33a   :  { %v236_v39 = vmul.f32 0.03125, %v226_v38  ;;  %v498_v38 = vld [vmem:[%s12512_s1 + $0x250] sm:$0xff] }
 0x33b   :  { %v241_v40 = vadd.f32 1e-05, %v237_v37  ;;  %v497_v37 = vld [vmem:[%s12512_s1 + $0x248] sm:$0xff]  ;;  %9627 = vmatprep.subr.bf16.mxu0 %v9626_v36 }
 0x33c   :  { %v240_v41 = vadd.f32 1e-05, %v236_v39  ;;  %v235_v42 = vpop.xlane.xlu1 %234  ;;  %v9630_v39 = vpack.c.bf16 %v498_v38, %v497_v37  ;;  %9629 = vmatpush3.bf16.msra.mxu0 %v9626_v36 }
 0x33d   :  { %10057 = vrsqrt.f32 %v241_v40  ;;  %v239_v43 = vmul.f32 0.03125, %v235_v42  ;;  %v232_v44 = vpop.xlane.xlu0 %231  ;;  %v346_v40 = vld [vmem:[%s12512_s1 + $0x1f8] sm:$0xff] }
 0x33e   :  { %10059 = vrsqrt.f32 %v240_v41  ;;  %v238_v45 = vmul.f32 0.03125, %v232_v44  ;;  %9631 = vmatprep.subr.bf16.mxu0 %v9630_v39  ;;  %8874 = vmatprep.mubr.msk.f32.mxu1 %vm198_vm1, %v346_v40 }
 0x33f   :  { %v243_v46 = vadd.f32 1e-05, %v239_v43 }
 0x340   :  { %v242_v47 = vadd.f32 1e-05, %v238_v45  ;;  %9633 = vmatpush3.bf16.msra.mxu0 %v9630_v39 }
 0x341   :  { %10061 = vrsqrt.f32 %v243_v46 }
 0x342   :  { %10063 = vrsqrt.f32 %v242_v47 }
 0x347   :  { %v10058_v48 = vpop.eup %10057 }
 0x348   :  { %v10060_v50 = vpop.eup %10059  ;;  %v249_v51 = vmul.f32 %v10058_v48, %v217_v20 }
 0x349   :  { %v248_v53 = vmul.f32 %v10060_v50, %v216_v21 }
 0x34a   :  { %v257_v54 = vmul.f32 %v8086_v49, %v249_v51 }
 0x34b   :  { %v10062_v55 = vpop.eup %10061  ;;  %v256_v57 = vmul.f32 %v8086_v49, %v248_v53 }
 0x34c   :  { %v10064_v58 = vpop.eup %10063  ;;  %v265_v59 = vadd.f32 %v8087_v52, %v257_v54  ;;  %v251_v61 = vmul.f32 %v10062_v55, %v219_v28  ;;  %v8088_v54 = vld [vmem:[%s12512_s1 + $0x1e8] ss:$0 sm:$0xff] }
 0x34d   :  { %v264_v62 = vadd.f32 %v8087_v52, %v256_v57  ;;  %v250_v63 = vmul.f32 %v10064_v58, %v218_v30  ;;  %v8089_v57 = vld [vmem:[%s12512_s1 + $0x1f0] ss:$0 sm:$0xff] }
 0x34e   :  { %v10436_v0 = vadd.f32 %v269_v56, %v265_v59  ;;  %v259_v1 = vmul.f32 %v8086_v49, %v251_v61 }
 0x34f   :  { %v10438_v2 = vadd.f32 %v268_v60, %v264_v62  ;;  %v258_v4 = vmul.f32 %v8086_v49, %v250_v63 }
 0x350   :  { %v281_v5 = vsel %vm198_vm1, %v10436_v0, 0.0  ;;  %v267_v6 = vadd.f32 %v8087_v52, %v259_v1 }
 0x351   :  { %282 = vadd.xlane.f32.xlu1 %v281_v5  ;;  %v278_v8 = vsel %vm198_vm1, %v10438_v2, 0.0  ;;  %v266_v9 = vadd.f32 %v8087_v52, %v258_v4  ;;  %v12574_v5 = vmov 0 }
 0x352   :  { %279 = vadd.xlane.f32.xlu0 %v278_v8  ;;  %v10450_v10 = vadd.f32 %v271_v3, %v267_v6  ;;  %v12575_v5 = vsel %vm10490_vm2, 4294967295, %v12574_v5 }
 0x353   :  { %v10452_v11 = vadd.f32 %v270_v7, %v266_v9  ;;  %12576 = vst [vmem:[#allocation6_spill] sm:$0xff] %v12575_v5 }
 0x354   :  { %v287_v12 = vsel %vm198_vm1, %v10450_v10, 0.0 }
 0x355   :  { %288 = vadd.xlane.f32.xlu1 %v287_v12  ;;  %v284_v13 = vsel %vm198_vm1, %v10452_v11, 0.0 }
 0x356   :  { %285 = vadd.xlane.f32.xlu0 %v284_v13 }
 0x3de   :  { %v283_v14 = vpop.xlane.xlu1 %282 }
 0x3df   :  { %v291_v15 = vmul.f32 0.03125, %v283_v14  ;;  %v280_v16 = vpop.xlane.xlu0 %279  ;;  %v347_v14 = vld [vmem:[%s12512_s1 + $0x200] sm:$0xff] }
 0x3e0   :  { %v290_v17 = vmul.f32 0.03125, %v280_v16  ;;  %v349_v16 = vld [vmem:[%s12512_s1 + $0x210] sm:$0xff] }
 0x3e1   :  { %v295_v18 = vsub.f32 %v10436_v0, %v291_v15  ;;  %v348_v15 = vld [vmem:[%s12512_s1 + $0x208] sm:$0xff] }
 0x3e2   :  { %v294_v19 = vsub.f32 %v10438_v2, %v290_v17  ;;  %v289_v20 = vpop.xlane.xlu1 %288  ;;  %v350_v17 = vld [vmem:[%s12512_s1 + $0x218] sm:$0xff] }
 0x3e3   :  { %v293_v21 = vmul.f32 0.03125, %v289_v20  ;;  %v286_v22 = vpop.xlane.xlu0 %285  ;;  %v299_v23 = vmul.f32 %v295_v18, %v295_v18  ;;  %v353_v20 = vld [vmem:[%s12512_s1 + $0x230] sm:$0xff] }
 0x3e4   :  { %v292_v24 = vmul.f32 0.03125, %v286_v22  ;;  %v298_v25 = vmul.f32 %v294_v19, %v294_v19 }
 0x3e5   :  { %v297_v26 = vsub.f32 %v10450_v10, %v293_v21  ;;  %v305_v27 = vsel %vm198_vm1, %v299_v23, 0.0 }
 0x3e6   :  { %v296_v28 = vsub.f32 %v10452_v11, %v292_v24  ;;  %306 = vadd.xlane.f32.xlu1 %v305_v27  ;;  %v302_v29 = vsel %vm198_vm1, %v298_v25, 0.0 }
 0x3e7   :  { %303 = vadd.xlane.f32.xlu0 %v302_v29  ;;  %v301_v30 = vmul.f32 %v297_v26, %v297_v26 }
 0x3e8   :  { %v300_v31 = vmul.f32 %v296_v28, %v296_v28 }
 0x3e9   :  { %v311_v32 = vsel %vm198_vm1, %v301_v30, 0.0 }
 0x3ea   :  { %312 = vadd.xlane.f32.xlu1 %v311_v32  ;;  %v308_v33 = vsel %vm198_vm1, %v300_v31, 0.0 }
 0x3eb   :  { %309 = vadd.xlane.f32.xlu0 %v308_v33 }
 0x473   :  { %v307_v41 = vpop.xlane.xlu1 %306 }
 0x474   :  { %v315_v42 = vmul.f32 0.03125, %v307_v41  ;;  %v304_v43 = vpop.xlane.xlu0 %303 }
 0x475   :  { %v314_v44 = vmul.f32 0.03125, %v304_v43 }
 0x476   :  { %v319_v45 = vadd.f32 1e-05, %v315_v42 }
 0x477   :  { %v318_v46 = vadd.f32 1e-05, %v314_v44  ;;  %v313_v47 = vpop.xlane.xlu1 %312 }
 0x478   :  { %10065 = vrsqrt.f32 %v319_v45  ;;  %v317_v48 = vmul.f32 0.03125, %v313_v47  ;;  %v310_v49 = vpop.xlane.xlu0 %309 }
 0x479   :  { %10067 = vrsqrt.f32 %v318_v46  ;;  %v316_v50 = vmul.f32 0.03125, %v310_v49 }
 0x47a   :  { %v321_v51 = vadd.f32 1e-05, %v317_v48 }
 0x47b   :  { %v320_v52 = vadd.f32 1e-05, %v316_v50 }
 0x47c   :  { %10069 = vrsqrt.f32 %v321_v51 }
 0x47d   :  { %10071 = vrsqrt.f32 %v320_v52 }
 0x482   :  { %v10066_v53 = vpop.eup %10065 }
 0x483   :  { %v10068_v55 = vpop.eup %10067  ;;  %v327_v56 = vmul.f32 %v10066_v53, %v295_v18  ;;  %v351_v18 = vld [vmem:[%s12512_s1 + $0x220] sm:$0xff] }
 0x484   :  { %v326_v58 = vmul.f32 %v10068_v55, %v294_v19  ;;  %v352_v19 = vld [vmem:[%s12512_s1 + $0x228] sm:$0xff] }
 0x485   :  { %v335_v59 = vmul.f32 %v8088_v54, %v327_v56 }
 0x486   :  { %v10070_v60 = vpop.eup %10069  ;;  %v334_v61 = vmul.f32 %v8088_v54, %v326_v58 }
 0x487   :  { %v10072_v62 = vpop.eup %10071  ;;  %v343_v63 = vadd.f32 %v8089_v57, %v335_v59  ;;  %v329_v1 = vmul.f32 %v10070_v60, %v297_v26 }
 0x488   :  { %v342_v3 = vadd.f32 %v8089_v57, %v334_v61  ;;  %v328_v4 = vmul.f32 %v10072_v62, %v296_v28 }
 0x489   :  { %v337_v6 = vmul.f32 %v8088_v54, %v329_v1 }
 0x48a   :  { %8894 = vmatprep.mubr.msk.f32.mxu0 %vm198_vm1, %v342_v3  ;;  %v9614_v7 = vpack.c.bf16 %v343_v63, %v342_v3  ;;  %v336_v8 = vmul.f32 %v8088_v54, %v328_v4 }
 0x48b   :  { %8895 = vmatmul.mubr.msk.f32.vlgmr.msra.gmra.mrb[4].mxu0 %vm198_vm1, %v343_v63  ;;  %v345_v9 = vadd.f32 %v8089_v57, %v337_v6  ;;  %v10342_v63 = vmov 0  }
 0x48c   :  { %9616 = vmatprep.subr.msk.bf16.mxu1 %vm10490_vm2, %v9614_v7  ;;  %v344_v12 = vadd.f32 %v8089_v57, %v336_v8  ;;  %9998 = vset.pattern.permute.xlu1 %v10342_v63 }
 0x48d   :  { %9619 = vmatpush3.bf16.xpose.msk.msra.mxu1 %vm10490_vm2, %v9614_v7  ;;  %9997 = vset.pattern.permute.xlu0 %v10342_v63 }
 0x48e   :  { %8897 = vmatprep.mubr.msk.f32.mxu0 %vm198_vm1, %v344_v12  ;;  %v9620_v13 = vpack.c.bf16 %v345_v9, %v344_v12 }
 0x48f   :  { %8898 = vmatmul.mubr.msk.f32.gmra.mrb[6].mxu0 %vm198_vm1, %v345_v9 }
 0x490   :  { %9622 = vmatprep.subr.msk.bf16.mxu1 %vm10490_vm2, %v9620_v13 }
 0x495   :  { %9625 = vmatpush3.bf16.xpose.msk.msra.mxu1 %vm10490_vm2, %v9620_v13  ;;  %v589_v13 = vld [vmem:[%s12512_s1 + $0x280] sm:$0xff] }
 0x49c   :  { %8875 = vmatmul.mubr.msk.f32.vlgmr.msra.gmra.mrb[0].mxu1 %vm198_vm1, %v347_v14 }
 0x49d   :  { %8877 = vmatprep.mubr.msk.f32.mxu1 %vm198_vm1, %v348_v15  ;;  %v10606_v15 = vld [vmem:[%s12512_s1 + $0x278] sm:$0xff] }
 0x4a0   :  { %8878 = vmatmul.mubr.msk.f32.gmra.mrb[2].mxu1 %vm198_vm1, %v349_v16 }
 0x4a1   :  { %8880 = vmatprep.mubr.msk.f32.mxu1 %vm198_vm1, %v350_v17 }
 0x4a4   :  { %8881 = vmatmul.mubr.msk.f32.gmra.mrb[4].mxu1 %vm198_vm1, %v351_v18 }
 0x4a5   :  { %8883 = vmatprep.mubr.msk.f32.mxu1 %vm198_vm1, %v352_v19 }
 0x4a8   :  { %8884 = vmatmul.mubr.msk.f32.gmra.mrb[6].mxu1 %vm198_vm1, %v353_v20 }
 0x55e   :  { %v10534_v21 = vpop.f32.mrb[4].mxu0 }
 0x55f   :  { %v10536_v22 = vpop.f32.mrb[5].mxu0 }
 0x560   :  { %8911 = vmatprep.mubr.msk.f32.mxu1 %vm600_vm3, %v10536_v22 }
 0x562   :  { %v10540_v23 = vpop.f32.mrb[6].mxu0 }
 0x563   :  { %v10542_v24 = vpop.f32.mrb[7].mxu0 }
 0x56f   :  { %v10544_v25 = vpop.f32.mrb[0].mxu1 }
 0x570   :  { %v10546_v26 = vpop.f32.mrb[1].mxu1  ;;  %v593_v39 = vmul.f32 %v10544_v25, %v10544_v25 }
 0x571   :  { %v592_v36 = vmul.f32 %v10546_v26, %v10546_v26 }
 0x572   :  { %v604_v61 = vsel %vm600_vm3, %v593_v39, 0.0 }
 0x573   :  { %v10548_v27 = vpop.f32.mrb[2].mxu1  ;;  %v601_v62 = vsel %vm600_vm3, %v592_v36, 0.0 }
 0x574   :  { %v10550_v28 = vpop.f32.mrb[3].mxu1  ;;  %v595_v40 = vmul.f32 %v10548_v27, %v10548_v27 }
 0x575   :  { %v594_v38 = vmul.f32 %v10550_v28, %v10550_v28 }
 0x576   :  { %v610_v1 = vsel %vm600_vm3, %v595_v40, 0.0 }
 0x577   :  { %v10552_v29 = vpop.f32.mrb[4].mxu1  ;;  %v607_v3 = vsel %vm600_vm3, %v594_v38, 0.0 }
 0x578   :  { %v597_v30 = vmul.f32 %v10552_v29, %v10552_v29  ;;  %v10556_v31 = vpop.f32.mrb[5].mxu1 }
 0x579   :  { %v596_v32 = vmul.f32 %v10556_v31, %v10556_v31 }
 0x57a   :  { %1122 = vrot.lane.b32.xlu1 %v597_v30, %s10341_s0  ;;  %v616_v57 = vsel %vm600_vm3, %v597_v30, 0.0 }
 0x57b   :  { %1120 = vrot.lane.b32.xlu0 %v596_v32, %s10341_s0  ;;  %v10562_v33 = vpop.f32.mrb[6].mxu1  ;;  %v613_v58 = vsel %vm600_vm3, %v596_v32, 0.0 }
 0x57c   :  { %v599_v34 = vmul.f32 %v10562_v33, %v10562_v33  ;;  %v10566_v35 = vpop.f32.mrb[7].mxu1 }
 0x57d   :  { %v598_v37 = vmul.f32 %v10566_v35, %v10566_v35 }
 0x57e   :  { %1126 = vrot.lane.b32.xlu1 %v599_v34, %s10341_s0  ;;  %v622_v59 = vsel %vm600_vm3, %v599_v34, 0.0 }
 0x57f   :  { %1112 = vrot.lane.b32.xlu0 %v592_v36, %s10341_s0  ;;  %v619_v60 = vsel %vm600_vm3, %v598_v37, 0.0 }
 0x582   :  { %1124 = vrot.lane.b32.xlu1 %v598_v37, %s10341_s0 }
 0x583   :  { %1116 = vrot.lane.b32.xlu0 %v594_v38, %s10341_s0 }
 0x586   :  { %1114 = vrot.lane.b32.xlu1 %v593_v39, %s10341_s0 }
 0x58a   :  { %1118 = vrot.lane.b32.xlu1 %v595_v40, %s10341_s0 }
 0x5ec   :  { %v1123_v41 = vpop.permute.xlu1 %1122 }
 0x5ed   :  { %v1121_v42 = vpop.permute.xlu0 %1120  ;;  %v1151_v43 = vsel %vm600_vm3, %v1123_v41, 0.0 }
 0x5ee   :  { %1152 = vadd.xlane.f32.xlu1 %v1151_v43  ;;  %v1148_v44 = vsel %vm600_vm3, %v1121_v42, 0.0  ;;  %v10612_v42 = vld [vmem:[%s12512_s1 + $0x258] sm:$0xff] }
 0x5ef   :  { %1149 = vadd.xlane.f32.xlu0 %v1148_v44 }
 0x5f0   :  { %v1127_v45 = vpop.permute.xlu1 %1126 }
 0x5f1   :  { %v1157_v46 = vsel %vm600_vm3, %v1127_v45, 0.0  ;;  %v1113_v48 = vpop.permute.xlu0 %1112 }
 0x5f2   :  { %v1136_v52 = vsel %vm600_vm3, %v1113_v48, 0.0 }
 0x5f3   :  { %1158 = vadd.xlane.f32.xlu0 %v1157_v46 }
 0x5f4   :  { %v1125_v47 = vpop.permute.xlu1 %1124 }
 0x5f5   :  { %v1154_v49 = vsel %vm600_vm3, %v1125_v47, 0.0  ;;  %v1117_v53 = vpop.permute.xlu0 %1116 }
 0x5f6   :  { %v1142_v56 = vsel %vm600_vm3, %v1117_v53, 0.0 }
 0x5f7   :  { %1155 = vadd.xlane.f32.xlu0 %v1154_v49 }
 0x5f8   :  { %v1115_v50 = vpop.permute.xlu1 %1114 }
 0x5f9   :  { %v1139_v51 = vsel %vm600_vm3, %v1115_v50, 0.0  ;;  %v591_v50 = vld [vmem:[%s12512_s1 + $0x290] sm:$0xff] }
 0x5fa   :  { %1140 = vadd.xlane.f32.xlu1 %v1139_v51 }
 0x5fb   :  { %1137 = vadd.xlane.f32.xlu0 %v1136_v52 }
 0x5fc   :  { %v1119_v54 = vpop.permute.xlu1 %1118 }
 0x5fd   :  { %v1145_v55 = vsel %vm600_vm3, %v1119_v54, 0.0 }
 0x5fe   :  { %1146 = vadd.xlane.f32.xlu1 %v1145_v55 }
 0x5ff   :  { %1143 = vadd.xlane.f32.xlu0 %v1142_v56 }
 0x602   :  { %617 = vadd.xlane.f32.xlu1 %v616_v57  ;;  %v590_v57 = vld [vmem:[%s12512_s1 + $0x288] sm:$0xff] }
 0x603   :  { %614 = vadd.xlane.f32.xlu0 %v613_v58 }
 0x606   :  { %623 = vadd.xlane.f32.xlu1 %v622_v59 }
 0x607   :  { %620 = vadd.xlane.f32.xlu0 %v619_v60 }
 0x60a   :  { %605 = vadd.xlane.f32.xlu1 %v604_v61 }
 0x60b   :  { %602 = vadd.xlane.f32.xlu0 %v601_v62 }
 0x60e   :  { %611 = vadd.xlane.f32.xlu1 %v610_v1  ;;  %v585_v1 = vld [vmem:[%s12512_s1 + $0x260] sm:$0xff] }
 0x60f   :  { %608 = vadd.xlane.f32.xlu0 %v607_v3 }
 0x67b   :  { %v1153_v4 = vpop.xlane.xlu1 %1152 }
 0x67c   :  { %v1165_v6 = vmax.f32 %v1153_v4, 1e-24  ;;  %v1150_v7 = vpop.xlane.xlu0 %1149 }
 0x67d   :  { %v1164_v8 = vmax.f32 %v1150_v7, 1e-24 }
 0x67e   :  { %10073 = vrsqrt.f32 %v1165_v6 }
 0x67f   :  { %10075 = vrsqrt.f32 %v1164_v8 }
 0x680   :  { %v1159_v9 = vpop.xlane.xlu0 %1158 }
 0x681   :  { %v1167_v19 = vmax.f32 %v1159_v9, 1e-24 }
 0x684   :  { %v1156_v12 = vpop.xlane.xlu0 %1155 }
 0x685   :  { %v1166_v36 = vmax.f32 %v1156_v12, 1e-24  ;;  %v586_v12 = vld [vmem:[%s12512_s1 + $0x268] sm:$0xff] }
 0x687   :  { %v1141_v14 = vpop.xlane.xlu1 %1140 }
 0x688   :  { %v10074_v16 = vpop.eup %10073  ;;  %v1138_v17 = vpop.xlane.xlu0 %1137  ;;  %v1161_v40 = vmax.f32 %v1141_v14, 1e-24 }
 0x689   :  { %v10076_v18 = vpop.eup %10075  ;;  %v1160_v20 = vmax.f32 %v1138_v17, 1e-24  ;;  %v1181_v30 = vmul.f32 %v10074_v16, %v589_v13 }
 0x68a   :  { %v1180_v32 = vmul.f32 %v10076_v18, %v10606_v15 }
 0x68b   :  { %10077 = vrsqrt.f32 %v1160_v20  ;;  %1211 = vperm.xlu1 %9998, %v1181_v30   ;;  %v1147_v34 = vpop.xlane.xlu1 %1146  ;;  %v587_v20 = vld [vmem:[%s12512_s1 + $0x270] sm:$0xff] }
 0x68c   :  { %1206 = vperm.xlu0 %9997, %v1180_v32   ;;  %10079 = vrsqrt.f32 %v1167_v19  ;;  %v1144_v37 = vpop.xlane.xlu0 %1143  ;;  %v1163_v52 = vmax.f32 %v1147_v34, 1e-24 }
 0x68d   :  { %10081 = vrsqrt.f32 %v1166_v36  ;;  %v1162_v46 = vmax.f32 %v1144_v37, 1e-24 }
 0x68f   :  { %v618_v38 = vpop.xlane.xlu1 %617 }
 0x690   :  { %v630_v39 = vmax.f32 %v618_v38, 1e-24  ;;  %v615_v43 = vpop.xlane.xlu0 %614 }
 0x691   :  { %v629_v60 = vmax.f32 %v615_v43, 1e-24 }
 0x692   :  { %10083 = vrsqrt.f32 %v630_v39 }
 0x693   :  { %v624_v41 = vpop.xlane.xlu1 %623  ;;  %10085 = vrsqrt.f32 %v1161_v40 }
 0x694   :  { %v632_v44 = vmax.f32 %v624_v41, 1e-24  ;;  %v621_v53 = vpop.xlane.xlu0 %620 }
 0x695   :  { %v10078_v45 = vpop.eup %10077  ;;  %v631_v6 = vmax.f32 %v621_v53, 1e-24 }
 0x696   :  { %10087 = vrsqrt.f32 %v632_v44  ;;  %v1176_v47 = vmul.f32 %v10078_v45, %v10612_v42  ;;  %v10080_v48 = vpop.eup %10079 }
 0x697   :  { %v606_v49 = vpop.xlane.xlu1 %605  ;;  %10089 = vrsqrt.f32 %v1162_v46  ;;  %v1183_v54 = vmul.f32 %v10080_v48, %v591_v50  ;;  %v10082_v55 = vpop.eup %10081 }
 0x698   :  { %v626_v51 = vmax.f32 %v606_v49, 1e-24  ;;  %1186 = vperm.xlu1 %9998, %v1176_v47   ;;  %v1182_v62 = vmul.f32 %v10082_v55, %v590_v57  ;;  %v603_v4 = vpop.xlane.xlu0 %602 }
 0x699   :  { %v625_v14 = vmax.f32 %v603_v4, 1e-24 }
 0x69a   :  { %10091 = vrsqrt.f32 %v626_v51 }
 0x69b   :  { %v612_v56 = vpop.xlane.xlu1 %611  ;;  %10093 = vrsqrt.f32 %v1163_v52 }
 0x69c   :  { %v10084_v58 = vpop.eup %10083  ;;  %v628_v59 = vmax.f32 %v612_v56, 1e-24  ;;  %1221 = vperm.xlu1 %9998, %v1183_v54   ;;  %v609_v17 = vpop.xlane.xlu0 %608 }
 0x69d   :  { %v646_v61 = vmul.f32 %v10084_v58, %v589_v13  ;;  %v10086_v63 = vpop.eup %10085  ;;  %v627_v32 = vmax.f32 %v609_v17, 1e-24 }
 0x69e   :  { %10095 = vrsqrt.f32 %v628_v59  ;;  %v1177_v8 = vmul.f32 %v10086_v63, %v585_v1 }
 0x69f   :  { %676 = vperm.xlu0 %9997, %v646_v61   ;;  %10097 = vrsqrt.f32 %v629_v60 }
 0x6a0   :  { %v10088_v3 = vpop.eup %10087  ;;  %1216 = vperm.xlu1 %9998, %v1182_v62   ;;  %10099 = vrsqrt.f32 %v631_v6  ;;  %v12577_v6 = vmov 0 }
 0x6a1   :  { %v648_v7 = vmul.f32 %v10088_v3, %v591_v50  ;;  %v10090_v9 = vpop.eup %10089  ;;  %10101 = vrsqrt.f32 %v625_v14  ;;  %v12578_v6 = vsel %vm10650_vm4, 4294967295, %v12577_v6 }
 0x6a2   :  { %v1178_v18 = vmul.f32 %v10090_v9, %v586_v12  ;;  %10103 = vrsqrt.f32 %v627_v32  ;;  %12579 = vst [vmem:[#allocation7_spill] sm:$0xff] %v12578_v6 }
 0x6a3   :  { %686 = vperm.xlu0 %9997, %v648_v7  }
 0x6a4   :  { %v10092_v13 = vpop.eup %10091  ;;  %1191 = vperm.xlu1 %9998, %v1177_v8  }
 0x6a5   :  { %v642_v16 = vmul.f32 %v10092_v13, %v585_v1  ;;  %v10094_v19 = vpop.eup %10093 }
 0x6a6   :  { %v1179_v36 = vmul.f32 %v10094_v19, %v587_v20 }
 0x6a7   :  { %656 = vperm.xlu0 %9997, %v642_v16  }
 0x6a8   :  { %v10096_v30 = vpop.eup %10095  ;;  %1196 = vperm.xlu1 %9998, %v1178_v18  }
 0x6a9   :  { %v644_v34 = vmul.f32 %v10096_v30, %v587_v20  ;;  %v10098_v37 = vpop.eup %10097 }
 0x6aa   :  { %v645_v38 = vmul.f32 %v10098_v37, %v10606_v15  ;;  %v10100_v39 = vpop.eup %10099 }
 0x6ab   :  { %666 = vperm.xlu0 %9997, %v644_v34   ;;  %v647_v40 = vmul.f32 %v10100_v39, %v590_v57  ;;  %v10102_v41 = vpop.eup %10101 }
 0x6ac   :  { %1201 = vperm.xlu1 %9998, %v1179_v36   ;;  %v641_v43 = vmul.f32 %v10102_v41, %v10612_v42  ;;  %v10104_v44 = vpop.eup %10103 }
 0x6ad   :  { %v643_v45 = vmul.f32 %v10104_v44, %v586_v12 }
 0x6b0   :  { %671 = vperm.xlu1 %9998, %v645_v38  }
 0x6b4   :  { %681 = vperm.xlu1 %9998, %v647_v40  }
 0x6b8   :  { %651 = vperm.xlu1 %9998, %v641_v43  }
 0x6bc   :  { %661 = vperm.xlu1 %9998, %v643_v45  }
 0x70a   :  { %v1212_v46 = vpop.permute.xlu1 %1211 }
 0x70b   :  { %v1229_v47 = vmul.f32 %v10552_v29, %v1212_v46  ;;  %v1207_v48 = vpop.permute.xlu0 %1206 }
 0x70c   :  { %v1228_v49 = vmul.f32 %v1207_v48, %v10556_v31 }
 0x70e   :  { %v9999_v50 = vpack.i.bf16 %v1229_v47, %v1228_v49 }
 0x710   :  { %10000 = vrot.lane.b32.xlu1 %v9999_v50, %s10341_s0 }
 0x717   :  { %v1187_v15 = vpop.permute.xlu1 %1186 }
 0x718   :  { %v1224_v51 = vmul.f32 %v1187_v15, %v10546_v26 }
 0x71a   :  { %1234 = vrot.lane.b32.xlu1 %v1224_v51, %s10341_s0 }
 0x71b   :  { %v1222_v52 = vpop.permute.xlu1 %1221 }
 0x71c   :  { %v1231_v53 = vmul.f32 %v10562_v33, %v1222_v52 }
 0x71e   :  { %v677_v60 = vpop.permute.xlu0 %676 }
 0x71f   :  { %v1217_v42 = vpop.permute.xlu1 %1216  ;;  %v694_v1 = vmul.f32 %v10552_v29, %v677_v60 }
 0x720   :  { %v1230_v54 = vmul.f32 %v1217_v42, %v10566_v35 }
 0x722   :  { %v10004_v55 = vpack.i.bf16 %v1231_v53, %v1230_v54  ;;  %v687_v4 = vpop.permute.xlu0 %686 }
 0x723   :  { %v1192_v56 = vpop.permute.xlu1 %1191  ;;  %v696_v9 = vmul.f32 %v10562_v33, %v687_v4 }
 0x724   :  { %10005 = vrot.lane.b32.xlu0 %v10004_v55, %s10341_s0  ;;  %v1225_v57 = vmul.f32 %v10544_v25, %v1192_v56 }
 0x727   :  { %v1197_v58 = vpop.permute.xlu1 %1196 }
 0x728   :  { %v1226_v59 = vmul.f32 %v1197_v58, %v10550_v28  ;;  %1236 = vrot.lane.b32.xlu0 %v1225_v57, %s10341_s0 }
 0x72a   :  { %1440 = vrot.lane.b32.xlu1 %v1226_v59, %s10341_s0 }
 0x72b   :  { %v1202_v61 = vpop.permute.xlu1 %1201 }
 0x72c   :  { %v1227_v62 = vmul.f32 %v10548_v27, %v1202_v61 }
 0x72e   :  { %1442 = vrot.lane.b32.xlu0 %v1227_v62, %s10341_s0 }
 0x72f   :  { %v672_v63 = vpop.permute.xlu1 %671 }
 0x730   :  { %v693_v3 = vmul.f32 %v672_v63, %v10556_v31  ;;  %v657_v31 = vpop.permute.xlu0 %656 }
 0x731   :  { %v690_v16 = vmul.f32 %v10544_v25, %v657_v31 }
 0x732   :  { %v9634_v7 = vpack.c.bf16 %v694_v1, %v693_v3 }
 0x733   :  { %v682_v8 = vpop.permute.xlu1 %681 }
 0x734   :  { %v695_v12 = vmul.f32 %v682_v8, %v10566_v35  ;;  %9636 = vmatprep.subr.msk.bf16.mxu0 %vm10650_vm4, %v9634_v7  ;;  %v667_v17 = vpop.permute.xlu0 %666 }
 0x735   :  { %9639 = vmatpush3.bf16.xpose.msk.msra.mxu0 %vm10650_vm4, %v9634_v7 }
 0x736   :  { %v9646_v29 = vpack.c.bf16 %v696_v9, %v695_v12 }
 0x737   :  { %v652_v13 = vpop.permute.xlu1 %651 }
 0x738   :  { %v689_v14 = vmul.f32 %v652_v13, %v10546_v26  ;;  %9648 = vmatprep.subr.msk.bf16.mxu0 %vm10650_vm4, %v9646_v29  ;;  %v692_v26 = vmul.f32 %v10548_v27, %v667_v17 }
 0x73a   :  { %8904 = vmatprep.mubr.msk.f32.mxu0 %vm600_vm3, %v689_v14 }
 0x73b   :  { %v662_v33 = vpop.permute.xlu1 %661 }
 0x73c   :  { %v691_v35 = vmul.f32 %v662_v33, %v10550_v28  ;;  %8905 = vmatmul.mubr.msk.f32.vlgmr.msra.gmra.mrb[8].mxu0 %vm600_vm3, %v690_v16 }
 0x73d   :  { %9651 = vmatpush3.bf16.xpose.msk.msra.mxu0 %vm10650_vm4, %v9646_v29 }
 0x73e   :  { %8918 = vmatprep.mubr.msk.f32.mxu0 %vm600_vm3, %v691_v35 }
 0x744   :  { %8919 = vmatmul.mubr.msk.f32.vlgmr.msra.gmra.mrb[10].mxu0 %vm600_vm3, %v692_v26 }
 0x782   :  { %v10001_v18 = vpop.permute.xlu1 %10000 }
 0x783   :  { %v10003_v19 = vunpack.i.h.bf16 %v10001_v18  ;;  %v10002_v25 = vunpack.i.l.bf16 %v10001_v18 }
 0x785   :  { %v9658_v20 = vpack.c.bf16 %v10003_v19, %v10002_v25 }
 0x787   :  { %9660 = vmatprep.subr.msk.bf16.mxu0 %vm10650_vm4, %v9658_v20 }
 0x788   :  { %9663 = vmatpush3.bf16.xpose.msk.msra.mxu0 %vm10650_vm4, %v9658_v20 }
 0x78c   :  { %v1235_v28 = vpop.permute.xlu1 %1234 }
 0x78d   :  { %8932 = vmatprep.mubr.msk.f32.mxu0 %vm600_vm3, %v1235_v28 }
 0x796   :  { %v10006_v30 = vpop.permute.xlu0 %10005 }
 0x797   :  { %v10008_v32 = vunpack.i.h.bf16 %v10006_v30  ;;  %v10007_v34 = vunpack.i.l.bf16 %v10006_v30 }
 0x799   :  { %v9670_v36 = vpack.c.bf16 %v10008_v32, %v10007_v34 }
 0x79a   :  { %v1237_v27 = vpop.permute.xlu0 %1236 }
 0x79b   :  { %8933 = vmatmul.mubr.msk.f32.vlgmr.msra.gmra.mrb[12].mxu0 %vm600_vm3, %v1237_v27  ;;  %9672 = vmatprep.subr.msk.bf16.mxu0 %vm10650_vm4, %v9670_v36 }
 0x79c   :  { %v1441_v37 = vpop.permute.xlu1 %1440  ;;  %9675 = vmatpush3.bf16.xpose.msk.msra.mxu0 %vm10650_vm4, %v9670_v36 }
 0x79d   :  { %8946 = vmatprep.mubr.msk.f32.mxu0 %vm600_vm3, %v1441_v37 }
 0x7a0   :  { %v1443_v38 = vpop.permute.xlu0 %1442 }
 0x7a3   :  { %8947 = vmatmul.mubr.msk.f32.vlgmr.msra.gmra.mrb[14].mxu0 %vm600_vm3, %v1443_v38 }
 0x80f   :  { %v8906_v39 = vpop.f32.mrb[8].mxu0 }
 0x810   :  { %v775_v40 = vpop.f32.mrb[9].mxu0  ;;  %v787_v41 = vsel %vm600_vm3, %v8906_v39, -inf }
 0x811   :  { %788 = vmax.xlane.f32.xlu0 %v787_v41  ;;  %v784_v43 = vsel %vm600_vm3, %v775_v40, -inf }
 0x812   :  { %785 = vmax.xlane.f32.xlu1 %v784_v43 }
 0x817   :  { %v8920_v44 = vpop.f32.mrb[10].mxu0 }
 0x818   :  { %v973_v45 = vpop.f32.mrb[11].mxu0  ;;  %v985_v46 = vsel %vm600_vm3, %v8920_v44, -inf }
 0x819   :  { %986 = vmax.xlane.f32.xlu1 %v985_v46  ;;  %v982_v47 = vsel %vm600_vm3, %v973_v45, -inf }
 0x81a   :  { %983 = vmax.xlane.f32.xlu0 %v982_v47 }
 0x86e   :  { %v8934_v48 = vpop.f32.mrb[12].mxu0 }
 0x86f   :  { %v1318_v49 = vpop.f32.mrb[13].mxu0  ;;  %v1330_v50 = vsel %vm600_vm3, %v8934_v48, -inf }
 0x870   :  { %1331 = vmax.xlane.f32.xlu1 %v1330_v50  ;;  %v1327_v15 = vsel %vm600_vm3, %v1318_v49, -inf }
 0x871   :  { %1328 = vmax.xlane.f32.xlu0 %v1327_v15 }
 0x876   :  { %v8948_v51 = vpop.f32.mrb[14].mxu0 }
 0x877   :  { %v1524_v52 = vpop.f32.mrb[15].mxu0  ;;  %v1536_v42 = vsel %vm600_vm3, %v8948_v51, -inf }
 0x878   :  { %1537 = vmax.xlane.f32.xlu1 %v1536_v42  ;;  %v1533_v53 = vsel %vm600_vm3, %v1524_v52, -inf }
 0x879   :  { %1534 = vmax.xlane.f32.xlu0 %v1533_v53 }
 0x89e   :  { %v789_v54 = vpop.xlane.xlu0 %788 }
 0x89f   :  { %v791_v55 = vsub.f32 %v8906_v39, %v789_v54  ;;  %v786_v56 = vpop.xlane.xlu1 %785 }
 0x8a0   :  { %v790_v57 = vsub.f32 %v775_v40, %v786_v56 }
 0x8a1   :  { %v794_v58 = vmul.f32 1.442695, %v791_v55 }
 0x8a2   :  { %v792_v59 = vmul.f32 1.442695, %v790_v57 }
 0x8a3   :  { %10105 = vpow2.f32 %v794_v58 }
 0x8a4   :  { %10107 = vpow2.f32 %v792_v59 }
 0x8a6   :  { %v987_v60 = vpop.xlane.xlu1 %986 }
 0x8a7   :  { %v989_v61 = vsub.f32 %v8920_v44, %v987_v60  ;;  %v984_v62 = vpop.xlane.xlu0 %983 }
 0x8a8   :  { %v988_v63 = vsub.f32 %v973_v45, %v984_v62 }
 0x8a9   :  { %v992_v1 = vmul.f32 1.442695, %v989_v61 }
 0x8aa   :  { %v990_v3 = vmul.f32 1.442695, %v988_v63 }
 0x8ab   :  { %10109 = vpow2.f32 %v992_v1 }
 0x8ac   :  { %10111 = vpow2.f32 %v990_v3 }
 0x8ad   :  { %v10106_v4 = vpop.eup %10105 }
 0x8ae   :  { %v10108_v7 = vpop.eup %10107  ;;  %v799_v8 = vsel %vm600_vm3, %v10106_v4, 0.0 }
 0x8af   :  { %800 = vadd.xlane.f32.xlu1 %v799_v8  ;;  %v796_v9 = vsel %vm600_vm3, %v10108_v7, 0.0 }
 0x8b0   :  { %797 = vadd.xlane.f32.xlu0 %v796_v9 }
 0x8b5   :  { %v10110_v12 = vpop.eup %10109 }
 0x8b6   :  { %v10112_v29 = vpop.eup %10111  ;;  %v997_v31 = vsel %vm600_vm3, %v10110_v12, 0.0 }
 0x8b7   :  { %998 = vadd.xlane.f32.xlu1 %v997_v31  ;;  %v994_v13 = vsel %vm600_vm3, %v10112_v29, 0.0 }
 0x8b8   :  { %995 = vadd.xlane.f32.xlu0 %v994_v13  ;;  %v1660_v13 = vld [vmem:[%s12512_s1 + $0x2a8] sm:$0xff] }
 0x8fd   :  { %v1332_v14 = vpop.xlane.xlu1 %1331 }
 0x8fe   :  { %v1334_v16 = vsub.f32 %v8934_v48, %v1332_v14  ;;  %v1329_v33 = vpop.xlane.xlu0 %1328  ;;  %v1661_v14 = vld [vmem:[%s12512_s1 + $0x2b0] sm:$0xff] }
 0x8ff   :  { %v1333_v35 = vsub.f32 %v1318_v49, %v1329_v33 }
 0x900   :  { %v1337_v17 = vmul.f32 1.442695, %v1334_v16  ;;  %v9686_v16 = vpack.c.bf16 %v1661_v14, %v1660_v13  ;;  %v8143_v14 = vld [vmem:[%s12512_s1 + $0x2c0] ss:$0 sm:$0xff] }
 0x901   :  { %v1335_v26 = vmul.f32 1.442695, %v1333_v35 }
 0x902   :  { %10113 = vpow2.f32 %v1337_v17 }
 0x903   :  { %10115 = vpow2.f32 %v1335_v26 }
 0x905   :  { %v1538_v18 = vpop.xlane.xlu1 %1537 }
 0x906   :  { %v1540_v19 = vsub.f32 %v8948_v51, %v1538_v18  ;;  %v1535_v25 = vpop.xlane.xlu0 %1534 }
 0x907   :  { %v1539_v20 = vsub.f32 %v1524_v52, %v1535_v25 }
 0x908   :  { %v1543_v28 = vmul.f32 1.442695, %v1540_v19 }
 0x909   :  { %v1541_v30 = vmul.f32 1.442695, %v1539_v20 }
 0x90a   :  { %10117 = vpow2.f32 %v1543_v28 }
 0x90b   :  { %10119 = vpow2.f32 %v1541_v30 }
 0x90c   :  { %v10114_v32 = vpop.eup %10113 }
 0x90d   :  { %v10116_v34 = vpop.eup %10115  ;;  %v1342_v36 = vsel %vm600_vm3, %v10114_v32, 0.0 }
 0x90e   :  { %1343 = vadd.xlane.f32.xlu1 %v1342_v36  ;;  %v1339_v27 = vsel %vm600_vm3, %v10116_v34, 0.0 }
 0x90f   :  { %1340 = vadd.xlane.f32.xlu0 %v1339_v27 }
 0x914   :  { %v10118_v37 = vpop.eup %10117 }
 0x915   :  { %v10120_v38 = vpop.eup %10119  ;;  %v1548_v39 = vsel %vm600_vm3, %v10118_v37, 0.0 }
 0x916   :  { %1549 = vadd.xlane.f32.xlu1 %v1548_v39  ;;  %v1545_v40 = vsel %vm600_vm3, %v10120_v38, 0.0 }
 0x917   :  { %1546 = vadd.xlane.f32.xlu0 %v1545_v40 }
 0x927   :  { %1006 = vrot.lane.b32.xlu1 %v10534_v21, %s10341_s0 }
 0x92b   :  { %1555 = vrot.lane.b32.xlu1 %v10542_v24, %s10341_s0 }
 0x92d   :  { %1004 = vrot.lane.b32.xlu0 %v10536_v22, %s10341_s0 }
 0x931   :  { %1557 = vrot.lane.b32.xlu0 %v10540_v23, %s10341_s0 }
 0x93c   :  { %v801_v41 = vpop.xlane.xlu1 %800 }
 0x93d   :  { %10121 = vrcp.f32 %v801_v41  ;;  %v798_v43 = vpop.xlane.xlu0 %797 }
 0x93e   :  { %10123 = vrcp.f32 %v798_v43 }
 0x944   :  { %v999_v44 = vpop.xlane.xlu1 %998 }
 0x945   :  { %10125 = vrcp.f32 %v999_v44  ;;  %v996_v45 = vpop.xlane.xlu0 %995 }
 0x946   :  { %10127 = vrcp.f32 %v996_v45 }
 0x947   :  { %v10122_v46 = vpop.eup %10121 }
 0x948   :  { %v10124_v47 = vpop.eup %10123  ;;  %v805_v48 = vmul.f32 %v10122_v46, %v10106_v4 }
 0x949   :  { %v804_v49 = vmul.f32 %v10124_v47, %v10108_v7 }
 0x94b   :  { %v9640_v50 = vpack.c.bf16 %v805_v48, %v804_v49 }
 0x94d   :  { %9642 = vmatprep.subr.msk.bf16.mxu1 %vm10650_vm4, %v9640_v50 }
 0x94e   :  { %9645 = vmatpush3.bf16.xpose.msk.msra.mxu1 %vm10650_vm4, %v9640_v50 }
 0x94f   :  { %v10126_v22 = vpop.eup %10125 }
 0x950   :  { %v10128_v15 = vpop.eup %10127  ;;  %v1003_v51 = vmul.f32 %v10126_v22, %v10110_v12 }
 0x951   :  { %v1002_v52 = vmul.f32 %v10128_v15, %v10112_v29  ;;  %v1659_v29 = vld [vmem:[%s12512_s1 + $0x2a0] sm:$0xff] }
 0x953   :  { %v9652_v42 = vpack.c.bf16 %v1003_v51, %v1002_v52 }
 0x955   :  { %8912 = vmatmul.mubr.msk.f32.vlgmr.msra.gmra.mrb[8].mxu1 %vm600_vm3, %v10534_v21  ;;  %9654 = vmatprep.subr.msk.bf16.mxu1 %vm10650_vm4, %v9652_v42 }
 0x956   :  { %9657 = vmatpush3.bf16.xpose.msk.msra.mxu1 %vm10650_vm4, %v9652_v42 }
 0x99b   :  { %v1344_v53 = vpop.xlane.xlu1 %1343 }
 0x99c   :  { %10129 = vrcp.f32 %v1344_v53  ;;  %v1341_v54 = vpop.xlane.xlu0 %1340 }
 0x99d   :  { %10131 = vrcp.f32 %v1341_v54 }
 0x9a3   :  { %v1550_v55 = vpop.xlane.xlu1 %1549 }
 0x9a4   :  { %10133 = vrcp.f32 %v1550_v55  ;;  %v1547_v56 = vpop.xlane.xlu0 %1546 }
 0x9a5   :  { %10135 = vrcp.f32 %v1547_v56 }
 0x9a6   :  { %v10130_v57 = vpop.eup %10129 }
 0x9a7   :  { %v10132_v58 = vpop.eup %10131  ;;  %v1348_v59 = vmul.f32 %v10130_v57, %v10114_v32  ;;  %v1007_v21 = vpop.permute.xlu1 %1006 }
 0x9a8   :  { %v1005_v60 = vpop.permute.xlu0 %1004  ;;  %v1347_v61 = vmul.f32 %v10132_v58, %v10116_v34 }
 0x9a9   :  { %8925 = vmatprep.mubr.msk.f32.mxu1 %vm600_vm3, %v1005_v60 }
 0x9aa   :  { %8926 = vmatmul.mubr.msk.f32.vlgmr.msra.gmra.mrb[10].mxu1 %vm600_vm3, %v1007_v21  ;;  %v9664_v62 = vpack.c.bf16 %v1348_v59, %v1347_v61 }
 0x9ab   :  { %8939 = vmatprep.mubr.msk.f32.mxu1 %vm600_vm3, %v10542_v24  ;;  %v1556_v8 = vpop.permute.xlu1 %1555 }
 0x9ac   :  { %9666 = vmatprep.subr.msk.bf16.mxu1 %vm10650_vm4, %v9664_v62  ;;  %v1558_v24 = vpop.permute.xlu0 %1557 }
 0x9ad   :  { %9669 = vmatpush3.bf16.xpose.msk.msra.mxu1 %vm10650_vm4, %v9664_v62 }
 0x9ae   :  { %v10134_v63 = vpop.eup %10133 }
 0x9af   :  { %v10136_v1 = vpop.eup %10135  ;;  %v1554_v3 = vmul.f32 %v10134_v63, %v10118_v37 }
 0x9b0   :  { %v1553_v4 = vmul.f32 %v10136_v1, %v10120_v38  ;;  %v8142_v38 = vld [vmem:[%s12512_s1 + $0x2b8] ss:$0 sm:$0xff] }
 0x9b2   :  { %v9676_v7 = vpack.c.bf16 %v1554_v3, %v1553_v4 }
 0x9b4   :  { %8940 = vmatmul.mubr.msk.f32.vlgmr.msra.gmra.mrb[12].mxu1 %vm600_vm3, %v10540_v23  ;;  %9678 = vmatprep.subr.msk.bf16.mxu1 %vm10650_vm4, %v9676_v7  ;;  %v1658_v23 = vld [vmem:[%s12512_s1 + $0x298] sm:$0xff] }
 0x9b5   :  { %9681 = vmatpush3.bf16.xpose.msk.msra.mxu1 %vm10650_vm4, %v9676_v7  ;;  %8953 = vmatprep.mubr.msk.f32.mxu1 %vm600_vm3, %v1556_v8  ;;  %v9682_v31 = vpack.c.bf16 %v1659_v29, %v1658_v23  ;;  %v10796_v7 = vld [vmem:[%s12512_s1 + $0x78] sm:$0xff] }
 0x9b6   :  { %v10803_v8 = vld [vmem:[%s12512_s1 + $0xd8] sm:$0xff] }
 0x9b7   :  { %9683 = vmatprep.subr.bf16.mxu0 %v9682_v31 }
 0x9b8   :  { %9685 = vmatpush3.bf16.msra.mxu0 %v9682_v31 }
 0x9b9   :  { %9687 = vmatprep.subr.bf16.mxu0 %v9686_v16 }
 0x9bc   :  { %8954 = vmatmul.mubr.msk.f32.vlgmr.msra.gmra.mrb[14].mxu1 %vm600_vm3, %v1558_v24  ;;  %9689 = vmatpush3.bf16.msra.mxu0 %v9686_v16 }
 0x9bd   :  { %8978 = vmatprep.mubr.msk.f32.mxu1 %vm198_vm1, %v10796_v7 }
 0xa28   :  { %v8913_v9 = vpop.f32.mrb[8].mxu1 }
 0xa29   :  { %894 = vst.msk [vmem:[#allocation2 + $0x8] sm:$0xff] %vm600_vm3, %v8913_v9  ;;  %v884_v12 = vpop.f32.mrb[9].mxu1 }
 0xa2a   :  { %893 = vst.msk [vmem:[#allocation2] sm:$0xff] %vm600_vm3, %v884_v12 }
 0xa7d   :  { %v8927_v33 = vpop.f32.mrb[10].mxu1 }
 0xa7e   :  { %1097 = vrot.lane.b32.xlu0 %v8927_v33, %s10343_s13  ;;  %v1084_v35 = vpop.f32.mrb[11].mxu1 }
 0xa7f   :  { %1095 = vrot.lane.b32.xlu1 %v1084_v35, %s10343_s13  ;;  %v8144_v35 = vld [vmem:[%s12512_s1 + $0x2c8] ss:$0 sm:$0xff] }
 0xa87   :  { %v8941_v17 = vpop.f32.mrb[12].mxu1 }
 0xa88   :  { %1437 = vst.msk [vmem:[#allocation2 + $0x18] sm:$0xff] %vm600_vm3, %v8941_v17  ;;  %v1427_v26 = vpop.f32.mrb[13].mxu1 }
 0xa89   :  { %1436 = vst.msk [vmem:[#allocation2 + $0x10] sm:$0xff] %vm600_vm3, %v1427_v26 }
 0xa8f   :  { %v8955_v18 = vpop.f32.mrb[14].mxu1 }
 0xa90   :  { %1648 = vrot.lane.b32.xlu0 %v8955_v18, %s10343_s13  ;;  %v1635_v19 = vpop.f32.mrb[15].mxu1 }
 0xa91   :  { %1646 = vrot.lane.b32.xlu1 %v1635_v19, %s10343_s13 }
 0xaf0   :  { %v1098_v25 = vpop.permute.xlu0 %1097 }
 0xaf1   :  { %1103 = vst.msk [vmem:[#allocation2 + $0x8] sm:$0xff] %vm1101_vm5, %v1098_v25  ;;  %v1096_v20 = vpop.permute.xlu1 %1095 }
 0xaf2   :  { %1102 = vst.msk [vmem:[#allocation2] sm:$0xff] %vm1101_vm5, %v1096_v20 }
 0xaf8   :  { %v1655_v30 = vld [vmem:[#allocation2 + $0x8] sm:$0xff] }
 0xaf9   :  { %v1654_v28 = vld [vmem:[#allocation2] sm:$0xff] }
 0xafa   :  { %8964 = vmatprep.mubr.msk.f32.mxu0 %vm198_vm1, %v1654_v28 }
 0xafb   :  { %8965 = vmatmul.mubr.msk.f32.vlgmr.msra.gmra.mrb[16].mxu0 %vm198_vm1, %v1655_v30 }
 0xb02   :  { %v1649_v32 = vpop.permute.xlu0 %1648 }
 0xb03   :  { %1653 = vst.msk [vmem:[#allocation2 + $0x18] sm:$0xff] %vm1101_vm5, %v1649_v32  ;;  %v1647_v34 = vpop.permute.xlu1 %1646 }
 0xb04   :  { %1652 = vst.msk [vmem:[#allocation2 + $0x10] sm:$0xff] %vm1101_vm5, %v1647_v34 }
 0xb0a   :  { %v1657_v27 = vld [vmem:[#allocation2 + $0x18] sm:$0xff] }
 0xb0b   :  { %v1656_v36 = vld [vmem:[#allocation2 + $0x10] sm:$0xff] }
 0xb0c   :  { %8967 = vmatprep.mubr.msk.f32.mxu0 %vm198_vm1, %v1656_v36 }
 0xb0d   :  { %8968 = vmatmul.mubr.msk.f32.gmra.mrb[18].mxu0 %vm198_vm1, %v1657_v27 }
 0xb0e   :  { %9004 = vmatprep.mubr.msk.f32.mxu0 %vm198_vm1, %v10803_v8 }
 0xbce   :  { %v8966_v37 = vpop.f32.mrb[16].mxu0 }
 0xbcf   :  { %v1760_v39 = vadd.f32 %v8966_v37, %v10436_v0  ;;  %v1740_v40 = vpop.f32.mrb[17].mxu0 }
 0xbd0   :  { %v1759_v41 = vadd.f32 %v1740_v40, %v10438_v2 }
 0xbd1   :  { %v10767_v43 = vadd.f32 %v8142_v38, %v1760_v39 }
 0xbd2   :  { %v10769_v44 = vadd.f32 %v8142_v38, %v1759_v41 }
 0xbd3   :  { %12580 = vst [vmem:[#allocation8_spill] sm:$0xff] %v10767_v43  ;;  %v1777_v45 = vsel %vm198_vm1, %v10767_v43, 0.0 }
 0xbd4   :  { %12581 = vst [vmem:[#allocation9_spill] sm:$0xff] %v10769_v44  ;;  %1778 = vadd.xlane.f32.xlu0 %v1777_v45  ;;  %v1774_v46 = vsel %vm198_vm1, %v10769_v44, 0.0 }
 0xbd5   :  { %1775 = vadd.xlane.f32.xlu1 %v1774_v46 }
 0xbe0   :  { %v8969_v47 = vpop.f32.mrb[18].mxu0 }
 0xbe1   :  { %v1762_v48 = vadd.f32 %v8969_v47, %v10450_v10  ;;  %v1750_v49 = vpop.f32.mrb[19].mxu0 }
 0xbe2   :  { %v1761_v0 = vadd.f32 %v1750_v49, %v10452_v11  ;;  %v10816_v49 = vld [vmem:[%s12512_s1 + $0x80] sm:$0xff] }
 0xbe3   :  { %v10777_v50 = vadd.f32 %v8142_v38, %v1762_v48 }
 0xbe4   :  { %v10779_v2 = vadd.f32 %v8142_v38, %v1761_v0  ;;  %v10821_v0 = vld [vmem:[%s12512_s1 + $0xe0] sm:$0xff] }
 0xbe5   :  { %12582 = vst [vmem:[#allocation10_spill] sm:$0xff] %v10777_v50  ;;  %v1783_v22 = vsel %vm198_vm1, %v10777_v50, 0.0 }
 0xbe6   :  { %12583 = vst [vmem:[#allocation11_spill] sm:$0xff] %v10779_v2  ;;  %1784 = vadd.xlane.f32.xlu1 %v1783_v22  ;;  %v1780_v15 = vsel %vm198_vm1, %v10779_v2, 0.0  ;;  %v10826_v22 = vld [vmem:[%s12512_s1 + $0x88] sm:$0xff] }
 0xbe7   :  { %1781 = vadd.xlane.f32.xlu0 %v1780_v15  ;;  %v10831_v15 = vld [vmem:[%s12512_s1 + $0xe8] sm:$0xff] }
 0xc61   :  { %v1779_v51 = vpop.xlane.xlu0 %1778 }
 0xc62   :  { %v1787_v52 = vmul.f32 0.03125, %v1779_v51  ;;  %v1776_v42 = vpop.xlane.xlu1 %1775  ;;  %v10842_v51 = vld [vmem:[%s12512_s1 + $0x90] sm:$0xff] }
 0xc63   :  { %v1786_v53 = vmul.f32 0.03125, %v1776_v42  ;;  %v10852_v42 = vld [vmem:[%s12512_s1 + $0x98] sm:$0xff] }
 0xc64   :  { %v1791_v10 = vsub.f32 %v10767_v43, %v1787_v52  ;;  %v10847_v52 = vld [vmem:[%s12512_s1 + $0xf0] sm:$0xff] }
 0xc65   :  { %v1790_v11 = vsub.f32 %v10769_v44, %v1786_v53  ;;  %v10859_v53 = vld [vmem:[%s12512_s1 + $0xf8] sm:$0xff] }
 0xc66   :  { %v1795_v54 = vmul.f32 %v1791_v10, %v1791_v10 }
 0xc67   :  { %v1794_v55 = vmul.f32 %v1790_v11, %v1790_v11 }
 0xc68   :  { %v1801_v56 = vsel %vm198_vm1, %v1795_v54, 0.0  ;;  %v10880_v54 = vld [vmem:[%s12512_s1 + $0xa8] sm:$0xff] }
 0xc69   :  { %1802 = vadd.xlane.f32.xlu1 %v1801_v56  ;;  %v1798_v57 = vsel %vm198_vm1, %v1794_v55, 0.0  ;;  %v10887_v55 = vld [vmem:[%s12512_s1 + $0x108] sm:$0xff]  ;;  %v10898_v56 = vld [vmem:[%s12512_s1 + $0xb0] sm:$0xff] }
 0xc6a   :  { %1799 = vadd.xlane.f32.xlu0 %v1798_v57  ;;  %v10905_v57 = vld [vmem:[%s12512_s1 + $0x110] sm:$0xff] }
 0xc73   :  { %v1785_v58 = vpop.xlane.xlu1 %1784 }
 0xc74   :  { %v1789_v59 = vmul.f32 0.03125, %v1785_v58  ;;  %v1782_v60 = vpop.xlane.xlu0 %1781  ;;  %v10910_v58 = vld [vmem:[%s12512_s1 + $0xb8] sm:$0xff] }
 0xc75   :  { %v1788_v61 = vmul.f32 0.03125, %v1782_v60  ;;  %v10926_v60 = vld [vmem:[%s12512_s1 + $0xc0] sm:$0xff] }
 0xc76   :  { %v1793_v21 = vsub.f32 %v10777_v50, %v1789_v59  ;;  %v10915_v59 = vld [vmem:[%s12512_s1 + $0x118] sm:$0xff] }
 0xc77   :  { %v1792_v62 = vsub.f32 %v10779_v2, %v1788_v61  ;;  %v10933_v61 = vld [vmem:[%s12512_s1 + $0x120] sm:$0xff] }
 0xc78   :  { %v1797_v63 = vmul.f32 %v1793_v21, %v1793_v21 }
 0xc79   :  { %v1796_v1 = vmul.f32 %v1792_v62, %v1792_v62 }
 0xc7a   :  { %v1807_v3 = vsel %vm198_vm1, %v1797_v63, 0.0  ;;  %v10954_v63 = vld [vmem:[%s12512_s1 + $0xd0] sm:$0xff] }
 0xc7b   :  { %1808 = vadd.xlane.f32.xlu1 %v1807_v3  ;;  %v1804_v4 = vsel %vm198_vm1, %v1796_v1, 0.0  ;;  %v10961_v1 = vld [vmem:[%s12512_s1 + $0x130] sm:$0xff]  ;;  %v10966_v3 = vld [vmem:[%s12512_s1 + $0x138] sm:$0xff] }
 0xc7c   :  { %1805 = vadd.xlane.f32.xlu0 %v1804_v4  ;;  %12584 = vst [vmem:[#allocation12_spill] sm:$0xff] %v10966_v3  ;;  %v10977_v4 = vld [vmem:[%s12512_s1 + $0x140] sm:$0xff] }
 0xc7d   :  { %12585 = vst [vmem:[#allocation13_spill] sm:$0xff] %v10977_v4 }
 0xcf6   :  { %v1803_v24 = vpop.xlane.xlu1 %1802 }
 0xcf7   :  { %v1811_v9 = vmul.f32 0.03125, %v1803_v24  ;;  %v1800_v12 = vpop.xlane.xlu0 %1799  ;;  %v10984_v24 = vld [vmem:[%s12512_s1 + $0x148] sm:$0xff] }
 0xcf8   :  { %v1810_v23 = vmul.f32 0.03125, %v1800_v12  ;;  %12586 = vst [vmem:[#allocation14_spill] sm:$0xff] %v10984_v24  ;;  %v11007_v12 = vld [vmem:[%s12512_s1 + $0x160] sm:$0xff] }
 0xcf9   :  { %v1815_v29 = vadd.f32 1e-05, %v1811_v9  ;;  %v10993_v9 = vld [vmem:[%s12512_s1 + $0x150] sm:$0xff]  ;;  %12589 = vst [vmem:[#allocation17_spill] sm:$0xff] %v11007_v12 }
 0xcfa   :  { %v1814_v31 = vadd.f32 1e-05, %v1810_v23  ;;  %12587 = vst [vmem:[#allocation15_spill] sm:$0xff] %v10993_v9  ;;  %v11012_v23 = vld [vmem:[%s12512_s1 + $0x168] sm:$0xff] }
 0xcfb   :  { %10137 = vrsqrt.f32 %v1815_v29  ;;  %12590 = vst [vmem:[#allocation18_spill] sm:$0xff] %v11012_v23  ;;  %v11021_v29 = vld [vmem:[%s12512_s1 + $0x170] sm:$0xff] }
 0xcfc   :  { %10139 = vrsqrt.f32 %v1814_v31  ;;  %12591 = vst [vmem:[#allocation19_spill] sm:$0xff] %v11021_v29  ;;  %v11026_v31 = vld [vmem:[%s12512_s1 + $0x178] sm:$0xff] }
 0xcfd   :  { %12592 = vst [vmem:[#allocation20_spill] sm:$0xff] %v11026_v31 }
 0xd05   :  { %v10138_v13 = vpop.eup %10137 }
 0xd06   :  { %v10140_v16 = vpop.eup %10139  ;;  %v1823_v33 = vmul.f32 %v10138_v13, %v1791_v10  ;;  %v10870_v10 = vld [vmem:[%s12512_s1 + $0xa0] sm:$0xff] }
 0xd07   :  { %v1822_v17 = vmul.f32 %v10140_v16, %v1790_v11  ;;  %v10875_v11 = vld [vmem:[%s12512_s1 + $0x100] sm:$0xff]  ;;  %v11049_v16 = vld [vmem:[%s12512_s1 + $0x190] sm:$0xff] }
 0xd08   :  { %v1831_v26 = vmul.f32 %v8143_v14, %v1823_v33  ;;  %v1809_v18 = vpop.xlane.xlu1 %1808  ;;  %v11035_v13 = vld [vmem:[%s12512_s1 + $0x180] sm:$0xff]  ;;  %12595 = vst [vmem:[#allocation23_spill] sm:$0xff] %v11049_v16  ;;  %v2018_v33 = vlaneseq }
 0xd09   :  { %v1830_v19 = vmul.f32 %v8143_v14, %v1822_v17  ;;  %v1813_v25 = vmul.f32 0.03125, %v1809_v18  ;;  %v1806_v20 = vpop.xlane.xlu0 %1805  ;;  %12593 = vst [vmem:[#allocation21_spill] sm:$0xff] %v11035_v13 }
 0xd0a   :  { %v1839_v28 = vadd.f32 %v8144_v35, %v1831_v26  ;;  %v1812_v30 = vmul.f32 0.03125, %v1806_v20 }
 0xd0b   :  { %v1838_v32 = vadd.f32 %v8144_v35, %v1830_v19  ;;  %v1817_v34 = vadd.f32 1e-05, %v1813_v25 }
 0xd0c   :  { %v1816_v36 = vadd.f32 1e-05, %v1812_v30 }
 0xd0d   :  { %10141 = vrsqrt.f32 %v1817_v34  ;;  %v9690_v27 = vpack.c.bf16 %v1839_v28, %v1838_v32  ;;  %v11066_v28 = vld [vmem:[%s12512_s1 + $0x2d0] sm:$0xff] }
 0xd0e   :  { %10143 = vrsqrt.f32 %v1816_v36 }
 0xd0f   :  { %9691 = vmatprep.subr.bf16.mxu1 %v9690_v27  ;;  %9699 = vmatprep.subr.bf16.mxu0 %v9690_v27 }
 0xd10   :  { %9693 = vmatpush3.bf16.msra.mxu1 %v9690_v27  ;;  %9701 = vmatpush3.bf16.msra.mxu0 %v9690_v27 }
 0xd17   :  { %v10142_v37 = vpop.eup %10141 }
 0xd18   :  { %v10144_v38 = vpop.eup %10143  ;;  %v1825_v39 = vmul.f32 %v10142_v37, %v1793_v21  ;;  %v10938_v21 = vld [vmem:[%s12512_s1 + $0xc8] sm:$0xff] }
 0xd19   :  { %v1824_v40 = vmul.f32 %v10144_v38, %v1792_v62  ;;  %v10943_v62 = vld [vmem:[%s12512_s1 + $0x128] sm:$0xff] }
 0xd1a   :  { %v1833_v41 = vmul.f32 %v8143_v14, %v1825_v39 }
 0xd1b   :  { %v1832_v45 = vmul.f32 %v8143_v14, %v1824_v40  ;;  %v11040_v14 = vld [vmem:[%s12512_s1 + $0x188] sm:$0xff] }
 0xd1c   :  { %v1841_v46 = vadd.f32 %v8144_v35, %v1833_v41  ;;  %12594 = vst [vmem:[#allocation22_spill] sm:$0xff] %v11040_v14 }
 0xd1d   :  { %v1840_v47 = vadd.f32 %v8144_v35, %v1832_v45  ;;  %v11055_v35 = vshrl.u32 %v2018_v33, 7 }
 0xd1f   :  { %v9694_v48 = vpack.c.bf16 %v1841_v46, %v1840_v47  ;;  %v11058_v18 = vsub.s32 0, %v11055_v35  ;;  %v11061_v25 = vsub.s32 1, %v11055_v35  ;;  %v11073_v38 = vsub.s32 2, %v11055_v35 }
 0xd20   :  { %v11076_v46 = vsub.s32 3, %v11055_v35  ;;  %v11079_v5 = vsub.s32 4, %v11055_v35 }
 0xd21   :  { %9695 = vmatprep.subr.bf16.mxu1 %v9694_v48  ;;  %9703 = vmatprep.subr.bf16.mxu0 %v9694_v48  ;;  %12596 = vst [vmem:[#allocation24_spill] sm:$0xff] %v11058_v18  ;;  %12597 = vst [vmem:[#allocation25_spill] sm:$0xff] %v11061_v25  ;;  %v2021_v32 = vrot.slane %v11066_v28, %v11058_v18  ;;  %v2033_v36 = vrot.slane %v11066_v28, %v11061_v25 }
 0xd22   :  { %9697 = vmatpush3.bf16.msra.mxu1 %v9694_v48  ;;  %9705 = vmatpush3.bf16.msra.mxu0 %v9694_v48  ;;  %12598 = vst [vmem:[#allocation26_spill] sm:$0xff] %v11073_v38  ;;  %12599 = vst [vmem:[#allocation27_spill] sm:$0xff] %v11076_v46  ;;  %v2045_v44 = vrot.slane %v11066_v28, %v11073_v38  ;;  %v2230_v18 = vrot.slane %v11066_v28, %v11076_v46 }
 0xd23   :  { %9707 = vmatprep.subr.bf16.mxu1 %v9690_v27  ;;  %12600 = vst [vmem:[#allocation28_spill] sm:$0xff] %v11079_v5 }
 0xd25   :  { %8979 = vmatmul.mubr.msk.f32.vlgmr.msra.gmra.mrb[16].mxu1 %vm198_vm1, %v10816_v49  ;;  %9005 = vmatmul.mubr.msk.f32.vlgmr.msra.gmra.mrb[20].mxu0 %vm198_vm1, %v10821_v0 }
 0xd26   :  { %9709 = vmatpush3.bf16.msra.mxu1 %v9690_v27  ;;  %8981 = vmatprep.mubr.msk.f32.mxu1 %vm198_vm1, %v10826_v22 }
 0xd27   :  { %9711 = vmatprep.subr.bf16.mxu1 %v9694_v48  ;;  %9007 = vmatprep.mubr.msk.f32.mxu0 %vm198_vm1, %v10831_v15 }
 0xd29   :  { %8982 = vmatmul.mubr.msk.f32.gmra.mrb[18].mxu1 %vm198_vm1, %v10842_v51  ;;  %9008 = vmatmul.mubr.msk.f32.gmra.mrb[22].mxu0 %vm198_vm1, %v10847_v52 }
 0xd2a   :  { %9713 = vmatpush3.bf16.msra.mxu1 %v9694_v48  ;;  %8984 = vmatprep.mubr.msk.f32.mxu1 %vm198_vm1, %v10852_v42 }
 0xd2b   :  { %9010 = vmatprep.mubr.msk.f32.mxu0 %vm198_vm1, %v10859_v53 }
 0xd2d   :  { %8985 = vmatmul.mubr.msk.f32.gmra.mrb[20].mxu1 %vm198_vm1, %v10870_v10  ;;  %9011 = vmatmul.mubr.msk.f32.gmra.mrb[24].mxu0 %vm198_vm1, %v10875_v11 }
 0xd2e   :  { %8987 = vmatprep.mubr.msk.f32.mxu1 %vm198_vm1, %v10880_v54  ;;  %9013 = vmatprep.mubr.msk.f32.mxu0 %vm198_vm1, %v10887_v55 }
 0xd31   :  { %8988 = vmatmul.mubr.msk.f32.gmra.mrb[22].mxu1 %vm198_vm1, %v10898_v56  ;;  %9014 = vmatmul.mubr.msk.f32.gmra.mrb[26].mxu0 %vm198_vm1, %v10905_v57 }
 0xd32   :  { %8990 = vmatprep.mubr.msk.f32.mxu1 %vm198_vm1, %v10910_v58  ;;  %9016 = vmatprep.mubr.msk.f32.mxu0 %vm198_vm1, %v10915_v59 }
 0xd35   :  { %8991 = vmatmul.mubr.msk.f32.gmra.mrb[24].mxu1 %vm198_vm1, %v10926_v60  ;;  %9017 = vmatmul.mubr.msk.f32.gmra.mrb[28].mxu0 %vm198_vm1, %v10933_v61 }
 0xd36   :  { %8993 = vmatprep.mubr.msk.f32.mxu1 %vm198_vm1, %v10938_v21  ;;  %9019 = vmatprep.mubr.msk.f32.mxu0 %vm198_vm1, %v10943_v62 }
 0xd39   :  { %8994 = vmatmul.mubr.msk.f32.gmra.mrb[26].mxu1 %vm198_vm1, %v10954_v63  ;;  %9020 = vmatmul.mubr.msk.f32.gmra.mrb[30].mxu0 %vm198_vm1, %v10961_v1 }
 0xd3a   :  { %9030 = vmatprep.mubr.msk.f32.mxu1 %vm198_vm1, %v10966_v3  ;;  %9056 = vmatprep.mubr.msk.f32.mxu0 %vm198_vm1, %v10796_v7  ;;  %v10998_v7 = vld [vmem:[%s12512_s1 + $0x158] sm:$0xff] }
 0xd3b   :  { %12588 = vst [vmem:[#allocation16_spill] sm:$0xff] %v10998_v7 }
 0xd3d   :  { %9031 = vmatmul.mubr.msk.f32.vlgmr.msra.gmra.mrb[28].mxu1 %vm198_vm1, %v10977_v4 }
 0xd3e   :  { %9033 = vmatprep.mubr.msk.f32.mxu1 %vm198_vm1, %v10984_v24 }
 0xd41   :  { %9034 = vmatmul.mubr.msk.f32.gmra.mrb[30].mxu1 %vm198_vm1, %v10993_v9 }
 0xd42   :  { %9036 = vmatprep.mubr.msk.f32.mxu1 %vm198_vm1, %v10998_v7 }
 0xd45   :  { %9037 = vmatmul.mubr.msk.f32.gmra.mrb[32].mxu1 %vm198_vm1, %v11007_v12 }
 0xd46   :  { %9039 = vmatprep.mubr.msk.f32.mxu1 %vm198_vm1, %v11012_v23 }
 0xd49   :  { %9040 = vmatmul.mubr.msk.f32.gmra.mrb[34].mxu1 %vm198_vm1, %v11021_v29 }
 0xd4a   :  { %9042 = vmatprep.mubr.msk.f32.mxu1 %vm198_vm1, %v11026_v31 }
 0xd4d   :  { %9043 = vmatmul.mubr.msk.f32.gmra.mrb[36].mxu1 %vm198_vm1, %v11035_v13 }
 0xd4e   :  { %9045 = vmatprep.mubr.msk.f32.mxu1 %vm198_vm1, %v11040_v14 }
 0xd51   :  { %9046 = vmatmul.mubr.msk.f32.gmra.mrb[38].mxu1 %vm198_vm1, %v11049_v16 }
 0xd52   :  { %9082 = vmatprep.mubr.msk.f32.mxu1 %vm198_vm1, %v10803_v8 }
 0xdf8   :  { %v8980_v17 = vpop.f32.mrb[16].mxu1  ;;  %v9006_v26 = vpop.f32.mrb[20].mxu0 }
 0xdf9   :  { %v1959_v19 = vpop.f32.mrb[17].mxu1  ;;  %v2168_v20 = vpop.f32.mrb[21].mxu0  ;;  %v2023_v40 = vmul.f32 %v8980_v17, %v2021_v32 }
 0xdfa   :  { %v2022_v48 = vmul.f32 %v2021_v32, %v1959_v19  ;;  %v11086_v19 = vsub.s32 5, %v11055_v35  ;;  %v2231_v23 = vmul.f32 %v2230_v18, %v2168_v20 }
 0xdfc   :  { %v8983_v30 = vpop.f32.mrb[18].mxu1  ;;  %v9009_v8 = vpop.f32.mrb[22].mxu0  ;;  %12601 = vst [vmem:[#allocation29_spill] sm:$0xff] %v11086_v19  ;;  %v2254_v46 = vrot.slane %v11066_v28, %v11086_v19 }
 0xdfd   :  { %v1969_v34 = vpop.f32.mrb[19].mxu1  ;;  %v2178_v27 = vpop.f32.mrb[23].mxu0  ;;  %v2025_v25 = vmul.f32 %v8983_v30, %v2021_v32  ;;  %v11091_v30 = vsub.s32 6, %v11055_v35 }
 0xdfe   :  { %v2233_v24 = vmul.f32 %v2230_v18, %v2178_v27 }
 0xdff   :  { %12602 = vst [vmem:[#allocation30_spill] sm:$0xff] %v11091_v30 }
 0xe00   :  { %v8986_v37 = vpop.f32.mrb[20].mxu1  ;;  %v9012_v39 = vpop.f32.mrb[24].mxu0 }
 0xe01   :  { %v2035_v41 = vmul.f32 %v8986_v37, %v2033_v36  ;;  %v1979_v45 = vpop.f32.mrb[21].mxu1  ;;  %v2188_v47 = vpop.f32.mrb[25].mxu0 }
 0xe02   :  { %v2034_v33 = vmul.f32 %v2033_v36, %v1979_v45 }
 0xe03   :  { %v2039_v6 = vadd.f32 %v2035_v41, %v2023_v40  ;;  %v2024_v40 = vmul.f32 %v2021_v32, %v1969_v34 }
 0xe04   :  { %v2038_v2 = vadd.f32 %v2034_v33, %v2022_v48  ;;  %v8989_v50 = vpop.f32.mrb[22].mxu1  ;;  %v9015_v43 = vpop.f32.mrb[26].mxu0  ;;  %v2242_v48 = vrot.slane %v11066_v28, %v11079_v5  ;;  %v2234_v5 = vmul.f32 %v9009_v8, %v2230_v18 }
 0xe05   :  { %v2037_v17 = vmul.f32 %v8989_v50, %v2033_v36  ;;  %v1989_v37 = vpop.f32.mrb[23].mxu1  ;;  %v2198_v16 = vpop.f32.mrb[27].mxu0  ;;  %v2232_v50 = vmul.f32 %v9006_v26, %v2230_v18 }
 0xe06   :  { %v2036_v41 = vmul.f32 %v2033_v36, %v1989_v37 }
 0xe07   :  { %v2041_v45 = vadd.f32 %v2037_v17, %v2025_v25  ;;  %v2244_v25 = vmul.f32 %v9012_v39, %v2242_v48  ;;  %v2243_v17 = vmul.f32 %v2242_v48, %v2188_v47  ;;  %v2245_v47 = vmul.f32 %v2242_v48, %v2198_v16 }
 0xe08   :  { %v2040_v33 = vadd.f32 %v2036_v41, %v2024_v40  ;;  %v8992_v14 = vpop.f32.mrb[24].mxu1  ;;  %v9018_v38 = vpop.f32.mrb[28].mxu0  ;;  %v2439_v40 = vrot.slane %v11066_v28, %v11091_v30  ;;  %v11098_v30 = vsub.s32 7, %v11055_v35 }
 0xe09   :  { %v2047_v13 = vmul.f32 %v8992_v14, %v2045_v44  ;;  %v1999_v31 = vpop.f32.mrb[25].mxu1  ;;  %v2208_v29 = vpop.f32.mrb[29].mxu0  ;;  %v2256_v7 = vmul.f32 %v9018_v38, %v2254_v46 }
 0xe0a   :  { %v2046_v32 = vmul.f32 %v2045_v44, %v1999_v31  ;;  %v2255_v20 = vmul.f32 %v2254_v46, %v2208_v29  ;;  %v2451_v35 = vrot.slane %v11066_v28, %v11098_v30 }
 0xe0b   :  { %v2051_v34 = vadd.f32 %v2047_v13, %v2039_v6  ;;  %v2246_v13 = vmul.f32 %v9015_v43, %v2242_v48 }
 0xe0c   :  { %v2050_v36 = vadd.f32 %v2046_v32, %v2038_v2  ;;  %v8995_v37 = vpop.f32.mrb[26].mxu1  ;;  %v9021_v41 = vpop.f32.mrb[30].mxu0 }
 0xe0d   :  { %v2236_v12 = vadd.f32 %v2232_v50, %v2051_v34  ;;  %v2049_v26 = vmul.f32 %v8995_v37, %v2045_v44  ;;  %v2009_v14 = vpop.f32.mrb[27].mxu1  ;;  %v2218_v9 = vpop.f32.mrb[31].mxu0  ;;  %v2258_v38 = vmul.f32 %v9021_v41, %v2254_v46 }
 0xe0e   :  { %v2235_v19 = vadd.f32 %v2231_v23, %v2050_v36  ;;  %v2048_v4 = vmul.f32 %v2045_v44, %v2009_v14  ;;  %v2257_v44 = vmul.f32 %v2254_v46, %v2218_v9 }
 0xe0f   :  { %v2248_v31 = vadd.f32 %v2244_v25, %v2236_v12  ;;  %v2053_v6 = vadd.f32 %v2049_v26, %v2041_v45 }
 0xe10   :  { %v2247_v2 = vadd.f32 %v2243_v17, %v2235_v19  ;;  %v2052_v39 = vadd.f32 %v2048_v4, %v2040_v33  ;;  %v9032_v32 = vpop.f32.mrb[28].mxu1 }
 0xe11   :  { %v2238_v8 = vadd.f32 %v2234_v5, %v2053_v6  ;;  %v2260_v50 = vadd.f32 %v2256_v7, %v2248_v31  ;;  %v2441_v34 = vmul.f32 %v9032_v32, %v2439_v40  ;;  %v2377_v37 = vpop.f32.mrb[29].mxu1 }
 0xe12   :  { %v2237_v3 = vadd.f32 %v2233_v24, %v2052_v39  ;;  %v2259_v18 = vadd.f32 %v2255_v20, %v2247_v2  ;;  %v2440_v23 = vmul.f32 %v2439_v40, %v2377_v37  ;;  %v8181_v20 = vld [vmem:[%s12512_s1 + $0x2d8] ss:$0 sm:$0xff]  ;;  %v8182_v2 = vld [vmem:[%s12512_s1 + $0x2e0] ss:$0 sm:$0xff] }
 0xe13   :  { %v2250_v29 = vadd.f32 %v2246_v13, %v2238_v8  ;;  %v2445_v12 = vadd.f32 %v2441_v34, %v2260_v50 }
 0xe14   :  { %v2249_v27 = vadd.f32 %v2245_v47, %v2237_v3  ;;  %v2444_v43 = vadd.f32 %v2440_v23, %v2259_v18  ;;  %v9035_v19 = vpop.f32.mrb[30].mxu1 }
 0xe15   :  { %v2262_v4 = vadd.f32 %v2258_v38, %v2250_v29  ;;  %v2443_v16 = vmul.f32 %v9035_v19, %v2439_v40  ;;  %v2387_v45 = vpop.f32.mrb[31].mxu1 }
 0xe16   :  { %v2261_v5 = vadd.f32 %v2257_v44, %v2249_v27  ;;  %v2442_v7 = vmul.f32 %v2439_v40, %v2387_v45 }
 0xe17   :  { %v2447_v48 = vadd.f32 %v2443_v16, %v2262_v4 }
 0xe18   :  { %v2446_v33 = vadd.f32 %v2442_v7, %v2261_v5  ;;  %v9038_v25 = vpop.f32.mrb[32].mxu1 }
 0xe19   :  { %v2453_v24 = vmul.f32 %v9038_v25, %v2451_v35  ;;  %v2397_v36 = vpop.f32.mrb[33].mxu1 }
 0xe1a   :  { %v2452_v17 = vmul.f32 %v2451_v35, %v2397_v36 }
 0xe1b   :  { %v2457_v9 = vadd.f32 %v2453_v24, %v2445_v12 }
 0xe1c   :  { %v2456_v46 = vadd.f32 %v2452_v17, %v2444_v43  ;;  %v9041_v41 = vpop.f32.mrb[34].mxu1 }
 0xe1d   :  { %v2455_v3 = vmul.f32 %v9041_v41, %v2451_v35  ;;  %v2407_v26 = vpop.f32.mrb[35].mxu1 }
 0xe1e   :  { %v2454_v14 = vmul.f32 %v2451_v35, %v2407_v26 }
 0xe1f   :  { %v2459_v31 = vadd.f32 %v2455_v3, %v2447_v48 }
 0xe20   :  { %v2458_v28 = vadd.f32 %v2454_v14, %v2446_v33  ;;  %v9044_v6 = vpop.f32.mrb[36].mxu1 }
 0xe21   :  { %v2465_v40 = vmul.f32 %v9044_v6, %v8181_v20  ;;  %v2417_v13 = vpop.f32.mrb[37].mxu1 }
 0xe22   :  { %v2464_v39 = vmul.f32 %v8181_v20, %v2417_v13 }
 0xe23   :  { %v2469_v47 = vadd.f32 %v2465_v40, %v2457_v9 }
 0xe24   :  { %v2468_v32 = vadd.f32 %v2464_v39, %v2456_v46  ;;  %v9047_v8 = vpop.f32.mrb[38].mxu1 }
 0xe25   :  { %v2477_v50 = vadd.f32 %v8182_v2, %v2469_v47  ;;  %v2467_v34 = vmul.f32 %v9047_v8, %v8181_v20  ;;  %v2427_v37 = vpop.f32.mrb[39].mxu1 }
 0xe26   :  { %v2476_v38 = vadd.f32 %v8182_v2, %v2468_v32  ;;  %v2466_v18 = vmul.f32 %v8181_v20, %v2427_v37 }
 0xe27   :  { %v2481_v23 = vsel %vm198_vm1, %v2477_v50, 0.0  ;;  %v2471_v44 = vadd.f32 %v2467_v34, %v2459_v31 }
 0xe28   :  { %v2480_v29 = vsel %vm198_vm1, %v2476_v38, 0.0  ;;  %v2470_v12 = vadd.f32 %v2466_v18, %v2458_v28 }
 0xe29   :  { %v2482_v27 = vadd.f32 %v2481_v23, %v2480_v29  ;;  %v2479_v43 = vadd.f32 %v8182_v2, %v2471_v44  ;;  %v8183_v44 = vld [vmem:[%s12512_s1 + $0x2e8] ss:$0 sm:$0xff] }
 0xe2a   :  { %v2478_v19 = vadd.f32 %v8182_v2, %v2470_v12 }
 0xe2b   :  { %v2485_v45 = vsel %vm198_vm1, %v2479_v43, 0.0 }
 0xe2c   :  { %v2483_v4 = vsel %vm198_vm1, %v2478_v19, 0.0 }
 0xe2d   :  { %v2484_v16 = vadd.f32 %v2483_v4, %v2482_v27 }
 0xe2f   :  { %v2486_v35 = vadd.f32 %v2485_v45, %v2484_v16 }
 0xe31   :  { %v2487_v5 = vrot.slane %v2486_v35, 4 }
 0xe33   :  { %v2488_v7 = vadd.f32 %v2487_v5, %v2486_v35 }
 0xe35   :  { %v2489_v48 = vrot.slane %v2488_v7, 2 }
 0xe37   :  { %v2490_v33 = vadd.f32 %v2489_v48, %v2488_v7 }
 0xe39   :  { %v2491_v25 = vrot.slane %v2490_v33, 1 }
 0xe3b   :  { %v2492_v24 = vadd.f32 %v2491_v25, %v2490_v33 }
 0xe3d   :  { %v2493_v36 = vmul.f32 0.03125, %v2492_v24 }
 0xe3f   :  { %v2494_v17 = vsub.f32 %v2476_v38, %v2493_v36  ;;  %v2495_v9 = vsub.f32 %v2477_v50, %v2493_v36  ;;  %v2496_v46 = vsub.f32 %v2478_v19, %v2493_v36  ;;  %v2497_v41 = vsub.f32 %v2479_v43, %v2493_v36  ;;  %v8184_v19 = vld [vmem:[%s12512_s1 + $0x2f0] ss:$0 sm:$0xff] }
 0xe41   :  { %v2498_v3 = vmul.f32 %v2494_v17, %v2494_v17  ;;  %v2499_v26 = vmul.f32 %v2495_v9, %v2495_v9  ;;  %v2500_v14 = vmul.f32 %v2496_v46, %v2496_v46  ;;  %v2501_v20 = vmul.f32 %v2497_v41, %v2497_v41 }
 0xe43   :  { %v2502_v31 = vsel %vm198_vm1, %v2498_v3, 0.0  ;;  %v2503_v28 = vsel %vm198_vm1, %v2499_v26, 0.0  ;;  %v2505_v40 = vsel %vm198_vm1, %v2500_v14, 0.0  ;;  %v2507_v2 = vsel %vm198_vm1, %v2501_v20, 0.0 }
 0xe44   :  { %v2504_v6 = vadd.f32 %v2503_v28, %v2502_v31 }
 0xe46   :  { %v2506_v13 = vadd.f32 %v2505_v40, %v2504_v6 }
 0xe48   :  { %v2508_v39 = vadd.f32 %v2507_v2, %v2506_v13 }
 0xe4a   :  { %v2509_v47 = vrot.slane %v2508_v39, 4 }
 0xe4c   :  { %v2510_v32 = vadd.f32 %v2509_v47, %v2508_v39 }
 0xe4e   :  { %v2511_v8 = vrot.slane %v2510_v32, 2 }
 0xe50   :  { %v2512_v50 = vadd.f32 %v2511_v8, %v2510_v32 }
 0xe52   :  { %v2513_v34 = vrot.slane %v2512_v50, 1 }
 0xe54   :  { %v2514_v37 = vadd.f32 %v2513_v34, %v2512_v50 }
 0xe56   :  { %v2515_v38 = vmul.f32 0.03125, %v2514_v37 }
 0xe58   :  { %v2516_v18 = vadd.f32 1e-05, %v2515_v38 }
 0xe5a   :  { %10145 = vrsqrt.f32 %v2516_v18 }
 0xe64   :  { %v10146_v23 = vpop.eup %10145 }
 0xe65   :  { %v2518_v29 = vmul.f32 %v10146_v23, %v2494_v17  ;;  %v2519_v12 = vmul.f32 %v10146_v23, %v2495_v9  ;;  %v2520_v27 = vmul.f32 %v10146_v23, %v2496_v46  ;;  %v2521_v43 = vmul.f32 %v10146_v23, %v2497_v41 }
 0xe67   :  { %v2527_v4 = vmul.f32 %v8183_v44, %v2518_v29  ;;  %v2528_v16 = vmul.f32 %v8183_v44, %v2519_v12  ;;  %v2529_v45 = vmul.f32 %v8183_v44, %v2520_v27  ;;  %v2530_v35 = vmul.f32 %v8183_v44, %v2521_v43 }
 0xe69   :  { %v2536_v5 = vadd.f32 %v8184_v19, %v2527_v4  ;;  %v2537_v7 = vadd.f32 %v8184_v19, %v2528_v16  ;;  %v2538_v48 = vadd.f32 %v8184_v19, %v2529_v45  ;;  %v2539_v33 = vadd.f32 %v8184_v19, %v2530_v35 }
 0xe6b   :  { %v2546_v25 = vmul.f32 0.044715, %v2538_v48  ;;  %v2544_v24 = vmul.f32 0.044715, %v2536_v5  ;;  %v2545_v36 = vmul.f32 0.044715, %v2537_v7 }
 0xe6c   :  { %v2547_v3 = vmul.f32 0.044715, %v2539_v33  ;;  %v2540_v34 = vmul.f32 0.5, %v2536_v5  ;;  %v2541_v18 = vmul.f32 0.5, %v2537_v7  ;;  %v2542_v12 = vmul.f32 0.5, %v2538_v48 }
 0xe6d   :  { %v2550_v17 = vmul.f32 %v2546_v25, %v2538_v48  ;;  %v2548_v9 = vmul.f32 %v2544_v24, %v2536_v5  ;;  %v2549_v46 = vmul.f32 %v2545_v36, %v2537_v7  ;;  %v2543_v19 = vmul.f32 0.5, %v2539_v33 }
 0xe6e   :  { %v2551_v41 = vmul.f32 %v2547_v3, %v2539_v33 }
 0xe6f   :  { %v2554_v26 = vmul.f32 %v2550_v17, %v2538_v48  ;;  %v2552_v14 = vmul.f32 %v2548_v9, %v2536_v5  ;;  %v2553_v20 = vmul.f32 %v2549_v46, %v2537_v7 }
 0xe70   :  { %v2555_v31 = vmul.f32 %v2551_v41, %v2539_v33 }
 0xe71   :  { %v2558_v28 = vadd.f32 %v2554_v26, %v2538_v48  ;;  %v2556_v6 = vadd.f32 %v2552_v14, %v2536_v5  ;;  %v2557_v40 = vadd.f32 %v2553_v20, %v2537_v7  ;;  %v12616_v5 = vld [vmem:[#allocation25_spill] sm:$0xff] }
 0xe72   :  { %v2559_v13 = vadd.f32 %v2555_v31, %v2539_v33 }
 0xe73   :  { %v2560_v2 = vmul.f32 0.7978846, %v2556_v6  ;;  %v2562_v39 = vmul.f32 0.7978846, %v2558_v28  ;;  %v2561_v47 = vmul.f32 0.7978846, %v2557_v40 }
 0xe74   :  { %v2563_v32 = vmul.f32 0.7978846, %v2559_v13  ;;  %v12617_v13 = vld [vmem:[#allocation27_spill] sm:$0xff] }
 0xe75   :  { %10147 = vtanh.f32 %v2560_v2 }
 0xe76   :  { %10149 = vtanh.f32 %v2561_v47 }
 0xe77   :  { %10151 = vtanh.f32 %v2562_v39  ;;  %v12618_v39 = vld [vmem:[#allocation26_spill] sm:$0xff] }
 0xe78   :  { %10153 = vtanh.f32 %v2563_v32 }
 0xe7f   :  { %v10148_v8 = vpop.eup %10147 }
 0xe80   :  { %v10150_v50 = vpop.eup %10149  ;;  %v2568_v37 = vadd.f32 1.0, %v10148_v8 }
 0xe81   :  { %v10152_v38 = vpop.eup %10151  ;;  %v2569_v23 = vadd.f32 1.0, %v10150_v50 }
 0xe82   :  { %v10154_v44 = vpop.eup %10153  ;;  %v2572_v29 = vmul.f32 %v2568_v37, %v2540_v34  ;;  %v2570_v27 = vadd.f32 1.0, %v10152_v38  ;;  %v12619_v37 = vld [vmem:[#allocation28_spill] sm:$0xff] }
 0xe83   :  { %v2573_v43 = vmul.f32 %v2569_v23, %v2541_v18  ;;  %v2571_v4 = vadd.f32 1.0, %v10154_v44 }
 0xe84   :  { %v2574_v16 = vmul.f32 %v2570_v27, %v2542_v12 }
 0xe85   :  { %v9714_v45 = vpack.c.bf16 %v2573_v43, %v2572_v29  ;;  %v2575_v35 = vmul.f32 %v2571_v4, %v2543_v19  ;;  %v12620_v43 = vld [vmem:[#allocation29_spill] sm:$0xff] }
 0xe87   :  { %9715 = vmatprep.subr.bf16.mxu0 %v9714_v45  ;;  %9723 = vmatprep.subr.bf16.mxu1 %v9714_v45  ;;  %v9718_v25 = vpack.c.bf16 %v2575_v35, %v2574_v16 }
 0xe88   :  { %9717 = vmatpush3.bf16.msra.mxu0 %v9714_v45  ;;  %9725 = vmatpush3.bf16.msra.mxu1 %v9714_v45 }
 0xe89   :  { %9719 = vmatprep.subr.bf16.mxu0 %v9718_v25  ;;  %9727 = vmatprep.subr.bf16.mxu1 %v9718_v25 }
 0xe8c   :  { %9721 = vmatpush3.bf16.msra.mxu0 %v9718_v25  ;;  %9729 = vmatpush3.bf16.msra.mxu1 %v9718_v25 }
 0xe8d   :  { %9731 = vmatprep.subr.bf16.mxu0 %v9714_v45 }
 0xe8f   :  { %9057 = vmatmul.mubr.msk.f32.vlgmr.msra.gmra.mrb[32].mxu0 %vm198_vm1, %v10816_v49  ;;  %9083 = vmatmul.mubr.msk.f32.vlgmr.msra.gmra.mrb[40].mxu1 %vm198_vm1, %v10821_v0  ;;  %v12603_v49 = vld [vmem:[#allocation12_spill] sm:$0xff]  ;;  %v12604_v0 = vld [vmem:[#allocation13_spill] sm:$0xff] }
 0xe90   :  { %9733 = vmatpush3.bf16.msra.mxu0 %v9714_v45  ;;  %9059 = vmatprep.mubr.msk.f32.mxu0 %vm198_vm1, %v10826_v22  ;;  %v12605_v22 = vld [vmem:[#allocation14_spill] sm:$0xff] }
 0xe91   :  { %9735 = vmatprep.subr.bf16.mxu0 %v9718_v25  ;;  %9085 = vmatprep.mubr.msk.f32.mxu1 %vm198_vm1, %v10831_v15  ;;  %v12606_v15 = vld [vmem:[#allocation15_spill] sm:$0xff] }
 0xe93   :  { %9060 = vmatmul.mubr.msk.f32.gmra.mrb[34].mxu0 %vm198_vm1, %v10842_v51  ;;  %9086 = vmatmul.mubr.msk.f32.gmra.mrb[42].mxu1 %vm198_vm1, %v10847_v52  ;;  %v12607_v51 = vld [vmem:[#allocation16_spill] sm:$0xff]  ;;  %v12608_v52 = vld [vmem:[#allocation17_spill] sm:$0xff] }
 0xe94   :  { %9737 = vmatpush3.bf16.msra.mxu0 %v9718_v25  ;;  %9062 = vmatprep.mubr.msk.f32.mxu0 %vm198_vm1, %v10852_v42  ;;  %v12609_v42 = vld [vmem:[#allocation18_spill] sm:$0xff] }
 0xe95   :  { %9088 = vmatprep.mubr.msk.f32.mxu1 %vm198_vm1, %v10859_v53  ;;  %v12610_v53 = vld [vmem:[#allocation19_spill] sm:$0xff] }
 0xe97   :  { %9063 = vmatmul.mubr.msk.f32.gmra.mrb[36].mxu0 %vm198_vm1, %v10870_v10  ;;  %9089 = vmatmul.mubr.msk.f32.gmra.mrb[44].mxu1 %vm198_vm1, %v10875_v11  ;;  %v12611_v10 = vld [vmem:[#allocation20_spill] sm:$0xff]  ;;  %v12612_v11 = vld [vmem:[#allocation21_spill] sm:$0xff] }
 0xe98   :  { %9065 = vmatprep.mubr.msk.f32.mxu0 %vm198_vm1, %v10880_v54  ;;  %9091 = vmatprep.mubr.msk.f32.mxu1 %vm198_vm1, %v10887_v55  ;;  %v12613_v54 = vld [vmem:[#allocation22_spill] sm:$0xff]  ;;  %v12614_v55 = vld [vmem:[#allocation23_spill] sm:$0xff] }
 0xe9b   :  { %9066 = vmatmul.mubr.msk.f32.gmra.mrb[38].mxu0 %vm198_vm1, %v10898_v56  ;;  %9092 = vmatmul.mubr.msk.f32.gmra.mrb[46].mxu1 %vm198_vm1, %v10905_v57 }
 0xe9c   :  { %9068 = vmatprep.mubr.msk.f32.mxu0 %vm198_vm1, %v10910_v58  ;;  %9094 = vmatprep.mubr.msk.f32.mxu1 %vm198_vm1, %v10915_v59 }
 0xe9f   :  { %9069 = vmatmul.mubr.msk.f32.gmra.mrb[40].mxu0 %vm198_vm1, %v10926_v60  ;;  %9095 = vmatmul.mubr.msk.f32.gmra.mrb[48].mxu1 %vm198_vm1, %v10933_v61  ;;  %v11193_v60 = vld [vmem:[%s12512_s1 + $0x2f8] sm:$0xff] }
 0xea0   :  { %9071 = vmatprep.mubr.msk.f32.mxu0 %vm198_vm1, %v10938_v21  ;;  %9097 = vmatprep.mubr.msk.f32.mxu1 %vm198_vm1, %v10943_v62  ;;  %v12615_v62 = vld [vmem:[#allocation24_spill] sm:$0xff]  ;;  %v2719_v7 = vrot.slane %v11193_v60, %v12616_v5  ;;  %v2868_v2 = vrot.slane %v11193_v60, %v12617_v13  ;;  %v2731_v47 = vrot.slane %v11193_v60, %v12618_v39 }
 0xea1   :  { %v2880_v38 = vrot.slane %v11193_v60, %v12619_v37  ;;  %v2892_v19 = vrot.slane %v11193_v60, %v12620_v43 }
 0xea3   :  { %9072 = vmatmul.mubr.msk.f32.gmra.mrb[42].mxu0 %vm198_vm1, %v10954_v63  ;;  %9098 = vmatmul.mubr.msk.f32.gmra.mrb[50].mxu1 %vm198_vm1, %v10961_v1  ;;  %v2707_v63 = vrot.slane %v11193_v60, %v12615_v62 }
 0xea4   :  { %9108 = vmatprep.mubr.msk.f32.mxu0 %vm198_vm1, %v12603_v49 }
 0xea7   :  { %9109 = vmatmul.mubr.msk.f32.vlgmr.msra.gmra.mrb[44].mxu0 %vm198_vm1, %v12604_v0 }
 0xea8   :  { %9111 = vmatprep.mubr.msk.f32.mxu0 %vm198_vm1, %v12605_v22 }
 0xeab   :  { %9112 = vmatmul.mubr.msk.f32.gmra.mrb[46].mxu0 %vm198_vm1, %v12606_v15  ;;  %v12621_v15 = vld [vmem:[#allocation30_spill] sm:$0xff] }
 0xeac   :  { %9114 = vmatprep.mubr.msk.f32.mxu0 %vm198_vm1, %v12607_v51  ;;  %v3029_v51 = vrot.slane %v11193_v60, %v12621_v15 }
 0xeaf   :  { %9115 = vmatmul.mubr.msk.f32.gmra.mrb[48].mxu0 %vm198_vm1, %v12608_v52 }
 0xeb0   :  { %9117 = vmatprep.mubr.msk.f32.mxu0 %vm198_vm1, %v12609_v42 }
 0xeb3   :  { %9118 = vmatmul.mubr.msk.f32.gmra.mrb[50].mxu0 %vm198_vm1, %v12610_v53 }
 0xeb4   :  { %9120 = vmatprep.mubr.msk.f32.mxu0 %vm198_vm1, %v12611_v10 }
 0xeb7   :  { %9121 = vmatmul.mubr.msk.f32.gmra.mrb[52].mxu0 %vm198_vm1, %v12612_v11 }
 0xeb8   :  { %9123 = vmatprep.mubr.msk.f32.mxu0 %vm198_vm1, %v12613_v54 }
 0xebb   :  { %9124 = vmatmul.mubr.msk.f32.gmra.mrb[54].mxu0 %vm198_vm1, %v12614_v55 }
 0xf62   :  { %v9058_v56 = vpop.f32.mrb[32].mxu0  ;;  %v9084_v57 = vpop.f32.mrb[40].mxu1 }
 0xf63   :  { %v2645_v58 = vpop.f32.mrb[33].mxu0  ;;  %v2806_v59 = vpop.f32.mrb[41].mxu1  ;;  %v2709_v36 = vmul.f32 %v9058_v56, %v2707_v63  ;;  %v2870_v29 = vmul.f32 %v9084_v57, %v2868_v2 }
 0xf64   :  { %v2708_v46 = vmul.f32 %v2707_v63, %v2645_v58  ;;  %v2869_v16 = vmul.f32 %v2868_v2, %v2806_v59 }
 0xf66   :  { %v9061_v61 = vpop.f32.mrb[34].mxu0  ;;  %v9087_v21 = vpop.f32.mrb[42].mxu1 }
 0xf67   :  { %v2655_v1 = vpop.f32.mrb[35].mxu0  ;;  %v2816_v48 = vpop.f32.mrb[43].mxu1  ;;  %v2711_v28 = vmul.f32 %v9061_v61, %v2707_v63  ;;  %v2872_v42 = vmul.f32 %v9087_v21, %v2868_v2 }
 0xf68   :  { %v2710_v8 = vmul.f32 %v2707_v63, %v2655_v1  ;;  %v2871_v56 = vmul.f32 %v2868_v2, %v2816_v48 }
 0xf6a   :  { %v9064_v33 = vpop.f32.mrb[36].mxu0  ;;  %v9090_v24 = vpop.f32.mrb[44].mxu1 }
 0xf6b   :  { %v2721_v3 = vmul.f32 %v9064_v33, %v2719_v7  ;;  %v2665_v17 = vpop.f32.mrb[37].mxu0  ;;  %v2826_v9 = vpop.f32.mrb[45].mxu1  ;;  %v2882_v25 = vmul.f32 %v9090_v24, %v2880_v38 }
 0xf6c   :  { %v2720_v41 = vmul.f32 %v2719_v7, %v2665_v17  ;;  %v2881_v0 = vmul.f32 %v2880_v38, %v2826_v9 }
 0xf6d   :  { %v2725_v26 = vadd.f32 %v2721_v3, %v2709_v36 }
 0xf6e   :  { %v2724_v14 = vadd.f32 %v2720_v41, %v2708_v46  ;;  %v9067_v20 = vpop.f32.mrb[38].mxu0  ;;  %v9093_v31 = vpop.f32.mrb[46].mxu1 }
 0xf6f   :  { %v2723_v6 = vmul.f32 %v9067_v20, %v2719_v7  ;;  %v2675_v40 = vpop.f32.mrb[39].mxu0  ;;  %v2836_v32 = vpop.f32.mrb[47].mxu1  ;;  %v2884_v1 = vmul.f32 %v9093_v31, %v2880_v38 }
 0xf70   :  { %v2722_v50 = vmul.f32 %v2719_v7, %v2675_v40  ;;  %v2883_v24 = vmul.f32 %v2880_v38, %v2836_v32  ;;  %v3041_v32 = vrot.slane %v11193_v60, %v11098_v30 }
 0xf71   :  { %v2727_v34 = vadd.f32 %v2723_v6, %v2711_v28 }
 0xf72   :  { %v2726_v18 = vadd.f32 %v2722_v50, %v2710_v8  ;;  %v9070_v23 = vpop.f32.mrb[40].mxu0  ;;  %v9096_v44 = vpop.f32.mrb[48].mxu1 }
 0xf73   :  { %v2733_v12 = vmul.f32 %v9070_v23, %v2731_v47  ;;  %v2685_v27 = vpop.f32.mrb[41].mxu0  ;;  %v2846_v4 = vpop.f32.mrb[49].mxu1  ;;  %v2894_v54 = vmul.f32 %v9096_v44, %v2892_v19 }
 0xf74   :  { %v2732_v45 = vmul.f32 %v2731_v47, %v2685_v27  ;;  %v2893_v59 = vmul.f32 %v2892_v19, %v2846_v4 }
 0xf75   :  { %v2737_v35 = vadd.f32 %v2733_v12, %v2725_v26 }
 0xf76   :  { %v2736_v49 = vadd.f32 %v2732_v45, %v2724_v14  ;;  %v9073_v22 = vpop.f32.mrb[42].mxu0  ;;  %v9099_v52 = vpop.f32.mrb[50].mxu1 }
 0xf77   :  { %v2874_v53 = vadd.f32 %v2870_v29, %v2737_v35  ;;  %v2735_v10 = vmul.f32 %v9073_v22, %v2731_v47  ;;  %v2695_v11 = vpop.f32.mrb[43].mxu0  ;;  %v2856_v55 = vpop.f32.mrb[51].mxu1  ;;  %v2896_v46 = vmul.f32 %v9099_v52, %v2892_v19  ;;  %v8222_v52 = vld [vmem:[%s12512_s1 + $0x308] ss:$0 sm:$0xff] }
 0xf78   :  { %v2873_v57 = vadd.f32 %v2869_v16, %v2736_v49  ;;  %v2734_v58 = vmul.f32 %v2731_v47, %v2695_v11  ;;  %v2895_v20 = vmul.f32 %v2892_v19, %v2856_v55 }
 0xf79   :  { %v2886_v61 = vadd.f32 %v2882_v25, %v2874_v53  ;;  %v2739_v63 = vadd.f32 %v2735_v10, %v2727_v34  ;;  %v8221_v25 = vld [vmem:[%s12512_s1 + $0x300] ss:$0 sm:$0xff] }
 0xf7a   :  { %v2885_v7 = vadd.f32 %v2881_v0, %v2873_v57  ;;  %v2738_v33 = vadd.f32 %v2734_v58, %v2726_v18  ;;  %v9110_v36 = vpop.f32.mrb[44].mxu0 }
 0xf7b   :  { %v2876_v3 = vadd.f32 %v2872_v42, %v2739_v63  ;;  %v2898_v17 = vadd.f32 %v2894_v54, %v2886_v61  ;;  %v3031_v9 = vmul.f32 %v9110_v36, %v3029_v51  ;;  %v2967_v21 = vpop.f32.mrb[45].mxu0  ;;  %v12622_v61 = vld [vmem:[#allocation8_spill] sm:$0xff] }
 0xf7c   :  { %v2875_v41 = vadd.f32 %v2871_v56, %v2738_v33  ;;  %v2897_v26 = vadd.f32 %v2893_v59, %v2885_v7  ;;  %v3030_v14 = vmul.f32 %v3029_v51, %v2967_v21  ;;  %v12623_v7 = vld [vmem:[#allocation9_spill] sm:$0xff] }
 0xf7d   :  { %v2888_v48 = vadd.f32 %v2884_v1, %v2876_v3  ;;  %v3035_v28 = vadd.f32 %v3031_v9, %v2898_v17  ;;  %v12624_v9 = vld [vmem:[#allocation10_spill] sm:$0xff] }
 0xf7e   :  { %v2887_v6 = vadd.f32 %v2883_v24, %v2875_v41  ;;  %v3034_v40 = vadd.f32 %v3030_v14, %v2897_v26  ;;  %v9113_v2 = vpop.f32.mrb[46].mxu0 }
 0xf7f   :  { %v2900_v47 = vadd.f32 %v2896_v46, %v2888_v48  ;;  %v3033_v31 = vmul.f32 %v9113_v2, %v3029_v51  ;;  %v2977_v8 = vpop.f32.mrb[47].mxu0  ;;  %v12625_v46 = vld [vmem:[#allocation11_spill] sm:$0xff] }
 0xf80   :  { %v2899_v50 = vadd.f32 %v2895_v20, %v2887_v6  ;;  %v3032_v34 = vmul.f32 %v3029_v51, %v2977_v8 }
 0xf81   :  { %v3037_v38 = vadd.f32 %v3033_v31, %v2900_v47 }
 0xf82   :  { %v3036_v18 = vadd.f32 %v3032_v34, %v2899_v50  ;;  %v9116_v23 = vpop.f32.mrb[48].mxu0 }
 0xf83   :  { %v3043_v44 = vmul.f32 %v9116_v23, %v3041_v32  ;;  %v2987_v29 = vpop.f32.mrb[49].mxu0 }
 0xf84   :  { %v3042_v12 = vmul.f32 %v3041_v32, %v2987_v29 }
 0xf85   :  { %v3047_v27 = vadd.f32 %v3043_v44, %v3035_v28 }
 0xf86   :  { %v3046_v19 = vadd.f32 %v3042_v12, %v3034_v40  ;;  %v9119_v4 = vpop.f32.mrb[50].mxu0 }
 0xf87   :  { %v3045_v16 = vmul.f32 %v9119_v4, %v3041_v32  ;;  %v2997_v45 = vpop.f32.mrb[51].mxu0  ;;  %v3144_v4 = vld [vmem:[%s12512_s1 + $0x320] sm:$0xff] }
 0xf88   :  { %v3044_v35 = vmul.f32 %v3041_v32, %v2997_v45 }
 0xf89   :  { %v3049_v49 = vadd.f32 %v3045_v16, %v3037_v38  ;;  %v3145_v16 = vld [vmem:[%s12512_s1 + $0x328] sm:$0xff] }
 0xf8a   :  { %v3048_v60 = vadd.f32 %v3044_v35, %v3036_v18  ;;  %v9122_v0 = vpop.f32.mrb[52].mxu0  ;;  %v9738_v45 = vpack.c.bf16 %v3145_v16, %v3144_v4  ;;  %v3146_v35 = vld [vmem:[%s12512_s1 + $0x330] sm:$0xff] }
 0xf8b   :  { %v3055_v22 = vmul.f32 %v9122_v0, %v8221_v25  ;;  %v3007_v51 = vpop.f32.mrb[53].mxu0 }
 0xf8c   :  { %v3054_v42 = vmul.f32 %v8221_v25, %v3007_v51  ;;  %9739 = vmatprep.subr.bf16.mxu1 %v9738_v45 }
 0xf8d   :  { %v3059_v53 = vadd.f32 %v3055_v22, %v3047_v27  ;;  %9741 = vmatpush3.bf16.msra.mxu1 %v9738_v45 }
 0xf8e   :  { %v3058_v10 = vadd.f32 %v3054_v42, %v3046_v19  ;;  %v9125_v11 = vpop.f32.mrb[54].mxu0 }
 0xf8f   :  { %v3067_v54 = vadd.f32 %v8222_v52, %v3059_v53  ;;  %v3057_v55 = vmul.f32 %v9125_v11, %v8221_v25  ;;  %v3017_v56 = vpop.f32.mrb[55].mxu0 }
 0xf90   :  { %v3066_v57 = vadd.f32 %v8222_v52, %v3058_v10  ;;  %v3056_v58 = vmul.f32 %v8221_v25, %v3017_v56  ;;  %v3147_v25 = vld [vmem:[%s12512_s1 + $0x338] sm:$0xff] }
 0xf91   :  { %v3061_v59 = vadd.f32 %v3057_v55, %v3049_v49  ;;  %v11218_v63 = vadd.f32 %v3067_v54, %v12622_v61  ;;  %v9742_v49 = vpack.c.bf16 %v3147_v25, %v3146_v35 }
 0xf92   :  { %v3060_v1 = vadd.f32 %v3056_v58, %v3048_v60  ;;  %v11221_v33 = vadd.f32 %v3066_v57, %v12623_v7  ;;  %v8223_v58 = vld [vmem:[%s12512_s1 + $0x310] ss:$0 sm:$0xff]  ;;  %v8224_v7 = vld [vmem:[%s12512_s1 + $0x318] ss:$0 sm:$0xff] }
 0xf93   :  { %v3069_v24 = vadd.f32 %v8222_v52, %v3061_v59  ;;  %v3079_v36 = vsel %vm198_vm1, %v11218_v63, 0.0  ;;  %9743 = vmatprep.subr.bf16.mxu1 %v9742_v49 }
 0xf94   :  { %v3068_v3 = vadd.f32 %v8222_v52, %v3060_v1  ;;  %3080 = vadd.xlane.f32.xlu1 %v3079_v36  ;;  %v3076_v17 = vsel %vm198_vm1, %v11221_v33, 0.0  ;;  %9745 = vmatpush3.bf16.msra.mxu1 %v9742_v49 }
 0xf95   :  { %3077 = vadd.xlane.f32.xlu0 %v3076_v17  ;;  %v11228_v21 = vadd.f32 %v3069_v24, %v12624_v9 }
 0xf96   :  { %v11231_v41 = vadd.f32 %v3068_v3, %v12625_v46 }
 0xf97   :  { %v3085_v26 = vsel %vm198_vm1, %v11228_v21, 0.0 }
 0xf98   :  { %3086 = vadd.xlane.f32.xlu1 %v3085_v26  ;;  %v3082_v14 = vsel %vm198_vm1, %v11231_v41, 0.0 }
 0xf99   :  { %3083 = vadd.xlane.f32.xlu0 %v3082_v14 }
0x1021   :  { %v3081_v20 = vpop.xlane.xlu1 %3080 }
0x1022   :  { %v3089_v48 = vmul.f32 0.03125, %v3081_v20  ;;  %v3078_v28 = vpop.xlane.xlu0 %3077 }
0x1023   :  { %v3088_v6 = vmul.f32 0.03125, %v3078_v28 }
0x1024   :  { %v3093_v40 = vsub.f32 %v11218_v63, %v3089_v48 }
0x1025   :  { %v3092_v2 = vsub.f32 %v11221_v33, %v3088_v6  ;;  %v3087_v47 = vpop.xlane.xlu1 %3086 }
0x1026   :  { %v3091_v31 = vmul.f32 0.03125, %v3087_v47  ;;  %v3084_v8 = vpop.xlane.xlu0 %3083  ;;  %v3097_v32 = vmul.f32 %v3093_v40, %v3093_v40 }
0x1027   :  { %v3090_v50 = vmul.f32 0.03125, %v3084_v8  ;;  %v3096_v34 = vmul.f32 %v3092_v2, %v3092_v2  ;;  %v3289_v8 = vld [vmem:[%s12512_s1 + $0x360] sm:$0xff] }
0x1028   :  { %v3095_v38 = vsub.f32 %v11228_v21, %v3091_v31  ;;  %v3103_v18 = vsel %vm198_vm1, %v3097_v32, 0.0  ;;  %v3288_v31 = vld [vmem:[%s12512_s1 + $0x358] sm:$0xff] }
0x1029   :  { %v3094_v23 = vsub.f32 %v11231_v41, %v3090_v50  ;;  %3104 = vadd.xlane.f32.xlu1 %v3103_v18  ;;  %v3100_v44 = vsel %vm198_vm1, %v3096_v34, 0.0  ;;  %v9750_v32 = vpack.c.bf16 %v3289_v8, %v3288_v31  ;;  %v3290_v50 = vld [vmem:[%s12512_s1 + $0x368] sm:$0xff]  ;;  %v3291_v34 = vld [vmem:[%s12512_s1 + $0x370] sm:$0xff]  ;;  %v3292_v18 = vld [vmem:[%s12512_s1 + $0x378] sm:$0xff] }
0x102a   :  { %3101 = vadd.xlane.f32.xlu0 %v3100_v44  ;;  %v3099_v29 = vmul.f32 %v3095_v38, %v3095_v38 }
0x102b   :  { %v3098_v12 = vmul.f32 %v3094_v23, %v3094_v23 }
0x102c   :  { %v3109_v27 = vsel %vm198_vm1, %v3099_v29, 0.0  ;;  %v8225_v29 = vld [vmem:[%s12512_s1 + $0x340] ss:$0 sm:$0xff] }
0x102d   :  { %3110 = vadd.xlane.f32.xlu1 %v3109_v27  ;;  %v3106_v19 = vsel %vm198_vm1, %v3098_v12, 0.0 }
0x102e   :  { %3107 = vadd.xlane.f32.xlu0 %v3106_v19 }
0x10b6   :  { %v3105_v60 = vpop.xlane.xlu1 %3104 }
0x10b7   :  { %v3113_v0 = vmul.f32 0.03125, %v3105_v60  ;;  %v3102_v22 = vpop.xlane.xlu0 %3101 }
0x10b8   :  { %v3112_v51 = vmul.f32 0.03125, %v3102_v22 }
0x10b9   :  { %v3117_v52 = vadd.f32 1e-05, %v3113_v0 }
0x10ba   :  { %v3116_v42 = vadd.f32 1e-05, %v3112_v51  ;;  %v3111_v53 = vpop.xlane.xlu1 %3110 }
0x10bb   :  { %10155 = vrsqrt.f32 %v3117_v52  ;;  %v3115_v10 = vmul.f32 0.03125, %v3111_v53  ;;  %v3108_v11 = vpop.xlane.xlu0 %3107 }
0x10bc   :  { %10157 = vrsqrt.f32 %v3116_v42  ;;  %v3114_v54 = vmul.f32 0.03125, %v3108_v11 }
0x10bd   :  { %v3119_v55 = vadd.f32 1e-05, %v3115_v10 }
0x10be   :  { %v3118_v56 = vadd.f32 1e-05, %v3114_v54 }
0x10bf   :  { %10159 = vrsqrt.f32 %v3119_v55 }
0x10c0   :  { %10161 = vrsqrt.f32 %v3118_v56 }
0x10c5   :  { %v10156_v57 = vpop.eup %10155 }
0x10c6   :  { %v10158_v59 = vpop.eup %10157  ;;  %v3125_v61 = vmul.f32 %v10156_v57, %v3093_v40  ;;  %v3286_v40 = vld [vmem:[%s12512_s1 + $0x348] sm:$0xff] }
0x10c7   :  { %v3124_v1 = vmul.f32 %v10158_v59, %v3092_v2  ;;  %v3287_v2 = vld [vmem:[%s12512_s1 + $0x350] sm:$0xff] }
0x10c8   :  { %v3133_v24 = vmul.f32 %v8223_v58, %v3125_v61  ;;  %v9746_v47 = vpack.c.bf16 %v3287_v2, %v3286_v40 }
0x10c9   :  { %v10160_v36 = vpop.eup %10159  ;;  %v3132_v3 = vmul.f32 %v8223_v58, %v3124_v1 }
0x10ca   :  { %v10162_v17 = vpop.eup %10161  ;;  %v3127_v9 = vmul.f32 %v10160_v36, %v3095_v38  ;;  %v3141_v14 = vadd.f32 %v8224_v7, %v3133_v24  ;;  %9747 = vmatprep.subr.bf16.mxu0 %v9746_v47  ;;  %v9754_v38 = vpack.c.bf16 %v3291_v34, %v3290_v50 }
0x10cb   :  { %v3140_v46 = vadd.f32 %v8224_v7, %v3132_v3  ;;  %v3126_v26 = vmul.f32 %v10162_v17, %v3094_v23  ;;  %9749 = vmatpush3.bf16.msra.mxu0 %v9746_v47  ;;  %v3293_v23 = vld [vmem:[%s12512_s1 + $0x380] sm:$0xff] }
0x10cc   :  { %v3135_v20 = vmul.f32 %v8223_v58, %v3127_v9  ;;  %9751 = vmatprep.subr.bf16.mxu0 %v9750_v32  ;;  %v9758_v44 = vpack.c.bf16 %v3293_v23, %v3292_v18 }
0x10cd   :  { %9134 = vmatprep.mubr.msk.f32.mxu1 %vm198_vm1, %v3140_v46  ;;  %v3134_v48 = vmul.f32 %v8223_v58, %v3126_v26 }
0x10ce   :  { %9135 = vmatmul.mubr.msk.f32.vlgmr.msra.gmra.mrb[52].mxu1 %vm198_vm1, %v3141_v14  ;;  %v3143_v6 = vadd.f32 %v8224_v7, %v3135_v20 }
0x10cf   :  { %v3142_v28 = vadd.f32 %v8224_v7, %v3134_v48  ;;  %9753 = vmatpush3.bf16.msra.mxu0 %v9750_v32  ;;  %v8230_v32 = vld [vmem:[%s12512_s1 + $0x388] ss:$0 sm:$0xff] }
0x10d0   :  { %9755 = vmatprep.subr.bf16.mxu0 %v9754_v38 }
0x10d1   :  { %9137 = vmatprep.mubr.msk.f32.mxu1 %vm198_vm1, %v3142_v28 }
0x10d2   :  { %9138 = vmatmul.mubr.msk.f32.gmra.mrb[54].mxu1 %vm198_vm1, %v3143_v6 }
0x10d3   :  { %9757 = vmatpush3.bf16.msra.mxu0 %v9754_v38 }
0x10d4   :  { %9759 = vmatprep.subr.bf16.mxu0 %v9758_v44 }
0x10d7   :  { %9761 = vmatpush3.bf16.msra.mxu0 %v9758_v44 }
0x11a1   :  { %v9136_v12 = vpop.f32.mrb[52].mxu1 }
0x11a2   :  { %v3237_v27 = vadd.f32 %v9136_v12, %v8225_v29  ;;  %v3231_v19 = vpop.f32.mrb[53].mxu1 }
0x11a3   :  { %v3232_v4 = vadd.f32 %v8225_v29, %v3231_v19 }
0x11a4   :  { %v3255_v16 = vmul.f32 0.044715, %v3237_v27  ;;  %v3251_v26 = vmul.f32 0.5, %v3237_v27 }
0x11a5   :  { %v3254_v45 = vmul.f32 0.044715, %v3232_v4  ;;  %v9139_v35 = vpop.f32.mrb[54].mxu1  ;;  %v3250_v9 = vmul.f32 0.5, %v3232_v4 }
0x11a6   :  { %v3259_v25 = vmul.f32 %v3255_v16, %v3237_v27  ;;  %v3247_v49 = vadd.f32 %v9139_v35, %v8225_v29  ;;  %v3241_v60 = vpop.f32.mrb[55].mxu1 }
0x11a7   :  { %v3258_v0 = vmul.f32 %v3254_v45, %v3232_v4  ;;  %v3242_v22 = vadd.f32 %v8225_v29, %v3241_v60 }
0x11a8   :  { %v3263_v51 = vmul.f32 %v3259_v25, %v3237_v27  ;;  %v3257_v52 = vmul.f32 0.044715, %v3247_v49  ;;  %v3253_v47 = vmul.f32 0.5, %v3247_v49 }
0x11a9   :  { %v3262_v42 = vmul.f32 %v3258_v0, %v3232_v4  ;;  %v3256_v53 = vmul.f32 0.044715, %v3242_v22  ;;  %v3252_v40 = vmul.f32 0.5, %v3242_v22 }
0x11aa   :  { %v3267_v10 = vadd.f32 %v3263_v51, %v3237_v27  ;;  %v3261_v11 = vmul.f32 %v3257_v52, %v3247_v49 }
0x11ab   :  { %v3266_v54 = vadd.f32 %v3262_v42, %v3232_v4  ;;  %v3260_v55 = vmul.f32 %v3256_v53, %v3242_v22 }
0x11ac   :  { %v3271_v56 = vmul.f32 0.7978846, %v3267_v10  ;;  %v3265_v57 = vmul.f32 %v3261_v11, %v3247_v49 }
0x11ad   :  { %v3264_v58 = vmul.f32 %v3260_v55, %v3242_v22  ;;  %v3270_v59 = vmul.f32 0.7978846, %v3266_v54 }
0x11ae   :  { %10163 = vtanh.f32 %v3271_v56  ;;  %v3269_v61 = vadd.f32 %v3265_v57, %v3247_v49 }
0x11af   :  { %v3268_v1 = vadd.f32 %v3264_v58, %v3242_v22  ;;  %10165 = vtanh.f32 %v3270_v59 }
0x11b0   :  { %v3273_v7 = vmul.f32 0.7978846, %v3269_v61 }
0x11b1   :  { %v3272_v24 = vmul.f32 0.7978846, %v3268_v1  ;;  %v3620_v1 = vld [vmem:[%s12512_s1 + $0x3e0] sm:$0xff] }
0x11b2   :  { %10167 = vtanh.f32 %v3273_v7  ;;  %v3621_v7 = vld [vmem:[%s12512_s1 + $0x3e8] sm:$0xff] }
0x11b3   :  { %10169 = vtanh.f32 %v3272_v24  ;;  %v9774_v24 = vpack.c.bf16 %v3621_v7, %v3620_v1 }
0x11b5   :  { %9775 = vmatprep.subr.bf16.mxu0 %v9774_v24 }
0x11b8   :  { %v10164_v36 = vpop.eup %10163 }
0x11b9   :  { %v10166_v3 = vpop.eup %10165  ;;  %v3279_v17 = vadd.f32 1.0, %v10164_v36  ;;  %v3622_v36 = vld [vmem:[%s12512_s1 + $0x3f0] sm:$0xff] }
0x11ba   :  { %v3278_v46 = vadd.f32 1.0, %v10166_v3  ;;  %v3623_v3 = vld [vmem:[%s12512_s1 + $0x3f8] sm:$0xff] }
0x11bb   :  { %v3283_v28 = vmul.f32 %v3279_v17, %v3251_v26  ;;  %v9778_v17 = vpack.c.bf16 %v3623_v3, %v3622_v36 }
0x11bc   :  { %v10168_v14 = vpop.eup %10167  ;;  %v3282_v20 = vmul.f32 %v3278_v46, %v3250_v9  ;;  %v3471_v9 = vld [vmem:[%s12512_s1 + $0x3a0] sm:$0xff] }
0x11bd   :  { %v10170_v48 = vpop.eup %10169  ;;  %v3281_v6 = vadd.f32 1.0, %v10168_v14  ;;  %9170 = vmatprep.mubr.msk.f32.mxu1 %vm198_vm1, %v3471_v9 }
0x11be   :  { %9156 = vmatprep.mubr.msk.f32.mxu0 %vm3299_vm6, %v3282_v20  ;;  %v3280_v2 = vadd.f32 1.0, %v10170_v48 }
0x11bf   :  { %9157 = vmatmul.mubr.msk.f32.vlgmr.msra.gmra.mrb[56].mxu0 %vm3299_vm6, %v3283_v28  ;;  %v3285_v8 = vmul.f32 %v3281_v6, %v3253_v47 }
0x11c0   :  { %v3284_v31 = vmul.f32 %v3280_v2, %v3252_v40  ;;  %9777 = vmatpush3.bf16.msra.mxu0 %v9774_v24 }
0x11c1   :  { %9779 = vmatprep.subr.bf16.mxu0 %v9778_v17 }
0x11c2   :  { %9159 = vmatprep.mubr.msk.f32.mxu0 %vm3299_vm6, %v3284_v31 }
0x11c3   :  { %9160 = vmatmul.mubr.msk.f32.gmra.mrb[58].mxu0 %vm3299_vm6, %v3285_v8 }
0x11c4   :  { %9781 = vmatpush3.bf16.msra.mxu0 %v9778_v17 }
0x1292   :  { %v9158_v50 = vpop.f32.mrb[56].mxu0 }
0x1293   :  { %v3384_v34 = vadd.f32 %v9158_v50, %v8230_v32  ;;  %v3378_v38 = vpop.f32.mrb[57].mxu0  ;;  %v8235_v50 = vld [vmem:[%s12512_s1 + $0x390] ss:$0 sm:$0xff] }
0x1294   :  { %v3379_v18 = vadd.f32 %v8230_v32, %v3378_v38 }
0x1295   :  { %v11302_v23 = vadd.f32 %v3384_v34, %v11218_v63 }
0x1296   :  { %v11305_v44 = vadd.f32 %v3379_v18, %v11221_v33  ;;  %v9161_v29 = vpop.f32.mrb[58].mxu0  ;;  %v8236_v18 = vld [vmem:[%s12512_s1 + $0x398] ss:$0 sm:$0xff] }
0x1297   :  { %v3394_v12 = vadd.f32 %v9161_v29, %v8230_v32  ;;  %v3388_v27 = vpop.f32.mrb[59].mxu0  ;;  %v3406_v19 = vsel %vm198_vm1, %v11302_v23, 0.0 }
0x1298   :  { %v3389_v4 = vadd.f32 %v8230_v32, %v3388_v27  ;;  %3407 = vadd.xlane.f32.xlu1 %v3406_v19  ;;  %v3403_v16 = vsel %vm198_vm1, %v11305_v44, 0.0 }
0x1299   :  { %v11312_v45 = vadd.f32 %v3394_v12, %v11228_v21  ;;  %3404 = vadd.xlane.f32.xlu0 %v3403_v16 }
0x129a   :  { %v11315_v63 = vadd.f32 %v3389_v4, %v11231_v41 }
0x129b   :  { %v3412_v33 = vsel %vm198_vm1, %v11312_v45, 0.0 }
0x129c   :  { %3413 = vadd.xlane.f32.xlu1 %v3412_v33  ;;  %v3409_v35 = vsel %vm198_vm1, %v11315_v63, 0.0 }
0x129d   :  { %3410 = vadd.xlane.f32.xlu0 %v3409_v35 }
0x1325   :  { %v3408_v25 = vpop.xlane.xlu1 %3407 }
0x1326   :  { %v3416_v49 = vmul.f32 0.03125, %v3408_v25  ;;  %v3405_v60 = vpop.xlane.xlu0 %3404 }
0x1327   :  { %v3415_v0 = vmul.f32 0.03125, %v3405_v60 }
0x1328   :  { %v3420_v22 = vsub.f32 %v11302_v23, %v3416_v49 }
0x1329   :  { %v3419_v21 = vsub.f32 %v11305_v44, %v3415_v0  ;;  %v3414_v51 = vpop.xlane.xlu1 %3413 }
0x132a   :  { %v3418_v52 = vmul.f32 0.03125, %v3414_v51  ;;  %v3411_v41 = vpop.xlane.xlu0 %3410  ;;  %v3424_v42 = vmul.f32 %v3420_v22, %v3420_v22 }
0x132b   :  { %v3417_v53 = vmul.f32 0.03125, %v3411_v41  ;;  %v3423_v10 = vmul.f32 %v3419_v21, %v3419_v21  ;;  %v3472_v41 = vld [vmem:[%s12512_s1 + $0x3a8] sm:$0xff] }
0x132c   :  { %v3422_v11 = vsub.f32 %v11312_v45, %v3418_v52  ;;  %v3430_v54 = vsel %vm198_vm1, %v3424_v42, 0.0  ;;  %v3473_v42 = vld [vmem:[%s12512_s1 + $0x3b0] sm:$0xff] }
0x132d   :  { %v3421_v55 = vsub.f32 %v11315_v63, %v3417_v53  ;;  %3431 = vadd.xlane.f32.xlu1 %v3430_v54  ;;  %v3427_v56 = vsel %vm198_vm1, %v3423_v10, 0.0  ;;  %v3474_v53 = vld [vmem:[%s12512_s1 + $0x3b8] sm:$0xff]  ;;  %v3475_v10 = vld [vmem:[%s12512_s1 + $0x3c0] sm:$0xff]  ;;  %v3477_v54 = vld [vmem:[%s12512_s1 + $0x3d0] sm:$0xff] }
0x132e   :  { %3428 = vadd.xlane.f32.xlu0 %v3427_v56  ;;  %v3426_v57 = vmul.f32 %v3422_v11, %v3422_v11 }
0x132f   :  { %v3425_v58 = vmul.f32 %v3421_v55, %v3421_v55 }
0x1330   :  { %v3436_v59 = vsel %vm198_vm1, %v3426_v57, 0.0 }
0x1331   :  { %3437 = vadd.xlane.f32.xlu1 %v3436_v59  ;;  %v3433_v61 = vsel %vm198_vm1, %v3425_v58, 0.0 }
0x1332   :  { %3434 = vadd.xlane.f32.xlu0 %v3433_v61 }
0x13ba   :  { %v3432_v46 = vpop.xlane.xlu1 %3431 }
0x13bb   :  { %v3440_v26 = vmul.f32 0.03125, %v3432_v46  ;;  %v3429_v14 = vpop.xlane.xlu0 %3428 }
0x13bc   :  { %v3439_v20 = vmul.f32 0.03125, %v3429_v14 }
0x13bd   :  { %v3444_v48 = vadd.f32 1e-05, %v3440_v26 }
0x13be   :  { %v3443_v28 = vadd.f32 1e-05, %v3439_v20  ;;  %v3438_v6 = vpop.xlane.xlu1 %3437 }
0x13bf   :  { %10171 = vrsqrt.f32 %v3444_v48  ;;  %v3442_v40 = vmul.f32 0.03125, %v3438_v6  ;;  %v3435_v2 = vpop.xlane.xlu0 %3434 }
0x13c0   :  { %10173 = vrsqrt.f32 %v3443_v28  ;;  %v3441_v47 = vmul.f32 0.03125, %v3435_v2 }
0x13c1   :  { %v3446_v31 = vadd.f32 1e-05, %v3442_v40 }
0x13c2   :  { %v3445_v8 = vadd.f32 1e-05, %v3441_v47 }
0x13c3   :  { %10175 = vrsqrt.f32 %v3446_v31 }
0x13c4   :  { %10177 = vrsqrt.f32 %v3445_v8 }
0x13c9   :  { %v10172_v32 = vpop.eup %10171 }
0x13ca   :  { %v10174_v34 = vpop.eup %10173  ;;  %v3452_v38 = vmul.f32 %v10172_v32, %v3420_v22 }
0x13cb   :  { %v3451_v29 = vmul.f32 %v10174_v34, %v3419_v21 }
0x13cc   :  { %v3460_v12 = vmul.f32 %v8235_v50, %v3452_v38 }
0x13cd   :  { %v10176_v27 = vpop.eup %10175  ;;  %v3459_v19 = vmul.f32 %v8235_v50, %v3451_v29 }
0x13ce   :  { %v10178_v4 = vpop.eup %10177  ;;  %v3468_v16 = vadd.f32 %v8236_v18, %v3460_v12  ;;  %v3454_v33 = vmul.f32 %v10176_v27, %v3422_v11  ;;  %v3476_v11 = vld [vmem:[%s12512_s1 + $0x3c8] sm:$0xff] }
0x13cf   :  { %v3467_v35 = vadd.f32 %v8236_v18, %v3459_v19  ;;  %v3453_v25 = vmul.f32 %v10178_v4, %v3421_v55  ;;  %v3478_v55 = vld [vmem:[%s12512_s1 + $0x3d8] sm:$0xff] }
0x13d0   :  { %v3462_v49 = vmul.f32 %v8235_v50, %v3454_v33 }
0x13d1   :  { %9190 = vmatprep.mubr.msk.f32.mxu0 %vm198_vm1, %v3467_v35  ;;  %v9762_v60 = vpack.c.bf16 %v3468_v16, %v3467_v35  ;;  %v3461_v0 = vmul.f32 %v8235_v50, %v3453_v25 }
0x13d2   :  { %9191 = vmatmul.mubr.msk.f32.vlgmr.msra.gmra.mrb[60].mxu0 %vm198_vm1, %v3468_v16  ;;  %v3470_v22 = vadd.f32 %v8236_v18, %v3462_v49 }
0x13d3   :  { %9764 = vmatprep.subr.msk.bf16.mxu1 %vm10490_vm2, %v9762_v60  ;;  %v3469_v21 = vadd.f32 %v8236_v18, %v3461_v0 }
0x13d4   :  { %9767 = vmatpush3.bf16.xpose.msk.msra.mxu1 %vm10490_vm2, %v9762_v60 }
0x13d5   :  { %9193 = vmatprep.mubr.msk.f32.mxu0 %vm198_vm1, %v3469_v21  ;;  %v9768_v52 = vpack.c.bf16 %v3470_v22, %v3469_v21 }
0x13d6   :  { %9194 = vmatmul.mubr.msk.f32.gmra.mrb[62].mxu0 %vm198_vm1, %v3470_v22 }
0x13d7   :  { %9770 = vmatprep.subr.msk.bf16.mxu1 %vm10490_vm2, %v9768_v52 }
0x13dc   :  { %9773 = vmatpush3.bf16.xpose.msk.msra.mxu1 %vm10490_vm2, %v9768_v52 }
0x13e3   :  { %9171 = vmatmul.mubr.msk.f32.vlgmr.msra.gmra.mrb[56].mxu1 %vm198_vm1, %v3472_v41 }
0x13e4   :  { %9173 = vmatprep.mubr.msk.f32.mxu1 %vm198_vm1, %v3473_v42 }
0x13e7   :  { %9174 = vmatmul.mubr.msk.f32.gmra.mrb[58].mxu1 %vm198_vm1, %v3474_v53 }
0x13e8   :  { %9176 = vmatprep.mubr.msk.f32.mxu1 %vm198_vm1, %v3475_v10 }
0x13eb   :  { %9177 = vmatmul.mubr.msk.f32.gmra.mrb[60].mxu1 %vm198_vm1, %v3476_v11 }
0x13ec   :  { %9179 = vmatprep.mubr.msk.f32.mxu1 %vm198_vm1, %v3477_v54 }
0x13ef   :  { %9180 = vmatmul.mubr.msk.f32.gmra.mrb[62].mxu1 %vm198_vm1, %v3478_v55 }
0x14a5   :  { %v11391_v56 = vpop.f32.mrb[60].mxu0 }
0x14a6   :  { %v11393_v57 = vpop.f32.mrb[61].mxu0 }
0x14a9   :  { %v11395_v58 = vpop.f32.mrb[62].mxu0 }
0x14aa   :  { %v11397_v59 = vpop.f32.mrb[63].mxu0 }
0x14b6   :  { %v11399_v61 = vpop.f32.mrb[56].mxu1 }
0x14b7   :  { %v11401_v1 = vpop.f32.mrb[57].mxu1  ;;  %v3718_v48 = vmul.f32 %v11399_v61, %v11399_v61 }
0x14b8   :  { %v3717_v28 = vmul.f32 %v11401_v1, %v11401_v1 }
0x14b9   :  { %v3728_v0 = vsel %vm600_vm3, %v3718_v48, 0.0 }
0x14ba   :  { %v11403_v7 = vpop.f32.mrb[58].mxu1  ;;  %v3725_v22 = vsel %vm600_vm3, %v3717_v28, 0.0 }
0x14bb   :  { %v11405_v24 = vpop.f32.mrb[59].mxu1  ;;  %v3720_v6 = vmul.f32 %v11403_v7, %v11403_v7 }
0x14bc   :  { %v3719_v40 = vmul.f32 %v11405_v24, %v11405_v24 }
0x14bd   :  { %v3734_v51 = vsel %vm600_vm3, %v3720_v6, 0.0 }
0x14be   :  { %v11407_v36 = vpop.f32.mrb[60].mxu1  ;;  %v3731_v21 = vsel %vm600_vm3, %v3719_v40, 0.0 }
0x14bf   :  { %v3722_v3 = vmul.f32 %v11407_v36, %v11407_v36  ;;  %v11411_v17 = vpop.f32.mrb[61].mxu1 }
0x14c0   :  { %v3721_v9 = vmul.f32 %v11411_v17, %v11411_v17 }
0x14c1   :  { %4245 = vrot.lane.b32.xlu1 %v3722_v3, %s10341_s0  ;;  %v3740_v35 = vsel %vm600_vm3, %v3722_v3, 0.0 }
0x14c2   :  { %4243 = vrot.lane.b32.xlu0 %v3721_v9, %s10341_s0  ;;  %v11417_v46 = vpop.f32.mrb[62].mxu1  ;;  %v3737_v25 = vsel %vm600_vm3, %v3721_v9, 0.0 }
0x14c3   :  { %v3724_v26 = vmul.f32 %v11417_v46, %v11417_v46  ;;  %v11421_v14 = vpop.f32.mrb[63].mxu1 }
0x14c4   :  { %v3723_v20 = vmul.f32 %v11421_v14, %v11421_v14 }
0x14c5   :  { %v3746_v49 = vsel %vm600_vm3, %v3724_v26, 0.0 }
0x14c6   :  { %4249 = vrot.lane.b32.xlu0 %v3724_v26, %s10341_s0  ;;  %4247 = vrot.lane.b32.xlu1 %v3723_v20, %s10341_s0  ;;  %v3743_v60 = vsel %vm600_vm3, %v3723_v20, 0.0 }
0x14ca   :  { %4237 = vrot.lane.b32.xlu0 %v3718_v48, %s10341_s0  ;;  %4235 = vrot.lane.b32.xlu1 %v3717_v28, %s10341_s0  ;;  %v11458_v48 = vld [vmem:[%s12512_s1 + $0x428] sm:$0xff]  ;;  %v3713_v28 = vld [vmem:[%s12512_s1 + $0x420] sm:$0xff] }
0x14ce   :  { %4241 = vrot.lane.b32.xlu0 %v3720_v6, %s10341_s0  ;;  %4239 = vrot.lane.b32.xlu1 %v3719_v40, %s10341_s0 }
0x1533   :  { %v4246_v2 = vpop.permute.xlu1 %4245 }
0x1534   :  { %v4244_v47 = vpop.permute.xlu0 %4243  ;;  %v4274_v31 = vsel %vm600_vm3, %v4246_v2, 0.0 }
0x1535   :  { %4275 = vadd.xlane.f32.xlu0 %v4274_v31  ;;  %v4271_v8 = vsel %vm600_vm3, %v4244_v47, 0.0 }
0x1536   :  { %4272 = vadd.xlane.f32.xlu1 %v4271_v8 }
0x1538   :  { %v4250_v32 = vpop.permute.xlu0 %4249  ;;  %v4248_v50 = vpop.permute.xlu1 %4247 }
0x1539   :  { %v4280_v34 = vsel %vm600_vm3, %v4250_v32, 0.0  ;;  %v4277_v38 = vsel %vm600_vm3, %v4248_v50, 0.0 }
0x153a   :  { %4281 = vadd.xlane.f32.xlu1 %v4280_v34  ;;  %4278 = vadd.xlane.f32.xlu0 %v4277_v38  ;;  %v3715_v34 = vld [vmem:[%s12512_s1 + $0x430] sm:$0xff] }
0x153c   :  { %v4238_v18 = vpop.permute.xlu0 %4237  ;;  %v4236_v29 = vpop.permute.xlu1 %4235 }
0x153d   :  { %v4262_v12 = vsel %vm600_vm3, %v4238_v18, 0.0  ;;  %v4259_v27 = vsel %vm600_vm3, %v4236_v29, 0.0  ;;  %v3716_v29 = vld [vmem:[%s12512_s1 + $0x438] sm:$0xff] }
0x153e   :  { %4263 = vadd.xlane.f32.xlu1 %v4262_v12  ;;  %4260 = vadd.xlane.f32.xlu0 %v4259_v27 }
0x1540   :  { %v4242_v19 = vpop.permute.xlu0 %4241  ;;  %v4240_v4 = vpop.permute.xlu1 %4239 }
0x1541   :  { %v4268_v16 = vsel %vm600_vm3, %v4242_v19, 0.0  ;;  %v4265_v33 = vsel %vm600_vm3, %v4240_v4, 0.0 }
0x1542   :  { %4269 = vadd.xlane.f32.xlu1 %v4268_v16  ;;  %4266 = vadd.xlane.f32.xlu0 %v4265_v33 }
0x1546   :  { %3741 = vadd.xlane.f32.xlu1 %v3740_v35  ;;  %3738 = vadd.xlane.f32.xlu0 %v3737_v25  ;;  %v3709_v35 = vld [vmem:[%s12512_s1 + $0x400] sm:$0xff] }
0x154a   :  { %3747 = vadd.xlane.f32.xlu1 %v3746_v49  ;;  %3744 = vadd.xlane.f32.xlu0 %v3743_v60  ;;  %v3710_v60 = vld [vmem:[%s12512_s1 + $0x408] sm:$0xff] }
0x154e   :  { %3729 = vadd.xlane.f32.xlu1 %v3728_v0  ;;  %3726 = vadd.xlane.f32.xlu0 %v3725_v22 }
0x1552   :  { %3735 = vadd.xlane.f32.xlu1 %v3734_v51  ;;  %3732 = vadd.xlane.f32.xlu0 %v3731_v21 }
0x15c2   :  { %v4276_v52 = vpop.xlane.xlu0 %4275 }
0x15c3   :  { %v4288_v41 = vmax.f32 %v4276_v52, 1e-24  ;;  %v4273_v42 = vpop.xlane.xlu1 %4272 }
0x15c4   :  { %v4287_v53 = vmax.f32 %v4273_v42, 1e-24  ;;  %v3711_v42 = vld [vmem:[%s12512_s1 + $0x410] sm:$0xff] }
0x15c5   :  { %10179 = vrsqrt.f32 %v4288_v41 }
0x15c6   :  { %10181 = vrsqrt.f32 %v4287_v53 }
0x15c7   :  { %v4279_v10 = vpop.xlane.xlu0 %4278  ;;  %v4282_v11 = vpop.xlane.xlu1 %4281 }
0x15c8   :  { %v4289_v54 = vmax.f32 %v4279_v10, 1e-24  ;;  %v4290_v55 = vmax.f32 %v4282_v11, 1e-24  ;;  %v3712_v11 = vld [vmem:[%s12512_s1 + $0x418] sm:$0xff] }
0x15ca   :  { %10183 = vrsqrt.f32 %v4289_v54 }
0x15cb   :  { %10185 = vrsqrt.f32 %v4290_v55  ;;  %v4261_v3 = vpop.xlane.xlu0 %4260  ;;  %v4264_v9 = vpop.xlane.xlu1 %4263 }
0x15cc   :  { %v4283_v26 = vmax.f32 %v4261_v3, 1e-24  ;;  %v4284_v20 = vmax.f32 %v4264_v9, 1e-24 }
0x15ce   :  { %10187 = vrsqrt.f32 %v4283_v26 }
0x15cf   :  { %v10180_v6 = vpop.eup %10179  ;;  %10189 = vrsqrt.f32 %v4284_v20  ;;  %v4267_v40 = vpop.xlane.xlu0 %4266 }
0x15d0   :  { %v4270_v2 = vpop.xlane.xlu1 %4269  ;;  %v10182_v47 = vpop.eup %10181  ;;  %v4285_v31 = vmax.f32 %v4267_v40, 1e-24  ;;  %v4304_v32 = vmul.f32 %v10180_v6, %v11458_v48 }
0x15d1   :  { %v4286_v8 = vmax.f32 %v4270_v2, 1e-24  ;;  %v4303_v50 = vmul.f32 %v10182_v47, %v3713_v28 }
0x15d2   :  { %10191 = vrsqrt.f32 %v4285_v31  ;;  %4334 = vperm.xlu1 %9998, %v4304_v32  }
0x15d3   :  { %10193 = vrsqrt.f32 %v4286_v8  ;;  %v3739_v38 = vpop.xlane.xlu0 %3738  ;;  %4329 = vperm.xlu0 %9997, %v4303_v50  }
0x15d4   :  { %v3742_v18 = vpop.xlane.xlu1 %3741  ;;  %v10184_v12 = vpop.eup %10183  ;;  %v3753_v27 = vmax.f32 %v3739_v38, 1e-24 }
0x15d5   :  { %v3754_v19 = vmax.f32 %v3742_v18, 1e-24  ;;  %v10186_v4 = vpop.eup %10185  ;;  %v4305_v16 = vmul.f32 %v10184_v12, %v3715_v34 }
0x15d6   :  { %10195 = vrsqrt.f32 %v3753_v27  ;;  %v4306_v33 = vmul.f32 %v10186_v4, %v3716_v29 }
0x15d7   :  { %10197 = vrsqrt.f32 %v3754_v19  ;;  %4339 = vperm.xlu1 %9998, %v4305_v16   ;;  %v3745_v49 = vpop.xlane.xlu0 %3744 }
0x15d8   :  { %v3748_v25 = vpop.xlane.xlu1 %3747  ;;  %v10188_v0 = vpop.eup %10187  ;;  %4344 = vperm.xlu0 %9997, %v4306_v33   ;;  %v3755_v51 = vmax.f32 %v3745_v49, 1e-24 }
0x15d9   :  { %v3756_v22 = vmax.f32 %v3748_v25, 1e-24  ;;  %v10190_v21 = vpop.eup %10189  ;;  %v4299_v52 = vmul.f32 %v10188_v0, %v3709_v35 }
0x15da   :  { %v4300_v41 = vmul.f32 %v10190_v21, %v3710_v60 }
0x15db   :  { %10199 = vrsqrt.f32 %v3756_v22  ;;  %4309 = vperm.xlu1 %9998, %v4299_v52   ;;  %v3727_v10 = vpop.xlane.xlu0 %3726 }
0x15dc   :  { %10201 = vrsqrt.f32 %v3755_v51  ;;  %v3730_v53 = vpop.xlane.xlu1 %3729  ;;  %v10192_v54 = vpop.eup %10191  ;;  %4314 = vperm.xlu0 %9997, %v4300_v41   ;;  %v3749_v3 = vmax.f32 %v3727_v10, 1e-24 }
0x15dd   :  { %v3750_v55 = vmax.f32 %v3730_v53, 1e-24  ;;  %v10194_v9 = vpop.eup %10193  ;;  %v4301_v26 = vmul.f32 %v10192_v54, %v3711_v42 }
0x15de   :  { %v4302_v20 = vmul.f32 %v10194_v9, %v3712_v11 }
0x15df   :  { %10203 = vrsqrt.f32 %v3750_v55  ;;  %4319 = vperm.xlu1 %9998, %v4301_v26   ;;  %v3733_v40 = vpop.xlane.xlu0 %3732 }
0x15e0   :  { %10205 = vrsqrt.f32 %v3749_v3  ;;  %v3736_v6 = vpop.xlane.xlu1 %3735  ;;  %v10196_v2 = vpop.eup %10195  ;;  %4324 = vperm.xlu0 %9997, %v4302_v20   ;;  %v3751_v31 = vmax.f32 %v3733_v40, 1e-24 }
0x15e1   :  { %v3752_v47 = vmax.f32 %v3736_v6, 1e-24  ;;  %v10198_v8 = vpop.eup %10197  ;;  %v3769_v32 = vmul.f32 %v10196_v2, %v3713_v28 }
0x15e2   :  { %v3770_v50 = vmul.f32 %v10198_v8, %v11458_v48 }
0x15e3   :  { %10207 = vrsqrt.f32 %v3752_v47  ;;  %3795 = vperm.xlu1 %9998, %v3769_v32  }
0x15e4   :  { %10209 = vrsqrt.f32 %v3751_v31  ;;  %3800 = vperm.xlu0 %9997, %v3770_v50  }
0x15e5   :  { %v10200_v38 = vpop.eup %10199 }
0x15e6   :  { %v10202_v18 = vpop.eup %10201  ;;  %v3772_v12 = vmul.f32 %v10200_v38, %v3716_v29 }
0x15e7   :  { %v3771_v27 = vmul.f32 %v10202_v18, %v3715_v34 }
0x15e8   :  { %3810 = vperm.xlu0 %9997, %v3772_v12  }
0x15e9   :  { %v10204_v19 = vpop.eup %10203  ;;  %3805 = vperm.xlu1 %9998, %v3771_v27  }
0x15ea   :  { %v10206_v4 = vpop.eup %10205  ;;  %v3766_v16 = vmul.f32 %v10204_v19, %v3710_v60 }
0x15eb   :  { %v3765_v33 = vmul.f32 %v10206_v4, %v3709_v35 }
0x15ec   :  { %3780 = vperm.xlu0 %9997, %v3766_v16  }
0x15ed   :  { %v10208_v25 = vpop.eup %10207  ;;  %3775 = vperm.xlu1 %9998, %v3765_v33  }
0x15ee   :  { %v10210_v28 = vpop.eup %10209  ;;  %v3768_v49 = vmul.f32 %v10208_v25, %v3712_v11 }
0x15ef   :  { %v3767_v0 = vmul.f32 %v10210_v28, %v3711_v42 }
0x15f0   :  { %3790 = vperm.xlu0 %9997, %v3768_v49  }
0x15f1   :  { %3785 = vperm.xlu1 %9998, %v3767_v0  }
0x1651   :  { %v4335_v48 = vpop.permute.xlu1 %4334 }
0x1652   :  { %v4352_v22 = vmul.f32 %v11407_v36, %v4335_v48  ;;  %v4330_v51 = vpop.permute.xlu0 %4329 }
0x1653   :  { %v4351_v34 = vmul.f32 %v4330_v51, %v11411_v17 }
0x1655   :  { %v10009_v29 = vpack.i.bf16 %v4352_v22, %v4351_v34 }
0x1656   :  { %v4340_v21 = vpop.permute.xlu1 %4339 }
0x1657   :  { %v4353_v52 = vmul.f32 %v4340_v21, %v11421_v14  ;;  %v4345_v60 = vpop.permute.xlu0 %4344  ;;  %10010 = vrot.lane.b32.xlu1 %v10009_v29, %s10341_s0 }
0x1658   :  { %v4354_v35 = vmul.f32 %v11417_v46, %v4345_v60 }
0x165a   :  { %v10014_v41 = vpack.i.bf16 %v4354_v35, %v4353_v52  ;;  %v4310_v53 = vpop.permute.xlu1 %4309 }
0x165b   :  { %v4347_v42 = vmul.f32 %v4310_v53, %v11401_v1  ;;  %v4315_v10 = vpop.permute.xlu0 %4314 }
0x165c   :  { %10015 = vrot.lane.b32.xlu0 %v10014_v41, %s10341_s0  ;;  %v4348_v11 = vmul.f32 %v11399_v61, %v4315_v10 }
0x165d   :  { %4357 = vrot.lane.b32.xlu1 %v4347_v42, %s10341_s0 }
0x165e   :  { %v4320_v54 = vpop.permute.xlu1 %4319 }
0x165f   :  { %v4349_v55 = vmul.f32 %v4320_v54, %v11405_v24  ;;  %v4325_v3 = vpop.permute.xlu0 %4324 }
0x1660   :  { %4359 = vrot.lane.b32.xlu0 %v4348_v11, %s10341_s0  ;;  %v4350_v9 = vmul.f32 %v11403_v7, %v4325_v3 }
0x1661   :  { %4563 = vrot.lane.b32.xlu1 %v4349_v55, %s10341_s0 }
0x1662   :  { %v3796_v26 = vpop.permute.xlu1 %3795 }
0x1663   :  { %v3817_v20 = vmul.f32 %v3796_v26, %v11411_v17  ;;  %v3801_v6 = vpop.permute.xlu0 %3800 }
0x1664   :  { %v3818_v40 = vmul.f32 %v11407_v36, %v3801_v6  ;;  %4565 = vrot.lane.b32.xlu0 %v4350_v9, %s10341_s0 }
0x1666   :  { %v9782_v2 = vpack.c.bf16 %v3818_v40, %v3817_v20 }
0x1667   :  { %v3811_v31 = vpop.permute.xlu0 %3810 }
0x1668   :  { %v3806_v47 = vpop.permute.xlu1 %3805  ;;  %v3820_v32 = vmul.f32 %v11417_v46, %v3811_v31  ;;  %9784 = vmatprep.subr.msk.bf16.mxu0 %vm10650_vm4, %v9782_v2 }
0x1669   :  { %v3819_v8 = vmul.f32 %v3806_v47, %v11421_v14  ;;  %9787 = vmatpush3.bf16.xpose.msk.msra.mxu0 %vm10650_vm4, %v9782_v2 }
0x166b   :  { %v9794_v38 = vpack.c.bf16 %v3820_v32, %v3819_v8  ;;  %v3781_v18 = vpop.permute.xlu0 %3780 }
0x166c   :  { %v3776_v17 = vpop.permute.xlu1 %3775  ;;  %v3814_v14 = vmul.f32 %v11399_v61, %v3781_v18 }
0x166d   :  { %v3813_v36 = vmul.f32 %v3776_v17, %v11401_v1  ;;  %9796 = vmatprep.subr.msk.bf16.mxu1 %vm10650_vm4, %v9794_v38 }
0x166e   :  { %9799 = vmatpush3.bf16.xpose.msk.msra.mxu1 %vm10650_vm4, %v9794_v38 }
0x166f   :  { %9200 = vmatprep.mubr.msk.f32.mxu0 %vm600_vm3, %v3813_v36  ;;  %v3791_v12 = vpop.permute.xlu0 %3790 }
0x1670   :  { %v3786_v46 = vpop.permute.xlu1 %3785  ;;  %9201 = vmatmul.mubr.msk.f32.vlgmr.msra.gmra.mrb[64].mxu0 %vm600_vm3, %v3814_v14  ;;  %v3816_v1 = vmul.f32 %v11403_v7, %v3791_v12 }
0x1671   :  { %v3815_v27 = vmul.f32 %v3786_v46, %v11405_v24  ;;  %9207 = vmatprep.mubr.msk.f32.mxu0 %vm600_vm3, %v11393_v57 }
0x1673   :  { %9214 = vmatprep.mubr.msk.f32.mxu1 %vm600_vm3, %v3815_v27 }
0x1675   :  { %9215 = vmatmul.mubr.msk.f32.vlgmr.msra.gmra.mrb[64].mxu1 %vm600_vm3, %v3816_v1 }
0x16c9   :  { %v10011_v19 = vpop.permute.xlu1 %10010 }
0x16ca   :  { %v10013_v4 = vunpack.i.h.bf16 %v10011_v19  ;;  %v10012_v61 = vunpack.i.l.bf16 %v10011_v19 }
0x16cc   :  { %v9806_v16 = vpack.c.bf16 %v10013_v4, %v10012_v61 }
0x16ce   :  { %v10016_v33 = vpop.permute.xlu0 %10015  ;;  %9808 = vmatprep.subr.msk.bf16.mxu1 %vm10650_vm4, %v9806_v16 }
0x16cf   :  { %v10018_v24 = vunpack.i.h.bf16 %v10016_v33  ;;  %v10017_v25 = vunpack.i.l.bf16 %v10016_v33  ;;  %v4358_v28 = vpop.permute.xlu1 %4357  ;;  %9811 = vmatpush3.bf16.xpose.msk.msra.mxu1 %vm10650_vm4, %v9806_v16 }
0x16d0   :  { %9228 = vmatprep.mubr.msk.f32.mxu1 %vm600_vm3, %v4358_v28 }
0x16d1   :  { %v9818_v7 = vpack.c.bf16 %v10018_v24, %v10017_v25 }
0x16d2   :  { %v4360_v49 = vpop.permute.xlu0 %4359 }
0x16d3   :  { %9820 = vmatprep.subr.msk.bf16.mxu1 %vm10650_vm4, %v9818_v7  ;;  %v4564_v0 = vpop.permute.xlu1 %4563 }
0x16d6   :  { %9229 = vmatmul.mubr.msk.f32.vlgmr.msra.gmra.mrb[66].mxu1 %vm600_vm3, %v4360_v49  ;;  %v4566_v48 = vpop.permute.xlu0 %4565 }
0x16d7   :  { %9823 = vmatpush3.bf16.xpose.msk.msra.mxu1 %vm10650_vm4, %v9818_v7  ;;  %9242 = vmatprep.mubr.msk.f32.mxu1 %vm600_vm3, %v4564_v0 }
0x16de   :  { %9243 = vmatmul.mubr.msk.f32.vlgmr.msra.gmra.mrb[68].mxu1 %vm600_vm3, %v4566_v48 }
0x1743   :  { %v9202_v22 = vpop.f32.mrb[64].mxu0 }
0x1744   :  { %v3899_v51 = vpop.f32.mrb[65].mxu0  ;;  %v3911_v34 = vsel %vm600_vm3, %v9202_v22, -inf }
0x1745   :  { %3912 = vmax.xlane.f32.xlu0 %v3911_v34  ;;  %v3908_v29 = vsel %vm600_vm3, %v3899_v51, -inf }
0x1746   :  { %3909 = vmax.xlane.f32.xlu1 %v3908_v29 }
0x1748   :  { %v9216_v21 = vpop.f32.mrb[64].mxu1 }
0x1749   :  { %v4097_v52 = vpop.f32.mrb[65].mxu1  ;;  %v4109_v60 = vsel %vm600_vm3, %v9216_v21, -inf }
0x174a   :  { %v4106_v35 = vsel %vm600_vm3, %v4097_v52, -inf  ;;  %4110 = vmax.xlane.f32.xlu1 %v4109_v60 }
0x174b   :  { %4107 = vmax.xlane.f32.xlu0 %v4106_v35 }
0x17a9   :  { %v9230_v41 = vpop.f32.mrb[66].mxu1 }
0x17aa   :  { %v4441_v53 = vpop.f32.mrb[67].mxu1  ;;  %v4453_v42 = vsel %vm600_vm3, %v9230_v41, -inf }
0x17ab   :  { %4454 = vmax.xlane.f32.xlu1 %v4453_v42  ;;  %v4450_v10 = vsel %vm600_vm3, %v4441_v53, -inf }
0x17ac   :  { %4451 = vmax.xlane.f32.xlu0 %v4450_v10 }
0x17b1   :  { %v9244_v11 = vpop.f32.mrb[68].mxu1 }
0x17b2   :  { %v4647_v54 = vpop.f32.mrb[69].mxu1  ;;  %v4659_v55 = vsel %vm600_vm3, %v9244_v11, -inf }
0x17b3   :  { %4660 = vmax.xlane.f32.xlu1 %v4659_v55  ;;  %v4656_v3 = vsel %vm600_vm3, %v4647_v54, -inf }
0x17b4   :  { %4657 = vmax.xlane.f32.xlu0 %v4656_v3 }
0x17d2   :  { %v3913_v9 = vpop.xlane.xlu0 %3912 }
0x17d3   :  { %v3915_v26 = vsub.f32 %v9202_v22, %v3913_v9  ;;  %v3910_v20 = vpop.xlane.xlu1 %3909 }
0x17d4   :  { %v3914_v6 = vsub.f32 %v3899_v51, %v3910_v20 }
0x17d5   :  { %v3918_v40 = vmul.f32 1.442695, %v3915_v26 }
0x17d6   :  { %v3916_v2 = vmul.f32 1.442695, %v3914_v6 }
0x17d7   :  { %10211 = vpow2.f32 %v3918_v40  ;;  %v4111_v47 = vpop.xlane.xlu1 %4110 }
0x17d8   :  { %v4108_v31 = vpop.xlane.xlu0 %4107  ;;  %10213 = vpow2.f32 %v3916_v2  ;;  %v4113_v8 = vsub.f32 %v9216_v21, %v4111_v47 }
0x17d9   :  { %v4112_v32 = vsub.f32 %v4097_v52, %v4108_v31 }
0x17da   :  { %v4116_v38 = vmul.f32 1.442695, %v4113_v8 }
0x17db   :  { %v4114_v17 = vmul.f32 1.442695, %v4112_v32 }
0x17dc   :  { %10215 = vpow2.f32 %v4116_v38 }
0x17dd   :  { %10217 = vpow2.f32 %v4114_v17 }
0x17e1   :  { %v10212_v18 = vpop.eup %10211 }
0x17e2   :  { %v10214_v36 = vpop.eup %10213  ;;  %v3923_v14 = vsel %vm600_vm3, %v10212_v18, 0.0 }
0x17e3   :  { %3924 = vadd.xlane.f32.xlu1 %v3923_v14  ;;  %v3920_v46 = vsel %vm600_vm3, %v10214_v36, 0.0 }
0x17e4   :  { %3921 = vadd.xlane.f32.xlu0 %v3920_v46 }
0x17e6   :  { %v10216_v12 = vpop.eup %10215 }
0x17e7   :  { %v10218_v27 = vpop.eup %10217  ;;  %v4121_v1 = vsel %vm600_vm3, %v10216_v12, 0.0 }
0x17e8   :  { %4122 = vadd.xlane.f32.xlu1 %v4121_v1  ;;  %v4118_v19 = vsel %vm600_vm3, %v10218_v27, 0.0 }
0x17e9   :  { %4119 = vadd.xlane.f32.xlu0 %v4118_v19 }
0x1838   :  { %v4455_v4 = vpop.xlane.xlu1 %4454 }
0x1839   :  { %v4457_v61 = vsub.f32 %v9230_v41, %v4455_v4  ;;  %v4452_v16 = vpop.xlane.xlu0 %4451 }
0x183a   :  { %v4456_v33 = vsub.f32 %v4441_v53, %v4452_v16 }
0x183b   :  { %v4460_v24 = vmul.f32 1.442695, %v4457_v61 }
0x183c   :  { %v4458_v25 = vmul.f32 1.442695, %v4456_v33 }
0x183d   :  { %10219 = vpow2.f32 %v4460_v24  ;;  %v4782_v24 = vld [vmem:[%s12512_s1 + $0x448] sm:$0xff] }
0x183e   :  { %10221 = vpow2.f32 %v4458_v25  ;;  %v4783_v25 = vld [vmem:[%s12512_s1 + $0x450] sm:$0xff] }
0x1840   :  { %v4661_v28 = vpop.xlane.xlu1 %4660 }
0x1841   :  { %v4663_v7 = vsub.f32 %v9244_v11, %v4661_v28  ;;  %v4658_v49 = vpop.xlane.xlu0 %4657 }
0x1842   :  { %v4662_v0 = vsub.f32 %v4647_v54, %v4658_v49 }
0x1843   :  { %v4666_v48 = vmul.f32 1.442695, %v4663_v7  ;;  %v4784_v7 = vld [vmem:[%s12512_s1 + $0x458] sm:$0xff] }
0x1844   :  { %v4664_v22 = vmul.f32 1.442695, %v4662_v0  ;;  %v9834_v49 = vpack.c.bf16 %v4784_v7, %v4783_v25  ;;  %v11643_v25 = vld [vmem:[%s12512_s1 + $0x78] sm:$0xff] }
0x1845   :  { %10223 = vpow2.f32 %v4666_v48 }
0x1846   :  { %10225 = vpow2.f32 %v4664_v22 }
0x1847   :  { %v10220_v51 = vpop.eup %10219 }
0x1848   :  { %v10222_v34 = vpop.eup %10221  ;;  %v4465_v29 = vsel %vm600_vm3, %v10220_v51, 0.0 }
0x1849   :  { %4466 = vadd.xlane.f32.xlu1 %v4465_v29  ;;  %v4462_v21 = vsel %vm600_vm3, %v10222_v34, 0.0 }
0x184a   :  { %4463 = vadd.xlane.f32.xlu0 %v4462_v21 }
0x184f   :  { %v10224_v52 = vpop.eup %10223 }
0x1850   :  { %v10226_v60 = vpop.eup %10225  ;;  %v4671_v35 = vsel %vm600_vm3, %v10224_v52, 0.0 }
0x1851   :  { %4672 = vadd.xlane.f32.xlu1 %v4671_v35  ;;  %v4668_v41 = vsel %vm600_vm3, %v10226_v60, 0.0 }
0x1852   :  { %4669 = vadd.xlane.f32.xlu0 %v4668_v41 }
0x1862   :  { %4130 = vrot.lane.b32.xlu1 %v11391_v56, %s10341_s0 }
0x1866   :  { %4678 = vrot.lane.b32.xlu1 %v11397_v59, %s10341_s0 }
0x1868   :  { %4128 = vrot.lane.b32.xlu0 %v11393_v57, %s10341_s0 }
0x186c   :  { %4680 = vrot.lane.b32.xlu0 %v11395_v58, %s10341_s0 }
0x1870   :  { %v3925_v53 = vpop.xlane.xlu1 %3924 }
0x1871   :  { %10227 = vrcp.f32 %v3925_v53  ;;  %v3922_v42 = vpop.xlane.xlu0 %3921 }
0x1872   :  { %10229 = vrcp.f32 %v3922_v42 }
0x1875   :  { %v4123_v10 = vpop.xlane.xlu1 %4122 }
0x1876   :  { %10231 = vrcp.f32 %v4123_v10  ;;  %v4120_v11 = vpop.xlane.xlu0 %4119 }
0x1877   :  { %10233 = vrcp.f32 %v4120_v11 }
0x187b   :  { %v10228_v54 = vpop.eup %10227 }
0x187c   :  { %v10230_v55 = vpop.eup %10229  ;;  %v3929_v3 = vmul.f32 %v10228_v54, %v10212_v18  ;;  %v8289_v54 = vld [vmem:[%s12512_s1 + $0x460] ss:$0 sm:$0xff] }
0x187d   :  { %v3928_v9 = vmul.f32 %v10230_v55, %v10214_v36 }
0x187f   :  { %v9788_v26 = vpack.c.bf16 %v3929_v3, %v3928_v9 }
0x1880   :  { %v10232_v20 = vpop.eup %10231 }
0x1881   :  { %v10234_v6 = vpop.eup %10233  ;;  %9790 = vmatprep.subr.msk.bf16.mxu0 %vm10650_vm4, %v9788_v26  ;;  %v4127_v57 = vmul.f32 %v10232_v20, %v10216_v12 }
0x1882   :  { %9793 = vmatpush3.bf16.xpose.msk.msra.mxu0 %vm10650_vm4, %v9788_v26  ;;  %v4126_v40 = vmul.f32 %v10234_v6, %v10218_v27 }
0x1884   :  { %v9800_v2 = vpack.c.bf16 %v4127_v57, %v4126_v40 }
0x1886   :  { %9802 = vmatprep.subr.msk.bf16.mxu0 %vm10650_vm4, %v9800_v2 }
0x1889   :  { %9208 = vmatmul.mubr.msk.f32.vlgmr.msra.gmra.mrb[66].mxu0 %vm600_vm3, %v11391_v56 }
0x188a   :  { %9805 = vmatpush3.bf16.xpose.msk.msra.mxu0 %vm10650_vm4, %v9800_v2 }
0x18d6   :  { %v4467_v47 = vpop.xlane.xlu1 %4466 }
0x18d7   :  { %10235 = vrcp.f32 %v4467_v47  ;;  %v4464_v31 = vpop.xlane.xlu0 %4463 }
0x18d8   :  { %10237 = vrcp.f32 %v4464_v31 }
0x18de   :  { %v4673_v8 = vpop.xlane.xlu1 %4672 }
0x18df   :  { %10239 = vrcp.f32 %v4673_v8  ;;  %v4670_v32 = vpop.xlane.xlu0 %4669 }
0x18e0   :  { %10241 = vrcp.f32 %v4670_v32 }
0x18e1   :  { %v10236_v38 = vpop.eup %10235 }
0x18e2   :  { %v10238_v17 = vpop.eup %10237  ;;  %v4471_v18 = vmul.f32 %v10236_v38, %v10220_v51  ;;  %v4131_v46 = vpop.permute.xlu1 %4130 }
0x18e3   :  { %v4129_v36 = vpop.permute.xlu0 %4128  ;;  %v4470_v14 = vmul.f32 %v10238_v17, %v10222_v34 }
0x18e4   :  { %9221 = vmatprep.mubr.msk.f32.mxu0 %vm600_vm3, %v4129_v36 }
0x18e5   :  { %9222 = vmatmul.mubr.msk.f32.vlgmr.msra.gmra.mrb[68].mxu0 %vm600_vm3, %v4131_v46  ;;  %v9812_v56 = vpack.c.bf16 %v4471_v18, %v4470_v14 }
0x18e6   :  { %9235 = vmatprep.mubr.msk.f32.mxu0 %vm600_vm3, %v11397_v59  ;;  %v4679_v61 = vpop.permute.xlu1 %4678 }
0x18e7   :  { %9814 = vmatprep.subr.msk.bf16.mxu0 %vm10650_vm4, %v9812_v56  ;;  %v4681_v59 = vpop.permute.xlu0 %4680 }
0x18e8   :  { %9817 = vmatpush3.bf16.xpose.msk.msra.mxu0 %vm10650_vm4, %v9812_v56 }
0x18e9   :  { %v10240_v12 = vpop.eup %10239 }
0x18ea   :  { %v10242_v27 = vpop.eup %10241  ;;  %v4677_v1 = vmul.f32 %v10240_v12, %v10224_v52 }
0x18eb   :  { %v4676_v19 = vmul.f32 %v10242_v27, %v10226_v60 }
0x18ed   :  { %v9824_v4 = vpack.c.bf16 %v4677_v1, %v4676_v19 }
0x18ef   :  { %9236 = vmatmul.mubr.msk.f32.vlgmr.msra.gmra.mrb[70].mxu0 %vm600_vm3, %v11395_v58  ;;  %9826 = vmatprep.subr.msk.bf16.mxu0 %vm10650_vm4, %v9824_v4  ;;  %v4781_v58 = vld [vmem:[%s12512_s1 + $0x440] sm:$0xff] }
0x18f0   :  { %9829 = vmatpush3.bf16.xpose.msk.msra.mxu0 %vm10650_vm4, %v9824_v4  ;;  %9249 = vmatprep.mubr.msk.f32.mxu0 %vm600_vm3, %v4679_v61  ;;  %v9830_v28 = vpack.c.bf16 %v4782_v24, %v4781_v58 }
0x18f2   :  { %9831 = vmatprep.subr.bf16.mxu1 %v9830_v28 }
0x18f3   :  { %9833 = vmatpush3.bf16.msra.mxu1 %v9830_v28  ;;  %v11650_v28 = vld [vmem:[%s12512_s1 + $0xd8] sm:$0xff] }
0x18f4   :  { %9835 = vmatprep.subr.bf16.mxu1 %v9834_v49 }
0x18f7   :  { %9250 = vmatmul.mubr.msk.f32.vlgmr.msra.gmra.mrb[72].mxu0 %vm600_vm3, %v4681_v59  ;;  %9837 = vmatpush3.bf16.msra.mxu1 %v9834_v49 }
0x18f8   :  { %9274 = vmatprep.mubr.msk.f32.mxu0 %vm198_vm1, %v11643_v25 }
0x195c   :  { %v9209_v16 = vpop.f32.mrb[66].mxu0 }
0x195d   :  { %4018 = vst.msk [vmem:[#allocation2 + $0x8] sm:$0xff] %vm600_vm3, %v9209_v16  ;;  %v4008_v33 = vpop.f32.mrb[67].mxu0 }
0x195e   :  { %4017 = vst.msk [vmem:[#allocation2] sm:$0xff] %vm600_vm3, %v4008_v33 }
0x19b8   :  { %v9223_v0 = vpop.f32.mrb[68].mxu0 }
0x19b9   :  { %4221 = vrot.lane.b32.xlu0 %v9223_v0, %s10343_s13  ;;  %v4208_v48 = vpop.f32.mrb[69].mxu0 }
0x19ba   :  { %4219 = vrot.lane.b32.xlu1 %v4208_v48, %s10343_s13 }
0x19c2   :  { %v9237_v22 = vpop.f32.mrb[70].mxu0 }
0x19c3   :  { %4560 = vst.msk [vmem:[#allocation2 + $0x18] sm:$0xff] %vm600_vm3, %v9237_v22  ;;  %v4550_v51 = vpop.f32.mrb[71].mxu0 }
0x19c4   :  { %4559 = vst.msk [vmem:[#allocation2 + $0x10] sm:$0xff] %vm600_vm3, %v4550_v51 }
0x19ca   :  { %v9251_v34 = vpop.f32.mrb[72].mxu0 }
0x19cb   :  { %4771 = vrot.lane.b32.xlu0 %v9251_v34, %s10343_s13  ;;  %v4758_v29 = vpop.f32.mrb[73].mxu0 }
0x19cc   :  { %4769 = vrot.lane.b32.xlu1 %v4758_v29, %s10343_s13  ;;  %v8290_v29 = vld [vmem:[%s12512_s1 + $0x468] ss:$0 sm:$0xff] }
0x1a2b   :  { %v4222_v21 = vpop.permute.xlu0 %4221 }
0x1a2c   :  { %4226 = vst.msk [vmem:[#allocation2 + $0x8] sm:$0xff] %vm1101_vm5, %v4222_v21  ;;  %v4220_v52 = vpop.permute.xlu1 %4219 }
0x1a2d   :  { %4225 = vst.msk [vmem:[#allocation2] sm:$0xff] %vm1101_vm5, %v4220_v52 }
0x1a33   :  { %v4778_v35 = vld [vmem:[#allocation2 + $0x8] sm:$0xff] }
0x1a34   :  { %v4777_v60 = vld [vmem:[#allocation2] sm:$0xff] }
0x1a35   :  { %9260 = vmatprep.mubr.msk.f32.mxu1 %vm198_vm1, %v4777_v60  ;;  %v8291_v60 = vld [vmem:[%s12512_s1 + $0x470] ss:$0 sm:$0xff] }
0x1a36   :  { %9261 = vmatmul.mubr.msk.f32.vlgmr.msra.gmra.mrb[70].mxu1 %vm198_vm1, %v4778_v35 }
0x1a3d   :  { %v4772_v41 = vpop.permute.xlu0 %4771 }
0x1a3e   :  { %4776 = vst.msk [vmem:[#allocation2 + $0x18] sm:$0xff] %vm1101_vm5, %v4772_v41  ;;  %v4770_v53 = vpop.permute.xlu1 %4769 }
0x1a3f   :  { %4775 = vst.msk [vmem:[#allocation2 + $0x10] sm:$0xff] %vm1101_vm5, %v4770_v53 }
0x1a45   :  { %v4780_v10 = vld [vmem:[#allocation2 + $0x18] sm:$0xff] }
0x1a46   :  { %v4779_v42 = vld [vmem:[#allocation2 + $0x10] sm:$0xff] }
0x1a47   :  { %9263 = vmatprep.mubr.msk.f32.mxu1 %vm198_vm1, %v4779_v42 }
0x1a48   :  { %9264 = vmatmul.mubr.msk.f32.gmra.mrb[72].mxu1 %vm198_vm1, %v4780_v10 }
0x1a49   :  { %9300 = vmatprep.mubr.msk.f32.mxu1 %vm198_vm1, %v11650_v28 }
0x1b09   :  { %v9262_v11 = vpop.f32.mrb[70].mxu1 }
0x1b0a   :  { %v4883_v55 = vadd.f32 %v9262_v11, %v11302_v23  ;;  %v4863_v3 = vpop.f32.mrb[71].mxu1 }
0x1b0b   :  { %v4882_v9 = vadd.f32 %v4863_v3, %v11305_v44 }
0x1b0c   :  { %v11614_v26 = vadd.f32 %v8289_v54, %v4883_v55 }
0x1b0d   :  { %v11616_v20 = vadd.f32 %v8289_v54, %v4882_v9 }
0x1b0e   :  { %12628 = vst [vmem:[#allocation12_spill] sm:$0xff] %v11614_v26  ;;  %v4900_v6 = vsel %vm198_vm1, %v11614_v26, 0.0 }
0x1b0f   :  { %12629 = vst [vmem:[#allocation13_spill] sm:$0xff] %v11616_v20  ;;  %4901 = vadd.xlane.f32.xlu0 %v4900_v6  ;;  %v4897_v57 = vsel %vm198_vm1, %v11616_v20, 0.0 }
0x1b10   :  { %4898 = vadd.xlane.f32.xlu1 %v4897_v57 }
0x1b1b   :  { %v9265_v40 = vpop.f32.mrb[72].mxu1 }
0x1b1c   :  { %v4885_v2 = vadd.f32 %v9265_v40, %v11312_v45  ;;  %v4873_v47 = vpop.f32.mrb[73].mxu1 }
0x1b1d   :  { %v4884_v23 = vadd.f32 %v4873_v47, %v11315_v63 }
0x1b1e   :  { %v11624_v31 = vadd.f32 %v8289_v54, %v4885_v2 }
0x1b1f   :  { %v11626_v44 = vadd.f32 %v8289_v54, %v4884_v23 }
0x1b20   :  { %12630 = vst [vmem:[#allocation14_spill] sm:$0xff] %v11624_v31  ;;  %v4906_v8 = vsel %vm198_vm1, %v11624_v31, 0.0 }
0x1b21   :  { %12631 = vst [vmem:[#allocation15_spill] sm:$0xff] %v11626_v44  ;;  %4907 = vadd.xlane.f32.xlu1 %v4906_v8  ;;  %v4903_v32 = vsel %vm198_vm1, %v11626_v44, 0.0 }
0x1b22   :  { %4904 = vadd.xlane.f32.xlu0 %v4903_v32 }
0x1b9c   :  { %v4902_v38 = vpop.xlane.xlu0 %4901 }
0x1b9d   :  { %v4910_v17 = vmul.f32 0.03125, %v4902_v38  ;;  %v4899_v18 = vpop.xlane.xlu1 %4898 }
0x1b9e   :  { %v4909_v36 = vmul.f32 0.03125, %v4899_v18 }
0x1b9f   :  { %v4914_v45 = vsub.f32 %v11614_v26, %v4910_v17 }
0x1ba0   :  { %v4913_v63 = vsub.f32 %v11616_v20, %v4909_v36  ;;  %v11663_v36 = vld [vmem:[%s12512_s1 + $0x80] sm:$0xff] }
0x1ba1   :  { %v4918_v14 = vmul.f32 %v4914_v45, %v4914_v45 }
0x1ba2   :  { %v4917_v46 = vmul.f32 %v4913_v63, %v4913_v63 }
0x1ba3   :  { %v4924_v56 = vsel %vm198_vm1, %v4918_v14, 0.0  ;;  %v11678_v14 = vld [vmem:[%s12512_s1 + $0xe8] sm:$0xff] }
0x1ba4   :  { %4925 = vadd.xlane.f32.xlu1 %v4924_v56  ;;  %v4921_v12 = vsel %vm198_vm1, %v4917_v46, 0.0  ;;  %v11689_v46 = vld [vmem:[%s12512_s1 + $0x90] sm:$0xff] }
0x1ba5   :  { %4922 = vadd.xlane.f32.xlu0 %v4921_v12  ;;  %v11694_v56 = vld [vmem:[%s12512_s1 + $0xf0] sm:$0xff]  ;;  %v11699_v12 = vld [vmem:[%s12512_s1 + $0x98] sm:$0xff] }
0x1bae   :  { %v4908_v27 = vpop.xlane.xlu1 %4907 }
0x1baf   :  { %v4912_v1 = vmul.f32 0.03125, %v4908_v27  ;;  %v4905_v19 = vpop.xlane.xlu0 %4904  ;;  %v11706_v27 = vld [vmem:[%s12512_s1 + $0xf8] sm:$0xff] }
0x1bb0   :  { %v4911_v4 = vmul.f32 0.03125, %v4905_v19  ;;  %v11722_v19 = vld [vmem:[%s12512_s1 + $0x100] sm:$0xff] }
0x1bb1   :  { %v4916_v61 = vsub.f32 %v11624_v31, %v4912_v1  ;;  %v11717_v1 = vld [vmem:[%s12512_s1 + $0xa0] sm:$0xff] }
0x1bb2   :  { %v4915_v59 = vsub.f32 %v11626_v44, %v4911_v4  ;;  %v11727_v4 = vld [vmem:[%s12512_s1 + $0xa8] sm:$0xff] }
0x1bb3   :  { %v4920_v16 = vmul.f32 %v4916_v61, %v4916_v61 }
0x1bb4   :  { %v4919_v33 = vmul.f32 %v4915_v59, %v4915_v59 }
0x1bb5   :  { %v4930_v58 = vsel %vm198_vm1, %v4920_v16, 0.0  ;;  %v11752_v16 = vld [vmem:[%s12512_s1 + $0x110] sm:$0xff] }
0x1bb6   :  { %4931 = vadd.xlane.f32.xlu1 %v4930_v58  ;;  %v4927_v24 = vsel %vm198_vm1, %v4919_v33, 0.0  ;;  %v11757_v33 = vld [vmem:[%s12512_s1 + $0xb8] sm:$0xff] }
0x1bb7   :  { %4928 = vadd.xlane.f32.xlu0 %v4927_v24  ;;  %v11762_v58 = vld [vmem:[%s12512_s1 + $0x118] sm:$0xff]  ;;  %v11773_v24 = vld [vmem:[%s12512_s1 + $0xc0] sm:$0xff] }
0x1c31   :  { %v4926_v7 = vpop.xlane.xlu1 %4925 }
0x1c32   :  { %v4934_v49 = vmul.f32 0.03125, %v4926_v7  ;;  %v4923_v0 = vpop.xlane.xlu0 %4922  ;;  %v11780_v7 = vld [vmem:[%s12512_s1 + $0x120] sm:$0xff] }
0x1c33   :  { %v4933_v48 = vmul.f32 0.03125, %v4923_v0  ;;  %v11790_v0 = vld [vmem:[%s12512_s1 + $0x128] sm:$0xff] }
0x1c34   :  { %v4938_v22 = vadd.f32 1e-05, %v4934_v49  ;;  %v11785_v49 = vld [vmem:[%s12512_s1 + $0xc8] sm:$0xff] }
0x1c35   :  { %v4937_v51 = vadd.f32 1e-05, %v4933_v48  ;;  %v11801_v48 = vld [vmem:[%s12512_s1 + $0xd0] sm:$0xff] }
0x1c36   :  { %10243 = vrsqrt.f32 %v4938_v22  ;;  %12632 = vst [vmem:[#allocation16_spill] sm:$0xff] %v11801_v48  ;;  %v11808_v22 = vld [vmem:[%s12512_s1 + $0x130] sm:$0xff] }
0x1c37   :  { %10245 = vrsqrt.f32 %v4937_v51  ;;  %12633 = vst [vmem:[#allocation17_spill] sm:$0xff] %v11808_v22  ;;  %v11813_v51 = vld [vmem:[%s12512_s1 + $0x138] sm:$0xff] }
0x1c38   :  { %12634 = vst [vmem:[#allocation18_spill] sm:$0xff] %v11813_v51 }
0x1c40   :  { %v10244_v34 = vpop.eup %10243 }
0x1c41   :  { %v10246_v21 = vpop.eup %10245  ;;  %v4946_v52 = vmul.f32 %v10244_v34, %v4914_v45  ;;  %v11668_v45 = vld [vmem:[%s12512_s1 + $0xe0] sm:$0xff] }
0x1c42   :  { %v4945_v35 = vmul.f32 %v10246_v21, %v4913_v63  ;;  %v11673_v63 = vld [vmem:[%s12512_s1 + $0x88] sm:$0xff]  ;;  %v11824_v34 = vld [vmem:[%s12512_s1 + $0x140] sm:$0xff]  ;;  %v11840_v21 = vld [vmem:[%s12512_s1 + $0x150] sm:$0xff] }
0x1c43   :  { %v4954_v41 = vmul.f32 %v8290_v29, %v4946_v52  ;;  %v4932_v53 = vpop.xlane.xlu1 %4931  ;;  %12635 = vst [vmem:[#allocation19_spill] sm:$0xff] %v11824_v34  ;;  %12637 = vst [vmem:[#allocation21_spill] sm:$0xff] %v11840_v21  ;;  %v11854_v52 = vld [vmem:[%s12512_s1 + $0x160] sm:$0xff] }
0x1c44   :  { %v4953_v42 = vmul.f32 %v8290_v29, %v4945_v35  ;;  %v4936_v10 = vmul.f32 0.03125, %v4932_v53  ;;  %v4929_v11 = vpop.xlane.xlu0 %4928  ;;  %12639 = vst [vmem:[#allocation23_spill] sm:$0xff] %v11854_v52  ;;  %v11868_v35 = vld [vmem:[%s12512_s1 + $0x170] sm:$0xff]  ;;  %v11882_v53 = vld [vmem:[%s12512_s1 + $0x180] sm:$0xff] }
0x1c45   :  { %v4962_v54 = vadd.f32 %v8291_v60, %v4954_v41  ;;  %v4935_v55 = vmul.f32 0.03125, %v4929_v11  ;;  %12641 = vst [vmem:[#allocation9_spill] sm:$0xff] %v11868_v35  ;;  %v11873_v41 = vld [vmem:[%s12512_s1 + $0x178] sm:$0xff]  ;;  %12643 = vst [vmem:[#allocation11_spill] sm:$0xff] %v11882_v53 }
0x1c46   :  { %v4961_v3 = vadd.f32 %v8291_v60, %v4953_v42  ;;  %v4940_v9 = vadd.f32 1e-05, %v4936_v10  ;;  %12642 = vst [vmem:[#allocation10_spill] sm:$0xff] %v11873_v41  ;;  %v11887_v42 = vld [vmem:[%s12512_s1 + $0x188] sm:$0xff]  ;;  %v11896_v10 = vld [vmem:[%s12512_s1 + $0x190] sm:$0xff] }
0x1c47   :  { %v4939_v6 = vadd.f32 1e-05, %v4935_v55  ;;  %12644 = vst [vmem:[#allocation6_spill] sm:$0xff] %v11887_v42  ;;  %12645 = vst [vmem:[#allocation31_spill] sm:$0xff] %v11896_v10 }
0x1c48   :  { %10247 = vrsqrt.f32 %v4940_v9  ;;  %v9838_v57 = vpack.c.bf16 %v4962_v54, %v4961_v3  ;;  %v11905_v9 = vld [vmem:[%s12512_s1 + $0x478] sm:$0xff] }
0x1c49   :  { %10249 = vrsqrt.f32 %v4939_v6 }
0x1c4a   :  { %9839 = vmatprep.subr.bf16.mxu0 %v9838_v57  ;;  %9847 = vmatprep.subr.bf16.mxu1 %v9838_v57 }
0x1c4b   :  { %9841 = vmatpush3.bf16.msra.mxu0 %v9838_v57  ;;  %9849 = vmatpush3.bf16.msra.mxu1 %v9838_v57 }
0x1c52   :  { %v10248_v40 = vpop.eup %10247 }
0x1c53   :  { %v10250_v2 = vpop.eup %10249  ;;  %v4948_v47 = vmul.f32 %v10248_v40, %v4916_v61  ;;  %v11734_v61 = vld [vmem:[%s12512_s1 + $0x108] sm:$0xff]  ;;  %v5144_v40 = vrot.slane %v11905_v9, %v12615_v62 }
0x1c54   :  { %v4947_v23 = vmul.f32 %v10250_v2, %v4915_v59  ;;  %v11745_v59 = vld [vmem:[%s12512_s1 + $0xb0] sm:$0xff] }
0x1c55   :  { %v4956_v8 = vmul.f32 %v8290_v29, %v4948_v47  ;;  %v5156_v47 = vrot.slane %v11905_v9, %v12616_v5  ;;  %v5168_v5 = vrot.slane %v11905_v9, %v12618_v39 }
0x1c56   :  { %v4955_v32 = vmul.f32 %v8290_v29, %v4947_v23  ;;  %v11831_v29 = vld [vmem:[%s12512_s1 + $0x148] sm:$0xff] }
0x1c57   :  { %v4964_v38 = vadd.f32 %v8291_v60, %v4956_v8  ;;  %12636 = vst [vmem:[#allocation20_spill] sm:$0xff] %v11831_v29 }
0x1c58   :  { %v4963_v17 = vadd.f32 %v8291_v60, %v4955_v32  ;;  %v11859_v60 = vld [vmem:[%s12512_s1 + $0x168] sm:$0xff] }
0x1c59   :  { %12640 = vst [vmem:[#allocation8_spill] sm:$0xff] %v11859_v60 }
0x1c5a   :  { %v9842_v18 = vpack.c.bf16 %v4964_v38, %v4963_v17 }
0x1c5c   :  { %9843 = vmatprep.subr.bf16.mxu0 %v9842_v18  ;;  %9851 = vmatprep.subr.bf16.mxu1 %v9842_v18 }
0x1c5d   :  { %9845 = vmatpush3.bf16.msra.mxu0 %v9842_v18  ;;  %9853 = vmatpush3.bf16.msra.mxu1 %v9842_v18 }
0x1c5e   :  { %9855 = vmatprep.subr.bf16.mxu0 %v9838_v57 }
0x1c60   :  { %9275 = vmatmul.mubr.msk.f32.vlgmr.msra.gmra.mrb[74].mxu0 %vm198_vm1, %v11663_v36  ;;  %9301 = vmatmul.mubr.msk.f32.vlgmr.msra.gmra.mrb[74].mxu1 %vm198_vm1, %v11668_v45 }
0x1c61   :  { %9857 = vmatpush3.bf16.msra.mxu0 %v9838_v57  ;;  %9277 = vmatprep.mubr.msk.f32.mxu0 %vm198_vm1, %v11673_v63 }
0x1c62   :  { %9859 = vmatprep.subr.bf16.mxu0 %v9842_v18  ;;  %9303 = vmatprep.mubr.msk.f32.mxu1 %vm198_vm1, %v11678_v14 }
0x1c64   :  { %9278 = vmatmul.mubr.msk.f32.gmra.mrb[76].mxu0 %vm198_vm1, %v11689_v46  ;;  %9304 = vmatmul.mubr.msk.f32.gmra.mrb[76].mxu1 %vm198_vm1, %v11694_v56 }
0x1c65   :  { %9861 = vmatpush3.bf16.msra.mxu0 %v9842_v18  ;;  %9280 = vmatprep.mubr.msk.f32.mxu0 %vm198_vm1, %v11699_v12 }
0x1c66   :  { %9306 = vmatprep.mubr.msk.f32.mxu1 %vm198_vm1, %v11706_v27 }
0x1c68   :  { %9281 = vmatmul.mubr.msk.f32.gmra.mrb[78].mxu0 %vm198_vm1, %v11717_v1  ;;  %9307 = vmatmul.mubr.msk.f32.gmra.mrb[78].mxu1 %vm198_vm1, %v11722_v19 }
0x1c69   :  { %9283 = vmatprep.mubr.msk.f32.mxu0 %vm198_vm1, %v11727_v4  ;;  %9309 = vmatprep.mubr.msk.f32.mxu1 %vm198_vm1, %v11734_v61 }
0x1c6c   :  { %9284 = vmatmul.mubr.msk.f32.gmra.mrb[80].mxu0 %vm198_vm1, %v11745_v59  ;;  %9310 = vmatmul.mubr.msk.f32.gmra.mrb[80].mxu1 %vm198_vm1, %v11752_v16 }
0x1c6d   :  { %9286 = vmatprep.mubr.msk.f32.mxu0 %vm198_vm1, %v11757_v33  ;;  %9312 = vmatprep.mubr.msk.f32.mxu1 %vm198_vm1, %v11762_v58 }
0x1c70   :  { %9287 = vmatmul.mubr.msk.f32.gmra.mrb[82].mxu0 %vm198_vm1, %v11773_v24  ;;  %9313 = vmatmul.mubr.msk.f32.gmra.mrb[82].mxu1 %vm198_vm1, %v11780_v7 }
0x1c71   :  { %9289 = vmatprep.mubr.msk.f32.mxu0 %vm198_vm1, %v11785_v49  ;;  %9315 = vmatprep.mubr.msk.f32.mxu1 %vm198_vm1, %v11790_v0 }
0x1c74   :  { %9290 = vmatmul.mubr.msk.f32.gmra.mrb[84].mxu0 %vm198_vm1, %v11801_v48  ;;  %9316 = vmatmul.mubr.msk.f32.gmra.mrb[84].mxu1 %vm198_vm1, %v11808_v22 }
0x1c75   :  { %9326 = vmatprep.mubr.msk.f32.mxu0 %vm198_vm1, %v11813_v51  ;;  %9352 = vmatprep.mubr.msk.f32.mxu1 %vm198_vm1, %v11643_v25  ;;  %v11845_v25 = vld [vmem:[%s12512_s1 + $0x158] sm:$0xff] }
0x1c76   :  { %12638 = vst [vmem:[#allocation22_spill] sm:$0xff] %v11845_v25 }
0x1c78   :  { %9327 = vmatmul.mubr.msk.f32.vlgmr.msra.gmra.mrb[86].mxu0 %vm198_vm1, %v11824_v34 }
0x1c79   :  { %9329 = vmatprep.mubr.msk.f32.mxu0 %vm198_vm1, %v11831_v29 }
0x1c7c   :  { %9330 = vmatmul.mubr.msk.f32.gmra.mrb[88].mxu0 %vm198_vm1, %v11840_v21 }
0x1c7d   :  { %9332 = vmatprep.mubr.msk.f32.mxu0 %vm198_vm1, %v11845_v25 }
0x1c80   :  { %9333 = vmatmul.mubr.msk.f32.gmra.mrb[90].mxu0 %vm198_vm1, %v11854_v52 }
0x1c81   :  { %9335 = vmatprep.mubr.msk.f32.mxu0 %vm198_vm1, %v11859_v60 }
0x1c84   :  { %9336 = vmatmul.mubr.msk.f32.gmra.mrb[92].mxu0 %vm198_vm1, %v11868_v35 }
0x1c85   :  { %9338 = vmatprep.mubr.msk.f32.mxu0 %vm198_vm1, %v11873_v41  ;;  %v5353_v41 = vrot.slane %v11905_v9, %v12617_v13 }
0x1c88   :  { %9339 = vmatmul.mubr.msk.f32.gmra.mrb[94].mxu0 %vm198_vm1, %v11882_v53 }
0x1c89   :  { %9341 = vmatprep.mubr.msk.f32.mxu0 %vm198_vm1, %v11887_v42 }
0x1c8c   :  { %9342 = vmatmul.mubr.msk.f32.gmra.mrb[96].mxu0 %vm198_vm1, %v11896_v10 }
0x1c8d   :  { %9378 = vmatprep.mubr.msk.f32.mxu0 %vm198_vm1, %v11650_v28 }
0x1d33   :  { %v9276_v11 = vpop.f32.mrb[74].mxu0  ;;  %v9302_v54 = vpop.f32.mrb[74].mxu1 }
0x1d34   :  { %v5082_v55 = vpop.f32.mrb[75].mxu0  ;;  %v5291_v3 = vpop.f32.mrb[75].mxu1  ;;  %v5146_v32 = vmul.f32 %v9276_v11, %v5144_v40 }
0x1d35   :  { %v5145_v50 = vmul.f32 %v5144_v40, %v5082_v55  ;;  %v5365_v55 = vrot.slane %v11905_v9, %v12619_v37  ;;  %v5354_v52 = vmul.f32 %v5353_v41, %v5291_v3 }
0x1d37   :  { %v9279_v6 = vpop.f32.mrb[76].mxu0  ;;  %v9305_v57 = vpop.f32.mrb[76].mxu1 }
0x1d38   :  { %v5092_v2 = vpop.f32.mrb[77].mxu0  ;;  %v5301_v23 = vpop.f32.mrb[77].mxu1  ;;  %v5148_v42 = vmul.f32 %v9279_v6, %v5144_v40 }
0x1d39   :  { %v5147_v11 = vmul.f32 %v5144_v40, %v5092_v2  ;;  %v5356_v29 = vmul.f32 %v5353_v41, %v5301_v23 }
0x1d3b   :  { %v9282_v28 = vpop.f32.mrb[78].mxu0  ;;  %v9308_v8 = vpop.f32.mrb[78].mxu1 }
0x1d3c   :  { %v5158_v38 = vmul.f32 %v9282_v28, %v5156_v47  ;;  %v5102_v17 = vpop.f32.mrb[79].mxu0  ;;  %v5311_v18 = vpop.f32.mrb[79].mxu1  ;;  %v5367_v21 = vmul.f32 %v9308_v8, %v5365_v55 }
0x1d3d   :  { %v5157_v44 = vmul.f32 %v5156_v47, %v5102_v17  ;;  %v5377_v17 = vrot.slane %v11905_v9, %v12620_v43 }
0x1d3e   :  { %v5162_v31 = vadd.f32 %v5158_v38, %v5146_v32  ;;  %v5355_v38 = vmul.f32 %v9302_v54, %v5353_v41 }
0x1d3f   :  { %v5161_v20 = vadd.f32 %v5157_v44, %v5145_v50  ;;  %v9285_v26 = vpop.f32.mrb[80].mxu0  ;;  %v9311_v10 = vpop.f32.mrb[80].mxu1 }
0x1d40   :  { %v5160_v53 = vmul.f32 %v9285_v26, %v5156_v47  ;;  %v5112_v62 = vpop.f32.mrb[81].mxu0  ;;  %v5321_v35 = vpop.f32.mrb[81].mxu1  ;;  %v5369_v8 = vmul.f32 %v9311_v10, %v5365_v55 }
0x1d41   :  { %v5159_v28 = vmul.f32 %v5156_v47, %v5112_v62  ;;  %v5366_v62 = vmul.f32 %v5365_v55, %v5311_v18  ;;  %v5357_v47 = vmul.f32 %v9305_v57, %v5353_v41  ;;  %v5368_v18 = vmul.f32 %v5365_v55, %v5321_v35 }
0x1d42   :  { %v5164_v60 = vadd.f32 %v5160_v53, %v5148_v42  ;;  %v5562_v42 = vrot.slane %v11905_v9, %v12621_v15 }
0x1d43   :  { %v5163_v32 = vadd.f32 %v5159_v28, %v5147_v11  ;;  %v9288_v50 = vpop.f32.mrb[82].mxu0  ;;  %v9314_v44 = vpop.f32.mrb[82].mxu1 }
0x1d44   :  { %v5170_v6 = vmul.f32 %v9288_v50, %v5168_v5  ;;  %v5122_v26 = vpop.f32.mrb[83].mxu0  ;;  %v5331_v13 = vpop.f32.mrb[83].mxu1  ;;  %v5379_v50 = vmul.f32 %v9314_v44, %v5377_v17 }
0x1d45   :  { %v5169_v25 = vmul.f32 %v5168_v5, %v5122_v26  ;;  %v5378_v3 = vmul.f32 %v5377_v17, %v5331_v13 }
0x1d46   :  { %v5174_v39 = vadd.f32 %v5170_v6, %v5162_v31 }
0x1d47   :  { %v5173_v40 = vadd.f32 %v5169_v25, %v5161_v20  ;;  %v9291_v53 = vpop.f32.mrb[84].mxu0  ;;  %v9317_v2 = vpop.f32.mrb[84].mxu1 }
0x1d48   :  { %v5359_v11 = vadd.f32 %v5355_v38, %v5174_v39  ;;  %v5172_v54 = vmul.f32 %v9291_v53, %v5168_v5  ;;  %v5132_v28 = vpop.f32.mrb[85].mxu0  ;;  %v5341_v37 = vpop.f32.mrb[85].mxu1  ;;  %v5381_v39 = vmul.f32 %v9317_v2, %v5377_v17 }
0x1d49   :  { %v5358_v43 = vadd.f32 %v5354_v52, %v5173_v40  ;;  %v5171_v34 = vmul.f32 %v5168_v5, %v5132_v28  ;;  %v5380_v48 = vmul.f32 %v5377_v17, %v5341_v37 }
0x1d4a   :  { %v5371_v26 = vadd.f32 %v5367_v21, %v5359_v11  ;;  %v5176_v31 = vadd.f32 %v5172_v54, %v5164_v60  ;;  %v8328_v11 = vld [vmem:[%s12512_s1 + $0x480] ss:$0 sm:$0xff] }
0x1d4b   :  { %v5370_v20 = vadd.f32 %v5366_v62, %v5358_v43  ;;  %v5175_v25 = vadd.f32 %v5171_v34, %v5163_v32  ;;  %v9328_v6 = vpop.f32.mrb[86].mxu0  ;;  %v5574_v34 = vrot.slane %v11905_v9, %v11098_v30 }
0x1d4c   :  { %v5361_v51 = vadd.f32 %v5357_v47, %v5176_v31  ;;  %v5383_v15 = vadd.f32 %v5379_v50, %v5371_v26  ;;  %v5564_v22 = vmul.f32 %v9328_v6, %v5562_v42  ;;  %v5500_v57 = vpop.f32.mrb[87].mxu0  ;;  %v8329_v50 = vld [vmem:[%s12512_s1 + $0x488] ss:$0 sm:$0xff] }
0x1d4d   :  { %v5360_v38 = vadd.f32 %v5356_v29, %v5175_v25  ;;  %v5382_v53 = vadd.f32 %v5378_v3, %v5370_v20  ;;  %v5563_v44 = vmul.f32 %v5562_v42, %v5500_v57 }
0x1d4e   :  { %v5373_v41 = vadd.f32 %v5369_v8, %v5361_v51  ;;  %v5568_v52 = vadd.f32 %v5564_v22, %v5383_v15 }
0x1d4f   :  { %v5372_v5 = vadd.f32 %v5368_v18, %v5360_v38  ;;  %v5567_v13 = vadd.f32 %v5563_v44, %v5382_v53  ;;  %v9331_v21 = vpop.f32.mrb[88].mxu0 }
0x1d50   :  { %v5385_v60 = vadd.f32 %v5381_v39, %v5373_v41  ;;  %v5566_v10 = vmul.f32 %v9331_v21, %v5562_v42  ;;  %v5510_v43 = vpop.f32.mrb[89].mxu0 }
0x1d51   :  { %v5384_v35 = vadd.f32 %v5380_v48, %v5372_v5  ;;  %v5565_v23 = vmul.f32 %v5562_v42, %v5510_v43 }
0x1d52   :  { %v5570_v55 = vadd.f32 %v5566_v10, %v5385_v60 }
0x1d53   :  { %v5569_v32 = vadd.f32 %v5565_v23, %v5384_v35  ;;  %v9334_v40 = vpop.f32.mrb[90].mxu0 }
0x1d54   :  { %v5576_v29 = vmul.f32 %v9334_v40, %v5574_v34  ;;  %v5520_v62 = vpop.f32.mrb[91].mxu0 }
0x1d55   :  { %v5575_v2 = vmul.f32 %v5574_v34, %v5520_v62 }
0x1d56   :  { %v5580_v37 = vadd.f32 %v5576_v29, %v5568_v52 }
0x1d57   :  { %v5579_v51 = vadd.f32 %v5575_v2, %v5567_v13  ;;  %v9337_v15 = vpop.f32.mrb[92].mxu0 }
0x1d58   :  { %v5578_v22 = vmul.f32 %v9337_v15, %v5574_v34  ;;  %v5530_v17 = vpop.f32.mrb[93].mxu0 }
0x1d59   :  { %v5577_v47 = vmul.f32 %v5574_v34, %v5530_v17 }
0x1d5a   :  { %v5582_v54 = vadd.f32 %v5578_v22, %v5570_v55 }
0x1d5b   :  { %v5581_v9 = vadd.f32 %v5577_v47, %v5569_v32  ;;  %v9340_v48 = vpop.f32.mrb[94].mxu0 }
0x1d5c   :  { %v5588_v42 = vmul.f32 %v9340_v48, %v8328_v11  ;;  %v5540_v28 = vpop.f32.mrb[95].mxu0 }
0x1d5d   :  { %v5587_v3 = vmul.f32 %v8328_v11, %v5540_v28 }
0x1d5e   :  { %v5592_v26 = vadd.f32 %v5588_v42, %v5580_v37 }
0x1d5f   :  { %v5591_v31 = vadd.f32 %v5587_v3, %v5579_v51  ;;  %v9343_v8 = vpop.f32.mrb[96].mxu0 }
0x1d60   :  { %v5600_v20 = vadd.f32 %v8329_v50, %v5592_v26  ;;  %v5590_v25 = vmul.f32 %v9343_v8, %v8328_v11  ;;  %v5550_v18 = vpop.f32.mrb[97].mxu0 }
0x1d61   :  { %v5599_v6 = vadd.f32 %v8329_v50, %v5591_v31  ;;  %v5589_v57 = vmul.f32 %v8328_v11, %v5550_v18 }
0x1d62   :  { %v5604_v39 = vsel %vm198_vm1, %v5600_v20, 0.0  ;;  %v5594_v38 = vadd.f32 %v5590_v25, %v5582_v54 }
0x1d63   :  { %v5603_v53 = vsel %vm198_vm1, %v5599_v6, 0.0  ;;  %v5593_v44 = vadd.f32 %v5589_v57, %v5581_v9  ;;  %v8330_v57 = vld [vmem:[%s12512_s1 + $0x490] ss:$0 sm:$0xff] }
0x1d64   :  { %v5605_v41 = vadd.f32 %v5604_v39, %v5603_v53  ;;  %v5602_v52 = vadd.f32 %v8329_v50, %v5594_v38 }
0x1d65   :  { %v5601_v5 = vadd.f32 %v8329_v50, %v5593_v44 }
0x1d66   :  { %v5608_v60 = vsel %vm198_vm1, %v5602_v52, 0.0 }
0x1d67   :  { %v5606_v13 = vsel %vm198_vm1, %v5601_v5, 0.0 }
0x1d68   :  { %v5607_v21 = vadd.f32 %v5606_v13, %v5605_v41  ;;  %v8331_v41 = vld [vmem:[%s12512_s1 + $0x498] ss:$0 sm:$0xff] }
0x1d6a   :  { %v5609_v10 = vadd.f32 %v5608_v60, %v5607_v21 }
0x1d6c   :  { %v5610_v43 = vrot.slane %v5609_v10, 4 }
0x1d6e   :  { %v5611_v34 = vadd.f32 %v5610_v43, %v5609_v10 }
0x1d70   :  { %v5612_v35 = vrot.slane %v5611_v34, 2 }
0x1d72   :  { %v5613_v23 = vadd.f32 %v5612_v35, %v5611_v34 }
0x1d74   :  { %v5614_v55 = vrot.slane %v5613_v23, 1 }
0x1d76   :  { %v5615_v32 = vadd.f32 %v5614_v55, %v5613_v23 }
0x1d78   :  { %v5616_v40 = vmul.f32 0.03125, %v5615_v32 }
0x1d7a   :  { %v5617_v29 = vsub.f32 %v5599_v6, %v5616_v40  ;;  %v5618_v62 = vsub.f32 %v5600_v20, %v5616_v40  ;;  %v5619_v2 = vsub.f32 %v5601_v5, %v5616_v40  ;;  %v5620_v37 = vsub.f32 %v5602_v52, %v5616_v40 }
0x1d7c   :  { %v5621_v51 = vmul.f32 %v5617_v29, %v5617_v29  ;;  %v5622_v15 = vmul.f32 %v5618_v62, %v5618_v62  ;;  %v5623_v22 = vmul.f32 %v5619_v2, %v5619_v2  ;;  %v5624_v17 = vmul.f32 %v5620_v37, %v5620_v37 }
0x1d7e   :  { %v5625_v47 = vsel %vm198_vm1, %v5621_v51, 0.0  ;;  %v5626_v11 = vsel %vm198_vm1, %v5622_v15, 0.0  ;;  %v5628_v9 = vsel %vm198_vm1, %v5623_v22, 0.0  ;;  %v5630_v42 = vsel %vm198_vm1, %v5624_v17, 0.0 }
0x1d7f   :  { %v5627_v54 = vadd.f32 %v5626_v11, %v5625_v47 }
0x1d81   :  { %v5629_v48 = vadd.f32 %v5628_v9, %v5627_v54 }
0x1d83   :  { %v5631_v28 = vadd.f32 %v5630_v42, %v5629_v48 }
0x1d85   :  { %v5632_v50 = vrot.slane %v5631_v28, 4 }
0x1d87   :  { %v5633_v3 = vadd.f32 %v5632_v50, %v5631_v28 }
0x1d89   :  { %v5634_v26 = vrot.slane %v5633_v3, 2 }
0x1d8b   :  { %v5635_v31 = vadd.f32 %v5634_v26, %v5633_v3 }
0x1d8d   :  { %v5636_v8 = vrot.slane %v5635_v31, 1 }
0x1d8f   :  { %v5637_v20 = vadd.f32 %v5636_v8, %v5635_v31 }
0x1d91   :  { %v5638_v25 = vmul.f32 0.03125, %v5637_v20 }
0x1d93   :  { %v5639_v18 = vadd.f32 1e-05, %v5638_v25 }
0x1d95   :  { %10251 = vrsqrt.f32 %v5639_v18 }
0x1d9f   :  { %v10252_v6 = vpop.eup %10251 }
0x1da0   :  { %v5641_v39 = vmul.f32 %v10252_v6, %v5617_v29  ;;  %v5642_v38 = vmul.f32 %v10252_v6, %v5618_v62  ;;  %v5643_v53 = vmul.f32 %v10252_v6, %v5619_v2  ;;  %v5644_v44 = vmul.f32 %v10252_v6, %v5620_v37 }
0x1da2   :  { %v5650_v52 = vmul.f32 %v8330_v57, %v5641_v39  ;;  %v5651_v5 = vmul.f32 %v8330_v57, %v5642_v38  ;;  %v5652_v13 = vmul.f32 %v8330_v57, %v5643_v53  ;;  %v5653_v21 = vmul.f32 %v8330_v57, %v5644_v44 }
0x1da4   :  { %v5659_v60 = vadd.f32 %v8331_v41, %v5650_v52  ;;  %v5660_v10 = vadd.f32 %v8331_v41, %v5651_v5  ;;  %v5661_v43 = vadd.f32 %v8331_v41, %v5652_v13  ;;  %v5662_v34 = vadd.f32 %v8331_v41, %v5653_v21 }
0x1da6   :  { %v5669_v35 = vmul.f32 0.044715, %v5661_v43  ;;  %v5667_v23 = vmul.f32 0.044715, %v5659_v60  ;;  %v5668_v55 = vmul.f32 0.044715, %v5660_v10 }
0x1da7   :  { %v5670_v32 = vmul.f32 0.044715, %v5662_v34  ;;  %v5663_v26 = vmul.f32 0.5, %v5659_v60  ;;  %v5664_v20 = vmul.f32 0.5, %v5660_v10  ;;  %v5665_v57 = vmul.f32 0.5, %v5661_v43 }
0x1da8   :  { %v5673_v40 = vmul.f32 %v5669_v35, %v5661_v43  ;;  %v5671_v29 = vmul.f32 %v5667_v23, %v5659_v60  ;;  %v5672_v62 = vmul.f32 %v5668_v55, %v5660_v10  ;;  %v5666_v53 = vmul.f32 0.5, %v5662_v34  ;;  %v12662_v55 = vld [vmem:[#allocation25_spill] sm:$0xff] }
0x1da9   :  { %v5674_v2 = vmul.f32 %v5670_v32, %v5662_v34 }
0x1daa   :  { %v5677_v37 = vmul.f32 %v5673_v40, %v5661_v43  ;;  %v5675_v51 = vmul.f32 %v5671_v29, %v5659_v60  ;;  %v5676_v15 = vmul.f32 %v5672_v62, %v5660_v10 }
0x1dab   :  { %v5678_v22 = vmul.f32 %v5674_v2, %v5662_v34 }
0x1dac   :  { %v5681_v17 = vadd.f32 %v5677_v37, %v5661_v43  ;;  %v5679_v47 = vadd.f32 %v5675_v51, %v5659_v60  ;;  %v5680_v11 = vadd.f32 %v5676_v15, %v5660_v10  ;;  %v12661_v60 = vld [vmem:[#allocation27_spill] sm:$0xff] }
0x1dad   :  { %v5682_v54 = vadd.f32 %v5678_v22, %v5662_v34 }
0x1dae   :  { %v5683_v9 = vmul.f32 0.7978846, %v5679_v47  ;;  %v5685_v48 = vmul.f32 0.7978846, %v5681_v17  ;;  %v5684_v42 = vmul.f32 0.7978846, %v5680_v11 }
0x1daf   :  { %v5686_v28 = vmul.f32 0.7978846, %v5682_v54 }
0x1db0   :  { %10253 = vtanh.f32 %v5683_v9 }
0x1db1   :  { %10255 = vtanh.f32 %v5684_v42 }
0x1db2   :  { %10257 = vtanh.f32 %v5685_v48  ;;  %v12663_v48 = vld [vmem:[#allocation28_spill] sm:$0xff] }
0x1db3   :  { %10259 = vtanh.f32 %v5686_v28 }
0x1dba   :  { %v10254_v50 = vpop.eup %10253 }
0x1dbb   :  { %v10256_v3 = vpop.eup %10255  ;;  %v5691_v31 = vadd.f32 1.0, %v10254_v50 }
0x1dbc   :  { %v10258_v8 = vpop.eup %10257  ;;  %v5692_v25 = vadd.f32 1.0, %v10256_v3 }
0x1dbd   :  { %v10260_v18 = vpop.eup %10259  ;;  %v5695_v6 = vmul.f32 %v5691_v31, %v5663_v26  ;;  %v5693_v39 = vadd.f32 1.0, %v10258_v8  ;;  %v12664_v8 = vld [vmem:[#allocation26_spill] sm:$0xff] }
0x1dbe   :  { %v5696_v38 = vmul.f32 %v5692_v25, %v5664_v20  ;;  %v5694_v44 = vadd.f32 1.0, %v10260_v18 }
0x1dbf   :  { %v5697_v41 = vmul.f32 %v5693_v39, %v5665_v57 }
0x1dc0   :  { %v9862_v52 = vpack.c.bf16 %v5696_v38, %v5695_v6  ;;  %v5698_v5 = vmul.f32 %v5694_v44, %v5666_v53 }
0x1dc2   :  { %9863 = vmatprep.subr.bf16.mxu1 %v9862_v52  ;;  %9871 = vmatprep.subr.bf16.mxu0 %v9862_v52  ;;  %v9866_v13 = vpack.c.bf16 %v5698_v5, %v5697_v41 }
0x1dc3   :  { %9865 = vmatpush3.bf16.msra.mxu1 %v9862_v52  ;;  %9873 = vmatpush3.bf16.msra.mxu0 %v9862_v52 }
0x1dc4   :  { %9867 = vmatprep.subr.bf16.mxu1 %v9866_v13  ;;  %9875 = vmatprep.subr.bf16.mxu0 %v9866_v13 }
0x1dc7   :  { %9869 = vmatpush3.bf16.msra.mxu1 %v9866_v13  ;;  %9877 = vmatpush3.bf16.msra.mxu0 %v9866_v13 }
0x1dc8   :  { %9879 = vmatprep.subr.bf16.mxu1 %v9862_v52 }
0x1dca   :  { %9353 = vmatmul.mubr.msk.f32.vlgmr.msra.gmra.mrb[86].mxu1 %vm198_vm1, %v11663_v36  ;;  %9379 = vmatmul.mubr.msk.f32.vlgmr.msra.gmra.mrb[98].mxu0 %vm198_vm1, %v11668_v45  ;;  %v12646_v36 = vld [vmem:[#allocation16_spill] sm:$0xff]  ;;  %v12647_v45 = vld [vmem:[#allocation17_spill] sm:$0xff] }
0x1dcb   :  { %9881 = vmatpush3.bf16.msra.mxu1 %v9862_v52  ;;  %9355 = vmatprep.mubr.msk.f32.mxu1 %vm198_vm1, %v11673_v63  ;;  %v12648_v63 = vld [vmem:[#allocation18_spill] sm:$0xff] }
0x1dcc   :  { %9883 = vmatprep.subr.bf16.mxu1 %v9866_v13  ;;  %9381 = vmatprep.mubr.msk.f32.mxu0 %vm198_vm1, %v11678_v14  ;;  %v12649_v14 = vld [vmem:[#allocation19_spill] sm:$0xff] }
0x1dce   :  { %9356 = vmatmul.mubr.msk.f32.gmra.mrb[88].mxu1 %vm198_vm1, %v11689_v46  ;;  %9382 = vmatmul.mubr.msk.f32.gmra.mrb[100].mxu0 %vm198_vm1, %v11694_v56  ;;  %v12650_v46 = vld [vmem:[#allocation20_spill] sm:$0xff]  ;;  %v12651_v56 = vld [vmem:[#allocation21_spill] sm:$0xff] }
0x1dcf   :  { %9885 = vmatpush3.bf16.msra.mxu1 %v9866_v13  ;;  %9358 = vmatprep.mubr.msk.f32.mxu1 %vm198_vm1, %v11699_v12  ;;  %v12652_v12 = vld [vmem:[#allocation22_spill] sm:$0xff]  ;;  %v12665_v13 = vld [vmem:[#allocation29_spill] sm:$0xff] }
0x1dd0   :  { %9384 = vmatprep.mubr.msk.f32.mxu0 %vm198_vm1, %v11706_v27  ;;  %v12653_v27 = vld [vmem:[#allocation23_spill] sm:$0xff] }
0x1dd2   :  { %9359 = vmatmul.mubr.msk.f32.gmra.mrb[90].mxu1 %vm198_vm1, %v11717_v1  ;;  %9385 = vmatmul.mubr.msk.f32.gmra.mrb[102].mxu0 %vm198_vm1, %v11722_v19  ;;  %v12654_v1 = vld [vmem:[#allocation8_spill] sm:$0xff]  ;;  %v12655_v19 = vld [vmem:[#allocation9_spill] sm:$0xff] }
0x1dd3   :  { %9361 = vmatprep.mubr.msk.f32.mxu1 %vm198_vm1, %v11727_v4  ;;  %9387 = vmatprep.mubr.msk.f32.mxu0 %vm198_vm1, %v11734_v61  ;;  %v12656_v4 = vld [vmem:[#allocation10_spill] sm:$0xff]  ;;  %v12657_v61 = vld [vmem:[#allocation11_spill] sm:$0xff] }
0x1dd6   :  { %9362 = vmatmul.mubr.msk.f32.gmra.mrb[92].mxu1 %vm198_vm1, %v11745_v59  ;;  %9388 = vmatmul.mubr.msk.f32.gmra.mrb[104].mxu0 %vm198_vm1, %v11752_v16  ;;  %v12658_v59 = vld [vmem:[#allocation6_spill] sm:$0xff]  ;;  %v12659_v16 = vld [vmem:[#allocation31_spill] sm:$0xff] }
0x1dd7   :  { %9364 = vmatprep.mubr.msk.f32.mxu1 %vm198_vm1, %v11757_v33  ;;  %9390 = vmatprep.mubr.msk.f32.mxu0 %vm198_vm1, %v11762_v58  ;;  %v12014_v33 = vld [vmem:[%s12512_s1 + $0x4a0] sm:$0xff] }
0x1dd8   :  { %v5991_v10 = vrot.slane %v12014_v33, %v12661_v60  ;;  %v5842_v32 = vrot.slane %v12014_v33, %v12662_v55  ;;  %v6003_v42 = vrot.slane %v12014_v33, %v12663_v48  ;;  %v5854_v20 = vrot.slane %v12014_v33, %v12664_v8 }
0x1dda   :  { %9365 = vmatmul.mubr.msk.f32.gmra.mrb[94].mxu1 %vm198_vm1, %v11773_v24  ;;  %9391 = vmatmul.mubr.msk.f32.gmra.mrb[106].mxu0 %vm198_vm1, %v11780_v7 }
0x1ddb   :  { %9367 = vmatprep.mubr.msk.f32.mxu1 %vm198_vm1, %v11785_v49  ;;  %9393 = vmatprep.mubr.msk.f32.mxu0 %vm198_vm1, %v11790_v0  ;;  %v12660_v0 = vld [vmem:[#allocation24_spill] sm:$0xff] }
0x1ddc   :  { %v5830_v21 = vrot.slane %v12014_v33, %v12660_v0 }
0x1dde   :  { %9368 = vmatmul.mubr.msk.f32.gmra.mrb[96].mxu1 %vm198_vm1, %v12646_v36  ;;  %9394 = vmatmul.mubr.msk.f32.gmra.mrb[108].mxu0 %vm198_vm1, %v12647_v45  ;;  %v6015_v36 = vrot.slane %v12014_v33, %v12665_v13  ;;  %v8369_v13 = vld [vmem:[%s12512_s1 + $0x4b0] ss:$0 sm:$0xff] }
0x1ddf   :  { %9404 = vmatprep.mubr.msk.f32.mxu1 %vm198_vm1, %v12648_v63 }
0x1de2   :  { %9405 = vmatmul.mubr.msk.f32.vlgmr.msra.gmra.mrb[98].mxu1 %vm198_vm1, %v12649_v14 }
0x1de3   :  { %9407 = vmatprep.mubr.msk.f32.mxu1 %vm198_vm1, %v12650_v46 }
0x1de6   :  { %9408 = vmatmul.mubr.msk.f32.gmra.mrb[100].mxu1 %vm198_vm1, %v12651_v56 }
0x1de7   :  { %9410 = vmatprep.mubr.msk.f32.mxu1 %vm198_vm1, %v12652_v12 }
0x1dea   :  { %9411 = vmatmul.mubr.msk.f32.gmra.mrb[102].mxu1 %vm198_vm1, %v12653_v27 }
0x1deb   :  { %9413 = vmatprep.mubr.msk.f32.mxu1 %vm198_vm1, %v12654_v1 }
0x1dee   :  { %9414 = vmatmul.mubr.msk.f32.gmra.mrb[104].mxu1 %vm198_vm1, %v12655_v19  ;;  %v12666_v19 = vld [vmem:[#allocation30_spill] sm:$0xff] }
0x1def   :  { %9416 = vmatprep.mubr.msk.f32.mxu1 %vm198_vm1, %v12656_v4  ;;  %v6152_v4 = vrot.slane %v12014_v33, %v12666_v19 }
0x1df2   :  { %9417 = vmatmul.mubr.msk.f32.gmra.mrb[106].mxu1 %vm198_vm1, %v12657_v61 }
0x1df3   :  { %9419 = vmatprep.mubr.msk.f32.mxu1 %vm198_vm1, %v12658_v59 }
0x1df6   :  { %9420 = vmatmul.mubr.msk.f32.gmra.mrb[108].mxu1 %vm198_vm1, %v12659_v16 }
0x1e9d   :  { %v9354_v58 = vpop.f32.mrb[86].mxu1  ;;  %v9380_v24 = vpop.f32.mrb[98].mxu0 }
0x1e9e   :  { %v5768_v7 = vpop.f32.mrb[87].mxu1  ;;  %v5929_v49 = vpop.f32.mrb[99].mxu0  ;;  %v5832_v15 = vmul.f32 %v9354_v58, %v5830_v21  ;;  %v5993_v41 = vmul.f32 %v9380_v24, %v5991_v10 }
0x1e9f   :  { %v5831_v11 = vmul.f32 %v5830_v21, %v5768_v7  ;;  %v5992_v63 = vmul.f32 %v5991_v10, %v5929_v49 }
0x1ea1   :  { %v9357_v43 = vpop.f32.mrb[88].mxu1  ;;  %v9383_v34 = vpop.f32.mrb[100].mxu0 }
0x1ea2   :  { %v5834_v35 = vmul.f32 %v9357_v43, %v5830_v21  ;;  %v5778_v23 = vpop.f32.mrb[89].mxu1  ;;  %v5995_v40 = vmul.f32 %v9383_v34, %v5991_v10  ;;  %v5939_v29 = vpop.f32.mrb[101].mxu0 }
0x1ea3   :  { %v5833_v62 = vmul.f32 %v5830_v21, %v5778_v23  ;;  %v5994_v2 = vmul.f32 %v5991_v10, %v5939_v29 }
0x1ea5   :  { %v9360_v37 = vpop.f32.mrb[90].mxu1  ;;  %v9386_v51 = vpop.f32.mrb[102].mxu0 }
0x1ea6   :  { %v5844_v22 = vmul.f32 %v9360_v37, %v5842_v32  ;;  %v5788_v17 = vpop.f32.mrb[91].mxu1  ;;  %v5949_v47 = vpop.f32.mrb[103].mxu0  ;;  %v6005_v56 = vmul.f32 %v9386_v51, %v6003_v42 }
0x1ea7   :  { %v5843_v54 = vmul.f32 %v5842_v32, %v5788_v17  ;;  %v6004_v27 = vmul.f32 %v6003_v42, %v5949_v47 }
0x1ea8   :  { %v5848_v9 = vadd.f32 %v5844_v22, %v5832_v15 }
0x1ea9   :  { %v5847_v28 = vadd.f32 %v5843_v54, %v5831_v11  ;;  %v9363_v50 = vpop.f32.mrb[92].mxu1  ;;  %v9389_v3 = vpop.f32.mrb[104].mxu0 }
0x1eaa   :  { %v5846_v26 = vmul.f32 %v9363_v50, %v5842_v32  ;;  %v5798_v31 = vpop.f32.mrb[93].mxu1  ;;  %v6007_v25 = vmul.f32 %v9389_v3, %v6003_v42  ;;  %v5959_v18 = vpop.f32.mrb[105].mxu0  ;;  %v6164_v50 = vrot.slane %v12014_v33, %v11098_v30 }
0x1eab   :  { %v5845_v6 = vmul.f32 %v5842_v32, %v5798_v31  ;;  %v6006_v57 = vmul.f32 %v6003_v42, %v5959_v18 }
0x1eac   :  { %v5850_v39 = vadd.f32 %v5846_v26, %v5834_v35 }
0x1ead   :  { %v5849_v38 = vadd.f32 %v5845_v6, %v5833_v62  ;;  %v9366_v53 = vpop.f32.mrb[94].mxu1  ;;  %v9392_v44 = vpop.f32.mrb[106].mxu0 }
0x1eae   :  { %v5856_v52 = vmul.f32 %v9366_v53, %v5854_v20  ;;  %v5808_v5 = vpop.f32.mrb[95].mxu1  ;;  %v5969_v45 = vpop.f32.mrb[107].mxu0  ;;  %v6017_v24 = vmul.f32 %v9392_v44, %v6015_v36  ;;  %v8368_v44 = vld [vmem:[%s12512_s1 + $0x4a8] ss:$0 sm:$0xff] }
0x1eaf   :  { %v5855_v14 = vmul.f32 %v5854_v20, %v5808_v5  ;;  %v6016_v43 = vmul.f32 %v6015_v36, %v5969_v45 }
0x1eb0   :  { %v5860_v46 = vadd.f32 %v5856_v52, %v5848_v9 }
0x1eb1   :  { %v5859_v12 = vadd.f32 %v5855_v14, %v5847_v28  ;;  %v9369_v1 = vpop.f32.mrb[96].mxu1  ;;  %v9395_v61 = vpop.f32.mrb[108].mxu0 }
0x1eb2   :  { %v5997_v59 = vadd.f32 %v5993_v41, %v5860_v46  ;;  %v5858_v16 = vmul.f32 %v9369_v1, %v5854_v20  ;;  %v5818_v58 = vpop.f32.mrb[97].mxu1  ;;  %v6019_v7 = vmul.f32 %v9395_v61, %v6015_v36  ;;  %v5979_v0 = vpop.f32.mrb[109].mxu0 }
0x1eb3   :  { %v5996_v21 = vadd.f32 %v5992_v63, %v5859_v12  ;;  %v5857_v60 = vmul.f32 %v5854_v20, %v5818_v58  ;;  %v6018_v49 = vmul.f32 %v6015_v36, %v5979_v0 }
0x1eb4   :  { %v6009_v10 = vadd.f32 %v6005_v56, %v5997_v59  ;;  %v5862_v34 = vadd.f32 %v5858_v16, %v5850_v39  ;;  %v12668_v16 = vld [vmem:[#allocation13_spill] sm:$0xff] }
0x1eb5   :  { %v6008_v35 = vadd.f32 %v6004_v27, %v5996_v21  ;;  %v5861_v23 = vadd.f32 %v5857_v60, %v5849_v38  ;;  %v9406_v55 = vpop.f32.mrb[98].mxu1 }
0x1eb6   :  { %v5999_v32 = vadd.f32 %v5995_v40, %v5862_v34  ;;  %v6021_v29 = vadd.f32 %v6017_v24, %v6009_v10  ;;  %v6154_v62 = vmul.f32 %v9406_v55, %v6152_v4  ;;  %v6090_v37 = vpop.f32.mrb[99].mxu1 }
0x1eb7   :  { %v5998_v51 = vadd.f32 %v5994_v2, %v5861_v23  ;;  %v6020_v15 = vadd.f32 %v6016_v43, %v6008_v35  ;;  %v6153_v22 = vmul.f32 %v6152_v4, %v6090_v37 }
0x1eb8   :  { %v6011_v17 = vadd.f32 %v6007_v25, %v5999_v32  ;;  %v6158_v47 = vadd.f32 %v6154_v62, %v6021_v29  ;;  %v12669_v29 = vld [vmem:[#allocation14_spill] sm:$0xff] }
0x1eb9   :  { %v6010_v11 = vadd.f32 %v6006_v57, %v5998_v51  ;;  %v6157_v54 = vadd.f32 %v6153_v22, %v6020_v15  ;;  %v9409_v9 = vpop.f32.mrb[100].mxu1  ;;  %v12670_v51 = vld [vmem:[#allocation15_spill] sm:$0xff] }
0x1eba   :  { %v6023_v48 = vadd.f32 %v6019_v7, %v6011_v17  ;;  %v6156_v42 = vmul.f32 %v9409_v9, %v6152_v4  ;;  %v6100_v28 = vpop.f32.mrb[101].mxu1  ;;  %v6269_v9 = vld [vmem:[%s12512_s1 + $0x4d8] sm:$0xff] }
0x1ebb   :  { %v6022_v3 = vadd.f32 %v6018_v49, %v6010_v11  ;;  %v6155_v26 = vmul.f32 %v6152_v4, %v6100_v28  ;;  %v12667_v4 = vld [vmem:[#allocation12_spill] sm:$0xff]  ;;  %v6268_v11 = vld [vmem:[%s12512_s1 + $0x4d0] sm:$0xff] }
0x1ebc   :  { %v6160_v40 = vadd.f32 %v6156_v42, %v6023_v48  ;;  %v6270_v48 = vld [vmem:[%s12512_s1 + $0x4e0] sm:$0xff] }
0x1ebd   :  { %v6159_v31 = vadd.f32 %v6155_v26, %v6022_v3  ;;  %v9412_v8 = vpop.f32.mrb[102].mxu1  ;;  %v9890_v42 = vpack.c.bf16 %v6270_v48, %v6269_v9  ;;  %v12133_v48 = vld [vmem:[%s12512_s1 + $0x530] ss:$0 sm:$0xff] }
0x1ebe   :  { %v6166_v20 = vmul.f32 %v9412_v8, %v6164_v50  ;;  %v6110_v2 = vpop.f32.mrb[103].mxu1 }
0x1ebf   :  { %v6165_v18 = vmul.f32 %v6164_v50, %v6110_v2 }
0x1ec0   :  { %v6170_v6 = vadd.f32 %v6166_v20, %v6158_v47  ;;  %v6267_v47 = vld [vmem:[%s12512_s1 + $0x4c8] sm:$0xff]  ;;  %v12077_v20 = vld [vmem:[%s12512_s1 + $0x4b8] ss:$0 sm:$0xff] }
0x1ec1   :  { %v6169_v25 = vadd.f32 %v6165_v18, %v6157_v54  ;;  %v9415_v39 = vpop.f32.mrb[104].mxu1  ;;  %v9886_v54 = vpack.c.bf16 %v6268_v11, %v6267_v47 }
0x1ec2   :  { %v6168_v57 = vmul.f32 %v9415_v39, %v6164_v50  ;;  %v6120_v38 = vpop.f32.mrb[105].mxu1 }
0x1ec3   :  { %v6167_v53 = vmul.f32 %v6164_v50, %v6120_v38  ;;  %9887 = vmatprep.subr.bf16.mxu0 %v9886_v54 }
0x1ec4   :  { %v6172_v41 = vadd.f32 %v6168_v57, %v6160_v40  ;;  %9889 = vmatpush3.bf16.msra.mxu0 %v9886_v54 }
0x1ec5   :  { %v6171_v30 = vadd.f32 %v6167_v53, %v6159_v31  ;;  %v9418_v33 = vpop.f32.mrb[106].mxu1  ;;  %9891 = vmatprep.subr.bf16.mxu0 %v9890_v42 }
0x1ec6   :  { %v6178_v52 = vmul.f32 %v9418_v33, %v8368_v44  ;;  %v6130_v5 = vpop.f32.mrb[107].mxu1  ;;  %v6411_v33 = vld [vmem:[%s12512_s1 + $0x500] sm:$0xff] }
0x1ec7   :  { %v6177_v36 = vmul.f32 %v8368_v44, %v6130_v5 }
0x1ec8   :  { %v6182_v45 = vadd.f32 %v6178_v52, %v6170_v6  ;;  %9893 = vmatpush3.bf16.msra.mxu0 %v9890_v42  ;;  %v6412_v52 = vld [vmem:[%s12512_s1 + $0x508] sm:$0xff] }
0x1ec9   :  { %v6181_v63 = vadd.f32 %v6177_v36, %v6169_v25  ;;  %v9421_v14 = vpop.f32.mrb[108].mxu1  ;;  %v12082_v25 = vld [vmem:[%s12512_s1 + $0x4c0] ss:$0 sm:$0xff]  ;;  %v9898_v5 = vpack.c.bf16 %v6412_v52, %v6411_v33  ;;  %v6414_v36 = vld [vmem:[%s12512_s1 + $0x518] sm:$0xff]  ;;  %v10344_v52 = vmov 0.0|0.0  }
0x1eca   :  { %v6190_v46 = vadd.f32 %v8369_v13, %v6182_v45  ;;  %v6180_v56 = vmul.f32 %v9421_v14, %v8368_v44  ;;  %v6140_v12 = vpop.f32.mrb[109].mxu1  ;;  %v6416_v14 = vld [vmem:[%s12512_s1 + $0x528] sm:$0xff]  ;;  %9910 = vmatprep.subr.bf16.mxu0 %v10344_v52 }
0x1ecb   :  { %v6189_v27 = vadd.f32 %v8369_v13, %v6181_v63  ;;  %v6179_v1 = vmul.f32 %v8368_v44, %v6140_v12  ;;  %v6409_v44 = vld [vmem:[%s12512_s1 + $0x4f0] sm:$0xff]  ;;  %v6415_v63 = vld [vmem:[%s12512_s1 + $0x520] sm:$0xff] }
0x1ecc   :  { %v6184_v19 = vadd.f32 %v6180_v56, %v6172_v41  ;;  %v12039_v61 = vadd.f32 %v6190_v46, %v12667_v4  ;;  %v6410_v41 = vld [vmem:[%s12512_s1 + $0x4f8] sm:$0xff]  ;;  %v9906_v46 = vpack.c.bf16 %v6416_v14, %v6415_v63  ;;  %v12117_v56 = vld [vmem:[%s12512_s1 + $0x1a8] sm:$0x3] }
0x1ecd   :  { %v6183_v59 = vadd.f32 %v6179_v1, %v6171_v30  ;;  %v12042_v58 = vadd.f32 %v6189_v27, %v12668_v16  ;;  %v9894_v30 = vpack.c.bf16 %v6410_v41, %v6409_v44  ;;  %v6597_v12 = vsel %vm6596_vm7, %v12117_v56, 0.0  ;;  %v12124_v27 = vld [vmem:[%s12512_s1 + $0x4e8] ss:$0 sm:$0xff] }
0x1ece   :  { %v6192_v24 = vadd.f32 %v8369_v13, %v6184_v19  ;;  %v6202_v7 = vsel %vm198_vm1, %v12039_v61, 0.0 }
0x1ecf   :  { %v6191_v0 = vadd.f32 %v8369_v13, %v6183_v59  ;;  %6203 = vadd.xlane.f32.xlu1 %v6202_v7  ;;  %v6199_v21 = vsel %vm198_vm1, %v12042_v58, 0.0  ;;  %9895 = vmatprep.subr.bf16.mxu1 %v9894_v30  ;;  %v6413_v13 = vld [vmem:[%s12512_s1 + $0x510] sm:$0xff] }
0x1ed0   :  { %6200 = vadd.xlane.f32.xlu0 %v6199_v21  ;;  %v12052_v62 = vadd.f32 %v6192_v24, %v12669_v29  ;;  %9897 = vmatpush3.bf16.msra.mxu1 %v9894_v30  ;;  %v9902_v45 = vpack.c.bf16 %v6414_v36, %v6413_v13  ;;  %v6621_v30 = vld [vmem:[%s12512_s1 + $0x550] sm:$0xff]  ;;  %v6623_v13 = vld [vmem:[%s12512_s1 + $0x560] sm:$0xff] }
0x1ed1   :  { %v12056_v15 = vadd.f32 %v6191_v0, %v12670_v51  ;;  %9899 = vmatprep.subr.bf16.mxu1 %v9898_v5 }
0x1ed2   :  { %v6208_v22 = vsel %vm198_vm1, %v12052_v62, 0.0 }
0x1ed3   :  { %v6205_v17 = vsel %vm198_vm1, %v12056_v15, 0.0 }
0x1ed4   :  { %9901 = vmatpush3.bf16.msra.mxu1 %v9898_v5  ;;  %v6622_v5 = vld [vmem:[%s12512_s1 + $0x558] sm:$0xff] }
0x1ed5   :  { %9903 = vmatprep.subr.bf16.mxu1 %v9902_v45  ;;  %v9914_v36 = vpack.c.bf16 %v6623_v13, %v6622_v5 }
0x1ed8   :  { %9905 = vmatpush3.bf16.msra.mxu1 %v9902_v45 }
0x1ed9   :  { %9907 = vmatprep.subr.bf16.mxu1 %v9906_v46 }
0x1edc   :  { %9909 = vmatpush3.bf16.msra.mxu1 %v9906_v46 }
0x1edd   :  { %9916 = vmatprep.subr.bf16.mxu1 %v10344_v52 }
0x1f5c   :  { %v6204_v60 = vpop.xlane.xlu1 %6203 }
0x1f5d   :  { %v6212_v43 = vmul.f32 0.03125, %v6204_v60  ;;  %v6201_v49 = vpop.xlane.xlu0 %6200 }
0x1f5e   :  { %v6211_v10 = vmul.f32 0.03125, %v6201_v49 }
0x1f5f   :  { %v6216_v34 = vsub.f32 %v12039_v61, %v6212_v43 }
0x1f60   :  { %v6215_v35 = vsub.f32 %v12042_v58, %v6211_v10 }
0x1f61   :  { %v6220_v23 = vmul.f32 %v6216_v34, %v6216_v34 }
0x1f62   :  { %v6219_v55 = vmul.f32 %v6215_v35, %v6215_v35 }
0x1f63   :  { %v6226_v32 = vsel %vm198_vm1, %v6220_v23, 0.0 }
0x1f64   :  { %6227 = vadd.xlane.f32.xlu1 %v6226_v32  ;;  %v6223_v37 = vsel %vm198_vm1, %v6219_v55, 0.0 }
0x1f65   :  { %6224 = vadd.xlane.f32.xlu0 %v6223_v37 }
0x1f68   :  { %6209 = vadd.xlane.f32.xlu1 %v6208_v22 }
0x1f69   :  { %6206 = vadd.xlane.f32.xlu0 %v6205_v17 }
0x1f6d   :  { %6598 = vadd.xlane.f32.xlu0 %v6597_v12 }
0x1ff1   :  { %v6228_v28 = vpop.xlane.xlu1 %6227 }
0x1ff2   :  { %v6236_v50 = vmul.f32 0.03125, %v6228_v28  ;;  %v6225_v3 = vpop.xlane.xlu0 %6224 }
0x1ff3   :  { %v6235_v26 = vmul.f32 0.03125, %v6225_v3 }
0x1ff4   :  { %v6240_v40 = vadd.f32 1e-05, %v6236_v50 }
0x1ff5   :  { %v6239_v31 = vadd.f32 1e-05, %v6235_v26  ;;  %v6210_v47 = vpop.xlane.xlu1 %6209 }
0x1ff6   :  { %10261 = vrsqrt.f32 %v6240_v40  ;;  %v6207_v17 = vpop.xlane.xlu0 %6206  ;;  %v6214_v11 = vmul.f32 0.03125, %v6210_v47 }
0x1ff7   :  { %10263 = vrsqrt.f32 %v6239_v31  ;;  %v6213_v9 = vmul.f32 0.03125, %v6207_v17 }
0x1ff8   :  { %v6218_v50 = vsub.f32 %v12052_v62, %v6214_v11  ;;  %v8385_v11 = vld [vmem:[%s12512_s1 + $0x540] ss:$0 sm:$0xff] }
0x1ff9   :  { %v6217_v40 = vsub.f32 %v12056_v15, %v6213_v9 }
0x1ffa   :  { %v6599_v54 = vpop.xlane.xlu0 %6598 }
0x1ffb   :  { %v6600_v28 = vmul.f32 0.03125, %v6599_v54 }
0x2000   :  { %v10262_v8 = vpop.eup %10261 }
0x2001   :  { %v10264_v2 = vpop.eup %10263  ;;  %v6248_v18 = vmul.f32 %v10262_v8, %v6216_v34 }
0x2002   :  { %v6247_v6 = vmul.f32 %v10264_v2, %v6215_v35 }
0x2003   :  { %v6256_v39 = vmul.f32 %v12077_v20, %v6248_v18  ;;  %v6601_v18 = vsub.f32 %v12117_v56, %v6600_v28  ;;  %v6698_v28 = vld [vmem:[%s12512_s1 + $0x568] sm:$0xff] }
0x2004   :  { %v6255_v57 = vmul.f32 %v12077_v20, %v6247_v6 }
0x2005   :  { %v6264_v53 = vadd.f32 %v12082_v25, %v6256_v39  ;;  %v6222_v39 = vmul.f32 %v6218_v50, %v6218_v50 }
0x2006   :  { %v6263_v38 = vadd.f32 %v12082_v25, %v6255_v57 }
0x2007   :  { %v6232_v44 = vsel %vm198_vm1, %v6222_v39, 0.0 }
0x2008   :  { %9430 = vmatprep.mubr.msk.f32.mxu0 %vm198_vm1, %v6263_v38  ;;  %v6221_v38 = vmul.f32 %v6217_v40, %v6217_v40 }
0x2009   :  { %9431 = vmatmul.mubr.msk.f32.vlgmr.msra.gmra.mrb[110].mxu0 %vm198_vm1, %v6264_v53  ;;  %v6602_v53 = vmul.f32 %v6601_v18, %v6601_v18 }
0x200a   :  { %v6229_v41 = vsel %vm198_vm1, %v6221_v38, 0.0  ;;  %v12208_v38 = vld [vmem:[%s12512_s1 + $0x198] ss:$0 sm:$0xff] }
0x20dc   :  { %v9432_v1 = vpop.f32.mrb[110].mxu0 }
0x20dd   :  { %v6360_v19 = vadd.f32 %v9432_v1, %v12124_v27  ;;  %v6354_v4 = vpop.f32.mrb[111].mxu0 }
0x20de   :  { %v6355_v59 = vadd.f32 %v12124_v27, %v6354_v4 }
0x20df   :  { %v6378_v16 = vmul.f32 0.044715, %v6360_v19  ;;  %v6374_v37 = vmul.f32 0.5, %v6360_v19 }
0x20e0   :  { %v6377_v24 = vmul.f32 0.044715, %v6355_v59  ;;  %v6373_v32 = vmul.f32 0.5, %v6355_v59 }
0x20e1   :  { %v6382_v7 = vmul.f32 %v6378_v16, %v6360_v19 }
0x20e2   :  { %v6381_v0 = vmul.f32 %v6377_v24, %v6355_v59 }
0x20e3   :  { %v6386_v21 = vmul.f32 %v6382_v7, %v6360_v19 }
0x20e4   :  { %v6385_v60 = vmul.f32 %v6381_v0, %v6355_v59 }
0x20e5   :  { %v6390_v43 = vadd.f32 %v6386_v21, %v6360_v19 }
0x20e6   :  { %v6389_v49 = vadd.f32 %v6385_v60, %v6355_v59 }
0x20e7   :  { %v6394_v10 = vmul.f32 0.7978846, %v6390_v43 }
0x20e8   :  { %v6393_v34 = vmul.f32 0.7978846, %v6389_v49 }
0x20e9   :  { %10265 = vtanh.f32 %v6394_v10 }
0x20ea   :  { %10267 = vtanh.f32 %v6393_v34 }
0x20f3   :  { %v10266_v35 = vpop.eup %10265 }
0x20f4   :  { %v10268_v23 = vpop.eup %10267  ;;  %v6402_v55 = vadd.f32 1.0, %v10266_v35 }
0x20f5   :  { %v6401_v29 = vadd.f32 1.0, %v10268_v23 }
0x20f6   :  { %v6406_v22 = vmul.f32 %v6402_v55, %v6374_v37 }
0x20f7   :  { %v6405_v51 = vmul.f32 %v6401_v29, %v6373_v32 }
0x20f9   :  { %9452 = vmatprep.mubr.msk.f32.mxu1 %vm3299_vm6, %v6405_v51 }
0x20fa   :  { %9453 = vmatmul.mubr.msk.f32.vlgmr.msra.gmra.mrb[110].mxu1 %vm3299_vm6, %v6406_v22  ;;  %v8384_v22 = vld [vmem:[%s12512_s1 + $0x538] ss:$0 sm:$0xff] }
0x21cd   :  { %v9454_v42 = vpop.f32.mrb[110].mxu1 }
0x21ce   :  { %v6506_v3 = vadd.f32 %v9454_v42, %v12133_v48  ;;  %v6500_v26 = vpop.f32.mrb[111].mxu1  ;;  %v10346_v42 = vmov 0.0  }
0x21cf   :  { %v6501_v31 = vadd.f32 %v12133_v48, %v6500_v26  ;;  %v6701_v26 = vld [vmem:[%s12512_s1 + $0x580] sm:$0xff] }
0x21d0   :  { %v6520_v8 = vadd.f32 %v6506_v3, %v12039_v61  ;;  %v6603_v61 = vsel %vm6596_vm7, %v6602_v53, 0.0  ;;  %v6700_v3 = vld [vmem:[%s12512_s1 + $0x578] sm:$0xff] }
0x21d1   :  { %v6519_v2 = vadd.f32 %v6501_v31, %v12042_v58  ;;  %v6620_v58 = vld [vmem:[%s12512_s1 + $0x548] sm:$0xff] }
0x21d2   :  { %v6528_v6 = vsel %vm198_vm1, %v6520_v8, 0.0  ;;  %v9911_v33 = vpack.c.bf16 %v6621_v30, %v6620_v58 }
0x21d3   :  { %6529 = vadd.xlane.f32.xlu0 %v6528_v6  ;;  %v6525_v57 = vsel %vm198_vm1, %v6519_v2, 0.0 }
0x21d4   :  { %6526 = vadd.xlane.f32.xlu1 %v6525_v57  ;;  %9912 = vmatpush3.bf16.msra.mxu0 %v9911_v33 }
0x21d5   :  { %9913 = vmatprep.subr.bf16.mxu0 %v10344_v52 }
0x21d7   :  { %6233 = vadd.xlane.f32.xlu0 %v6232_v44 }
0x21d8   :  { %6230 = vadd.xlane.f32.xlu1 %v6229_v41  ;;  %9915 = vmatpush3.bf16.msra.mxu0 %v9914_v36 }
0x21dc   :  { %6604 = vadd.xlane.f32.xlu1 %v6603_v61  ;;  %v12215_v61 = vld [vmem:[%s12512_s1 + $0x1a0] ss:$0 sm:$0xff] }
0x2260   :  { %v6530_v45 = vpop.xlane.xlu0 %6529 }
0x2261   :  { %v6538_v63 = vmul.f32 0.03125, %v6530_v45  ;;  %v6527_v14 = vpop.xlane.xlu1 %6526 }
0x2262   :  { %v6537_v46 = vmul.f32 0.03125, %v6527_v14 }
0x2263   :  { %v12162_v12 = vsub.f32 %v6520_v8, %v6538_v63 }
0x2264   :  { %v12164_v1 = vsub.f32 %v6519_v2, %v6537_v46  ;;  %v6234_v19 = vpop.xlane.xlu0 %6233 }
0x2265   :  { %v6238_v4 = vmul.f32 0.03125, %v6234_v19  ;;  %v6231_v59 = vpop.xlane.xlu1 %6230  ;;  %v6546_v16 = vmul.f32 %v12162_v12, %v12162_v12 }
0x2266   :  { %v6237_v24 = vmul.f32 0.03125, %v6231_v59  ;;  %v6545_v7 = vmul.f32 %v12164_v1, %v12164_v1 }
0x2267   :  { %v6242_v0 = vadd.f32 1e-05, %v6238_v4  ;;  %v6552_v21 = vsel %vm198_vm1, %v6546_v16, 0.0 }
0x2268   :  { %v6241_v60 = vadd.f32 1e-05, %v6237_v24  ;;  %6553 = vadd.xlane.f32.xlu1 %v6552_v21  ;;  %v6549_v43 = vsel %vm198_vm1, %v6545_v7, 0.0 }
0x2269   :  { %10269 = vrsqrt.f32 %v6242_v0  ;;  %6550 = vadd.xlane.f32.xlu0 %v6549_v43  ;;  %v6605_v49 = vpop.xlane.xlu1 %6604 }
0x226a   :  { %10271 = vrsqrt.f32 %v6241_v60  ;;  %v6606_v10 = vmul.f32 0.03125, %v6605_v49 }
0x226c   :  { %v6607_v34 = vadd.f32 1e-05, %v6606_v10 }
0x226e   :  { %10273 = vrsqrt.f32 %v6607_v34 }
0x2273   :  { %v10270_v35 = vpop.eup %10269 }
0x2274   :  { %v10272_v23 = vpop.eup %10271  ;;  %v6250_v55 = vmul.f32 %v10270_v35, %v6218_v50 }
0x2275   :  { %v6249_v32 = vmul.f32 %v10272_v23, %v6217_v40  ;;  %v9920_v40 = vpack.c.bf16 %v6701_v26, %v6700_v3 }
0x2276   :  { %v6258_v29 = vmul.f32 %v12077_v20, %v6250_v55 }
0x2277   :  { %v6257_v37 = vmul.f32 %v12077_v20, %v6249_v32 }
0x2278   :  { %v10274_v51 = vpop.eup %10273  ;;  %v6266_v54 = vadd.f32 %v12082_v25, %v6258_v29 }
0x2279   :  { %v6609_v17 = vmul.f32 %v10274_v51, %v6601_v18  ;;  %v6265_v47 = vadd.f32 %v12082_v25, %v6257_v37  ;;  %v6699_v25 = vld [vmem:[%s12512_s1 + $0x570] sm:$0xff] }
0x227a   :  { %v9917_v50 = vpack.c.bf16 %v6699_v25, %v6698_v28 }
0x227b   :  { %v6614_v9 = vmul.f32 %v8384_v22, %v6609_v17  ;;  %9433 = vmatprep.mubr.msk.f32.mxu0 %vm198_vm1, %v6265_v47 }
0x227c   :  { %9434 = vmatmul.mubr.msk.f32.gmra.mrb[112].mxu0 %vm198_vm1, %v6266_v54  ;;  %9923 = vmatprep.subr.bf16.mxu0 %v9917_v50 }
0x227d   :  { %v12184_v20 = vadd.f32 %v8385_v11, %v6614_v9  ;;  %9466 = vmatprep.mubr.msk.f32.mxu0 %vm10345_vm8, %v10346_v42  ;;  %9918 = vmatpush3.bf16.msra.mxu1 %v9917_v50 }
0x227e   :  { %9919 = vmatprep.subr.bf16.mxu1 %v10344_v52 }
0x2280   :  { %9467 = vmatmul.mubr.msk.f32.vlgmr.msra.gmra.mrb[114].mxu0 %vm198_vm1, %v12184_v20 }
0x2281   :  { %9925 = vmatpush3.bf16.msra.mxu0 %v9917_v50  ;;  %9921 = vmatpush3.bf16.msra.mxu1 %v9920_v40 }
0x2282   :  { %9927 = vmatprep.subr.bf16.mxu0 %v9920_v40  ;;  %9930 = vmatprep.subr.bf16.mxu1 %v10344_v52 }
0x2285   :  { %9929 = vmatpush3.bf16.msra.mxu0 %v9920_v40 }
0x2286   :  { %9941 = vmatprep.subr.bf16.mxu0 %v10344_v52 }
0x22f5   :  { %v6554_v31 = vpop.xlane.xlu1 %6553 }
0x22f6   :  { %v6562_v8 = vmul.f32 0.03125, %v6554_v31  ;;  %v6551_v2 = vpop.xlane.xlu0 %6550 }
0x22f7   :  { %v6561_v18 = vmul.f32 0.03125, %v6551_v2 }
0x22f8   :  { %v6566_v6 = vadd.f32 1e-05, %v6562_v8 }
0x22f9   :  { %v6565_v39 = vadd.f32 1e-05, %v6561_v18 }
0x22fa   :  { %10275 = vrsqrt.f32 %v6566_v6 }
0x22fb   :  { %10277 = vrsqrt.f32 %v6565_v39 }
0x2304   :  { %v10276_v57 = vpop.eup %10275 }
0x2305   :  { %v10278_v53 = vpop.eup %10277  ;;  %v6574_v44 = vmul.f32 %v10276_v57, %v12162_v12 }
0x2306   :  { %v6573_v41 = vmul.f32 %v10278_v53, %v12164_v1 }
0x2307   :  { %v6582_v58 = vmul.f32 %v12208_v38, %v6574_v44 }
0x2308   :  { %v6581_v30 = vmul.f32 %v12208_v38, %v6573_v41 }
0x2309   :  { %v6590_v5 = vadd.f32 %v12215_v61, %v6582_v58 }
0x230a   :  { %v6589_v33 = vadd.f32 %v12215_v61, %v6581_v30 }
0x230c   :  { %9488 = vmatprep.mubr.msk.f32.mxu0 %vm198_vm1, %v6589_v33 }
0x230d   :  { %9489 = vmatmul.mubr.msk.f32.vlgmr.msra.gmra.mrb[116].mxu0 %vm198_vm1, %v6590_v5 }
0x234f   :  { %v9435_v13 = vpop.f32.mrb[112].mxu0 }
0x2350   :  { %v6370_v36 = vadd.f32 %v9435_v13, %v12124_v27  ;;  %v6364_v45 = vpop.f32.mrb[113].mxu0 }
0x2351   :  { %v6365_v63 = vadd.f32 %v12124_v27, %v6364_v45 }
0x2352   :  { %v6380_v14 = vmul.f32 0.044715, %v6370_v36  ;;  %v6376_v27 = vmul.f32 0.5, %v6370_v36 }
0x2353   :  { %v6379_v46 = vmul.f32 0.044715, %v6365_v63  ;;  %v6693_v12 = vpop.f32.mrb[114].mxu0  ;;  %v6375_v10 = vmul.f32 0.5, %v6365_v63 }
0x2354   :  { %v6384_v1 = vmul.f32 %v6380_v14, %v6370_v36  ;;  %v9468_v19 = vpop.f32.mrb[115].mxu0  ;;  %v12238_v22 = vmul.f32 0.25, %v6693_v12 }
0x2355   :  { %v6383_v4 = vmul.f32 %v6379_v46, %v6365_v63 }
0x2356   :  { %v6388_v59 = vmul.f32 %v6384_v1, %v6370_v36 }
0x2357   :  { %v6387_v16 = vmul.f32 %v6383_v4, %v6365_v63 }
0x2358   :  { %v6392_v24 = vadd.f32 %v6388_v59, %v6370_v36 }
0x2359   :  { %v6391_v7 = vadd.f32 %v6387_v16, %v6365_v63 }
0x235a   :  { %v6396_v0 = vmul.f32 0.7978846, %v6392_v24 }
0x235b   :  { %v6395_v21 = vmul.f32 0.7978846, %v6391_v7 }
0x235c   :  { %10279 = vtanh.f32 %v6396_v0 }
0x235d   :  { %10281 = vtanh.f32 %v6395_v21 }
0x2366   :  { %v10280_v60 = vpop.eup %10279 }
0x2367   :  { %v10282_v43 = vpop.eup %10281  ;;  %v6404_v49 = vadd.f32 1.0, %v10280_v60 }
0x2368   :  { %v6403_v34 = vadd.f32 1.0, %v10282_v43 }
0x2369   :  { %v6408_v23 = vmul.f32 %v6404_v49, %v6376_v27 }
0x236a   :  { %v6407_v35 = vmul.f32 %v6403_v34, %v6375_v10 }
0x236c   :  { %9455 = vmatprep.mubr.msk.f32.mxu1 %vm3299_vm6, %v6407_v35 }
0x236d   :  { %9456 = vmatmul.mubr.msk.f32.gmra.mrb[112].mxu1 %vm3299_vm6, %v6408_v23 }
0x236e   :  { %9477 = vmatprep.mubr.msk.f32.mxu1 %vm10345_vm8, %v10346_v42 }
0x2371   :  { %9478 = vmatmul.mubr.msk.f32.vlgmr.msra.gmra.mrb[114].mxu1 %vm198_vm1, %v12184_v20 }
0x2372   :  { %9498 = vmatprep.mubr.msk.f32.mxu1 %vm10345_vm8, %v10346_v42 }
0x23e0   :  { %v9490_v55 = vpop.f32.mrb[116].mxu0 }
0x23e1   :  { %v6850_v32 = vpop.f32.mrb[117].mxu0 }
0x23e2   :  { %v12233_v29 = vpack.i.bf16 %v9490_v55, %v6850_v32  ;;  %v9931_v37 = vpack.c.bf16 %v9490_v55, %v6850_v32 }
0x23e4   :  { %9933 = vmatpush3.bf16.xpose.msk.msra.mxu1 %vm10650_vm4, %v9931_v37 }
0x23e5   :  { %9934 = vmatprep.subr.bf16.mxu1 %v10344_v52 }
0x23eb   :  { %9499 = vmatmul.mubr.msk.f32.vlgmr.msra.gmra.mrb[116].mxu1 %vm600_vm3, %v12238_v22 }
0x23ec   :  { %9505 = vmatprep.mubr.msk.f32.mxu1 %vm10345_vm8, %v10346_v42 }
0x2440   :  { %v9457_v17 = vpop.f32.mrb[112].mxu1 }
0x2441   :  { %v6516_v47 = vadd.f32 %v9457_v17, %v12133_v48  ;;  %v6510_v11 = vpop.f32.mrb[113].mxu1 }
0x2442   :  { %v6511_v9 = vadd.f32 %v12133_v48, %v6510_v11 }
0x2443   :  { %v6522_v54 = vadd.f32 %v6516_v47, %v12052_v62 }
0x2444   :  { %v12247_v20 = vpop.f32.mrb[114].mxu1  ;;  %v6521_v3 = vadd.f32 %v6511_v9, %v12056_v15 }
0x2445   :  { %v9479_v28 = vpop.f32.mrb[115].mxu1  ;;  %v6534_v25 = vsel %vm198_vm1, %v6522_v54, 0.0  ;;  %v6869_v50 = vmul.f32 %v12247_v20, %v12238_v22 }
0x2446   :  { %6535 = vadd.xlane.f32.xlu1 %v6534_v25  ;;  %v6531_v40 = vsel %vm198_vm1, %v6521_v3, 0.0 }
0x2447   :  { %v6871_v26 = vsel %vm6870_vm9, %v6869_v50, 0.0  ;;  %v7250_v36 = vsel %vm7249_vm10, %v6869_v50, 0.0 }
0x2448   :  { %6872 = vadd.xlane.f32.xlu0 %v6871_v26 }
0x244c   :  { %6532 = vadd.xlane.f32.xlu0 %v6531_v40 }
0x2462   :  { %10020 = vrot.lane.b32.xlu0 %v12233_v29, %s10347_s20 }
0x24be   :  { %v6949_v62 = vpop.f32.mrb[116].mxu1 }
0x24bf   :  { %v9500_v48 = vpop.f32.mrb[117].mxu1  ;;  %v6953_v31 = vsel %vm6870_vm9, %v6949_v62, -inf }
0x24c0   :  { %6954 = vmax.xlane.f32.xlu1 %v6953_v31 }
0x24d1   :  { %10025 = vrot.lane.b32.xlu1 %v12233_v29, %s10341_s0 }
0x24d3   :  { %v6536_v58 = vpop.xlane.xlu1 %6535 }
0x24d4   :  { %v6540_v30 = vmul.f32 0.03125, %v6536_v58 }
0x24d5   :  { %7061 = vrot.lane.b32.xlu1 %v12238_v22, %s10341_s0  ;;  %v12262_v15 = vpop.xlane.xlu0 %6872 }
0x24d6   :  { %v6544_v33 = vsub.f32 %v6522_v54, %v6540_v30 }
0x24d8   :  { %v6548_v5 = vmul.f32 %v6544_v33, %v6544_v33 }
0x24d9   :  { %v6533_v8 = vpop.xlane.xlu0 %6532 }
0x24da   :  { %v6539_v2 = vmul.f32 0.03125, %v6533_v8  ;;  %v6558_v13 = vsel %vm198_vm1, %v6548_v5, 0.0 }
0x24dc   :  { %v6543_v18 = vsub.f32 %v6521_v3, %v6539_v2 }
0x24dd   :  { %v10021_v6 = vpop.permute.xlu0 %10020 }
0x24de   :  { %v10023_v39 = vunpack.i.h.bf16 %v10021_v6  ;;  %v10022_v57 = vunpack.i.l.bf16 %v10021_v6  ;;  %v6547_v53 = vmul.f32 %v6543_v18, %v6543_v18 }
0x24e0   :  { %v9935_v44 = vpack.c.bf16 %v10023_v39, %v10022_v57  ;;  %v6555_v41 = vsel %vm198_vm1, %v6547_v53, 0.0  ;;  %v7253_v39 = vrot.slane %v12238_v22, 1 }
0x24e1   :  { %6556 = vadd.xlane.f32.xlu0 %v6555_v41 }
0x24e2   :  { %9936 = vmatpush3.bf16.msra.mxu1 %v9935_v44 }
0x24e3   :  { %9937 = vmatprep.subr.bf16.mxu1 %v10344_v52 }
0x24f7   :  { %7055 = vrot.lane.b32.xlu0 %v6869_v50, %s10341_s0 }
0x24f9   :  { %6559 = vadd.xlane.f32.xlu1 %v6558_v13 }
0x2516   :  { %7251 = vadd.xlane.f32.xlu0 %v7250_v36 }
0x254d   :  { %v6955_v45 = vpop.xlane.xlu1 %6954 }
0x254e   :  { %v12270_v63 = vmax.f32 %v6955_v45, %v12262_v15 }
0x2550   :  { %v6960_v14 = vsub.f32 %v6949_v62, %v12270_v63 }
0x2551   :  { %v10026_v12 = vpop.permute.xlu1 %10025 }
0x2552   :  { %v6961_v46 = vmul.f32 1.442695, %v6960_v14  ;;  %v10028_v1 = vunpack.i.h.bf16 %v10026_v12  ;;  %v10027_v19 = vunpack.i.l.bf16 %v10026_v12 }
0x2554   :  { %10283 = vpow2.f32 %v6961_v46  ;;  %v9938_v59 = vpack.c.bf16 %v10028_v1, %v10027_v19 }
0x2555   :  { %v7062_v16 = vpop.permute.xlu1 %7061 }
0x255e   :  { %v12273_v4 = vpop.eup %10283 }
0x255f   :  { %9506 = vmatmul.mubr.msk.f32.vlgmr.msra.gmra.mrb[118].mxu1 %vm600_vm3, %v12273_v4 }
0x2560   :  { %9940 = vmatpush3.bf16.xpose.msk.msra.mxu1 %vm10650_vm4, %v9938_v59  ;;  %9512 = vmatprep.mubr.msk.f32.mxu1 %vm10345_vm8, %v10346_v42 }
0x2561   :  { %9948 = vmatprep.subr.bf16.mxu1 %v10344_v52 }
0x2567   :  { %9513 = vmatmul.mubr.msk.f32.vlgmr.msra.gmra.mrb[120].mxu1 %vm600_vm3, %v7062_v16 }
0x2568   :  { %9533 = vmatprep.mubr.msk.f32.mxu1 %vm10345_vm8, %v10346_v42 }
0x256e   :  { %v6557_v24 = vpop.xlane.xlu0 %6556 }
0x256f   :  { %v6563_v7 = vmul.f32 0.03125, %v6557_v24 }
0x2571   :  { %v6567_v0 = vadd.f32 1e-05, %v6563_v7 }
0x2572   :  { %v12285_v21 = vpop.permute.xlu0 %7055 }
0x2573   :  { %10285 = vrsqrt.f32 %v6567_v0  ;;  %v7058_v60 = vsel %vm6870_vm9, %v12285_v21, 0.0  ;;  %v7456_v46 = vsel %vm7249_vm10, %v12285_v21, 0.0 }
0x2574   :  { %7059 = vadd.xlane.f32.xlu1 %v7058_v60 }
0x257d   :  { %v10286_v43 = vpop.eup %10285 }
0x257e   :  { %v6575_v49 = vmul.f32 %v10286_v43, %v6543_v18 }
0x2580   :  { %v6583_v10 = vmul.f32 %v12208_v38, %v6575_v49 }
0x2582   :  { %v6591_v34 = vadd.f32 %v12215_v61, %v6583_v10 }
0x2584   :  { %9491 = vmatprep.mubr.msk.f32.mxu0 %vm198_vm1, %v6591_v34 }
0x2586   :  { %v6560_v27 = vpop.xlane.xlu1 %6559 }
0x2587   :  { %v6564_v35 = vmul.f32 0.03125, %v6560_v27 }
0x2589   :  { %v6568_v23 = vadd.f32 1e-05, %v6564_v35 }
0x258b   :  { %10287 = vrsqrt.f32 %v6568_v23 }
0x2595   :  { %v10288_v55 = vpop.eup %10287 }
0x2596   :  { %v6576_v32 = vmul.f32 %v10288_v55, %v6544_v33 }
0x2598   :  { %v6584_v37 = vmul.f32 %v12208_v38, %v6576_v32 }
0x259a   :  { %v6592_v17 = vadd.f32 %v12215_v61, %v6584_v37 }
0x259c   :  { %9492 = vmatmul.mubr.msk.f32.gmra.mrb[118].mxu0 %vm198_vm1, %v6592_v17 }
0x259d   :  { %9519 = vmatprep.mubr.msk.f32.mxu0 %vm10345_vm8, %v10346_v42 }
0x25a3   :  { %v12331_v30 = vpop.xlane.xlu0 %7251 }
0x25a4   :  { %v7336_v22 = vrot.slane %v12331_v30, 1 }
0x2601   :  { %v12304_v3 = vpop.xlane.xlu1 %7059 }
0x2632   :  { %v12297_v47 = vpop.f32.mrb[118].mxu1 }
0x2633   :  { %v9507_v11 = vpop.f32.mrb[119].mxu1 }
0x263a   :  { %v7139_v54 = vpop.f32.mrb[120].mxu1 }
0x263b   :  { %v9514_v9 = vpop.f32.mrb[121].mxu1  ;;  %v7143_v28 = vsel %vm6870_vm9, %v7139_v54, -inf }
0x263c   :  { %7144 = vmax.xlane.f32.xlu1 %v7143_v28 }
0x264d   :  { %10030 = vrot.lane.b32.xlu1 %v12233_v29, %s10348_s21 }
0x266f   :  { %v9493_v38 = vpop.f32.mrb[118].mxu0 }
0x2670   :  { %v6860_v25 = vpop.f32.mrb[119].mxu0 }
0x2671   :  { %v12302_v61 = vpack.i.bf16 %v9493_v38, %v6860_v25  ;;  %v9945_v50 = vpack.c.bf16 %v9493_v38, %v6860_v25 }
0x26c9   :  { %v7145_v26 = vpop.xlane.xlu1 %7144 }
0x26ca   :  { %v12307_v40 = vmax.f32 %v7145_v26, %v12304_v3 }
0x26cc   :  { %v7147_v62 = vsub.f32 %v12304_v3, %v12307_v40  ;;  %v7150_v48 = vsub.f32 %v7139_v54, %v12307_v40  ;;  %v6957_v3 = vsub.f32 %v12262_v15, %v12270_v63 }
0x26cd   :  { %v10031_v31 = vpop.permute.xlu1 %10030 }
0x26ce   :  { %v7151_v8 = vmul.f32 1.442695, %v7150_v48  ;;  %v10033_v2 = vunpack.i.h.bf16 %v10031_v31  ;;  %v10032_v29 = vunpack.i.l.bf16 %v10031_v31 }
0x26d0   :  { %v9942_v18 = vpack.c.bf16 %v10033_v2, %v10032_v29  ;;  %10289 = vpow2.f32 %v7151_v8  ;;  %v7148_v29 = vmul.f32 1.442695, %v7147_v62 }
0x26d2   :  { %9943 = vmatpush3.bf16.msra.mxu0 %v9942_v18 }
0x26d3   :  { %9944 = vmatprep.subr.bf16.mxu0 %v10344_v52 }
0x26da   :  { %v12313_v6 = vpop.eup %10289 }
0x26db   :  { %9520 = vmatmul.mubr.msk.f32.vlgmr.msra.gmra.mrb[120].mxu0 %vm600_vm3, %v12313_v6  ;;  %v7153_v8 = vsel %vm6870_vm9, %v12313_v6, 0.0  ;;  %v6963_v6 = vsel %vm6870_vm9, %v12273_v4, 0.0 }
0x26dc   :  { %9947 = vmatpush3.bf16.xpose.msk.msra.mxu0 %vm10650_vm4, %v9945_v50  ;;  %9526 = vmatprep.mubr.msk.f32.mxu0 %vm10345_vm8, %v10346_v42 }
0x26dd   :  { %9955 = vmatprep.subr.bf16.mxu0 %v10344_v52 }
0x26e3   :  { %9527 = vmatmul.mubr.msk.f32.vlgmr.msra.gmra.mrb[122].mxu0 %vm600_vm3, %v7253_v39 }
0x26e4   :  { %9547 = vmatprep.mubr.msk.f32.mxu0 %vm10345_vm8, %v10346_v42 }
0x27ae   :  { %v12326_v57 = vpop.f32.mrb[120].mxu0 }
0x27af   :  { %v9521_v53 = vpop.f32.mrb[121].mxu0 }
0x27b6   :  { %v7328_v44 = vpop.f32.mrb[122].mxu0 }
0x27b7   :  { %v9528_v41 = vpop.f32.mrb[123].mxu0  ;;  %v7332_v58 = vsel %vm6870_vm9, %v7328_v44, -inf }
0x27b8   :  { %7333 = vmax.xlane.f32.xlu1 %v7332_v58 }
0x27c9   :  { %10035 = vrot.lane.b32.xlu1 %v12302_v61, %s10347_s20 }
0x2845   :  { %v7334_v33 = vpop.xlane.xlu1 %7333 }
0x2846   :  { %v12334_v5 = vmax.f32 %v7334_v33, %v7336_v22  ;;  %v6958_v33 = vmul.f32 1.442695, %v6957_v3 }
0x2848   :  { %7346 = vperm.xlu0 %9997, %v12334_v5   ;;  %v7340_v31 = vrot.slane %v12334_v5, 7 }
0x2849   :  { %v10036_v13 = vpop.permute.xlu1 %10035 }
0x284a   :  { %v10038_v36 = vunpack.i.h.bf16 %v10036_v13  ;;  %v10037_v45 = vunpack.i.l.bf16 %v10036_v13  ;;  %v7342_v2 = vsub.f32 %v12331_v30, %v7340_v31 }
0x284c   :  { %v9949_v14 = vpack.c.bf16 %v10038_v36, %v10037_v45  ;;  %10040 = vrot.lane.b32.xlu0 %v12302_v61, %s10341_s0  ;;  %v7343_v18 = vmul.f32 1.442695, %v7342_v2 }
0x284e   :  { %9950 = vmatpush3.bf16.msra.mxu1 %v9949_v14 }
0x284f   :  { %9951 = vmatprep.subr.bf16.mxu1 %v10344_v52 }
0x2850   :  { %7459 = vrot.lane.b32.xlu0 %v7253_v39, %s10341_s0 }
0x286f   :  { %7457 = vadd.xlane.f32.xlu0 %v7456_v46 }
0x28c7   :  { %v7347_v12 = vpop.permute.xlu0 %7346 }
0x28c8   :  { %v7349_v1 = vsub.f32 %v7328_v44, %v7347_v12 }
0x28ca   :  { %v7350_v19 = vmul.f32 1.442695, %v7349_v1 }
0x28cb   :  { %v10041_v59 = vpop.permute.xlu0 %10040 }
0x28cc   :  { %10291 = vpow2.f32 %v7350_v19  ;;  %v10043_v16 = vunpack.i.h.bf16 %v10041_v59  ;;  %v10042_v24 = vunpack.i.l.bf16 %v10041_v59 }
0x28ce   :  { %v9952_v0 = vpack.c.bf16 %v10043_v16, %v10042_v24 }
0x28cf   :  { %v7460_v21 = vpop.permute.xlu0 %7459 }
0x28d6   :  { %v10292_v7 = vpop.eup %10291 }
0x28d7   :  { %9534 = vmatmul.mubr.msk.f32.vlgmr.msra.gmra.mrb[122].mxu1 %vm600_vm3, %v10292_v7  ;;  %v7352_v38 = vsel %vm6870_vm9, %v10292_v7, 0.0 }
0x28d8   :  { %9954 = vmatpush3.bf16.xpose.msk.msra.mxu1 %vm10650_vm4, %v9952_v0  ;;  %9540 = vmatprep.mubr.msk.f32.mxu1 %vm10345_vm8, %v10346_v42 }
0x28d9   :  { %9964 = vmatprep.subr.bf16.mxu1 %v10344_v52 }
0x28df   :  { %9541 = vmatmul.mubr.msk.f32.vlgmr.msra.gmra.mrb[124].mxu1 %vm600_vm3, %v7460_v21 }
0x28e0   :  { %9569 = vmatprep.mubr.msk.f32.mxu1 %vm10345_vm8, %v10346_v42 }
0x28fc   :  { %v7458_v51 = vpop.xlane.xlu0 %7457 }
0x28fd   :  { %v7545_v27 = vrot.slane %v7458_v51, 1 }
0x29aa   :  { %v12352_v60 = vpop.f32.mrb[122].mxu1 }
0x29ab   :  { %v9535_v43 = vpop.f32.mrb[123].mxu1 }
0x29ac   :  { %v7670_v43 = vld [vmem:[%s12512_s1 + $0x588] sm:$0xff] }
0x29b2   :  { %v7537_v49 = vpop.f32.mrb[124].mxu1 }
0x29b3   :  { %v9542_v10 = vpop.f32.mrb[125].mxu1  ;;  %v7541_v34 = vsel %vm6870_vm9, %v7537_v49, -inf }
0x29b4   :  { %7542 = vmax.xlane.f32.xlu1 %v7541_v34  ;;  %v7673_v10 = vld [vmem:[%s12512_s1 + $0x5a0] sm:$0xff] }
0x29c5   :  { %10045 = vrot.lane.b32.xlu1 %v12302_v61, %s10348_s21 }
0x2a41   :  { %v7543_v35 = vpop.xlane.xlu1 %7542 }
0x2a42   :  { %v7547_v23 = vmax.f32 %v7543_v35, %v7545_v27 }
0x2a44   :  { %v7549_v55 = vrot.slane %v7547_v23, 7  ;;  %7555 = vperm.xlu0 %9997, %v7547_v23  }
0x2a45   :  { %v10046_v32 = vpop.permute.xlu1 %10045 }
0x2a46   :  { %v7551_v37 = vsub.f32 %v7458_v51, %v7549_v55  ;;  %v10048_v17 = vunpack.i.h.bf16 %v10046_v32  ;;  %v10047_v11 = vunpack.i.l.bf16 %v10046_v32 }
0x2a48   :  { %v7552_v54 = vmul.f32 1.442695, %v7551_v37  ;;  %v9956_v9 = vpack.c.bf16 %v10048_v17, %v10047_v11 }
0x2a4a   :  { %10293 = vpow2.f32 %v7552_v54  ;;  %9957 = vmatpush3.bf16.msra.mxu0 %v9956_v9 }
0x2a4b   :  { %9958 = vmatprep.subr.bf16.mxu0 %v10344_v52 }
0x2a54   :  { %v10294_v28 = vpop.eup %10293 }
0x2a55   :  { %7570 = vperm.xlu1 %9998, %v10294_v28   ;;  %v7565_v41 = vrot.slane %v10294_v28, 1 }
0x2a79   :  { %7353 = vadd.xlane.f32.xlu1 %v7352_v38 }
0x2ac3   :  { %v7556_v25 = vpop.permute.xlu0 %7555 }
0x2ac4   :  { %v7558_v61 = vsub.f32 %v7537_v49, %v7556_v25 }
0x2ac6   :  { %v7559_v50 = vmul.f32 1.442695, %v7558_v61 }
0x2ac8   :  { %10295 = vpow2.f32 %v7559_v50 }
0x2ac9   :  { %10297 = vpow2.f32 %v7148_v29 }
0x2aca   :  { %10299 = vpow2.f32 %v7343_v18 }
0x2ad2   :  { %v10296_v26 = vpop.eup %10295 }
0x2ad3   :  { %9548 = vmatmul.mubr.msk.f32.vlgmr.msra.gmra.mrb[124].mxu0 %vm600_vm3, %v10296_v26  ;;  %v7561_v48 = vsel %vm6870_vm9, %v10296_v26, 0.0  ;;  %v10298_v39 = vpop.eup %10297 }
0x2ad4   :  { %7562 = vadd.xlane.f32.xlu0 %v7561_v48  ;;  %9558 = vmatprep.mubr.msk.f32.mxu0 %vm10345_vm8, %v10346_v42  ;;  %v10300_v53 = vpop.eup %10299  ;;  %v7158_v44 = vmul.f32 %v10298_v39, %v12247_v20  ;;  %v7571_v58 = vpop.permute.xlu1 %7570 }
0x2ad5   :  { %v7356_v62 = vrot.slane %v10300_v53, 1  ;;  %v7573_v13 = vmul.f32 %v7571_v58, %v12247_v20  ;;  %v7780_v58 = vld [vmem:[%s12512_s1 + $0x5d0] sm:$0xff] }
0x2ad7   :  { %v7581_v14 = vrot.slane %v7573_v13, 1 }
0x2ad8   :  { %7154 = vadd.xlane.f32.xlu0 %v7153_v8 }
0x2aee   :  { %7361 = vperm.xlu0 %9997, %v10300_v53  }
0x2af2   :  { %7166 = vrot.lane.b32.xlu0 %v7158_v44, %s10348_s21 }
0x2b06   :  { %v7354_v40 = vpop.xlane.xlu1 %7353 }
0x2b07   :  { %v7358_v5 = vadd.f32 %v7356_v62, %v7354_v40 }
0x2b11   :  { %6964 = vadd.xlane.f32.xlu0 %v6963_v6  ;;  %v7778_v6 = vld [vmem:[%s12512_s1 + $0x5c0] sm:$0xff] }
0x2b61   :  { %v7563_v30 = vpop.xlane.xlu0 %7562 }
0x2b62   :  { %v7567_v22 = vadd.f32 %v7565_v41, %v7563_v30  ;;  %v7781_v30 = vld [vmem:[%s12512_s1 + $0x5d8] sm:$0xff] }
0x2b64   :  { %10301 = vrcp.f32 %v7567_v22  ;;  %v9968_v22 = vpack.c.bf16 %v7781_v30, %v7780_v58 }
0x2b65   :  { %10303 = vpow2.f32 %v6958_v33  ;;  %v7155_v36 = vpop.xlane.xlu0 %7154 }
0x2b66   :  { %10305 = vrcp.f32 %v7358_v5  ;;  %v7156_v4 = vadd.f32 %v10298_v39, %v7155_v36  ;;  %v8410_v5 = vld [vmem:[%s12512_s1 + $0x5b0] ss:$0 sm:$0xff]  ;;  %v8411_v36 = vld [vmem:[%s12512_s1 + $0x5b8] ss:$0 sm:$0xff] }
0x2b68   :  { %10307 = vrcp.f32 %v7156_v4 }
0x2b6d   :  { %v7362_v46 = vpop.permute.xlu0 %7361 }
0x2b6e   :  { %v10302_v45 = vpop.eup %10301  ;;  %v7364_v63 = vmul.f32 %v7362_v46, %v12247_v20  ;;  %v7870_v46 = vld [vmem:[%s12512_s1 + $0x5f0] sm:$0xff] }
0x2b6f   :  { %7660 = vperm.xlu1 %9998, %v10302_v45   ;;  %v10304_v12 = vpop.eup %10303 }
0x2b70   :  { %v10306_v15 = vpop.eup %10305  ;;  %v6968_v1 = vmul.f32 %v10304_v12, %v12247_v20  ;;  %v7372_v59 = vrot.slane %v7364_v63, 1  ;;  %v7671_v20 = vld [vmem:[%s12512_s1 + $0x590] sm:$0xff]  ;;  %v7872_v63 = vld [vmem:[%s12512_s1 + $0x600] sm:$0xff] }
0x2b71   :  { %v7167_v19 = vpop.permute.xlu0 %7166  ;;  %v9959_v49 = vpack.c.bf16 %v7671_v20, %v7670_v43 }
0x2b72   :  { %v7239_v16 = vadd.f32 %v12326_v57, %v7167_v19  ;;  %v10308_v24 = vpop.eup %10307  ;;  %v7672_v57 = vld [vmem:[%s12512_s1 + $0x598] sm:$0xff]  ;;  %v7874_v19 = vld [vmem:[%s12512_s1 + $0x610] sm:$0xff] }
0x2b73   :  { %7582 = vrot.lane.b32.xlu1 %v7581_v14, %s10348_s21  ;;  %9960 = vmatpush3.bf16.msra.mxu0 %v9959_v49  ;;  %v9962_v51 = vpack.c.bf16 %v7673_v10, %v7672_v57  ;;  %v7869_v14 = vld [vmem:[%s12512_s1 + $0x5e8] sm:$0xff] }
0x2b74   :  { %v7242_v7 = vmul.f32 %v10308_v24, %v7239_v16  ;;  %9961 = vmatprep.subr.bf16.mxu0 %v10344_v52  ;;  %v7875_v16 = vld [vmem:[%s12512_s1 + $0x618] sm:$0xff]  ;;  %v7876_v24 = vld [vmem:[%s12512_s1 + $0x620] sm:$0xff] }
0x2b77   :  { %7451 = vperm.xlu1 %9998, %v10306_v15   ;;  %9963 = vmatpush3.bf16.msra.mxu0 %v9962_v51  ;;  %v7871_v15 = vld [vmem:[%s12512_s1 + $0x5f8] sm:$0xff] }
0x2b78   :  { %9970 = vmatprep.subr.bf16.mxu0 %v10344_v52 }
0x2b7b   :  { %6976 = vrot.lane.b32.xlu1 %v6968_v1, %s10347_s20  ;;  %v7873_v1 = vld [vmem:[%s12512_s1 + $0x608] sm:$0xff] }
0x2b7f   :  { %7373 = vrot.lane.b32.xlu1 %v7372_v59, %s10347_s20  ;;  %v9977_v59 = vpack.c.bf16 %v7874_v19, %v7873_v1  ;;  %s10349_s20 = smov [#allocation3]  }
0x2b80   :  { %s8071_s21 = sshll.u32 %s10349_s20, 4  ;;  %s8072_s21 = int_to_ptr.vmem [resolvable:$true] %s8071_s21 }
0x2b81   :  { %s10317_s0 = scalar_lea.vmem %s8072_s21, 32  ;;  %p10322_p1 = scmp.lt.s32.totalorder %s8072_s21, %s8072_s21 }
0x2b82   :  { %p10318_p0 = scmp.ne.s32.totalorder %s8072_s21, %s10317_s0  ;;  %p10323_p2 = scmp.lt.s32.totalorder %s10317_s0, %s10317_s0 }
0x2b83   :  { %7244 = vrot.lane.b32.xlu1 %v7242_v7, %s10343_s13  ;;  %v9980_v7 = vpack.c.bf16 %v7876_v24, %v7875_v16 }
0x2b84   :  { %p10324_p3 = por %p10323_p2, %p10322_p1 }
0x2b86   :  { %p10325_p4 = pnand %p10324_p3, %p10318_p0 }
0x2b9e   :  { %v6965_v34 = vpop.xlane.xlu0 %6964 }
0x2b9f   :  { %v6966_v27 = vadd.f32 %v10304_v12, %v6965_v34  ;;  %v9971_v12 = vpack.c.bf16 %v7870_v46, %v7869_v14 }
0x2ba1   :  { %10309 = vrcp.f32 %v6966_v27 }
0x2ba6   :  { %v7654_v0 = vpop.f32.mrb[124].mxu0 }
0x2ba7   :  { %v9549_v21 = vpop.f32.mrb[125].mxu0 }
0x2bab   :  { %v10310_v54 = vpop.eup %10309 }
0x2bee   :  { %v7661_v35 = vpop.permute.xlu1 %7660 }
0x2bf2   :  { %v7583_v23 = vpop.permute.xlu1 %7582 }
0x2bf3   :  { %v7655_v55 = vadd.f32 %v7654_v0, %v7583_v23  ;;  %v8412_v0 = vld [vmem:[%s12512_s1 + $0x5e0] ss:$0 sm:$0xff] }
0x2bf5   :  { %v7663_v32 = vmul.f32 %v7661_v35, %v7655_v55 }
0x2bf6   :  { %v7452_v37 = vpop.permute.xlu1 %7451 }
0x2bf7   :  { %7665 = vrot.lane.b32.xlu1 %v7663_v32, %s10343_s13  ;;  %v8414_v32 = vld [vmem:[%s12512_s1 + $0x628] ss:$0 sm:$0xff] }
0x2bfa   :  { %v6977_v17 = vpop.permute.xlu1 %6976 }
0x2bfb   :  { %v7049_v11 = vadd.f32 %v12297_v47, %v6977_v17  ;;  %v8408_v47 = vld [vmem:[%s12512_s1 + $0x5a8] ss:$0 sm:$0xff] }
0x2bfd   :  { %v7052_v9 = vmul.f32 %v10310_v54, %v7049_v11 }
0x2bfe   :  { %v7374_v28 = vpop.permute.xlu1 %7373 }
0x2bff   :  { %7053 = vst.msk [vmem:[#allocation2] sm:$0x1] %vm6870_vm9, %v7052_v9  ;;  %v7446_v38 = vadd.f32 %v12352_v60, %v7374_v28 }
0x2c01   :  { %v7454_v25 = vmul.f32 %v7452_v37, %v7446_v38 }
0x2c02   :  { %v7245_v61 = vpop.permute.xlu1 %7244 }
0x2c03   :  { %7455 = vst.msk [vmem:[#allocation2 + $0x1] sm:$0x1] %vm6870_vm9, %v7454_v25 }
0x2c04   :  { %7248 = vst.msk [vmem:[#allocation2] sm:$0x1] %vm7247_vm11, %v7245_v61 }
0x2c69   :  { %v7666_v50 = vpop.permute.xlu1 %7665 }
0x2c6a   :  { %7668 = vst.msk [vmem:[#allocation2 + $0x1] sm:$0x1] %vm7247_vm11, %v7666_v50 }
0x2c71   :  { %v7669_v26 = vld [vmem:[#allocation2] sm:$0x3] }
0x2c72   :  { %9559 = vmatmul.mubr.msk.f32.vlgmr.msra.gmra.mrb[126].mxu0 %vm198_vm1, %v7669_v26  ;;  %v7981_v26 = vld [vmem:[%s12512_s1 + $0x1c0] sm:$0xff] }
0x2c73   :  { %9588 = vmatprep.mubr.msk.f32.mxu0 %vm10345_vm8, %v10346_v42  ;;  %9972 = vmatpush3.bf16.msra.mxu0 %v9971_v12 }
0x2c74   :  { %9973 = vmatprep.subr.bf16.mxu0 %v10344_v52 }
0x2d45   :  { %v7748_v48 = vpop.f32.mrb[126].mxu0 }
0x2d46   :  { %v7749_v60 = vadd.f32 %v8408_v47, %v7748_v48  ;;  %v9560_v31 = vpop.f32.mrb[127].mxu0  ;;  %v7982_v47 = vld [vmem:[%s12512_s1 + $0x1c8] sm:$0xff] }
0x2d47   :  { %v9983_v48 = vpack.c.bf16 %v7982_v47, %v7981_v26  ;;  %v7984_v31 = vld [vmem:[%s12512_s1 + $0x1d8] sm:$0xff] }
0x2d48   :  { %v12410_v8 = vadd.f32 %v7749_v60, %v12117_v56  ;;  %v7779_v56 = vld [vmem:[%s12512_s1 + $0x5c8] sm:$0xff]  ;;  %v7983_v60 = vld [vmem:[%s12512_s1 + $0x1d0] sm:$0xff] }
0x2d49   :  { %v9965_v41 = vpack.c.bf16 %v7779_v56, %v7778_v6 }
0x2d4a   :  { %v7755_v2 = vsel %vm6596_vm7, %v12410_v8, 0.0 }
0x2d4b   :  { %7756 = vadd.xlane.f32.xlu1 %v7755_v2  ;;  %9966 = vmatpush3.bf16.msra.mxu1 %v9965_v41  ;;  %v8418_v41 = vld [vmem:[%s12512_s1 + $0x1e0] ss:$0 sm:$0xff] }
0x2d4c   :  { %9967 = vmatprep.subr.bf16.mxu1 %v10344_v52 }
0x2d4f   :  { %9969 = vmatpush3.bf16.msra.mxu1 %v9968_v22 }
0x2d50   :  { %9982 = vmatprep.subr.bf16.mxu1 %v10344_v52 }
0x2dd8   :  { %v7757_v29 = vpop.xlane.xlu1 %7756 }
0x2dd9   :  { %v7758_v18 = vmul.f32 0.03125, %v7757_v29 }
0x2ddb   :  { %v7759_v39 = vsub.f32 %v12410_v8, %v7758_v18 }
0x2ddd   :  { %v7760_v53 = vmul.f32 %v7759_v39, %v7759_v39 }
0x2ddf   :  { %v7761_v44 = vsel %vm6596_vm7, %v7760_v53, 0.0  ;;  %v8416_v53 = vld [vmem:[%s12512_s1 + $0x1b0] ss:$0 sm:$0xff] }
0x2de0   :  { %7762 = vadd.xlane.f32.xlu0 %v7761_v44  ;;  %v8417_v44 = vld [vmem:[%s12512_s1 + $0x1b8] ss:$0 sm:$0xff] }
0x2e6d   :  { %v7763_v3 = vpop.xlane.xlu0 %7762 }
0x2e6e   :  { %v7764_v40 = vmul.f32 0.03125, %v7763_v3 }
0x2e70   :  { %v7765_v62 = vadd.f32 1e-05, %v7764_v40 }
0x2e72   :  { %10311 = vrsqrt.f32 %v7765_v62 }
0x2e7c   :  { %v10312_v33 = vpop.eup %10311 }
0x2e7d   :  { %v7767_v13 = vmul.f32 %v10312_v33, %v7759_v39 }
0x2e7f   :  { %v7772_v45 = vmul.f32 %v8410_v5, %v7767_v13 }
0x2e81   :  { %v7777_v4 = vadd.f32 %v8411_v36, %v7772_v45 }
0x2e83   :  { %9570 = vmatmul.mubr.msk.f32.vlgmr.msra.gmra.mrb[126].mxu1 %vm198_vm1, %v7777_v4 }
0x2e84   :  { %9599 = vmatprep.mubr.msk.f32.mxu1 %vm10345_vm8, %v10346_v42  ;;  %v9974_v42 = vpack.c.bf16 %v7872_v63, %v7871_v15  ;;  %9984 = vmatpush3.bf16.msra.mxu1 %v9983_v48 }
0x2e85   :  { %9985 = vmatprep.subr.bf16.mxu1 %v10344_v52 }
0x2e86   :  { %9975 = vmatpush3.bf16.msra.mxu0 %v9974_v42 }
0x2e87   :  { %9976 = vmatprep.subr.bf16.mxu0 %v10344_v52 }
0x2e8a   :  { %9978 = vmatpush3.bf16.msra.mxu0 %v9977_v59 }
0x2e8b   :  { %9979 = vmatprep.subr.bf16.mxu0 %v10344_v52 }
0x2e8e   :  { %9981 = vmatpush3.bf16.msra.mxu0 %v9980_v7 }
0x2f56   :  { %v7856_v21 = vpop.f32.mrb[126].mxu1 }
0x2f57   :  { %v7857_v43 = vadd.f32 %v8412_v0, %v7856_v21  ;;  %v9571_v20 = vpop.f32.mrb[127].mxu1 }
0x2f59   :  { %v7861_v49 = vmul.f32 0.044715, %v7857_v43  ;;  %v7860_v35 = vmul.f32 0.5, %v7857_v43 }
0x2f5b   :  { %v7862_v57 = vmul.f32 %v7861_v49, %v7857_v43 }
0x2f5d   :  { %v7863_v10 = vmul.f32 %v7862_v57, %v7857_v43 }
0x2f5f   :  { %v7864_v34 = vadd.f32 %v7863_v10, %v7857_v43 }
0x2f61   :  { %v7865_v51 = vmul.f32 0.7978846, %v7864_v34 }
0x2f63   :  { %10313 = vtanh.f32 %v7865_v51 }
0x2f6d   :  { %v10314_v27 = vpop.eup %10313 }
0x2f6e   :  { %v7867_v23 = vadd.f32 1.0, %v10314_v27 }
0x2f70   :  { %v7868_v55 = vmul.f32 %v7867_v23, %v7860_v35 }
0x2f72   :  { %9589 = vmatmul.mubr.msk.f32.vlgmr.msra.gmra.mrb[128].mxu0 %vm3299_vm6, %v7868_v55 }
0x3045   :  { %v7951_v37 = vpop.f32.mrb[128].mxu0 }
0x3046   :  { %v7952_v17 = vadd.f32 %v8414_v32, %v7951_v37  ;;  %v9590_v11 = vpop.f32.mrb[129].mxu0 }
0x3048   :  { %v7955_v54 = vadd.f32 %v7952_v17, %v12410_v8  ;;  %v9986_v8 = vpack.c.bf16 %v7984_v31, %v7983_v60 }
0x304a   :  { %v7958_v9 = vsel %vm6596_vm7, %v7955_v54, 0.0  ;;  %9987 = vmatpush3.bf16.msra.mxu1 %v9986_v8 }
0x304b   :  { %7959 = vadd.xlane.f32.xlu0 %v7958_v9 }
0x30d8   :  { %v7960_v28 = vpop.xlane.xlu0 %7959 }
0x30d9   :  { %v7961_v38 = vmul.f32 0.03125, %v7960_v28 }
0x30db   :  { %v7962_v25 = vsub.f32 %v7955_v54, %v7961_v38 }
0x30dd   :  { %v7963_v61 = vmul.f32 %v7962_v25, %v7962_v25 }
0x30df   :  { %v7964_v50 = vsel %vm6596_vm7, %v7963_v61, 0.0 }
0x30e0   :  { %7965 = vadd.xlane.f32.xlu0 %v7964_v50 }
0x316d   :  { %v7966_v2 = vpop.xlane.xlu0 %7965 }
0x316e   :  { %v7967_v29 = vmul.f32 0.03125, %v7966_v2 }
0x3170   :  { %v7968_v18 = vadd.f32 1e-05, %v7967_v29 }
0x3172   :  { %10315 = vrsqrt.f32 %v7968_v18 }
0x317c   :  { %v10316_v39 = vpop.eup %10315 }
0x317d   :  { %v7970_v52 = vmul.f32 %v10316_v39, %v7962_v25 }
0x317f   :  { %v7975_v6 = vmul.f32 %v8416_v53, %v7970_v52 }
0x3181   :  { %v7980_v56 = vadd.f32 %v8417_v44, %v7975_v6 }
0x3183   :  { %9600 = vmatmul.mubr.msk.f32.vlgmr.msra.gmra.mrb[128].mxu1 %vm198_vm1, %v7980_v56 }
0x3256   :  { %v8059_v58 = vpop.f32.mrb[128].mxu1 }
0x3257   :  { %v8060_v30 = vadd.f32 %v8418_v41, %v8059_v58  ;;  %v9601_v22 = vpop.f32.mrb[129].mxu1 }
0x3259   :  { %8064 = vst.msk [vmem:[#allocation3] sm:$0x3] %vm8063_vm12, %v8060_v30 }
0x325a   :  { %10328 = shalt.err (!%p10325_p4)
}
0x325b   :  { %s10329_s24 = scalar_lea.hbm %s12513_s2, 32 }
0x325c   :  { %p10330_p5 = scmp.ne.s32.totalorder %s12513_s2, %s10329_s24  ;;  %p10333_p6 = scmp.lt.u32.totalorder %s10329_s24, %s12513_s2 }
0x325e   :  { %p10335_p7 = pnand %p10333_p6, %p10330_p5 }
0x3260   :  { %10338 = shalt.err (!%p10335_p7)
}
0x3261   :  { %8074 = dma.vmem_to_hbm [thread:$0]  %s8072_s21, 32, %s12513_s2, [#allocation4]  }
0x3262   :  { %10339 = dma.done.wait [#allocation4], 32  }
0x3263   :  { %10340 = vsyncadd [#allocation4], 4294967264 }
0x3264   :  { %8078 = vsyncpa [#allocation4], 1 }

</bundles_post_ra>
